<compile_context>
chip_gen: v7x
topology: tpu7x:2x2x1
jax: 0.10.0
libtpu: 0.0.40
codegen_flags: <defaults>
</compile_context>

<pallas_src>
import math
from functools import partial

import jax
import jax.numpy as jnp
from jax import lax
from jax.experimental import pallas as pl
from jax.experimental.pallas import tpu as pltpu


LANE = 128                                   # lane width: pad conv channels to this
ACT_DTYPE = jnp.float32                      # flip to bf16 for perf; BN math stays f32
VMEM_LIMIT_BYTES = 56 * 1024 * 1024          # safe on v5e/v6e (128 MiB) and v7x (64 MiB)
BN_EPS = 1e-5
LEAKY_SLOPE = 0.2


def _round_up(x, m):
    return (x + m - 1) // m * m


# ----------------------------------------------------------------------------
# Kernel 1: one output row of a KxK conv (stride 1 or 2) per grid step.
#   grid = (N, H_out); inputs are `n_halo` aliased views of the phase-packed
#   input (one per vertical tap offset), the packed weights and (no-BN only)
#   the conv bias.  Outputs: activation row (+ per-row channel sum / sumsq
#   when the block has BatchNorm).
# ----------------------------------------------------------------------------
def _conv_row_kernel(*refs, ksize, stride, wo, use_bn, slope):
    n_halo = (ksize - 1) // stride + 1
    x_refs = refs[:n_halo]
    if use_bn:
        w_ref, y_ref, s1_ref, s2_ref = refs[n_halo:]
        b_ref = None
    else:
        w_ref, b_ref, y_ref = refs[n_halo:]
    cp = y_ref.shape[-1]

    acc = jnp.zeros((wo, cp), jnp.float32)
    for kh in range(ksize):
        d = kh // stride                      # which halo-shifted input view
        for kw in range(ksize):
            p = (kh % stride) * stride + (kw % stride)   # stride phase
            dw = kw // stride                             # horizontal shift (static)
            xrow = x_refs[d][p, 0, dw:dw + wo, :]         # (wo, Cin)  -- static slices only
            acc = acc + jnp.dot(xrow, w_ref[kh * ksize + kw],
                                preferred_element_type=jnp.float32)

    if use_bn:
        # Pre-BN output + per-row batch statistics (bias skipped: BN cancels it).
        s1_ref[...] = jnp.sum(acc, axis=0, keepdims=True).reshape(1, 1, 1, cp)
        s2_ref[...] = jnp.sum(acc * acc, axis=0, keepdims=True).reshape(1, 1, 1, cp)
        y = acc
    else:
        y = acc + b_ref[...]
        y = jnp.where(y >= 0.0, y, slope * y)             # LeakyReLU(0.2)
    y_ref[...] = y.reshape(1, 1, wo, cp).astype(y_ref.dtype)


# ----------------------------------------------------------------------------
# Kernel 2: tiled per-channel affine + LeakyReLU  (BatchNorm pass 2).
# ----------------------------------------------------------------------------
def _affine_act_kernel(y_ref, scale_ref, shift_ref, o_ref, *, slope):
    y = y_ref[...].astype(jnp.float32) * scale_ref[...] + shift_ref[...]
    o_ref[...] = jnp.where(y >= 0.0, y, slope * y).astype(o_ref.dtype)


def _affine_act(y, scale, shift, *, slope=LEAKY_SLOPE, tm=512):
    """y: (M, C) -> leakyrelu(y*scale + shift), tiled over M."""
    M, C = y.shape
    TM = tm if M >= tm else _round_up(M, 8)
    Mp = _round_up(M, TM)
    if Mp != M:
        y = jnp.pad(y, ((0, Mp - M), (0, 0)))
    out = pl.pallas_call(
        partial(_affine_act_kernel, slope=slope),
        out_shape=jax.ShapeDtypeStruct((Mp, C), y.dtype),
        grid=(Mp // TM,),
        in_specs=[pl.BlockSpec((TM, C), lambda i: (i, 0)),
                  pl.BlockSpec((1, C), lambda i: (0, 0)),
                  pl.BlockSpec((1, C), lambda i: (0, 0))],
        out_specs=pl.BlockSpec((TM, C), lambda i: (i, 0)),
        compiler_params=pltpu.CompilerParams(
            dimension_semantics=("parallel",),
            vmem_limit_bytes=VMEM_LIMIT_BYTES),
    )(y, scale, shift)
    return out[:M] if Mp != M else out


# ----------------------------------------------------------------------------
# Kernel 3: fused FC head.  K-tiled (N,K)@(K,1024) with VMEM accumulator,
# LeakyReLU epilogue and fc2 (1024 -> 1, padded to 128 lanes) fused at the
# last K step.
# ----------------------------------------------------------------------------
def _fc_kernel(x_ref, w1_ref, b1_ref, w2_ref, b2_ref, o_ref, acc_ref, *, slope):
    k = pl.program_id(0)

    @pl.when(k == 0)
    def _():
        acc_ref[...] = jnp.zeros_like(acc_ref)

    acc_ref[...] += jnp.dot(x_ref[...], w1_ref[...],
                            preferred_element_type=jnp.float32)

    @pl.when(k == pl.num_programs(0) - 1)
    def _():
        h = acc_ref[...] + b1_ref[...]
        h = jnp.where(h >= 0.0, h, slope * h)             # LeakyReLU(0.2)
        o_ref[...] = (jnp.dot(h, w2_ref[...], preferred_element_type=jnp.float32)
                      + b2_ref[...]).astype(o_ref.dtype)


def fc_head(feat, w1, b1, w2, b2, *, slope=LEAKY_SLOPE, tk=512):
    N, K = feat.shape
    F = w1.shape[1]
    C2 = w2.shape[1]
    TK = tk if K >= tk else _round_up(K, LANE)
    Kp = _round_up(K, TK)
    if Kp != K:
        feat = jnp.pad(feat, ((0, 0), (0, Kp - K)))
        w1 = jnp.pad(w1, ((0, Kp - K), (0, 0)))
    return pl.pallas_call(
        partial(_fc_kernel, slope=slope),
        out_shape=jax.ShapeDtypeStruct((N, C2), jnp.float32),
        grid=(Kp // TK,),
        in_specs=[pl.BlockSpec((N, TK), lambda k: (0, k)),
                  pl.BlockSpec((TK, F), lambda k: (k, 0)),
                  pl.BlockSpec((1, F), lambda k: (0, 0)),
                  pl.BlockSpec((F, C2), lambda k: (0, 0)),
                  pl.BlockSpec((1, C2), lambda k: (0, 0))],
        out_specs=pl.BlockSpec((N, C2), lambda k: (0, 0)),
        scratch_shapes=[pltpu.VMEM((N, F), jnp.float32)],
        compiler_params=pltpu.CompilerParams(
            dimension_semantics=("arbitrary",),
            vmem_limit_bytes=VMEM_LIMIT_BYTES),
    )(feat, w1, b1, w2, b2)


# ----------------------------------------------------------------------------
# Glue: spatial zero-pad + stride-phase packing (1x data, channels stay last).
# ----------------------------------------------------------------------------
def _phase_pack(x, ksize, stride):
    """x: (N, H, W, C) -> phase-packed (N*stride^2, Hh, Wh, C), plus Ho/Wo/n_halo."""
    p = ksize // 2
    xp = jnp.pad(x, ((0, 0), (p, p), (p, p), (0, 0)))
    N, Hp, Wp, C = xp.shape
    Ho = (Hp - ksize) // stride + 1
    Wo = (Wp - ksize) // stride + 1
    d_max = (ksize - 1) // stride
    Hh, Wh = Ho + d_max, Wo + d_max
    phases = []
    for a in range(stride):
        for b in range(stride):
            ph = xp[:, a::stride, b::stride, :][:, :Hh, :Wh, :]
            ph = jnp.pad(ph, ((0, 0), (0, Hh - ph.shape[1]),
                              (0, Wh - ph.shape[2]), (0, 0)))
            phases.append(ph)
    xph = jnp.stack(phases, axis=1).reshape(N * stride * stride, Hh, Wh, C)
    return xph, Ho, Wo, d_max + 1


def conv_block(x, blk, *, ksize, stride, use_bn, slope=LEAKY_SLOPE):
    """One ConvolutionalBlock: conv(+bias) [+BN] + LeakyReLU, NHWC, C padded to 128."""
    N = x.shape[0]
    w = blk["w"]
    cp = w.shape[-1]
    xph, Ho, Wo, n_halo = _phase_pack(x, ksize, stride)
    ss = stride * stride
    _, Hh, Wh, Cin = xph.shape

    x_specs = [pl.BlockSpec((ss, 1, Wh, Cin), (lambda n, i, d=d: (n, i + d, 0, 0)))
               for d in range(n_halo)]
    in_specs = x_specs + [pl.BlockSpec((ksize * ksize, Cin, cp), lambda n, i: (0, 0, 0))]
    inputs = [xph] * n_halo + [w]
    if not use_bn:
        in_specs.append(pl.BlockSpec((1, cp), lambda n, i: (0, 0)))
        inputs.append(blk["b"])

    y_sds = jax.ShapeDtypeStruct((N, Ho, Wo, cp), ACT_DTYPE)
    y_spec = pl.BlockSpec((1, 1, Wo, cp), lambda n, i: (n, i, 0, 0))
    if use_bn:
        s_sds = jax.ShapeDtypeStruct((N, Ho, 1, cp), jnp.float32)
        s_spec = pl.BlockSpec((1, 1, 1, cp), lambda n, i: (n, i, 0, 0))
        out_shape = (y_sds, s_sds, s_sds)
        out_specs = (y_spec, s_spec, s_spec)
    else:
        out_shape = y_sds
        out_specs = y_spec

    outs = pl.pallas_call(
        partial(_conv_row_kernel, ksize=ksize, stride=stride, wo=Wo,
                use_bn=use_bn, slope=slope),
        out_shape=out_shape,
        grid=(N, Ho),
        in_specs=in_specs,
        out_specs=out_specs,
        compiler_params=pltpu.CompilerParams(
            dimension_semantics=("parallel", "parallel"),
            vmem_limit_bytes=VMEM_LIMIT_BYTES),
    )(*inputs)

    if not use_bn:
        return outs

    y, s1, s2 = outs
    # BN pass 2: tiny XLA reduction of the per-row sums -> per-channel affine.
    cnt = float(N * Ho * Wo)
    S1 = jnp.sum(s1, axis=(0, 1, 2))
    S2 = jnp.sum(s2, axis=(0, 1, 2))
    mean = S1 / cnt
    var = jnp.maximum(S2 / cnt - mean * mean, 0.0)        # biased var (PyTorch train mode)
    scale = blk["gamma"] * lax.rsqrt(var + BN_EPS)        # (1, cp)
    shift = blk["beta"] - mean * scale                    # (1, cp)
    y = _affine_act(y.reshape(N * Ho * Wo, cp), scale, shift, slope=slope)
    return y.reshape(N, Ho, Wo, cp)


def adaptive_avg_pool_nhwc(x, out_hw):
    """PyTorch AdaptiveAvgPool2d semantics on NHWC (tiny data-rearrangement glue)."""
    N, H, W, C = x.shape
    oh, ow = out_hw
    rows = []
    for i in range(oh):
        hs, he = (i * H) // oh, -(-((i + 1) * H) // oh)
        cols = []
        for j in range(ow):
            ws, we = (j * W) // ow, -(-((j + 1) * W) // ow)
            cols.append(jnp.mean(x[:, hs:he, ws:we, :], axis=(1, 2)))   # (N, C)
        rows.append(jnp.stack(cols, axis=1))                            # (N, ow, C)
    return jnp.stack(rows, axis=1)                                      # (N, oh, ow, C)


# ----------------------------------------------------------------------------
# Parameters (pre-packed, lane-padded) + forward
# ----------------------------------------------------------------------------
def init_discriminator(key, kernel_size=3, n_channels=64, n_blocks=8, fc_size=1024):
    k = kernel_size
    blocks, cfg = [], []
    in_c, in_cp = 3, 3                       # image channels kept unpadded
    out_c, out_cp = in_c, in_cp
    for i in range(n_blocks):
        out_c = (n_channels if i == 0 else in_c * 2) if i % 2 == 0 else in_c
        stride = 1 if i % 2 == 0 else 2
        use_bn = (i != 0)
        out_cp = _round_up(out_c, LANE)
        key, kw_, kb_ = jax.random.split(key, 3)
        fan_in = in_c * k * k
        w = jax.random.normal(kw_, (k, k, in_c, out_c), jnp.float32) / math.sqrt(fan_in)
        wp = jnp.zeros((k * k, in_cp, out_cp), jnp.float32)
        wp = wp.at[:, :in_c, :out_c].set(w.reshape(k * k, in_c, out_c))
        blk = {"w": wp}
        if use_bn:
            # conv bias omitted: train-mode BN cancels it exactly.
            blk["gamma"] = jnp.zeros((1, out_cp), jnp.float32).at[:, :out_c].set(1.0)
            blk["beta"] = jnp.zeros((1, out_cp), jnp.float32)
        else:
            b = jax.random.normal(kb_, (out_c,), jnp.float32) * 0.01
            blk["b"] = jnp.zeros((1, out_cp), jnp.float32).at[0, :out_c].set(b)
        blocks.append(blk)
        cfg.append({"stride": stride, "use_bn": use_bn})
        in_c, in_cp = out_c, out_cp

    # FC head, pre-packed: fc1 weights laid out for the (h, w, c_pad) flatten of the
    # NHWC pooled features (zero rows on padded channels), fc2 padded to 128 lanes.
    key, k1, k2, k3, k4 = jax.random.split(key, 5)
    fc_in_real = out_c * 6 * 6
    w1 = jax.random.normal(k1, (6, 6, out_c, fc_size), jnp.float32) / math.sqrt(fc_in_real)
    w1p = jnp.zeros((6, 6, out_cp, fc_size), jnp.float32).at[:, :, :out_c, :].set(w1)
    w1p = w1p.reshape(6 * 6 * out_cp, fc_size)
    b1 = (jax.random.normal(k2, (fc_size,), jnp.float32) * 0.01).reshape(1, fc_size)
    assert fc_size == 1024, "nn.Linear(1024, 1) is hard-coded in the PyTorch module"
    w2 = jax.random.normal(k3, (1024, 1), jnp.float32) / math.sqrt(1024.0)
    w2p = jnp.zeros((1024, LANE), jnp.float32).at[:, :1].set(w2)
    b2p = jnp.zeros((1, LANE), jnp.float32).at[0, 0].set(
        jax.random.normal(k4, (), jnp.float32) * 0.01)
    return {"blocks": blocks, "cfg": cfg, "kernel_size": k,
            "fc1_w": w1p, "fc1_b": b1, "fc2_w": w2p, "fc2_b": b2p}


def discriminator_forward(params, imgs):
    n = imgs.shape[0]
    x = jnp.transpose(imgs, (0, 2, 3, 1))                 # single NCHW -> NHWC transpose
    k = params["kernel_size"]
    for blk, cfg in zip(params["blocks"], params["cfg"]):
        x = conv_block(x, blk, ksize=k, stride=cfg["stride"], use_bn=cfg["use_bn"])
    x = adaptive_avg_pool_nhwc(x, (6, 6))                 # (N, 6, 6, Cpad)
    feat = x.reshape(n, -1)                               # matches packed fc1 layout
    logits = fc_head(feat, params["fc1_w"], params["fc1_b"],
                     params["fc2_w"], params["fc2_b"])    # (N, 128), col 0 is real
    return logits[:, :1]                                  # (N, 1)


if __name__ == "__main__":
    key = jax.random.PRNGKey(0)
    pkey, xkey = jax.random.split(key)

    # Small config consistent with the module's constructor:
    #   kernel_size=3, n_channels=8, n_blocks=4, fc_size=1024 (fc2 hard-codes 1024)
    # Input 24x24 -> 24x24x8 -> 12x12x8 -> 12x12x16 -> 6x6x16 -> pool(6,6) -> fc1 -> fc2.
    params = init_discriminator(pkey, kernel_size=3, n_channels=8, n_blocks=4, fc_size=1024)
    imgs = jax.random.normal(xkey, (2, 3, 24, 24), jnp.float32)

    fwd = jax.jit(partial(discriminator_forward, params))
    logit = jax.block_until_ready(fwd(imgs))

    assert logit.shape == (2, 1), logit.shape
    assert bool(jnp.all(jnp.isfinite(logit)))
    print("KERNEL_OK")
</pallas_src>

<mosaic_0001>
module attributes {stable_mosaic.version = 11 : i64} {
  func.func @_conv_row_kernel(%arg0: i32, %arg1: i32, %arg2: memref<1x1x26x3xf32, #tpu.memory_space<vmem>>, %arg3: memref<1x1x26x3xf32, #tpu.memory_space<vmem>>, %arg4: memref<1x1x26x3xf32, #tpu.memory_space<vmem>>, %arg5: memref<9x3x128xf32, #tpu.memory_space<vmem>>, %arg6: memref<1x128xf32, #tpu.memory_space<vmem>>, %arg7: memref<1x1x24x128xf32, #tpu.memory_space<vmem>>) attributes {dimension_semantics = [#tpu.dimension_semantics<parallel>, #tpu.dimension_semantics<parallel>], iteration_bounds = array<i64: 2, 24>, scalar_prefetch = 0 : i64, scratch_operands = 0 : i64, tpu.core_type = #tpu.core_type<tc>, window_params = [{transform_indices = @transform_0, window_bounds = array<i64: 1, 1, 26, 3>}, {transform_indices = @transform_1, window_bounds = array<i64: 1, 1, 26, 3>}, {transform_indices = @transform_2, window_bounds = array<i64: 1, 1, 26, 3>}, {pipeline_mode = #tpu.pipeline_mode<synchronous>, transform_indices = @transform_3, window_bounds = array<i64: 9, 3, 128>}, {pipeline_mode = #tpu.pipeline_mode<synchronous>, transform_indices = @transform_4, window_bounds = array<i64: 1, 128>}, {transform_indices = @transform_5, window_bounds = array<i64: 1, 1, 24, 128>}]} {
    %cst = arith.constant 0.000000e+00 : f32
    %0 = vector.broadcast %cst : f32 to vector<24x128xf32>
    %c0 = arith.constant 0 : index
    %c0_0 = arith.constant 0 : index
    %c0_1 = arith.constant 0 : index
    %c0_2 = arith.constant 0 : index
    %1 = vector.load %arg2[%c0, %c0_0, %c0_1, %c0_2] : memref<1x1x26x3xf32, #tpu.memory_space<vmem>>, vector<1x1x24x3xf32>
    %2 = vector.shape_cast %1 : vector<1x1x24x3xf32> to vector<24x3xf32>
    %c0_3 = arith.constant 0 : index
    %c0_4 = arith.constant 0 : index
    %c0_5 = arith.constant 0 : index
    %3 = vector.load %arg5[%c0_3, %c0_4, %c0_5] : memref<9x3x128xf32, #tpu.memory_space<vmem>>, vector<1x3x128xf32>
    %4 = vector.shape_cast %3 : vector<1x3x128xf32> to vector<3x128xf32>
    %cst_6 = arith.constant dense<0.000000e+00> : vector<24x128xf32>
    %5 = tpu.matmul %2, %4, %cst_6 {dimension_numbers = #tpu.dot_dimension_numbers<[1], [0], [0], [1], [0, 0, 1, 1], [], []>} : vector<24x3xf32>, vector<3x128xf32>, vector<24x128xf32> -> vector<24x128xf32>
    %6 = arith.addf %0, %5 : vector<24x128xf32>
    %c0_7 = arith.constant 0 : index
    %c0_8 = arith.constant 0 : index
    %c1 = arith.constant 1 : index
    %c0_9 = arith.constant 0 : index
    %7 = vector.load %arg2[%c0_7, %c0_8, %c1, %c0_9] : memref<1x1x26x3xf32, #tpu.memory_space<vmem>>, vector<1x1x24x3xf32>
    %8 = vector.shape_cast %7 : vector<1x1x24x3xf32> to vector<24x3xf32>
    %c1_10 = arith.constant 1 : index
    %c0_11 = arith.constant 0 : index
    %c0_12 = arith.constant 0 : index
    %9 = vector.load %arg5[%c1_10, %c0_11, %c0_12] : memref<9x3x128xf32, #tpu.memory_space<vmem>>, vector<1x3x128xf32>
    %10 = vector.shape_cast %9 : vector<1x3x128xf32> to vector<3x128xf32>
    %cst_13 = arith.constant dense<0.000000e+00> : vector<24x128xf32>
    %11 = tpu.matmul %8, %10, %cst_13 {dimension_numbers = #tpu.dot_dimension_numbers<[1], [0], [0], [1], [0, 0, 1, 1], [], []>} : vector<24x3xf32>, vector<3x128xf32>, vector<24x128xf32> -> vector<24x128xf32>
    %12 = arith.addf %6, %11 : vector<24x128xf32>
    %c0_14 = arith.constant 0 : index
    %c0_15 = arith.constant 0 : index
    %c2 = arith.constant 2 : index
    %c0_16 = arith.constant 0 : index
    %13 = vector.load %arg2[%c0_14, %c0_15, %c2, %c0_16] : memref<1x1x26x3xf32, #tpu.memory_space<vmem>>, vector<1x1x24x3xf32>
    %14 = vector.shape_cast %13 : vector<1x1x24x3xf32> to vector<24x3xf32>
    %c2_17 = arith.constant 2 : index
    %c0_18 = arith.constant 0 : index
    %c0_19 = arith.constant 0 : index
    %15 = vector.load %arg5[%c2_17, %c0_18, %c0_19] : memref<9x3x128xf32, #tpu.memory_space<vmem>>, vector<1x3x128xf32>
    %16 = vector.shape_cast %15 : vector<1x3x128xf32> to vector<3x128xf32>
    %cst_20 = arith.constant dense<0.000000e+00> : vector<24x128xf32>
    %17 = tpu.matmul %14, %16, %cst_20 {dimension_numbers = #tpu.dot_dimension_numbers<[1], [0], [0], [1], [0, 0, 1, 1], [], []>} : vector<24x3xf32>, vector<3x128xf32>, vector<24x128xf32> -> vector<24x128xf32>
    %18 = arith.addf %12, %17 : vector<24x128xf32>
    %c0_21 = arith.constant 0 : index
    %c0_22 = arith.constant 0 : index
    %c0_23 = arith.constant 0 : index
    %c0_24 = arith.constant 0 : index
    %19 = vector.load %arg3[%c0_21, %c0_22, %c0_23, %c0_24] : memref<1x1x26x3xf32, #tpu.memory_space<vmem>>, vector<1x1x24x3xf32>
    %20 = vector.shape_cast %19 : vector<1x1x24x3xf32> to vector<24x3xf32>
    %c3 = arith.constant 3 : index
    %c0_25 = arith.constant 0 : index
    %c0_26 = arith.constant 0 : index
    %21 = vector.load %arg5[%c3, %c0_25, %c0_26] : memref<9x3x128xf32, #tpu.memory_space<vmem>>, vector<1x3x128xf32>
    %22 = vector.shape_cast %21 : vector<1x3x128xf32> to vector<3x128xf32>
    %cst_27 = arith.constant dense<0.000000e+00> : vector<24x128xf32>
    %23 = tpu.matmul %20, %22, %cst_27 {dimension_numbers = #tpu.dot_dimension_numbers<[1], [0], [0], [1], [0, 0, 1, 1], [], []>} : vector<24x3xf32>, vector<3x128xf32>, vector<24x128xf32> -> vector<24x128xf32>
    %24 = arith.addf %18, %23 : vector<24x128xf32>
    %c0_28 = arith.constant 0 : index
    %c0_29 = arith.constant 0 : index
    %c1_30 = arith.constant 1 : index
    %c0_31 = arith.constant 0 : index
    %25 = vector.load %arg3[%c0_28, %c0_29, %c1_30, %c0_31] : memref<1x1x26x3xf32, #tpu.memory_space<vmem>>, vector<1x1x24x3xf32>
    %26 = vector.shape_cast %25 : vector<1x1x24x3xf32> to vector<24x3xf32>
    %c4 = arith.constant 4 : index
    %c0_32 = arith.constant 0 : index
    %c0_33 = arith.constant 0 : index
    %27 = vector.load %arg5[%c4, %c0_32, %c0_33] : memref<9x3x128xf32, #tpu.memory_space<vmem>>, vector<1x3x128xf32>
    %28 = vector.shape_cast %27 : vector<1x3x128xf32> to vector<3x128xf32>
    %cst_34 = arith.constant dense<0.000000e+00> : vector<24x128xf32>
    %29 = tpu.matmul %26, %28, %cst_34 {dimension_numbers = #tpu.dot_dimension_numbers<[1], [0], [0], [1], [0, 0, 1, 1], [], []>} : vector<24x3xf32>, vector<3x128xf32>, vector<24x128xf32> -> vector<24x128xf32>
    %30 = arith.addf %24, %29 : vector<24x128xf32>
    %c0_35 = arith.constant 0 : index
    %c0_36 = arith.constant 0 : index
    %c2_37 = arith.constant 2 : index
    %c0_38 = arith.constant 0 : index
    %31 = vector.load %arg3[%c0_35, %c0_36, %c2_37, %c0_38] : memref<1x1x26x3xf32, #tpu.memory_space<vmem>>, vector<1x1x24x3xf32>
    %32 = vector.shape_cast %31 : vector<1x1x24x3xf32> to vector<24x3xf32>
    %c5 = arith.constant 5 : index
    %c0_39 = arith.constant 0 : index
    %c0_40 = arith.constant 0 : index
    %33 = vector.load %arg5[%c5, %c0_39, %c0_40] : memref<9x3x128xf32, #tpu.memory_space<vmem>>, vector<1x3x128xf32>
    %34 = vector.shape_cast %33 : vector<1x3x128xf32> to vector<3x128xf32>
    %cst_41 = arith.constant dense<0.000000e+00> : vector<24x128xf32>
    %35 = tpu.matmul %32, %34, %cst_41 {dimension_numbers = #tpu.dot_dimension_numbers<[1], [0], [0], [1], [0, 0, 1, 1], [], []>} : vector<24x3xf32>, vector<3x128xf32>, vector<24x128xf32> -> vector<24x128xf32>
    %36 = arith.addf %30, %35 : vector<24x128xf32>
    %c0_42 = arith.constant 0 : index
    %c0_43 = arith.constant 0 : index
    %c0_44 = arith.constant 0 : index
    %c0_45 = arith.constant 0 : index
    %37 = vector.load %arg4[%c0_42, %c0_43, %c0_44, %c0_45] : memref<1x1x26x3xf32, #tpu.memory_space<vmem>>, vector<1x1x24x3xf32>
    %38 = vector.shape_cast %37 : vector<1x1x24x3xf32> to vector<24x3xf32>
    %c6 = arith.constant 6 : index
    %c0_46 = arith.constant 0 : index
    %c0_47 = arith.constant 0 : index
    %39 = vector.load %arg5[%c6, %c0_46, %c0_47] : memref<9x3x128xf32, #tpu.memory_space<vmem>>, vector<1x3x128xf32>
    %40 = vector.shape_cast %39 : vector<1x3x128xf32> to vector<3x128xf32>
    %cst_48 = arith.constant dense<0.000000e+00> : vector<24x128xf32>
    %41 = tpu.matmul %38, %40, %cst_48 {dimension_numbers = #tpu.dot_dimension_numbers<[1], [0], [0], [1], [0, 0, 1, 1], [], []>} : vector<24x3xf32>, vector<3x128xf32>, vector<24x128xf32> -> vector<24x128xf32>
    %42 = arith.addf %36, %41 : vector<24x128xf32>
    %c0_49 = arith.constant 0 : index
    %c0_50 = arith.constant 0 : index
    %c1_51 = arith.constant 1 : index
    %c0_52 = arith.constant 0 : index
    %43 = vector.load %arg4[%c0_49, %c0_50, %c1_51, %c0_52] : memref<1x1x26x3xf32, #tpu.memory_space<vmem>>, vector<1x1x24x3xf32>
    %44 = vector.shape_cast %43 : vector<1x1x24x3xf32> to vector<24x3xf32>
    %c7 = arith.constant 7 : index
    %c0_53 = arith.constant 0 : index
    %c0_54 = arith.constant 0 : index
    %45 = vector.load %arg5[%c7, %c0_53, %c0_54] : memref<9x3x128xf32, #tpu.memory_space<vmem>>, vector<1x3x128xf32>
    %46 = vector.shape_cast %45 : vector<1x3x128xf32> to vector<3x128xf32>
    %cst_55 = arith.constant dense<0.000000e+00> : vector<24x128xf32>
    %47 = tpu.matmul %44, %46, %cst_55 {dimension_numbers = #tpu.dot_dimension_numbers<[1], [0], [0], [1], [0, 0, 1, 1], [], []>} : vector<24x3xf32>, vector<3x128xf32>, vector<24x128xf32> -> vector<24x128xf32>
    %48 = arith.addf %42, %47 : vector<24x128xf32>
    %c0_56 = arith.constant 0 : index
    %c0_57 = arith.constant 0 : index
    %c2_58 = arith.constant 2 : index
    %c0_59 = arith.constant 0 : index
    %49 = vector.load %arg4[%c0_56, %c0_57, %c2_58, %c0_59] : memref<1x1x26x3xf32, #tpu.memory_space<vmem>>, vector<1x1x24x3xf32>
    %50 = vector.shape_cast %49 : vector<1x1x24x3xf32> to vector<24x3xf32>
    %c8 = arith.constant 8 : index
    %c0_60 = arith.constant 0 : index
    %c0_61 = arith.constant 0 : index
    %51 = vector.load %arg5[%c8, %c0_60, %c0_61] : memref<9x3x128xf32, #tpu.memory_space<vmem>>, vector<1x3x128xf32>
    %52 = vector.shape_cast %51 : vector<1x3x128xf32> to vector<3x128xf32>
    %cst_62 = arith.constant dense<0.000000e+00> : vector<24x128xf32>
    %53 = tpu.matmul %50, %52, %cst_62 {dimension_numbers = #tpu.dot_dimension_numbers<[1], [0], [0], [1], [0, 0, 1, 1], [], []>} : vector<24x3xf32>, vector<3x128xf32>, vector<24x128xf32> -> vector<24x128xf32>
    %54 = arith.addf %48, %53 : vector<24x128xf32>
    %c0_63 = arith.constant 0 : index
    %c0_64 = arith.constant 0 : index
    %55 = vector.load %arg6[%c0_63, %c0_64] : memref<1x128xf32, #tpu.memory_space<vmem>>, vector<1x128xf32>
    %56 = vector.broadcast %55 : vector<1x128xf32> to vector<24x128xf32>
    %57 = arith.addf %54, %56 : vector<24x128xf32>
    %cst_65 = arith.constant 0.000000e+00 : f32
    %58 = vector.broadcast %cst_65 : f32 to vector<24x128xf32>
    %59 = arith.cmpf oge, %57, %58 : vector<24x128xf32>
    %cst_66 = arith.constant 2.000000e-01 : f32
    %60 = vector.broadcast %cst_66 : f32 to vector<24x128xf32>
    %61 = arith.mulf %60, %57 : vector<24x128xf32>
    %62 = arith.select %59, %57, %61 : vector<24x128xi1>, vector<24x128xf32>
    %63 = vector.shape_cast %62 : vector<24x128xf32> to vector<1x1x24x128xf32>
    %c0_67 = arith.constant 0 : index
    %c0_68 = arith.constant 0 : index
    %c0_69 = arith.constant 0 : index
    %c0_70 = arith.constant 0 : index
    %64 = vector.load %arg7[%c0_67, %c0_68, %c0_69, %c0_70] : memref<1x1x24x128xf32, #tpu.memory_space<vmem>>, vector<1x1x24x128xf32>
    tpu.vector_store %arg7[%c0_67, %c0_68, %c0_69, %c0_70], %63 {strides = array<i32>} : memref<1x1x24x128xf32, #tpu.memory_space<vmem>>, vector<1x1x24x128xf32>,
    return
  }
  func.func @transform_0(%arg0: i32, %arg1: i32) -> (i32, i32, i32, i32) {
    %c0_i32 = arith.constant 0 : i32
    %0 = arith.addi %arg1, %c0_i32 : i32
    %c0_i32_0 = arith.constant 0 : i32
    %c0_i32_1 = arith.constant 0 : i32
    %c0_i32_2 = arith.constant 0 : i32
    return %arg0, %0, %c0_i32_0, %c0_i32_1 : i32, i32, i32, i32
  }
  func.func @transform_1(%arg0: i32, %arg1: i32) -> (i32, i32, i32, i32) {
    %c1_i32 = arith.constant 1 : i32
    %0 = arith.addi %arg1, %c1_i32 : i32
    %c0_i32 = arith.constant 0 : i32
    %c0_i32_0 = arith.constant 0 : i32
    %c0_i32_1 = arith.constant 0 : i32
    return %arg0, %0, %c0_i32, %c0_i32_0 : i32, i32, i32, i32
  }
  func.func @transform_2(%arg0: i32, %arg1: i32) -> (i32, i32, i32, i32) {
    %c2_i32 = arith.constant 2 : i32
    %0 = arith.addi %arg1, %c2_i32 : i32
    %c0_i32 = arith.constant 0 : i32
    %c0_i32_0 = arith.constant 0 : i32
    %c0_i32_1 = arith.constant 0 : i32
    return %arg0, %0, %c0_i32, %c0_i32_0 : i32, i32, i32, i32
  }
  func.func @transform_3(%arg0: i32, %arg1: i32) -> (i32, i32, i32) {
    %c0_i32 = arith.constant 0 : i32
    %c0_i32_0 = arith.constant 0 : i32
    %c0_i32_1 = arith.constant 0 : i32
    %c0_i32_2 = arith.constant 0 : i32
    return %c0_i32, %c0_i32_0, %c0_i32_1 : i32, i32, i32
  }
  func.func @transform_4(%arg0: i32, %arg1: i32) -> (i32, i32) {
    %c0_i32 = arith.constant 0 : i32
    %c0_i32_0 = arith.constant 0 : i32
    %c0_i32_1 = arith.constant 0 : i32
    return %c0_i32, %c0_i32_0 : i32, i32
  }
  func.func @transform_5(%arg0: i32, %arg1: i32) -> (i32, i32, i32, i32) {
    %c0_i32 = arith.constant 0 : i32
    %c0_i32_0 = arith.constant 0 : i32
    %c0_i32_1 = arith.constant 0 : i32
    return %arg0, %arg1, %c0_i32, %c0_i32_0 : i32, i32, i32, i32
  }
}

module attributes {stable_mosaic.version = 11 : i64} {
  func.func @_conv_row_kernel(%arg0: i32, %arg1: i32, %arg2: memref<4x1x13x128xf32, #tpu.memory_space<vmem>>, %arg3: memref<4x1x13x128xf32, #tpu.memory_space<vmem>>, %arg4: memref<9x128x128xf32, #tpu.memory_space<vmem>>, %arg5: memref<1x1x12x128xf32, #tpu.memory_space<vmem>>, %arg6: memref<1x1x1x128xf32, #tpu.memory_space<vmem>>, %arg7: memref<1x1x1x128xf32, #tpu.memory_space<vmem>>) attributes {dimension_semantics = [#tpu.dimension_semantics<parallel>, #tpu.dimension_semantics<parallel>], iteration_bounds = array<i64: 2, 12>, scalar_prefetch = 0 : i64, scratch_operands = 0 : i64, tpu.core_type = #tpu.core_type<tc>, window_params = [{transform_indices = @transform_0, window_bounds = array<i64: 4, 1, 13, 128>}, {transform_indices = @transform_1, window_bounds = array<i64: 4, 1, 13, 128>}, {pipeline_mode = #tpu.pipeline_mode<synchronous>, transform_indices = @transform_2, window_bounds = array<i64: 9, 128, 128>}, {transform_indices = @transform_3, window_bounds = array<i64: 1, 1, 12, 128>}, {transform_indices = @transform_4, window_bounds = array<i64: 1, 1, 1, 128>}, {transform_indices = @transform_5, window_bounds = array<i64: 1, 1, 1, 128>}]} {
    %cst = arith.constant 0.000000e+00 : f32
    %0 = vector.broadcast %cst : f32 to vector<12x128xf32>
    %c0 = arith.constant 0 : index
    %c0_0 = arith.constant 0 : index
    %c0_1 = arith.constant 0 : index
    %c0_2 = arith.constant 0 : index
    %1 = vector.load %arg2[%c0, %c0_0, %c0_1, %c0_2] : memref<4x1x13x128xf32, #tpu.memory_space<vmem>>, vector<1x1x12x128xf32>
    %2 = vector.shape_cast %1 : vector<1x1x12x128xf32> to vector<12x128xf32>
    %c0_3 = arith.constant 0 : index
    %c0_4 = arith.constant 0 : index
    %c0_5 = arith.constant 0 : index
    %3 = vector.load %arg4[%c0_3, %c0_4, %c0_5] : memref<9x128x128xf32, #tpu.memory_space<vmem>>, vector<1x128x128xf32>
    %4 = vector.shape_cast %3 : vector<1x128x128xf32> to vector<128x128xf32>
    %cst_6 = arith.constant dense<0.000000e+00> : vector<12x128xf32>
    %5 = tpu.matmul %2, %4, %cst_6 {dimension_numbers = #tpu.dot_dimension_numbers<[1], [0], [0], [1], [0, 0, 1, 1], [], []>} : vector<12x128xf32>, vector<128x128xf32>, vector<12x128xf32> -> vector<12x128xf32>
    %6 = arith.addf %0, %5 : vector<12x128xf32>
    %c1 = arith.constant 1 : index
    %c0_7 = arith.constant 0 : index
    %c0_8 = arith.constant 0 : index
    %c0_9 = arith.constant 0 : index
    %7 = vector.load %arg2[%c1, %c0_7, %c0_8, %c0_9] : memref<4x1x13x128xf32, #tpu.memory_space<vmem>>, vector<1x1x12x128xf32>
    %8 = vector.shape_cast %7 : vector<1x1x12x128xf32> to vector<12x128xf32>
    %c1_10 = arith.constant 1 : index
    %c0_11 = arith.constant 0 : index
    %c0_12 = arith.constant 0 : index
    %9 = vector.load %arg4[%c1_10, %c0_11, %c0_12] : memref<9x128x128xf32, #tpu.memory_space<vmem>>, vector<1x128x128xf32>
    %10 = vector.shape_cast %9 : vector<1x128x128xf32> to vector<128x128xf32>
    %cst_13 = arith.constant dense<0.000000e+00> : vector<12x128xf32>
    %11 = tpu.matmul %8, %10, %cst_13 {dimension_numbers = #tpu.dot_dimension_numbers<[1], [0], [0], [1], [0, 0, 1, 1], [], []>} : vector<12x128xf32>, vector<128x128xf32>, vector<12x128xf32> -> vector<12x128xf32>
    %12 = arith.addf %6, %11 : vector<12x128xf32>
    %c0_14 = arith.constant 0 : index
    %c0_15 = arith.constant 0 : index
    %c1_16 = arith.constant 1 : index
    %c0_17 = arith.constant 0 : index
    %13 = vector.load %arg2[%c0_14, %c0_15, %c1_16, %c0_17] : memref<4x1x13x128xf32, #tpu.memory_space<vmem>>, vector<1x1x12x128xf32>
    %14 = vector.shape_cast %13 : vector<1x1x12x128xf32> to vector<12x128xf32>
    %c2 = arith.constant 2 : index
    %c0_18 = arith.constant 0 : index
    %c0_19 = arith.constant 0 : index
    %15 = vector.load %arg4[%c2, %c0_18, %c0_19] : memref<9x128x128xf32, #tpu.memory_space<vmem>>, vector<1x128x128xf32>
    %16 = vector.shape_cast %15 : vector<1x128x128xf32> to vector<128x128xf32>
    %cst_20 = arith.constant dense<0.000000e+00> : vector<12x128xf32>
    %17 = tpu.matmul %14, %16, %cst_20 {dimension_numbers = #tpu.dot_dimension_numbers<[1], [0], [0], [1], [0, 0, 1, 1], [], []>} : vector<12x128xf32>, vector<128x128xf32>, vector<12x128xf32> -> vector<12x128xf32>
    %18 = arith.addf %12, %17 : vector<12x128xf32>
    %c2_21 = arith.constant 2 : index
    %c0_22 = arith.constant 0 : index
    %c0_23 = arith.constant 0 : index
    %c0_24 = arith.constant 0 : index
    %19 = vector.load %arg2[%c2_21, %c0_22, %c0_23, %c0_24] : memref<4x1x13x128xf32, #tpu.memory_space<vmem>>, vector<1x1x12x128xf32>
    %20 = vector.shape_cast %19 : vector<1x1x12x128xf32> to vector<12x128xf32>
    %c3 = arith.constant 3 : index
    %c0_25 = arith.constant 0 : index
    %c0_26 = arith.constant 0 : index
    %21 = vector.load %arg4[%c3, %c0_25, %c0_26] : memref<9x128x128xf32, #tpu.memory_space<vmem>>, vector<1x128x128xf32>
    %22 = vector.shape_cast %21 : vector<1x128x128xf32> to vector<128x128xf32>
    %cst_27 = arith.constant dense<0.000000e+00> : vector<12x128xf32>
    %23 = tpu.matmul %20, %22, %cst_27 {dimension_numbers = #tpu.dot_dimension_numbers<[1], [0], [0], [1], [0, 0, 1, 1], [], []>} : vector<12x128xf32>, vector<128x128xf32>, vector<12x128xf32> -> vector<12x128xf32>
    %24 = arith.addf %18, %23 : vector<12x128xf32>
    %c3_28 = arith.constant 3 : index
    %c0_29 = arith.constant 0 : index
    %c0_30 = arith.constant 0 : index
    %c0_31 = arith.constant 0 : index
    %25 = vector.load %arg2[%c3_28, %c0_29, %c0_30, %c0_31] : memref<4x1x13x128xf32, #tpu.memory_space<vmem>>, vector<1x1x12x128xf32>
    %26 = vector.shape_cast %25 : vector<1x1x12x128xf32> to vector<12x128xf32>
    %c4 = arith.constant 4 : index
    %c0_32 = arith.constant 0 : index
    %c0_33 = arith.constant 0 : index
    %27 = vector.load %arg4[%c4, %c0_32, %c0_33] : memref<9x128x128xf32, #tpu.memory_space<vmem>>, vector<1x128x128xf32>
    %28 = vector.shape_cast %27 : vector<1x128x128xf32> to vector<128x128xf32>
    %cst_34 = arith.constant dense<0.000000e+00> : vector<12x128xf32>
    %29 = tpu.matmul %26, %28, %cst_34 {dimension_numbers = #tpu.dot_dimension_numbers<[1], [0], [0], [1], [0, 0, 1, 1], [], []>} : vector<12x128xf32>, vector<128x128xf32>, vector<12x128xf32> -> vector<12x128xf32>
    %30 = arith.addf %24, %29 : vector<12x128xf32>
    %c2_35 = arith.constant 2 : index
    %c0_36 = arith.constant 0 : index
    %c1_37 = arith.constant 1 : index
    %c0_38 = arith.constant 0 : index
    %31 = vector.load %arg2[%c2_35, %c0_36, %c1_37, %c0_38] : memref<4x1x13x128xf32, #tpu.memory_space<vmem>>, vector<1x1x12x128xf32>
    %32 = vector.shape_cast %31 : vector<1x1x12x128xf32> to vector<12x128xf32>
    %c5 = arith.constant 5 : index
    %c0_39 = arith.constant 0 : index
    %c0_40 = arith.constant 0 : index
    %33 = vector.load %arg4[%c5, %c0_39, %c0_40] : memref<9x128x128xf32, #tpu.memory_space<vmem>>, vector<1x128x128xf32>
    %34 = vector.shape_cast %33 : vector<1x128x128xf32> to vector<128x128xf32>
    %cst_41 = arith.constant dense<0.000000e+00> : vector<12x128xf32>
    %35 = tpu.matmul %32, %34, %cst_41 {dimension_numbers = #tpu.dot_dimension_numbers<[1], [0], [0], [1], [0, 0, 1, 1], [], []>} : vector<12x128xf32>, vector<128x128xf32>, vector<12x128xf32> -> vector<12x128xf32>
    %36 = arith.addf %30, %35 : vector<12x128xf32>
    %c0_42 = arith.constant 0 : index
    %c0_43 = arith.constant 0 : index
    %c0_44 = arith.constant 0 : index
    %c0_45 = arith.constant 0 : index
    %37 = vector.load %arg3[%c0_42, %c0_43, %c0_44, %c0_45] : memref<4x1x13x128xf32, #tpu.memory_space<vmem>>, vector<1x1x12x128xf32>
    %38 = vector.shape_cast %37 : vector<1x1x12x128xf32> to vector<12x128xf32>
    %c6 = arith.constant 6 : index
    %c0_46 = arith.constant 0 : index
    %c0_47 = arith.constant 0 : index
    %39 = vector.load %arg4[%c6, %c0_46, %c0_47] : memref<9x128x128xf32, #tpu.memory_space<vmem>>, vector<1x128x128xf32>
    %40 = vector.shape_cast %39 : vector<1x128x128xf32> to vector<128x128xf32>
    %cst_48 = arith.constant dense<0.000000e+00> : vector<12x128xf32>
    %41 = tpu.matmul %38, %40, %cst_48 {dimension_numbers = #tpu.dot_dimension_numbers<[1], [0], [0], [1], [0, 0, 1, 1], [], []>} : vector<12x128xf32>, vector<128x128xf32>, vector<12x128xf32> -> vector<12x128xf32>
    %42 = arith.addf %36, %41 : vector<12x128xf32>
    %c1_49 = arith.constant 1 : index
    %c0_50 = arith.constant 0 : index
    %c0_51 = arith.constant 0 : index
    %c0_52 = arith.constant 0 : index
    %43 = vector.load %arg3[%c1_49, %c0_50, %c0_51, %c0_52] : memref<4x1x13x128xf32, #tpu.memory_space<vmem>>, vector<1x1x12x128xf32>
    %44 = vector.shape_cast %43 : vector<1x1x12x128xf32> to vector<12x128xf32>
    %c7 = arith.constant 7 : index
    %c0_53 = arith.constant 0 : index
    %c0_54 = arith.constant 0 : index
    %45 = vector.load %arg4[%c7, %c0_53, %c0_54] : memref<9x128x128xf32, #tpu.memory_space<vmem>>, vector<1x128x128xf32>
    %46 = vector.shape_cast %45 : vector<1x128x128xf32> to vector<128x128xf32>
    %cst_55 = arith.constant dense<0.000000e+00> : vector<12x128xf32>
    %47 = tpu.matmul %44, %46, %cst_55 {dimension_numbers = #tpu.dot_dimension_numbers<[1], [0], [0], [1], [0, 0, 1, 1], [], []>} : vector<12x128xf32>, vector<128x128xf32>, vector<12x128xf32> -> vector<12x128xf32>
    %48 = arith.addf %42, %47 : vector<12x128xf32>
    %c0_56 = arith.constant 0 : index
    %c0_57 = arith.constant 0 : index
    %c1_58 = arith.constant 1 : index
    %c0_59 = arith.constant 0 : index
    %49 = vector.load %arg3[%c0_56, %c0_57, %c1_58, %c0_59] : memref<4x1x13x128xf32, #tpu.memory_space<vmem>>, vector<1x1x12x128xf32>
    %50 = vector.shape_cast %49 : vector<1x1x12x128xf32> to vector<12x128xf32>
    %c8 = arith.constant 8 : index
    %c0_60 = arith.constant 0 : index
    %c0_61 = arith.constant 0 : index
    %51 = vector.load %arg4[%c8, %c0_60, %c0_61] : memref<9x128x128xf32, #tpu.memory_space<vmem>>, vector<1x128x128xf32>
    %52 = vector.shape_cast %51 : vector<1x128x128xf32> to vector<128x128xf32>
    %cst_62 = arith.constant dense<0.000000e+00> : vector<12x128xf32>
    %53 = tpu.matmul %50, %52, %cst_62 {dimension_numbers = #tpu.dot_dimension_numbers<[1], [0], [0], [1], [0, 0, 1, 1], [], []>} : vector<12x128xf32>, vector<128x128xf32>, vector<12x128xf32> -> vector<12x128xf32>
    %54 = arith.addf %48, %53 : vector<12x128xf32>
    %cst_63 = arith.constant dense<0.000000e+00> : vector<128xf32>
    %55 = vector.multi_reduction <add>, %54, %cst_63 [0] : vector<12x128xf32> to vector<128xf32>
    %56 = vector.shape_cast %55 : vector<128xf32> to vector<1x128xf32>
    %57 = vector.shape_cast %56 : vector<1x128xf32> to vector<1x1x1x128xf32>
    %c0_64 = arith.constant 0 : index
    %c0_65 = arith.constant 0 : index
    %c0_66 = arith.constant 0 : index
    %c0_67 = arith.constant 0 : index
    %58 = vector.load %arg6[%c0_64, %c0_65, %c0_66, %c0_67] : memref<1x1x1x128xf32, #tpu.memory_space<vmem>>, vector<1x1x1x128xf32>
    tpu.vector_store %arg6[%c0_64, %c0_65, %c0_66, %c0_67], %57 {strides = array<i32>} : memref<1x1x1x128xf32, #tpu.memory_space<vmem>>, vector<1x1x1x128xf32>,
    %59 = arith.mulf %54, %54 : vector<12x128xf32>
    %cst_68 = arith.constant dense<0.000000e+00> : vector<128xf32>
    %60 = vector.multi_reduction <add>, %59, %cst_68 [0] : vector<12x128xf32> to vector<128xf32>
    %61 = vector.shape_cast %60 : vector<128xf32> to vector<1x128xf32>
    %62 = vector.shape_cast %61 : vector<1x128xf32> to vector<1x1x1x128xf32>
    %c0_69 = arith.constant 0 : index
    %c0_70 = arith.constant 0 : index
    %c0_71 = arith.constant 0 : index
    %c0_72 = arith.constant 0 : index
    %63 = vector.load %arg7[%c0_69, %c0_70, %c0_71, %c0_72] : memref<1x1x1x128xf32, #tpu.memory_space<vmem>>, vector<1x1x1x128xf32>
    tpu.vector_store %arg7[%c0_69, %c0_70, %c0_71, %c0_72], %62 {strides = array<i32>} : memref<1x1x1x128xf32, #tpu.memory_space<vmem>>, vector<1x1x1x128xf32>,
    %64 = vector.shape_cast %54 : vector<12x128xf32> to vector<1x1x12x128xf32>
    %c0_73 = arith.constant 0 : index
    %c0_74 = arith.constant 0 : index
    %c0_75 = arith.constant 0 : index
    %c0_76 = arith.constant 0 : index
    %65 = vector.load %arg5[%c0_73, %c0_74, %c0_75, %c0_76] : memref<1x1x12x128xf32, #tpu.memory_space<vmem>>, vector<1x1x12x128xf32>
    tpu.vector_store %arg5[%c0_73, %c0_74, %c0_75, %c0_76], %64 {strides = array<i32>} : memref<1x1x12x128xf32, #tpu.memory_space<vmem>>, vector<1x1x12x128xf32>,
    return
  }
  func.func @transform_0(%arg0: i32, %arg1: i32) -> (i32, i32, i32, i32) {
    %c0_i32 = arith.constant 0 : i32
    %0 = arith.addi %arg1, %c0_i32 : i32
    %c0_i32_0 = arith.constant 0 : i32
    %c0_i32_1 = arith.constant 0 : i32
    %c0_i32_2 = arith.constant 0 : i32
    return %arg0, %0, %c0_i32_0, %c0_i32_1 : i32, i32, i32, i32
  }
  func.func @transform_1(%arg0: i32, %arg1: i32) -> (i32, i32, i32, i32) {
    %c1_i32 = arith.constant 1 : i32
    %0 = arith.addi %arg1, %c1_i32 : i32
    %c0_i32 = arith.constant 0 : i32
    %c0_i32_0 = arith.constant 0 : i32
    %c0_i32_1 = arith.constant 0 : i32
    return %arg0, %0, %c0_i32, %c0_i32_0 : i32, i32, i32, i32
  }
  func.func @transform_2(%arg0: i32, %arg1: i32) -> (i32, i32, i32) {
    %c0_i32 = arith.constant 0 : i32
    %c0_i32_0 = arith.constant 0 : i32
    %c0_i32_1 = arith.constant 0 : i32
    %c0_i32_2 = arith.constant 0 : i32
    return %c0_i32, %c0_i32_0, %c0_i32_1 : i32, i32, i32
  }
  func.func @transform_3(%arg0: i32, %arg1: i32) -> (i32, i32, i32, i32) {
    %c0_i32 = arith.constant 0 : i32
    %c0_i32_0 = arith.constant 0 : i32
    %c0_i32_1 = arith.constant 0 : i32
    return %arg0, %arg1, %c0_i32, %c0_i32_0 : i32, i32, i32, i32
  }
  func.func @transform_4(%arg0: i32, %arg1: i32) -> (i32, i32, i32, i32) {
    %c0_i32 = arith.constant 0 : i32
    %c0_i32_0 = arith.constant 0 : i32
    %c0_i32_1 = arith.constant 0 : i32
    return %arg0, %arg1, %c0_i32, %c0_i32_0 : i32, i32, i32, i32
  }
  func.func @transform_5(%arg0: i32, %arg1: i32) -> (i32, i32, i32, i32) {
    %c0_i32 = arith.constant 0 : i32
    %c0_i32_0 = arith.constant 0 : i32
    %c0_i32_1 = arith.constant 0 : i32
    return %arg0, %arg1, %c0_i32, %c0_i32_0 : i32, i32, i32, i32
  }
}

module attributes {stable_mosaic.version = 11 : i64} {
  func.func @_affine_act_kernel(%arg0: i32, %arg1: memref<288x128xf32, #tpu.memory_space<vmem>>, %arg2: memref<1x128xf32, #tpu.memory_space<vmem>>, %arg3: memref<1x128xf32, #tpu.memory_space<vmem>>, %arg4: memref<288x128xf32, #tpu.memory_space<vmem>>) attributes {dimension_semantics = [#tpu.dimension_semantics<parallel>], iteration_bounds = array<i64: 1>, scalar_prefetch = 0 : i64, scratch_operands = 0 : i64, tpu.core_type = #tpu.core_type<tc>, window_params = [{transform_indices = @transform_0, window_bounds = array<i64: 288, 128>}, {pipeline_mode = #tpu.pipeline_mode<synchronous>, transform_indices = @transform_1, window_bounds = array<i64: 1, 128>}, {pipeline_mode = #tpu.pipeline_mode<synchronous>, transform_indices = @transform_2, window_bounds = array<i64: 1, 128>}, {transform_indices = @transform_3, window_bounds = array<i64: 288, 128>}]} {
    %c0 = arith.constant 0 : index
    %c0_0 = arith.constant 0 : index
    %0 = vector.load %arg1[%c0, %c0_0] : memref<288x128xf32, #tpu.memory_space<vmem>>, vector<288x128xf32>
    %c0_1 = arith.constant 0 : index
    %c0_2 = arith.constant 0 : index
    %1 = vector.load %arg2[%c0_1, %c0_2] : memref<1x128xf32, #tpu.memory_space<vmem>>, vector<1x128xf32>
    %2 = vector.broadcast %1 : vector<1x128xf32> to vector<288x128xf32>
    %3 = arith.mulf %0, %2 : vector<288x128xf32>
    %c0_3 = arith.constant 0 : index
    %c0_4 = arith.constant 0 : index
    %4 = vector.load %arg3[%c0_3, %c0_4] : memref<1x128xf32, #tpu.memory_space<vmem>>, vector<1x128xf32>
    %5 = vector.broadcast %4 : vector<1x128xf32> to vector<288x128xf32>
    %6 = arith.addf %3, %5 : vector<288x128xf32>
    %cst = arith.constant 0.000000e+00 : f32
    %7 = vector.broadcast %cst : f32 to vector<288x128xf32>
    %8 = arith.cmpf oge, %6, %7 : vector<288x128xf32>
    %cst_5 = arith.constant 2.000000e-01 : f32
    %9 = vector.broadcast %cst_5 : f32 to vector<288x128xf32>
    %10 = arith.mulf %9, %6 : vector<288x128xf32>
    %11 = arith.select %8, %6, %10 : vector<288x128xi1>, vector<288x128xf32>
    %c0_6 = arith.constant 0 : index
    %c0_7 = arith.constant 0 : index
    %12 = vector.load %arg4[%c0_6, %c0_7] : memref<288x128xf32, #tpu.memory_space<vmem>>, vector<288x128xf32>
    tpu.vector_store %arg4[%c0_6, %c0_7], %11 {strides = array<i32>} : memref<288x128xf32, #tpu.memory_space<vmem>>, vector<288x128xf32>,
    return
  }
  func.func @transform_0(%arg0: i32) -> (i32, i32) {
    %c0_i32 = arith.constant 0 : i32
    %c0_i32_0 = arith.constant 0 : i32
    return %arg0, %c0_i32 : i32, i32
  }
  func.func @transform_1(%arg0: i32) -> (i32, i32) {
    %c0_i32 = arith.constant 0 : i32
    %c0_i32_0 = arith.constant 0 : i32
    %c0_i32_1 = arith.constant 0 : i32
    return %c0_i32, %c0_i32_0 : i32, i32
  }
  func.func @transform_2(%arg0: i32) -> (i32, i32) {
    %c0_i32 = arith.constant 0 : i32
    %c0_i32_0 = arith.constant 0 : i32
    %c0_i32_1 = arith.constant 0 : i32
    return %c0_i32, %c0_i32_0 : i32, i32
  }
  func.func @transform_3(%arg0: i32) -> (i32, i32) {
    %c0_i32 = arith.constant 0 : i32
    %c0_i32_0 = arith.constant 0 : i32
    return %arg0, %c0_i32 : i32, i32
  }
}

module attributes {stable_mosaic.version = 11 : i64} {
  func.func @_conv_row_kernel(%arg0: i32, %arg1: i32, %arg2: memref<1x1x14x128xf32, #tpu.memory_space<vmem>>, %arg3: memref<1x1x14x128xf32, #tpu.memory_space<vmem>>, %arg4: memref<1x1x14x128xf32, #tpu.memory_space<vmem>>, %arg5: memref<9x128x128xf32, #tpu.memory_space<vmem>>, %arg6: memref<1x1x12x128xf32, #tpu.memory_space<vmem>>, %arg7: memref<1x1x1x128xf32, #tpu.memory_space<vmem>>, %arg8: memref<1x1x1x128xf32, #tpu.memory_space<vmem>>) attributes {dimension_semantics = [#tpu.dimension_semantics<parallel>, #tpu.dimension_semantics<parallel>], iteration_bounds = array<i64: 2, 12>, scalar_prefetch = 0 : i64, scratch_operands = 0 : i64, tpu.core_type = #tpu.core_type<tc>, window_params = [{transform_indices = @transform_0, window_bounds = array<i64: 1, 1, 14, 128>}, {transform_indices = @transform_1, window_bounds = array<i64: 1, 1, 14, 128>}, {transform_indices = @transform_2, window_bounds = array<i64: 1, 1, 14, 128>}, {pipeline_mode = #tpu.pipeline_mode<synchronous>, transform_indices = @transform_3, window_bounds = array<i64: 9, 128, 128>}, {transform_indices = @transform_4, window_bounds = array<i64: 1, 1, 12, 128>}, {transform_indices = @transform_5, window_bounds = array<i64: 1, 1, 1, 128>}, {transform_indices = @transform_6, window_bounds = array<i64: 1, 1, 1, 128>}]} {
    %cst = arith.constant 0.000000e+00 : f32
    %0 = vector.broadcast %cst : f32 to vector<12x128xf32>
    %c0 = arith.constant 0 : index
    %c0_0 = arith.constant 0 : index
    %c0_1 = arith.constant 0 : index
    %c0_2 = arith.constant 0 : index
    %1 = vector.load %arg2[%c0, %c0_0, %c0_1, %c0_2] : memref<1x1x14x128xf32, #tpu.memory_space<vmem>>, vector<1x1x12x128xf32>
    %2 = vector.shape_cast %1 : vector<1x1x12x128xf32> to vector<12x128xf32>
    %c0_3 = arith.constant 0 : index
    %c0_4 = arith.constant 0 : index
    %c0_5 = arith.constant 0 : index
    %3 = vector.load %arg5[%c0_3, %c0_4, %c0_5] : memref<9x128x128xf32, #tpu.memory_space<vmem>>, vector<1x128x128xf32>
    %4 = vector.shape_cast %3 : vector<1x128x128xf32> to vector<128x128xf32>
    %cst_6 = arith.constant dense<0.000000e+00> : vector<12x128xf32>
    %5 = tpu.matmul %2, %4, %cst_6 {dimension_numbers = #tpu.dot_dimension_numbers<[1], [0], [0], [1], [0, 0, 1, 1], [], []>} : vector<12x128xf32>, vector<128x128xf32>, vector<12x128xf32> -> vector<12x128xf32>
    %6 = arith.addf %0, %5 : vector<12x128xf32>
    %c0_7 = arith.constant 0 : index
    %c0_8 = arith.constant 0 : index
    %c1 = arith.constant 1 : index
    %c0_9 = arith.constant 0 : index
    %7 = vector.load %arg2[%c0_7, %c0_8, %c1, %c0_9] : memref<1x1x14x128xf32, #tpu.memory_space<vmem>>, vector<1x1x12x128xf32>
    %8 = vector.shape_cast %7 : vector<1x1x12x128xf32> to vector<12x128xf32>
    %c1_10 = arith.constant 1 : index
    %c0_11 = arith.constant 0 : index
    %c0_12 = arith.constant 0 : index
    %9 = vector.load %arg5[%c1_10, %c0_11, %c0_12] : memref<9x128x128xf32, #tpu.memory_space<vmem>>, vector<1x128x128xf32>
    %10 = vector.shape_cast %9 : vector<1x128x128xf32> to vector<128x128xf32>
    %cst_13 = arith.constant dense<0.000000e+00> : vector<12x128xf32>
    %11 = tpu.matmul %8, %10, %cst_13 {dimension_numbers = #tpu.dot_dimension_numbers<[1], [0], [0], [1], [0, 0, 1, 1], [], []>} : vector<12x128xf32>, vector<128x128xf32>, vector<12x128xf32> -> vector<12x128xf32>
    %12 = arith.addf %6, %11 : vector<12x128xf32>
    %c0_14 = arith.constant 0 : index
    %c0_15 = arith.constant 0 : index
    %c2 = arith.constant 2 : index
    %c0_16 = arith.constant 0 : index
    %13 = vector.load %arg2[%c0_14, %c0_15, %c2, %c0_16] : memref<1x1x14x128xf32, #tpu.memory_space<vmem>>, vector<1x1x12x128xf32>
    %14 = vector.shape_cast %13 : vector<1x1x12x128xf32> to vector<12x128xf32>
    %c2_17 = arith.constant 2 : index
    %c0_18 = arith.constant 0 : index
    %c0_19 = arith.constant 0 : index
    %15 = vector.load %arg5[%c2_17, %c0_18, %c0_19] : memref<9x128x128xf32, #tpu.memory_space<vmem>>, vector<1x128x128xf32>
    %16 = vector.shape_cast %15 : vector<1x128x128xf32> to vector<128x128xf32>
    %cst_20 = arith.constant dense<0.000000e+00> : vector<12x128xf32>
    %17 = tpu.matmul %14, %16, %cst_20 {dimension_numbers = #tpu.dot_dimension_numbers<[1], [0], [0], [1], [0, 0, 1, 1], [], []>} : vector<12x128xf32>, vector<128x128xf32>, vector<12x128xf32> -> vector<12x128xf32>
    %18 = arith.addf %12, %17 : vector<12x128xf32>
    %c0_21 = arith.constant 0 : index
    %c0_22 = arith.constant 0 : index
    %c0_23 = arith.constant 0 : index
    %c0_24 = arith.constant 0 : index
    %19 = vector.load %arg3[%c0_21, %c0_22, %c0_23, %c0_24] : memref<1x1x14x128xf32, #tpu.memory_space<vmem>>, vector<1x1x12x128xf32>
    %20 = vector.shape_cast %19 : vector<1x1x12x128xf32> to vector<12x128xf32>
    %c3 = arith.constant 3 : index
    %c0_25 = arith.constant 0 : index
    %c0_26 = arith.constant 0 : index
    %21 = vector.load %arg5[%c3, %c0_25, %c0_26] : memref<9x128x128xf32, #tpu.memory_space<vmem>>, vector<1x128x128xf32>
    %22 = vector.shape_cast %21 : vector<1x128x128xf32> to vector<128x128xf32>
    %cst_27 = arith.constant dense<0.000000e+00> : vector<12x128xf32>
    %23 = tpu.matmul %20, %22, %cst_27 {dimension_numbers = #tpu.dot_dimension_numbers<[1], [0], [0], [1], [0, 0, 1, 1], [], []>} : vector<12x128xf32>, vector<128x128xf32>, vector<12x128xf32> -> vector<12x128xf32>
    %24 = arith.addf %18, %23 : vector<12x128xf32>
    %c0_28 = arith.constant 0 : index
    %c0_29 = arith.constant 0 : index
    %c1_30 = arith.constant 1 : index
    %c0_31 = arith.constant 0 : index
    %25 = vector.load %arg3[%c0_28, %c0_29, %c1_30, %c0_31] : memref<1x1x14x128xf32, #tpu.memory_space<vmem>>, vector<1x1x12x128xf32>
    %26 = vector.shape_cast %25 : vector<1x1x12x128xf32> to vector<12x128xf32>
    %c4 = arith.constant 4 : index
    %c0_32 = arith.constant 0 : index
    %c0_33 = arith.constant 0 : index
    %27 = vector.load %arg5[%c4, %c0_32, %c0_33] : memref<9x128x128xf32, #tpu.memory_space<vmem>>, vector<1x128x128xf32>
    %28 = vector.shape_cast %27 : vector<1x128x128xf32> to vector<128x128xf32>
    %cst_34 = arith.constant dense<0.000000e+00> : vector<12x128xf32>
    %29 = tpu.matmul %26, %28, %cst_34 {dimension_numbers = #tpu.dot_dimension_numbers<[1], [0], [0], [1], [0, 0, 1, 1], [], []>} : vector<12x128xf32>, vector<128x128xf32>, vector<12x128xf32> -> vector<12x128xf32>
    %30 = arith.addf %24, %29 : vector<12x128xf32>
    %c0_35 = arith.constant 0 : index
    %c0_36 = arith.constant 0 : index
    %c2_37 = arith.constant 2 : index
    %c0_38 = arith.constant 0 : index
    %31 = vector.load %arg3[%c0_35, %c0_36, %c2_37, %c0_38] : memref<1x1x14x128xf32, #tpu.memory_space<vmem>>, vector<1x1x12x128xf32>
    %32 = vector.shape_cast %31 : vector<1x1x12x128xf32> to vector<12x128xf32>
    %c5 = arith.constant 5 : index
    %c0_39 = arith.constant 0 : index
    %c0_40 = arith.constant 0 : index
    %33 = vector.load %arg5[%c5, %c0_39, %c0_40] : memref<9x128x128xf32, #tpu.memory_space<vmem>>, vector<1x128x128xf32>
    %34 = vector.shape_cast %33 : vector<1x128x128xf32> to vector<128x128xf32>
    %cst_41 = arith.constant dense<0.000000e+00> : vector<12x128xf32>
    %35 = tpu.matmul %32, %34, %cst_41 {dimension_numbers = #tpu.dot_dimension_numbers<[1], [0], [0], [1], [0, 0, 1, 1], [], []>} : vector<12x128xf32>, vector<128x128xf32>, vector<12x128xf32> -> vector<12x128xf32>
    %36 = arith.addf %30, %35 : vector<12x128xf32>
    %c0_42 = arith.constant 0 : index
    %c0_43 = arith.constant 0 : index
    %c0_44 = arith.constant 0 : index
    %c0_45 = arith.constant 0 : index
    %37 = vector.load %arg4[%c0_42, %c0_43, %c0_44, %c0_45] : memref<1x1x14x128xf32, #tpu.memory_space<vmem>>, vector<1x1x12x128xf32>
    %38 = vector.shape_cast %37 : vector<1x1x12x128xf32> to vector<12x128xf32>
    %c6 = arith.constant 6 : index
    %c0_46 = arith.constant 0 : index
    %c0_47 = arith.constant 0 : index
    %39 = vector.load %arg5[%c6, %c0_46, %c0_47] : memref<9x128x128xf32, #tpu.memory_space<vmem>>, vector<1x128x128xf32>
    %40 = vector.shape_cast %39 : vector<1x128x128xf32> to vector<128x128xf32>
    %cst_48 = arith.constant dense<0.000000e+00> : vector<12x128xf32>
    %41 = tpu.matmul %38, %40, %cst_48 {dimension_numbers = #tpu.dot_dimension_numbers<[1], [0], [0], [1], [0, 0, 1, 1], [], []>} : vector<12x128xf32>, vector<128x128xf32>, vector<12x128xf32> -> vector<12x128xf32>
    %42 = arith.addf %36, %41 : vector<12x128xf32>
    %c0_49 = arith.constant 0 : index
    %c0_50 = arith.constant 0 : index
    %c1_51 = arith.constant 1 : index
    %c0_52 = arith.constant 0 : index
    %43 = vector.load %arg4[%c0_49, %c0_50, %c1_51, %c0_52] : memref<1x1x14x128xf32, #tpu.memory_space<vmem>>, vector<1x1x12x128xf32>
    %44 = vector.shape_cast %43 : vector<1x1x12x128xf32> to vector<12x128xf32>
    %c7 = arith.constant 7 : index
    %c0_53 = arith.constant 0 : index
    %c0_54 = arith.constant 0 : index
    %45 = vector.load %arg5[%c7, %c0_53, %c0_54] : memref<9x128x128xf32, #tpu.memory_space<vmem>>, vector<1x128x128xf32>
    %46 = vector.shape_cast %45 : vector<1x128x128xf32> to vector<128x128xf32>
    %cst_55 = arith.constant dense<0.000000e+00> : vector<12x128xf32>
    %47 = tpu.matmul %44, %46, %cst_55 {dimension_numbers = #tpu.dot_dimension_numbers<[1], [0], [0], [1], [0, 0, 1, 1], [], []>} : vector<12x128xf32>, vector<128x128xf32>, vector<12x128xf32> -> vector<12x128xf32>
    %48 = arith.addf %42, %47 : vector<12x128xf32>
    %c0_56 = arith.constant 0 : index
    %c0_57 = arith.constant 0 : index
    %c2_58 = arith.constant 2 : index
    %c0_59 = arith.constant 0 : index
    %49 = vector.load %arg4[%c0_56, %c0_57, %c2_58, %c0_59] : memref<1x1x14x128xf32, #tpu.memory_space<vmem>>, vector<1x1x12x128xf32>
    %50 = vector.shape_cast %49 : vector<1x1x12x128xf32> to vector<12x128xf32>
    %c8 = arith.constant 8 : index
    %c0_60 = arith.constant 0 : index
    %c0_61 = arith.constant 0 : index
    %51 = vector.load %arg5[%c8, %c0_60, %c0_61] : memref<9x128x128xf32, #tpu.memory_space<vmem>>, vector<1x128x128xf32>
    %52 = vector.shape_cast %51 : vector<1x128x128xf32> to vector<128x128xf32>
    %cst_62 = arith.constant dense<0.000000e+00> : vector<12x128xf32>
    %53 = tpu.matmul %50, %52, %cst_62 {dimension_numbers = #tpu.dot_dimension_numbers<[1], [0], [0], [1], [0, 0, 1, 1], [], []>} : vector<12x128xf32>, vector<128x128xf32>, vector<12x128xf32> -> vector<12x128xf32>
    %54 = arith.addf %48, %53 : vector<12x128xf32>
    %cst_63 = arith.constant dense<0.000000e+00> : vector<128xf32>
    %55 = vector.multi_reduction <add>, %54, %cst_63 [0] : vector<12x128xf32> to vector<128xf32>
    %56 = vector.shape_cast %55 : vector<128xf32> to vector<1x128xf32>
    %57 = vector.shape_cast %56 : vector<1x128xf32> to vector<1x1x1x128xf32>
    %c0_64 = arith.constant 0 : index
    %c0_65 = arith.constant 0 : index
    %c0_66 = arith.constant 0 : index
    %c0_67 = arith.constant 0 : index
    %58 = vector.load %arg7[%c0_64, %c0_65, %c0_66, %c0_67] : memref<1x1x1x128xf32, #tpu.memory_space<vmem>>, vector<1x1x1x128xf32>
    tpu.vector_store %arg7[%c0_64, %c0_65, %c0_66, %c0_67], %57 {strides = array<i32>} : memref<1x1x1x128xf32, #tpu.memory_space<vmem>>, vector<1x1x1x128xf32>,
    %59 = arith.mulf %54, %54 : vector<12x128xf32>
    %cst_68 = arith.constant dense<0.000000e+00> : vector<128xf32>
    %60 = vector.multi_reduction <add>, %59, %cst_68 [0] : vector<12x128xf32> to vector<128xf32>
    %61 = vector.shape_cast %60 : vector<128xf32> to vector<1x128xf32>
    %62 = vector.shape_cast %61 : vector<1x128xf32> to vector<1x1x1x128xf32>
    %c0_69 = arith.constant 0 : index
    %c0_70 = arith.constant 0 : index
    %c0_71 = arith.constant 0 : index
    %c0_72 = arith.constant 0 : index
    %63 = vector.load %arg8[%c0_69, %c0_70, %c0_71, %c0_72] : memref<1x1x1x128xf32, #tpu.memory_space<vmem>>, vector<1x1x1x128xf32>
    tpu.vector_store %arg8[%c0_69, %c0_70, %c0_71, %c0_72], %62 {strides = array<i32>} : memref<1x1x1x128xf32, #tpu.memory_space<vmem>>, vector<1x1x1x128xf32>,
    %64 = vector.shape_cast %54 : vector<12x128xf32> to vector<1x1x12x128xf32>
    %c0_73 = arith.constant 0 : index
    %c0_74 = arith.constant 0 : index
    %c0_75 = arith.constant 0 : index
    %c0_76 = arith.constant 0 : index
    %65 = vector.load %arg6[%c0_73, %c0_74, %c0_75, %c0_76] : memref<1x1x12x128xf32, #tpu.memory_space<vmem>>, vector<1x1x12x128xf32>
    tpu.vector_store %arg6[%c0_73, %c0_74, %c0_75, %c0_76], %64 {strides = array<i32>} : memref<1x1x12x128xf32, #tpu.memory_space<vmem>>, vector<1x1x12x128xf32>,
    return
  }
  func.func @transform_0(%arg0: i32, %arg1: i32) -> (i32, i32, i32, i32) {
    %c0_i32 = arith.constant 0 : i32
    %0 = arith.addi %arg1, %c0_i32 : i32
    %c0_i32_0 = arith.constant 0 : i32
    %c0_i32_1 = arith.constant 0 : i32
    %c0_i32_2 = arith.constant 0 : i32
    return %arg0, %0, %c0_i32_0, %c0_i32_1 : i32, i32, i32, i32
  }
  func.func @transform_1(%arg0: i32, %arg1: i32) -> (i32, i32, i32, i32) {
    %c1_i32 = arith.constant 1 : i32
    %0 = arith.addi %arg1, %c1_i32 : i32
    %c0_i32 = arith.constant 0 : i32
    %c0_i32_0 = arith.constant 0 : i32
    %c0_i32_1 = arith.constant 0 : i32
    return %arg0, %0, %c0_i32, %c0_i32_0 : i32, i32, i32, i32
  }
  func.func @transform_2(%arg0: i32, %arg1: i32) -> (i32, i32, i32, i32) {
    %c2_i32 = arith.constant 2 : i32
    %0 = arith.addi %arg1, %c2_i32 : i32
    %c0_i32 = arith.constant 0 : i32
    %c0_i32_0 = arith.constant 0 : i32
    %c0_i32_1 = arith.constant 0 : i32
    return %arg0, %0, %c0_i32, %c0_i32_0 : i32, i32, i32, i32
  }
  func.func @transform_3(%arg0: i32, %arg1: i32) -> (i32, i32, i32) {
    %c0_i32 = arith.constant 0 : i32
    %c0_i32_0 = arith.constant 0 : i32
    %c0_i32_1 = arith.constant 0 : i32
    %c0_i32_2 = arith.constant 0 : i32
    return %c0_i32, %c0_i32_0, %c0_i32_1 : i32, i32, i32
  }
  func.func @transform_4(%arg0: i32, %arg1: i32) -> (i32, i32, i32, i32) {
    %c0_i32 = arith.constant 0 : i32
    %c0_i32_0 = arith.constant 0 : i32
    %c0_i32_1 = arith.constant 0 : i32
    return %arg0, %arg1, %c0_i32, %c0_i32_0 : i32, i32, i32, i32
  }
  func.func @transform_5(%arg0: i32, %arg1: i32) -> (i32, i32, i32, i32) {
    %c0_i32 = arith.constant 0 : i32
    %c0_i32_0 = arith.constant 0 : i32
    %c0_i32_1 = arith.constant 0 : i32
    return %arg0, %arg1, %c0_i32, %c0_i32_0 : i32, i32, i32, i32
  }
  func.func @transform_6(%arg0: i32, %arg1: i32) -> (i32, i32, i32, i32) {
    %c0_i32 = arith.constant 0 : i32
    %c0_i32_0 = arith.constant 0 : i32
    %c0_i32_1 = arith.constant 0 : i32
    return %arg0, %arg1, %c0_i32, %c0_i32_0 : i32, i32, i32, i32
  }
}

module attributes {stable_mosaic.version = 11 : i64} {
  func.func @_conv_row_kernel(%arg0: i32, %arg1: i32, %arg2: memref<4x1x7x128xf32, #tpu.memory_space<vmem>>, %arg3: memref<4x1x7x128xf32, #tpu.memory_space<vmem>>, %arg4: memref<9x128x128xf32, #tpu.memory_space<vmem>>, %arg5: memref<1x1x6x128xf32, #tpu.memory_space<vmem>>, %arg6: memref<1x1x1x128xf32, #tpu.memory_space<vmem>>, %arg7: memref<1x1x1x128xf32, #tpu.memory_space<vmem>>) attributes {dimension_semantics = [#tpu.dimension_semantics<parallel>, #tpu.dimension_semantics<parallel>], iteration_bounds = array<i64: 2, 6>, scalar_prefetch = 0 : i64, scratch_operands = 0 : i64, tpu.core_type = #tpu.core_type<tc>, window_params = [{transform_indices = @transform_0, window_bounds = array<i64: 4, 1, 7, 128>}, {transform_indices = @transform_1, window_bounds = array<i64: 4, 1, 7, 128>}, {pipeline_mode = #tpu.pipeline_mode<synchronous>, transform_indices = @transform_2, window_bounds = array<i64: 9, 128, 128>}, {transform_indices = @transform_3, window_bounds = array<i64: 1, 1, 6, 128>}, {transform_indices = @transform_4, window_bounds = array<i64: 1, 1, 1, 128>}, {transform_indices = @transform_5, window_bounds = array<i64: 1, 1, 1, 128>}]} {
    %cst = arith.constant 0.000000e+00 : f32
    %0 = vector.broadcast %cst : f32 to vector<6x128xf32>
    %c0 = arith.constant 0 : index
    %c0_0 = arith.constant 0 : index
    %c0_1 = arith.constant 0 : index
    %c0_2 = arith.constant 0 : index
    %1 = vector.load %arg2[%c0, %c0_0, %c0_1, %c0_2] : memref<4x1x7x128xf32, #tpu.memory_space<vmem>>, vector<1x1x6x128xf32>
    %2 = vector.shape_cast %1 : vector<1x1x6x128xf32> to vector<6x128xf32>
    %c0_3 = arith.constant 0 : index
    %c0_4 = arith.constant 0 : index
    %c0_5 = arith.constant 0 : index
    %3 = vector.load %arg4[%c0_3, %c0_4, %c0_5] : memref<9x128x128xf32, #tpu.memory_space<vmem>>, vector<1x128x128xf32>
    %4 = vector.shape_cast %3 : vector<1x128x128xf32> to vector<128x128xf32>
    %cst_6 = arith.constant dense<0.000000e+00> : vector<6x128xf32>
    %5 = tpu.matmul %2, %4, %cst_6 {dimension_numbers = #tpu.dot_dimension_numbers<[1], [0], [0], [1], [0, 0, 1, 1], [], []>} : vector<6x128xf32>, vector<128x128xf32>, vector<6x128xf32> -> vector<6x128xf32>
    %6 = arith.addf %0, %5 : vector<6x128xf32>
    %c1 = arith.constant 1 : index
    %c0_7 = arith.constant 0 : index
    %c0_8 = arith.constant 0 : index
    %c0_9 = arith.constant 0 : index
    %7 = vector.load %arg2[%c1, %c0_7, %c0_8, %c0_9] : memref<4x1x7x128xf32, #tpu.memory_space<vmem>>, vector<1x1x6x128xf32>
    %8 = vector.shape_cast %7 : vector<1x1x6x128xf32> to vector<6x128xf32>
    %c1_10 = arith.constant 1 : index
    %c0_11 = arith.constant 0 : index
    %c0_12 = arith.constant 0 : index
    %9 = vector.load %arg4[%c1_10, %c0_11, %c0_12] : memref<9x128x128xf32, #tpu.memory_space<vmem>>, vector<1x128x128xf32>
    %10 = vector.shape_cast %9 : vector<1x128x128xf32> to vector<128x128xf32>
    %cst_13 = arith.constant dense<0.000000e+00> : vector<6x128xf32>
    %11 = tpu.matmul %8, %10, %cst_13 {dimension_numbers = #tpu.dot_dimension_numbers<[1], [0], [0], [1], [0, 0, 1, 1], [], []>} : vector<6x128xf32>, vector<128x128xf32>, vector<6x128xf32> -> vector<6x128xf32>
    %12 = arith.addf %6, %11 : vector<6x128xf32>
    %c0_14 = arith.constant 0 : index
    %c0_15 = arith.constant 0 : index
    %c1_16 = arith.constant 1 : index
    %c0_17 = arith.constant 0 : index
    %13 = vector.load %arg2[%c0_14, %c0_15, %c1_16, %c0_17] : memref<4x1x7x128xf32, #tpu.memory_space<vmem>>, vector<1x1x6x128xf32>
    %14 = vector.shape_cast %13 : vector<1x1x6x128xf32> to vector<6x128xf32>
    %c2 = arith.constant 2 : index
    %c0_18 = arith.constant 0 : index
    %c0_19 = arith.constant 0 : index
    %15 = vector.load %arg4[%c2, %c0_18, %c0_19] : memref<9x128x128xf32, #tpu.memory_space<vmem>>, vector<1x128x128xf32>
    %16 = vector.shape_cast %15 : vector<1x128x128xf32> to vector<128x128xf32>
    %cst_20 = arith.constant dense<0.000000e+00> : vector<6x128xf32>
    %17 = tpu.matmul %14, %16, %cst_20 {dimension_numbers = #tpu.dot_dimension_numbers<[1], [0], [0], [1], [0, 0, 1, 1], [], []>} : vector<6x128xf32>, vector<128x128xf32>, vector<6x128xf32> -> vector<6x128xf32>
    %18 = arith.addf %12, %17 : vector<6x128xf32>
    %c2_21 = arith.constant 2 : index
    %c0_22 = arith.constant 0 : index
    %c0_23 = arith.constant 0 : index
    %c0_24 = arith.constant 0 : index
    %19 = vector.load %arg2[%c2_21, %c0_22, %c0_23, %c0_24] : memref<4x1x7x128xf32, #tpu.memory_space<vmem>>, vector<1x1x6x128xf32>
    %20 = vector.shape_cast %19 : vector<1x1x6x128xf32> to vector<6x128xf32>
    %c3 = arith.constant 3 : index
    %c0_25 = arith.constant 0 : index
    %c0_26 = arith.constant 0 : index
    %21 = vector.load %arg4[%c3, %c0_25, %c0_26] : memref<9x128x128xf32, #tpu.memory_space<vmem>>, vector<1x128x128xf32>
    %22 = vector.shape_cast %21 : vector<1x128x128xf32> to vector<128x128xf32>
    %cst_27 = arith.constant dense<0.000000e+00> : vector<6x128xf32>
    %23 = tpu.matmul %20, %22, %cst_27 {dimension_numbers = #tpu.dot_dimension_numbers<[1], [0], [0], [1], [0, 0, 1, 1], [], []>} : vector<6x128xf32>, vector<128x128xf32>, vector<6x128xf32> -> vector<6x128xf32>
    %24 = arith.addf %18, %23 : vector<6x128xf32>
    %c3_28 = arith.constant 3 : index
    %c0_29 = arith.constant 0 : index
    %c0_30 = arith.constant 0 : index
    %c0_31 = arith.constant 0 : index
    %25 = vector.load %arg2[%c3_28, %c0_29, %c0_30, %c0_31] : memref<4x1x7x128xf32, #tpu.memory_space<vmem>>, vector<1x1x6x128xf32>
    %26 = vector.shape_cast %25 : vector<1x1x6x128xf32> to vector<6x128xf32>
    %c4 = arith.constant 4 : index
    %c0_32 = arith.constant 0 : index
    %c0_33 = arith.constant 0 : index
    %27 = vector.load %arg4[%c4, %c0_32, %c0_33] : memref<9x128x128xf32, #tpu.memory_space<vmem>>, vector<1x128x128xf32>
    %28 = vector.shape_cast %27 : vector<1x128x128xf32> to vector<128x128xf32>
    %cst_34 = arith.constant dense<0.000000e+00> : vector<6x128xf32>
    %29 = tpu.matmul %26, %28, %cst_34 {dimension_numbers = #tpu.dot_dimension_numbers<[1], [0], [0], [1], [0, 0, 1, 1], [], []>} : vector<6x128xf32>, vector<128x128xf32>, vector<6x128xf32> -> vector<6x128xf32>
    %30 = arith.addf %24, %29 : vector<6x128xf32>
    %c2_35 = arith.constant 2 : index
    %c0_36 = arith.constant 0 : index
    %c1_37 = arith.constant 1 : index
    %c0_38 = arith.constant 0 : index
    %31 = vector.load %arg2[%c2_35, %c0_36, %c1_37, %c0_38] : memref<4x1x7x128xf32, #tpu.memory_space<vmem>>, vector<1x1x6x128xf32>
    %32 = vector.shape_cast %31 : vector<1x1x6x128xf32> to vector<6x128xf32>
    %c5 = arith.constant 5 : index
    %c0_39 = arith.constant 0 : index
    %c0_40 = arith.constant 0 : index
    %33 = vector.load %arg4[%c5, %c0_39, %c0_40] : memref<9x128x128xf32, #tpu.memory_space<vmem>>, vector<1x128x128xf32>
    %34 = vector.shape_cast %33 : vector<1x128x128xf32> to vector<128x128xf32>
    %cst_41 = arith.constant dense<0.000000e+00> : vector<6x128xf32>
    %35 = tpu.matmul %32, %34, %cst_41 {dimension_numbers = #tpu.dot_dimension_numbers<[1], [0], [0], [1], [0, 0, 1, 1], [], []>} : vector<6x128xf32>, vector<128x128xf32>, vector<6x128xf32> -> vector<6x128xf32>
    %36 = arith.addf %30, %35 : vector<6x128xf32>
    %c0_42 = arith.constant 0 : index
    %c0_43 = arith.constant 0 : index
    %c0_44 = arith.constant 0 : index
    %c0_45 = arith.constant 0 : index
    %37 = vector.load %arg3[%c0_42, %c0_43, %c0_44, %c0_45] : memref<4x1x7x128xf32, #tpu.memory_space<vmem>>, vector<1x1x6x128xf32>
    %38 = vector.shape_cast %37 : vector<1x1x6x128xf32> to vector<6x128xf32>
    %c6 = arith.constant 6 : index
    %c0_46 = arith.constant 0 : index
    %c0_47 = arith.constant 0 : index
    %39 = vector.load %arg4[%c6, %c0_46, %c0_47] : memref<9x128x128xf32, #tpu.memory_space<vmem>>, vector<1x128x128xf32>
    %40 = vector.shape_cast %39 : vector<1x128x128xf32> to vector<128x128xf32>
    %cst_48 = arith.constant dense<0.000000e+00> : vector<6x128xf32>
    %41 = tpu.matmul %38, %40, %cst_48 {dimension_numbers = #tpu.dot_dimension_numbers<[1], [0], [0], [1], [0, 0, 1, 1], [], []>} : vector<6x128xf32>, vector<128x128xf32>, vector<6x128xf32> -> vector<6x128xf32>
    %42 = arith.addf %36, %41 : vector<6x128xf32>
    %c1_49 = arith.constant 1 : index
    %c0_50 = arith.constant 0 : index
    %c0_51 = arith.constant 0 : index
    %c0_52 = arith.constant 0 : index
    %43 = vector.load %arg3[%c1_49, %c0_50, %c0_51, %c0_52] : memref<4x1x7x128xf32, #tpu.memory_space<vmem>>, vector<1x1x6x128xf32>
    %44 = vector.shape_cast %43 : vector<1x1x6x128xf32> to vector<6x128xf32>
    %c7 = arith.constant 7 : index
    %c0_53 = arith.constant 0 : index
    %c0_54 = arith.constant 0 : index
    %45 = vector.load %arg4[%c7, %c0_53, %c0_54] : memref<9x128x128xf32, #tpu.memory_space<vmem>>, vector<1x128x128xf32>
    %46 = vector.shape_cast %45 : vector<1x128x128xf32> to vector<128x128xf32>
    %cst_55 = arith.constant dense<0.000000e+00> : vector<6x128xf32>
    %47 = tpu.matmul %44, %46, %cst_55 {dimension_numbers = #tpu.dot_dimension_numbers<[1], [0], [0], [1], [0, 0, 1, 1], [], []>} : vector<6x128xf32>, vector<128x128xf32>, vector<6x128xf32> -> vector<6x128xf32>
    %48 = arith.addf %42, %47 : vector<6x128xf32>
    %c0_56 = arith.constant 0 : index
    %c0_57 = arith.constant 0 : index
    %c1_58 = arith.constant 1 : index
    %c0_59 = arith.constant 0 : index
    %49 = vector.load %arg3[%c0_56, %c0_57, %c1_58, %c0_59] : memref<4x1x7x128xf32, #tpu.memory_space<vmem>>, vector<1x1x6x128xf32>
    %50 = vector.shape_cast %49 : vector<1x1x6x128xf32> to vector<6x128xf32>
    %c8 = arith.constant 8 : index
    %c0_60 = arith.constant 0 : index
    %c0_61 = arith.constant 0 : index
    %51 = vector.load %arg4[%c8, %c0_60, %c0_61] : memref<9x128x128xf32, #tpu.memory_space<vmem>>, vector<1x128x128xf32>
    %52 = vector.shape_cast %51 : vector<1x128x128xf32> to vector<128x128xf32>
    %cst_62 = arith.constant dense<0.000000e+00> : vector<6x128xf32>
    %53 = tpu.matmul %50, %52, %cst_62 {dimension_numbers = #tpu.dot_dimension_numbers<[1], [0], [0], [1], [0, 0, 1, 1], [], []>} : vector<6x128xf32>, vector<128x128xf32>, vector<6x128xf32> -> vector<6x128xf32>
    %54 = arith.addf %48, %53 : vector<6x128xf32>
    %cst_63 = arith.constant dense<0.000000e+00> : vector<128xf32>
    %55 = vector.multi_reduction <add>, %54, %cst_63 [0] : vector<6x128xf32> to vector<128xf32>
    %56 = vector.shape_cast %55 : vector<128xf32> to vector<1x128xf32>
    %57 = vector.shape_cast %56 : vector<1x128xf32> to vector<1x1x1x128xf32>
    %c0_64 = arith.constant 0 : index
    %c0_65 = arith.constant 0 : index
    %c0_66 = arith.constant 0 : index
    %c0_67 = arith.constant 0 : index
    %58 = vector.load %arg6[%c0_64, %c0_65, %c0_66, %c0_67] : memref<1x1x1x128xf32, #tpu.memory_space<vmem>>, vector<1x1x1x128xf32>
    tpu.vector_store %arg6[%c0_64, %c0_65, %c0_66, %c0_67], %57 {strides = array<i32>} : memref<1x1x1x128xf32, #tpu.memory_space<vmem>>, vector<1x1x1x128xf32>,
    %59 = arith.mulf %54, %54 : vector<6x128xf32>
    %cst_68 = arith.constant dense<0.000000e+00> : vector<128xf32>
    %60 = vector.multi_reduction <add>, %59, %cst_68 [0] : vector<6x128xf32> to vector<128xf32>
    %61 = vector.shape_cast %60 : vector<128xf32> to vector<1x128xf32>
    %62 = vector.shape_cast %61 : vector<1x128xf32> to vector<1x1x1x128xf32>
    %c0_69 = arith.constant 0 : index
    %c0_70 = arith.constant 0 : index
    %c0_71 = arith.constant 0 : index
    %c0_72 = arith.constant 0 : index
    %63 = vector.load %arg7[%c0_69, %c0_70, %c0_71, %c0_72] : memref<1x1x1x128xf32, #tpu.memory_space<vmem>>, vector<1x1x1x128xf32>
    tpu.vector_store %arg7[%c0_69, %c0_70, %c0_71, %c0_72], %62 {strides = array<i32>} : memref<1x1x1x128xf32, #tpu.memory_space<vmem>>, vector<1x1x1x128xf32>,
    %64 = vector.shape_cast %54 : vector<6x128xf32> to vector<1x1x6x128xf32>
    %c0_73 = arith.constant 0 : index
    %c0_74 = arith.constant 0 : index
    %c0_75 = arith.constant 0 : index
    %c0_76 = arith.constant 0 : index
    %65 = vector.load %arg5[%c0_73, %c0_74, %c0_75, %c0_76] : memref<1x1x6x128xf32, #tpu.memory_space<vmem>>, vector<1x1x6x128xf32>
    tpu.vector_store %arg5[%c0_73, %c0_74, %c0_75, %c0_76], %64 {strides = array<i32>} : memref<1x1x6x128xf32, #tpu.memory_space<vmem>>, vector<1x1x6x128xf32>,
    return
  }
  func.func @transform_0(%arg0: i32, %arg1: i32) -> (i32, i32, i32, i32) {
    %c0_i32 = arith.constant 0 : i32
    %0 = arith.addi %arg1, %c0_i32 : i32
    %c0_i32_0 = arith.constant 0 : i32
    %c0_i32_1 = arith.constant 0 : i32
    %c0_i32_2 = arith.constant 0 : i32
    return %arg0, %0, %c0_i32_0, %c0_i32_1 : i32, i32, i32, i32
  }
  func.func @transform_1(%arg0: i32, %arg1: i32) -> (i32, i32, i32, i32) {
    %c1_i32 = arith.constant 1 : i32
    %0 = arith.addi %arg1, %c1_i32 : i32
    %c0_i32 = arith.constant 0 : i32
    %c0_i32_0 = arith.constant 0 : i32
    %c0_i32_1 = arith.constant 0 : i32
    return %arg0, %0, %c0_i32, %c0_i32_0 : i32, i32, i32, i32
  }
  func.func @transform_2(%arg0: i32, %arg1: i32) -> (i32, i32, i32) {
    %c0_i32 = arith.constant 0 : i32
    %c0_i32_0 = arith.constant 0 : i32
    %c0_i32_1 = arith.constant 0 : i32
    %c0_i32_2 = arith.constant 0 : i32
    return %c0_i32, %c0_i32_0, %c0_i32_1 : i32, i32, i32
  }
  func.func @transform_3(%arg0: i32, %arg1: i32) -> (i32, i32, i32, i32) {
    %c0_i32 = arith.constant 0 : i32
    %c0_i32_0 = arith.constant 0 : i32
    %c0_i32_1 = arith.constant 0 : i32
    return %arg0, %arg1, %c0_i32, %c0_i32_0 : i32, i32, i32, i32
  }
  func.func @transform_4(%arg0: i32, %arg1: i32) -> (i32, i32, i32, i32) {
    %c0_i32 = arith.constant 0 : i32
    %c0_i32_0 = arith.constant 0 : i32
    %c0_i32_1 = arith.constant 0 : i32
    return %arg0, %arg1, %c0_i32, %c0_i32_0 : i32, i32, i32, i32
  }
  func.func @transform_5(%arg0: i32, %arg1: i32) -> (i32, i32, i32, i32) {
    %c0_i32 = arith.constant 0 : i32
    %c0_i32_0 = arith.constant 0 : i32
    %c0_i32_1 = arith.constant 0 : i32
    return %arg0, %arg1, %c0_i32, %c0_i32_0 : i32, i32, i32, i32
  }
}

module attributes {stable_mosaic.version = 11 : i64} {
  func.func @_affine_act_kernel(%arg0: i32, %arg1: memref<72x128xf32, #tpu.memory_space<vmem>>, %arg2: memref<1x128xf32, #tpu.memory_space<vmem>>, %arg3: memref<1x128xf32, #tpu.memory_space<vmem>>, %arg4: memref<72x128xf32, #tpu.memory_space<vmem>>) attributes {dimension_semantics = [#tpu.dimension_semantics<parallel>], iteration_bounds = array<i64: 1>, scalar_prefetch = 0 : i64, scratch_operands = 0 : i64, tpu.core_type = #tpu.core_type<tc>, window_params = [{transform_indices = @transform_0, window_bounds = array<i64: 72, 128>}, {pipeline_mode = #tpu.pipeline_mode<synchronous>, transform_indices = @transform_1, window_bounds = array<i64: 1, 128>}, {pipeline_mode = #tpu.pipeline_mode<synchronous>, transform_indices = @transform_2, window_bounds = array<i64: 1, 128>}, {transform_indices = @transform_3, window_bounds = array<i64: 72, 128>}]} {
    %c0 = arith.constant 0 : index
    %c0_0 = arith.constant 0 : index
    %0 = vector.load %arg1[%c0, %c0_0] : memref<72x128xf32, #tpu.memory_space<vmem>>, vector<72x128xf32>
    %c0_1 = arith.constant 0 : index
    %c0_2 = arith.constant 0 : index
    %1 = vector.load %arg2[%c0_1, %c0_2] : memref<1x128xf32, #tpu.memory_space<vmem>>, vector<1x128xf32>
    %2 = vector.broadcast %1 : vector<1x128xf32> to vector<72x128xf32>
    %3 = arith.mulf %0, %2 : vector<72x128xf32>
    %c0_3 = arith.constant 0 : index
    %c0_4 = arith.constant 0 : index
    %4 = vector.load %arg3[%c0_3, %c0_4] : memref<1x128xf32, #tpu.memory_space<vmem>>, vector<1x128xf32>
    %5 = vector.broadcast %4 : vector<1x128xf32> to vector<72x128xf32>
    %6 = arith.addf %3, %5 : vector<72x128xf32>
    %cst = arith.constant 0.000000e+00 : f32
    %7 = vector.broadcast %cst : f32 to vector<72x128xf32>
    %8 = arith.cmpf oge, %6, %7 : vector<72x128xf32>
    %cst_5 = arith.constant 2.000000e-01 : f32
    %9 = vector.broadcast %cst_5 : f32 to vector<72x128xf32>
    %10 = arith.mulf %9, %6 : vector<72x128xf32>
    %11 = arith.select %8, %6, %10 : vector<72x128xi1>, vector<72x128xf32>
    %c0_6 = arith.constant 0 : index
    %c0_7 = arith.constant 0 : index
    %12 = vector.load %arg4[%c0_6, %c0_7] : memref<72x128xf32, #tpu.memory_space<vmem>>, vector<72x128xf32>
    tpu.vector_store %arg4[%c0_6, %c0_7], %11 {strides = array<i32>} : memref<72x128xf32, #tpu.memory_space<vmem>>, vector<72x128xf32>,
    return
  }
  func.func @transform_0(%arg0: i32) -> (i32, i32) {
    %c0_i32 = arith.constant 0 : i32
    %c0_i32_0 = arith.constant 0 : i32
    return %arg0, %c0_i32 : i32, i32
  }
  func.func @transform_1(%arg0: i32) -> (i32, i32) {
    %c0_i32 = arith.constant 0 : i32
    %c0_i32_0 = arith.constant 0 : i32
    %c0_i32_1 = arith.constant 0 : i32
    return %c0_i32, %c0_i32_0 : i32, i32
  }
  func.func @transform_2(%arg0: i32) -> (i32, i32) {
    %c0_i32 = arith.constant 0 : i32
    %c0_i32_0 = arith.constant 0 : i32
    %c0_i32_1 = arith.constant 0 : i32
    return %c0_i32, %c0_i32_0 : i32, i32
  }
  func.func @transform_3(%arg0: i32) -> (i32, i32) {
    %c0_i32 = arith.constant 0 : i32
    %c0_i32_0 = arith.constant 0 : i32
    return %arg0, %c0_i32 : i32, i32
  }
}

module attributes {stable_mosaic.version = 11 : i64} {
  func.func @_fc_kernel(%arg0: i32, %arg1: memref<2x512xf32, #tpu.memory_space<vmem>>, %arg2: memref<512x1024xf32, #tpu.memory_space<vmem>>, %arg3: memref<1x1024xf32, #tpu.memory_space<vmem>>, %arg4: memref<1024x128xf32, #tpu.memory_space<vmem>>, %arg5: memref<1x128xf32, #tpu.memory_space<vmem>>, %arg6: memref<2x128xf32, #tpu.memory_space<vmem>>, %arg7: memref<2x1024xf32, #tpu.memory_space<vmem>>) attributes {dimension_semantics = [#tpu.dimension_semantics<arbitrary>], iteration_bounds = array<i64: 9>, scalar_prefetch = 0 : i64, scratch_operands = 1 : i64, tpu.core_type = #tpu.core_type<tc>, window_params = [{transform_indices = @transform_0, window_bounds = array<i64: 2, 512>}, {transform_indices = @transform_1, window_bounds = array<i64: 512, 1024>}, {pipeline_mode = #tpu.pipeline_mode<synchronous>, transform_indices = @transform_2, window_bounds = array<i64: 1, 1024>}, {pipeline_mode = #tpu.pipeline_mode<synchronous>, transform_indices = @transform_3, window_bounds = array<i64: 1024, 128>}, {pipeline_mode = #tpu.pipeline_mode<synchronous>, transform_indices = @transform_4, window_bounds = array<i64: 1, 128>}, {pipeline_mode = #tpu.pipeline_mode<synchronous>, transform_indices = @transform_5, window_bounds = array<i64: 2, 128>}]} {
    %c0_i32 = arith.constant 0 : i32
    %0 = arith.cmpi eq, %arg0, %c0_i32 : i32
    %1 = arith.extui %0 : i1 to i32
    %c0_i32_0 = arith.constant 0 : i32
    %2 = arith.cmpi ne, %1, %c0_i32_0 : i32
    scf.if %2 {
      %cst_9 = arith.constant 0.000000e+00 : f32
      %12 = vector.broadcast %cst_9 : f32 to vector<2x1024xf32>
      %c0_10 = arith.constant 0 : index
      %c0_11 = arith.constant 0 : index
      %13 = vector.load %arg7[%c0_10, %c0_11] : memref<2x1024xf32, #tpu.memory_space<vmem>>, vector<2x1024xf32>
      tpu.vector_store %arg7[%c0_10, %c0_11], %12 {strides = array<i32>} : memref<2x1024xf32, #tpu.memory_space<vmem>>, vector<2x1024xf32>,
    } else {
    }
    %c0 = arith.constant 0 : index
    %c0_1 = arith.constant 0 : index
    %3 = vector.load %arg7[%c0, %c0_1] : memref<2x1024xf32, #tpu.memory_space<vmem>>, vector<2x1024xf32>
    %c0_2 = arith.constant 0 : index
    %c0_3 = arith.constant 0 : index
    %4 = vector.load %arg1[%c0_2, %c0_3] : memref<2x512xf32, #tpu.memory_space<vmem>>, vector<2x512xf32>
    %c0_4 = arith.constant 0 : index
    %c0_5 = arith.constant 0 : index
    %5 = vector.load %arg2[%c0_4, %c0_5] : memref<512x1024xf32, #tpu.memory_space<vmem>>, vector<512x1024xf32>
    %cst = arith.constant dense<0.000000e+00> : vector<2x1024xf32>
    %6 = tpu.matmul %4, %5, %cst {dimension_numbers = #tpu.dot_dimension_numbers<[1], [0], [0], [1], [0, 0, 1, 1], [], []>} : vector<2x512xf32>, vector<512x1024xf32>, vector<2x1024xf32> -> vector<2x1024xf32>
    %7 = arith.addf %3, %6 : vector<2x1024xf32>
    %c0_6 = arith.constant 0 : index
    %c0_7 = arith.constant 0 : index
    %8 = vector.load %arg7[%c0_6, %c0_7] : memref<2x1024xf32, #tpu.memory_space<vmem>>, vector<2x1024xf32>
    tpu.vector_store %arg7[%c0_6, %c0_7], %7 {strides = array<i32>} : memref<2x1024xf32, #tpu.memory_space<vmem>>, vector<2x1024xf32>,
    %c8_i32 = arith.constant 8 : i32
    %9 = arith.cmpi eq, %arg0, %c8_i32 : i32
    %10 = arith.extui %9 : i1 to i32
    %c0_i32_8 = arith.constant 0 : i32
    %11 = arith.cmpi ne, %10, %c0_i32_8 : i32
    scf.if %11 {
      %c0_9 = arith.constant 0 : index
      %c0_10 = arith.constant 0 : index
      %12 = vector.load %arg7[%c0_9, %c0_10] : memref<2x1024xf32, #tpu.memory_space<vmem>>, vector<2x1024xf32>
      %c0_11 = arith.constant 0 : index
      %c0_12 = arith.constant 0 : index
      %13 = vector.load %arg3[%c0_11, %c0_12] : memref<1x1024xf32, #tpu.memory_space<vmem>>, vector<1x1024xf32>
      %14 = vector.broadcast %13 : vector<1x1024xf32> to vector<2x1024xf32>
      %15 = arith.addf %12, %14 : vector<2x1024xf32>
      %cst_13 = arith.constant 0.000000e+00 : f32
      %16 = vector.broadcast %cst_13 : f32 to vector<2x1024xf32>
      %17 = arith.cmpf oge, %15, %16 : vector<2x1024xf32>
      %cst_14 = arith.constant 2.000000e-01 : f32
      %18 = vector.broadcast %cst_14 : f32 to vector<2x1024xf32>
      %19 = arith.mulf %18, %15 : vector<2x1024xf32>
      %20 = arith.select %17, %15, %19 : vector<2x1024xi1>, vector<2x1024xf32>
      %c0_15 = arith.constant 0 : index
      %c0_16 = arith.constant 0 : index
      %21 = vector.load %arg4[%c0_15, %c0_16] : memref<1024x128xf32, #tpu.memory_space<vmem>>, vector<1024x128xf32>
      %cst_17 = arith.constant dense<0.000000e+00> : vector<2x128xf32>
      %22 = tpu.matmul %20, %21, %cst_17 {dimension_numbers = #tpu.dot_dimension_numbers<[1], [0], [0], [1], [0, 0, 1, 1], [], []>} : vector<2x1024xf32>, vector<1024x128xf32>, vector<2x128xf32> -> vector<2x128xf32>
      %c0_18 = arith.constant 0 : index
      %c0_19 = arith.constant 0 : index
      %23 = vector.load %arg5[%c0_18, %c0_19] : memref<1x128xf32, #tpu.memory_space<vmem>>, vector<1x128xf32>
      %24 = vector.broadcast %23 : vector<1x128xf32> to vector<2x128xf32>
      %25 = arith.addf %22, %24 : vector<2x128xf32>
      %c0_20 = arith.constant 0 : index
      %c0_21 = arith.constant 0 : index
      %26 = vector.load %arg6[%c0_20, %c0_21] : memref<2x128xf32, #tpu.memory_space<vmem>>, vector<2x128xf32>
      tpu.vector_store %arg6[%c0_20, %c0_21], %25 {strides = array<i32>} : memref<2x128xf32, #tpu.memory_space<vmem>>, vector<2x128xf32>,
    } else {
    }
    return
  }
  func.func @transform_0(%arg0: i32) -> (i32, i32) {
    %c0_i32 = arith.constant 0 : i32
    %c0_i32_0 = arith.constant 0 : i32
    return %c0_i32, %arg0 : i32, i32
  }
  func.func @transform_1(%arg0: i32) -> (i32, i32) {
    %c0_i32 = arith.constant 0 : i32
    %c0_i32_0 = arith.constant 0 : i32
    return %arg0, %c0_i32 : i32, i32
  }
  func.func @transform_2(%arg0: i32) -> (i32, i32) {
    %c0_i32 = arith.constant 0 : i32
    %c0_i32_0 = arith.constant 0 : i32
    %c0_i32_1 = arith.constant 0 : i32
    return %c0_i32, %c0_i32_0 : i32, i32
  }
  func.func @transform_3(%arg0: i32) -> (i32, i32) {
    %c0_i32 = arith.constant 0 : i32
    %c0_i32_0 = arith.constant 0 : i32
    %c0_i32_1 = arith.constant 0 : i32
    return %c0_i32, %c0_i32_0 : i32, i32
  }
  func.func @transform_4(%arg0: i32) -> (i32, i32) {
    %c0_i32 = arith.constant 0 : i32
    %c0_i32_0 = arith.constant 0 : i32
    %c0_i32_1 = arith.constant 0 : i32
    return %c0_i32, %c0_i32_0 : i32, i32
  }
  func.func @transform_5(%arg0: i32) -> (i32, i32) {
    %c0_i32 = arith.constant 0 : i32
    %c0_i32_0 = arith.constant 0 : i32
    %c0_i32_1 = arith.constant 0 : i32
    return %c0_i32, %c0_i32_0 : i32, i32
  }
}

</mosaic_0001>

<bundles_post_ra>
// kernel: discriminator_forward.8
= control target key start
LH: loop header
LB: loop body
LE: loop exit
PB: predicated region body
PF: predicated region fallthrough
CT: control target
= control target key end

     0   :  { %10 = vsyncpa [#allocation3], 0  ;;  %s2135_s0 = inlined_call_operand.vmem [shape: f32[2,26,26,3], index: 0, kind: input, shape index: {}, may-alias: {0,1,2}]   ;;  %s2136_s1 = inlined_call_operand.vmem [shape: f32[2,26,26,3], index: 1, kind: input, shape index: {}, may-alias: {0,1,2}]   ;;  %s2137_s2 = inlined_call_operand.vmem [shape: f32[2,26,26,3], index: 2, kind: input, shape index: {}, may-alias: {0,1,2}]   ;;  %s2138_s3 = inlined_call_operand.hbm [shape: f32[9,3,128], index: 3, kind: input, shape index: {}]   ;;  %s2139_s4 = inlined_call_operand.hbm [shape: f32[1,128], index: 4, kind: input, shape index: {}]   ;;  %s2140_s5 = inlined_call_operand.vmem [shape: f32[2,24,24,128], index: 5, kind: output, shape index: {}]  }
   0x1   :  { %11 = vsyncpa [#allocation5], 0  ;;  %s1848_s18 = smov 0   ;;  %s1850_s19 = smov 0  }
   0x2   :  { %s1852_s20 = smov 0   ;;  %s1854_s21 = smov 0  }
   0x3   :  { %s1856_s22 = smov 0  }
   0x4 LB: > { %s1448_s23 = sadd.s32 4294967295, %s1810_s22   ;;  %s26_s24 = sadd.s32 1, %s1802_s20  ;;  %s1810_s22 = sphi %s1856_s22, %s17_s22   ;;  %s1806_s21 = sphi %s1854_s21, %s2153_s21   ;;  %s1802_s20 = sphi %s1852_s20, %s2152_s20   ;;  %s1798_s19 = sphi %s1850_s19, %s2151_s19   ;;  %s1794_s18 = sphi %s1848_s18, %s2150_s18  }
   0x5   : > { %p27_p0 = scmp.ge.s32.totalorder %s26_s24, 24  ;;  %s29_s25 = sadd.s32 1, %s1806_s21 }
   0x6   : > { %p1450_p1 = scmp.ge.s32.totalorder %s1810_s22, 1  ;;  %p192_p2 = scmp.lt.s32.totalorder %s1810_s22, 49 }
   0x7   : > { %s2155_s24 = smov (%p27_p0, %s26_s24), 0  ;;  %s2157_s25 = smov (!%p27_p0, %s29_s25), %s1806_s21 }
   0x8   : > { %p1881_p3 = pnand %p1450_p1, %p192_p2  ;;  %p31_p4 = scmp.ge.s32.totalorder %s2157_s25, 2 }
   0x9   : > { %p1885_p5 = scmp.eq.s32.totalorder %s1448_s23, 0  ;;  %s1812_s28 = smov [#allocation2]  }
   0xa   : > { %s2144_s26 = scalar_select %p1881_p3, 1, 0 }
   0xb   : > { %s2145_s27 = scalar_select %p1885_p5, 1, 0 }
   0xc   : > { %p1651_p6 = pneg %p1881_p3  ;;  %s2159_s25 = smov (%p31_p4, %s2157_s25), 0 }
   0xd   : > { %s204_s29 = sshll.u32 %s1812_s28, 4  ;;  %s1708_s8 = scalar_lea.hbm %s2138_s3, 576  ;;  %s205_s29 = int_to_ptr.vmem [resolvable:$true] %s204_s29 }
   0xe   : > { %p1895_p7 = pnand %p1885_p5, %p1651_p6  ;;  %p1709_p8 = scmp.ne.s32.totalorder %s2138_s3, %s1708_s8 }
   0xf   : > { %p1715_p12 = scmp.lt.u32.totalorder %s1708_s8, %s2138_s3 }
  0x10   : > { %p1710_p9 = pneg %p1895_p7 }
  0x12   : > { %p1711_p10 = pnand %p1710_p9, %p1709_p8 }
  0x14   : > { %p1712_p11 = pneg %p1711_p10 }
  0x16   : > { %p1717_p13 = pnand %p1715_p12, %p1712_p11 }
  0x18   : > { %1720 = shalt.err (!%p1717_p13)
}
  0x19   : > { %s1721_s13 = scalar_lea.vmem %s205_s29, 576  ;;  %p1729_p4 = scmp.lt.s32.totalorder %s205_s29, %s205_s29 }
  0x1a   : > { %p1722_p0 = scmp.ne.s32.totalorder %s205_s29, %s1721_s13  ;;  %p1730_p6 = scmp.lt.s32.totalorder %s1721_s13, %s1721_s13 }
  0x1c   : > { %p1724_p1 = pnand %p1722_p0, %p1710_p9  ;;  %p1731_p5 = por %p1730_p6, %p1729_p4 }
  0x1e   : > { %p1725_p2 = pneg %p1724_p1 }
  0x20   : > { %p1732_p3 = pnand %p1731_p5, %p1725_p2 }
  0x22   : > { %1735 = shalt.err (!%p1732_p3)
}
  0x23   : > { %s1813_s14 = smov 64   ;;  %s1814_s15 = smov 4  }
  0x24   : > { %1654 = dma.hbm_to_vmem [thread:$0]  (!%p1895_p7), %s2138_s3, 576, %s205_s29, [#allocation3], %s1813_s14, %s1813_s14, %s1814_s15  }
  0x25   : > { %s1815_s23 = smov [#allocation4]   ;;  %s1736_s8 = scalar_lea.hbm %s2139_s4, 16 }
  0x26   : > { %s218_s28 = sshll.u32 %s1815_s23, 4  ;;  %p1737_p3 = scmp.ne.s32.totalorder %s2139_s4, %s1736_s8  ;;  %s219_s28 = int_to_ptr.vmem [resolvable:$true] %s218_s28 }
  0x27   : > { %p1743_p10 = scmp.lt.u32.totalorder %s1736_s8, %s2139_s4 }
  0x28   : > { %p1739_p5 = pnand %p1737_p3, %p1710_p9 }
  0x2a   : > { %p1740_p8 = pneg %p1739_p5 }
  0x2c   : > { %p1745_p11 = pnand %p1743_p10, %p1740_p8 }
  0x2e   : > { %1748 = shalt.err (!%p1745_p11)
}
  0x2f   : > { %s1749_s29 = scalar_lea.vmem %s219_s28, 16  ;;  %s1756_s13 = scalar_lea.vmem %s219_s28, 32 }
  0x30   : > { %p1750_p12 = scmp.ne.s32.totalorder %s219_s28, %s1749_s29  ;;  %p1757_p1 = scmp.lt.s32.totalorder %s219_s28, %s219_s28 }
  0x31   : > { %p1758_p2 = scmp.lt.s32.totalorder %s1756_s13, %s1749_s29 }
  0x32   : > { %p1752_p13 = pnand %p1750_p12, %p1710_p9 }
  0x33   : > { %p1759_p4 = por %p1758_p2, %p1757_p1 }
  0x34   : > { %p1753_p0 = pneg %p1752_p13 }
  0x36   : > { %p1760_p6 = pnand %p1759_p4, %p1753_p0 }
  0x38   : > { %1763 = shalt.err (!%p1760_p6)
}
  0x39   : > { %1657 = dma.hbm_to_vmem [thread:$0]  (!%p1895_p7), %s2139_s4, 16, %s219_s28, [#allocation5]  }
  0x3a   : > { %p2147_p3 = scmp.ne.s32.totalorder %s2144_s26, 0 }
  0x3b   : > { %p2148_p5 = scmp.ne.s32.totalorder (!%p2147_p3), %s2145_s27, 0 }
  0x3c   : > { %271 = sbr.rel (%p2147_p3) target bundleno = 354 (0x162), region = 40 }
  0x43   : > { %1785 = dma.done.wait (%p2148_p5), [#allocation3], 576  }
  0x44   : > { %1787 = vsyncadd (%p2148_p5), [#allocation3], 4294966720 }
  0x45   : > { %1789 = dma.done.wait (%p2148_p5), [#allocation5], 16  }
  0x46   : > { %1791 = vsyncadd (%p2148_p5), [#allocation5], 4294967280  ;;  %p331_p7 = scmp.lt.s32.totalorder %s1798_s19, 1  ;;  %v1816_v0 = vmov 0.0   ;;  %vm1817_vm0 = vmmov 0   ;;  %p333_p9 = scmp.lt.s32.totalorder %s1794_s18, 25 }
  0x47   : > { %1638 = vmatprep.subr.mxu1 %v1816_v0  ;;  %1544 = vmatprep.mubr.msk.f32.mxu1 %vm1817_vm0, %v1816_v0  ;;  %s340_s26 = sadd.s32 1, %s1794_s18  ;;  %vm390_vm1 = vcmask 1042432   ;;  %v379_v1 = vld [vmem:[#allocation2 + $0x4] sm:$0x7]  ;;  %vm380_vm2 = vcmask 23552   ;;  %s351_s10 = sadd.s32 2, %s1794_s18 }
  0x48   : > { %s2161_s19 = smov (!%p331_p7, %s1798_s19), 1  ;;  %1539 = vmatprep.subr.mxu0 %v1816_v0  ;;  %1541 = vmatprep.mubr.msk.f32.mxu0 %vm1817_vm0, %v1816_v0  ;;  %p1967_p8 = scmp.lt.s32.totalorder %s340_s26, 25  ;;  %v374_v2 = vld [vmem:[#allocation2] sm:$0x7]  ;;  %v570_v5 = vld [vmem:[#allocation2 + $0x8] sm:$0x7] }
  0x49   : > { %s334_s27 = scalar_select %p333_p9, %s1794_s18, 25  ;;  %1639 = vmatpush3.msk.msra.mxu1 %vm390_vm1, %v379_v1  ;;  %1540 = vmatpush3.msk.msra.mxu0 %vm390_vm1, %v379_v1  ;;  %v770_v8 = vld [vmem:[#allocation2 + $0x10] sm:$0x7]  ;;  %v670_v11 = vld [vmem:[#allocation2 + $0xc] sm:$0x7] }
  0x4a   : > { %s1965_s30 = smul.u32 104, %s2161_s19  ;;  %1550 = vmatprep.subr.mxu1 %v1816_v0  ;;  %1561 = vmatprep.subr.mxu0 %v1816_v0  ;;  %s2163_s26 = smov (!%p1967_p8, %s340_s26), 25  ;;  %v970_v16 = vld [vmem:[#allocation2 + $0x18] sm:$0x7]  ;;  %v870_v19 = vld [vmem:[#allocation2 + $0x14] sm:$0x7] }
  0x4b   : > { %s1457_s16 = sshll.u32 %s334_s27, 2  ;;  %s1459_s9 = sshll.u32 %s2163_s26, 2  ;;  %v1170_v24 = vld [vmem:[#allocation2 + $0x20] sm:$0x7]  ;;  %v1070_v27 = vld [vmem:[#allocation2 + $0x1c] sm:$0x7] }
  0x4c   : > { %s337_s23 = sadd.s32 %s1965_s30, %s1457_s16  ;;  %s347_s11 = sadd.s32 %s1965_s30, %s1459_s9 }
  0x4d   : > { %s1458_s28 = sshll.u32 %s337_s23, 3  ;;  %p354_p10 = scmp.lt.s32.totalorder %s351_s10, 25 }
  0x4e   : > { %s1976_s8 = scalar_lea.vmem %s2135_s0, %s1458_s28  ;;  %s1460_s12 = sshll.u32 %s347_s11, 3 }
  0x4f   : > { %v376_v3 = vld [vmem:[%s1976_s8 + $0x9] sm:$0xff]  ;;  %v375_v4 = vld [vmem:[%s1976_s8 + $0x1] sm:$0xff]  ;;  %v377_v6 = vld [vmem:[%s1976_s8 + $0x11] sm:$0xff]  ;;  %s2165_s10 = smov (!%p354_p10, %s351_s10), 25  ;;  %s2022_s14 = scalar_lea.vmem %s2136_s1, %s1460_s12 }
  0x50   : > { %1545 = vmatmul.mubr.msk.f32.vlgmr.msra.gmra.mrb[0].mxu1 %vm380_vm2, %v376_v3  ;;  %1542 = vmatmul.mubr.msk.f32.vlgmr.msra.gmra.mrb[0].mxu0 %vm380_vm2, %v375_v4  ;;  %v566_v7 = vld [vmem:[%s1976_s8 + $0x2] sm:$0xff]  ;;  %v567_v10 = vld [vmem:[%s1976_s8 + $0xa] sm:$0xff]  ;;  %v568_v13 = vld [vmem:[%s1976_s8 + $0x12] sm:$0xff]  ;;  %s1461_s15 = sshll.u32 %s2165_s10, 2  ;;  %p364_p11 = scmp.lt.s32.totalorder %s1794_s18, 23 }
  0x51   : > { %1551 = vmatpush3.msk.msra.mxu1 %vm390_vm1, %v374_v2  ;;  %1547 = vmatprep.mubr.msk.f32.mxu1 %vm1817_vm0, %v1816_v0  ;;  %v371_v9 = vld [vmem:[%s1976_s8] sm:$0xff]  ;;  %v372_v12 = vld [vmem:[%s1976_s8 + $0x8] sm:$0xff]  ;;  %v373_v14 = vld [vmem:[%s1976_s8 + $0x10] sm:$0xff]  ;;  %s358_s26 = sadd.s32 %s1965_s30, %s1461_s15  ;;  %s1642_s23 = smul.u32 72, %s2161_s19 }
  0x52   : > { %1562 = vmatpush3.msk.msra.mxu0 %vm390_vm1, %v570_v5  ;;  %1572 = vmatprep.subr.mxu1 %v1816_v0  ;;  %v766_v15 = vld [vmem:[%s2022_s14 + $0x1] sm:$0xff]  ;;  %v767_v18 = vld [vmem:[%s2022_s14 + $0x9] sm:$0xff]  ;;  %s1462_s27 = sshll.u32 %s358_s26, 3  ;;  %v768_v21 = vld [vmem:[%s2022_s14 + $0x11] sm:$0xff]  ;;  %s2167_s18 = smov (!%p364_p11, %s1794_s18), 23 }
  0x53   : > { %1563 = vmatprep.mubr.msk.f32.mxu0 %vm1817_vm0, %v1816_v0  ;;  %1583 = vmatprep.subr.mxu0 %v1816_v0  ;;  %v666_v17 = vld [vmem:[%s2022_s14] sm:$0xff]  ;;  %v667_v20 = vld [vmem:[%s2022_s14 + $0x8] sm:$0xff]  ;;  %s2056_s17 = scalar_lea.vmem %s2137_s2, %s1462_s27  ;;  %v668_v22 = vld [vmem:[%s2022_s14 + $0x10] sm:$0xff]  ;;  %s1641_s28 = smul.u32 3, %s2167_s18 }
  0x54   : > { %1548 = vmatmul.mubr.msk.f32.gmra.mrb[2].mxu1 %vm380_vm2, %v377_v6  ;;  %1564 = vmatmul.mubr.msk.f32.vlgmr.msra.gmra.mrb[2].mxu0 %vm380_vm2, %v566_v7  ;;  %v966_v23 = vld [vmem:[%s2056_s17] sm:$0xff]  ;;  %v967_v26 = vld [vmem:[%s2056_s17 + $0x8] sm:$0xff]  ;;  %v968_v29 = vld [vmem:[%s2056_s17 + $0x10] sm:$0xff] }
  0x55   : > { %1552 = vmatprep.mubr.msk.f32.mxu1 %vm1817_vm0, %v1816_v0  ;;  %1584 = vmatpush3.msk.msra.mxu0 %vm390_vm1, %v770_v8  ;;  %v866_v25 = vld [vmem:[%s2022_s14 + $0x2] sm:$0xff]  ;;  %v867_v28 = vld [vmem:[%s2022_s14 + $0xa] sm:$0xff]  ;;  %v868_v30 = vld [vmem:[%s2022_s14 + $0x12] sm:$0xff]  ;;  %s368_s6 = sadd.s32 %s1642_s23, %s1641_s28 }
  0x56   : > { %1566 = vmatprep.mubr.msk.f32.mxu0 %vm1817_vm0, %v1816_v0  ;;  %1605 = vmatprep.subr.mxu0 %v1816_v0  ;;  %v1166_v31 = vld [vmem:[%s2056_s17 + $0x2] sm:$0xff]  ;;  %v1167_v33 = vld [vmem:[%s2056_s17 + $0xa] sm:$0xff]  ;;  %v1168_v35 = vld [vmem:[%s2056_s17 + $0x12] sm:$0xff]  ;;  %s1463_s7 = sshll.u32 %s368_s6, 3 }
  0x57   : > { %v1066_v32 = vld [vmem:[%s2056_s17 + $0x1] sm:$0xff]  ;;  %v1067_v34 = vld [vmem:[%s2056_s17 + $0x9] sm:$0xff]  ;;  %v1068_v36 = vld [vmem:[%s2056_s17 + $0x11] sm:$0xff]  ;;  %s370_s18 = scalar_lea.vmem %s2140_s5, %s1463_s7 }
  0x58   : > { %1553 = vmatmul.mubr.msk.f32.vlgmr.msra.gmra.mrb[4].mxu1 %vm380_vm2, %v371_v9  ;;  %1567 = vmatmul.mubr.msk.f32.gmra.mrb[4].mxu0 %vm380_vm2, %v567_v10 }
  0x59   : > { %1573 = vmatpush3.msk.msra.mxu1 %vm390_vm1, %v670_v11  ;;  %1555 = vmatprep.mubr.msk.f32.mxu1 %vm1817_vm0, %v1816_v0 }
  0x5a   : > { %1569 = vmatprep.mubr.msk.f32.mxu0 %vm1817_vm0, %v1816_v0  ;;  %1594 = vmatprep.subr.mxu1 %v1816_v0 }
  0x5c   : > { %1556 = vmatmul.mubr.msk.f32.gmra.mrb[6].mxu1 %vm380_vm2, %v372_v12  ;;  %1570 = vmatmul.mubr.msk.f32.gmra.mrb[6].mxu0 %vm380_vm2, %v568_v13 }
  0x5d   : > { %1558 = vmatprep.mubr.msk.f32.mxu1 %vm1817_vm0, %v1816_v0  ;;  %1585 = vmatprep.mubr.msk.f32.mxu0 %vm1817_vm0, %v1816_v0 }
  0x60   : > { %1559 = vmatmul.mubr.msk.f32.gmra.mrb[8].mxu1 %vm380_vm2, %v373_v14  ;;  %1586 = vmatmul.mubr.msk.f32.vlgmr.msra.gmra.mrb[8].mxu0 %vm380_vm2, %v766_v15 }
  0x61   : > { %1574 = vmatprep.mubr.msk.f32.mxu1 %vm1817_vm0, %v1816_v0  ;;  %1606 = vmatpush3.msk.msra.mxu0 %vm390_vm1, %v970_v16 }
  0x62   : > { %1588 = vmatprep.mubr.msk.f32.mxu0 %vm1817_vm0, %v1816_v0  ;;  %1627 = vmatprep.subr.mxu0 %v1816_v0 }
  0x64   : > { %1575 = vmatmul.mubr.msk.f32.vlgmr.msra.gmra.mrb[10].mxu1 %vm380_vm2, %v666_v17  ;;  %1589 = vmatmul.mubr.msk.f32.gmra.mrb[10].mxu0 %vm380_vm2, %v767_v18 }
  0x65   : > { %1595 = vmatpush3.msk.msra.mxu1 %vm390_vm1, %v870_v19  ;;  %1577 = vmatprep.mubr.msk.f32.mxu1 %vm1817_vm0, %v1816_v0 }
  0x66   : > { %1591 = vmatprep.mubr.msk.f32.mxu0 %vm1817_vm0, %v1816_v0  ;;  %1616 = vmatprep.subr.mxu1 %v1816_v0 }
  0x68   : > { %1578 = vmatmul.mubr.msk.f32.gmra.mrb[12].mxu1 %vm380_vm2, %v667_v20  ;;  %1592 = vmatmul.mubr.msk.f32.gmra.mrb[12].mxu0 %vm380_vm2, %v768_v21 }
  0x69   : > { %1580 = vmatprep.mubr.msk.f32.mxu1 %vm1817_vm0, %v1816_v0  ;;  %1607 = vmatprep.mubr.msk.f32.mxu0 %vm1817_vm0, %v1816_v0 }
  0x6c   : > { %1581 = vmatmul.mubr.msk.f32.gmra.mrb[14].mxu1 %vm380_vm2, %v668_v22  ;;  %1608 = vmatmul.mubr.msk.f32.vlgmr.msra.gmra.mrb[14].mxu0 %vm380_vm2, %v966_v23 }
  0x6d   : > { %1596 = vmatprep.mubr.msk.f32.mxu1 %vm1817_vm0, %v1816_v0  ;;  %1628 = vmatpush3.msk.msra.mxu0 %vm390_vm1, %v1170_v24 }
  0x6e   : > { %1610 = vmatprep.mubr.msk.f32.mxu0 %vm1817_vm0, %v1816_v0 }
  0x70   : > { %1597 = vmatmul.mubr.msk.f32.vlgmr.msra.gmra.mrb[16].mxu1 %vm380_vm2, %v866_v25  ;;  %1611 = vmatmul.mubr.msk.f32.gmra.mrb[16].mxu0 %vm380_vm2, %v967_v26 }
  0x71   : > { %1617 = vmatpush3.msk.msra.mxu1 %vm390_vm1, %v1070_v27  ;;  %1599 = vmatprep.mubr.msk.f32.mxu1 %vm1817_vm0, %v1816_v0 }
  0x72   : > { %1613 = vmatprep.mubr.msk.f32.mxu0 %vm1817_vm0, %v1816_v0 }
  0x74   : > { %1600 = vmatmul.mubr.msk.f32.gmra.mrb[18].mxu1 %vm380_vm2, %v867_v28  ;;  %1614 = vmatmul.mubr.msk.f32.gmra.mrb[18].mxu0 %vm380_vm2, %v968_v29 }
  0x75   : > { %1602 = vmatprep.mubr.msk.f32.mxu1 %vm1817_vm0, %v1816_v0  ;;  %1629 = vmatprep.mubr.msk.f32.mxu0 %vm1817_vm0, %v1816_v0 }
  0x78   : > { %1603 = vmatmul.mubr.msk.f32.gmra.mrb[20].mxu1 %vm380_vm2, %v868_v30  ;;  %1630 = vmatmul.mubr.msk.f32.vlgmr.msra.gmra.mrb[20].mxu0 %vm380_vm2, %v1166_v31 }
  0x79   : > { %1618 = vmatprep.mubr.msk.f32.mxu1 %vm1817_vm0, %v1816_v0  ;;  %1632 = vmatprep.mubr.msk.f32.mxu0 %vm1817_vm0, %v1816_v0 }
  0x7c   : > { %1619 = vmatmul.mubr.msk.f32.vlgmr.msra.gmra.mrb[22].mxu1 %vm380_vm2, %v1066_v32  ;;  %1633 = vmatmul.mubr.msk.f32.gmra.mrb[22].mxu0 %vm380_vm2, %v1167_v33 }
  0x7d   : > { %1621 = vmatprep.mubr.msk.f32.mxu1 %vm1817_vm0, %v1816_v0  ;;  %1635 = vmatprep.mubr.msk.f32.mxu0 %vm1817_vm0, %v1816_v0 }
  0x80   : > { %1622 = vmatmul.mubr.msk.f32.gmra.mrb[24].mxu1 %vm380_vm2, %v1067_v34  ;;  %1636 = vmatmul.mubr.msk.f32.gmra.mrb[24].mxu0 %vm380_vm2, %v1168_v35 }
  0x81   : > { %1624 = vmatprep.mubr.msk.f32.mxu1 %vm1817_vm0, %v1816_v0 }
  0x84   : > { %1625 = vmatmul.mubr.msk.f32.gmra.mrb[26].mxu1 %vm380_vm2, %v1068_v36 }
 0x123   : > { %v465_v37 = vpop.f32.mrb[0].mxu1  ;;  %v460_v38 = vpop.f32.mrb[0].mxu0 }
 0x124   : > { %v1546_v39 = vpop.f32.mrb[1].mxu1  ;;  %v1543_v40 = vpop.f32.mrb[1].mxu0 }
 0x125   : > { %v1500_v40 = vld [vmem:[#allocation4] ss:$0 sm:$0xff] }
 0x127   : > { %v470_v41 = vpop.f32.mrb[2].mxu1  ;;  %v649_v42 = vpop.f32.mrb[2].mxu0 }
 0x128   : > { %v1549_v43 = vpop.f32.mrb[3].mxu1  ;;  %v1565_v44 = vpop.f32.mrb[3].mxu0 }
 0x12b   : > { %v552_v45 = vpop.f32.mrb[4].mxu1  ;;  %v654_v46 = vpop.f32.mrb[4].mxu0 }
 0x12c   : > { %v553_v47 = vadd.f32 %v552_v45, %v460_v38  ;;  %v1554_v48 = vpop.f32.mrb[5].mxu1  ;;  %v1568_v49 = vpop.f32.mrb[5].mxu0 }
 0x12e   : > { %v663_v50 = vadd.f32 %v649_v42, %v553_v47 }
 0x12f   : > { %v557_v51 = vpop.f32.mrb[6].mxu1  ;;  %v659_v52 = vpop.f32.mrb[6].mxu0 }
 0x130   : > { %v558_v53 = vadd.f32 %v557_v51, %v465_v37  ;;  %v1557_v54 = vpop.f32.mrb[7].mxu1  ;;  %v1571_v55 = vpop.f32.mrb[7].mxu0 }
 0x132   : > { %v664_v56 = vadd.f32 %v654_v46, %v558_v53 }
 0x133   : > { %v562_v57 = vpop.f32.mrb[8].mxu1  ;;  %v849_v58 = vpop.f32.mrb[8].mxu0 }
 0x134   : > { %v563_v59 = vadd.f32 %v562_v57, %v470_v41  ;;  %v1560_v60 = vpop.f32.mrb[9].mxu1  ;;  %v1587_v61 = vpop.f32.mrb[9].mxu0 }
 0x136   : > { %v665_v62 = vadd.f32 %v659_v52, %v563_v59 }
 0x137   : > { %v749_v63 = vpop.f32.mrb[10].mxu1  ;;  %v854_v0 = vpop.f32.mrb[10].mxu0 }
 0x138   : > { %v763_v1 = vadd.f32 %v749_v63, %v663_v50  ;;  %v1576_v2 = vpop.f32.mrb[11].mxu1  ;;  %v1590_v3 = vpop.f32.mrb[11].mxu0 }
 0x13a   : > { %v863_v4 = vadd.f32 %v849_v58, %v763_v1 }
 0x13b   : > { %v754_v5 = vpop.f32.mrb[12].mxu1  ;;  %v859_v6 = vpop.f32.mrb[12].mxu0 }
 0x13c   : > { %v764_v7 = vadd.f32 %v754_v5, %v664_v56  ;;  %v1579_v8 = vpop.f32.mrb[13].mxu1  ;;  %v1593_v9 = vpop.f32.mrb[13].mxu0 }
 0x13e   : > { %v864_v10 = vadd.f32 %v854_v0, %v764_v7 }
 0x13f   : > { %v759_v11 = vpop.f32.mrb[14].mxu1  ;;  %v1049_v12 = vpop.f32.mrb[14].mxu0 }
 0x140   : > { %v765_v13 = vadd.f32 %v759_v11, %v665_v62  ;;  %v1582_v14 = vpop.f32.mrb[15].mxu1  ;;  %v1609_v15 = vpop.f32.mrb[15].mxu0 }
 0x142   : > { %v865_v16 = vadd.f32 %v859_v6, %v765_v13 }
 0x143   : > { %v949_v17 = vpop.f32.mrb[16].mxu1  ;;  %v1054_v18 = vpop.f32.mrb[16].mxu0 }
 0x144   : > { %v963_v19 = vadd.f32 %v949_v17, %v863_v4  ;;  %v1598_v20 = vpop.f32.mrb[17].mxu1  ;;  %v1612_v21 = vpop.f32.mrb[17].mxu0 }
 0x146   : > { %v1063_v22 = vadd.f32 %v1049_v12, %v963_v19 }
 0x147   : > { %v954_v23 = vpop.f32.mrb[18].mxu1  ;;  %v1059_v24 = vpop.f32.mrb[18].mxu0 }
 0x148   : > { %v964_v25 = vadd.f32 %v954_v23, %v864_v10  ;;  %v1601_v26 = vpop.f32.mrb[19].mxu1  ;;  %v1615_v27 = vpop.f32.mrb[19].mxu0 }
 0x14a   : > { %v1064_v28 = vadd.f32 %v1054_v18, %v964_v25 }
 0x14b   : > { %v959_v29 = vpop.f32.mrb[20].mxu1  ;;  %v1249_v30 = vpop.f32.mrb[20].mxu0 }
 0x14c   : > { %v965_v31 = vadd.f32 %v959_v29, %v865_v16  ;;  %v1604_v32 = vpop.f32.mrb[21].mxu1  ;;  %v1631_v33 = vpop.f32.mrb[21].mxu0 }
 0x14e   : > { %v1065_v34 = vadd.f32 %v1059_v24, %v965_v31 }
 0x14f   : > { %v1149_v35 = vpop.f32.mrb[22].mxu1  ;;  %v1254_v36 = vpop.f32.mrb[22].mxu0 }
 0x150   : > { %v1163_v37 = vadd.f32 %v1149_v35, %v1063_v22  ;;  %v1620_v38 = vpop.f32.mrb[23].mxu1  ;;  %v1634_v39 = vpop.f32.mrb[23].mxu0 }
 0x152   : > { %v1263_v41 = vadd.f32 %v1249_v30, %v1163_v37 }
 0x153   : > { %v1154_v42 = vpop.f32.mrb[24].mxu1  ;;  %v1259_v43 = vpop.f32.mrb[24].mxu0 }
 0x154   : > { %v1273_v44 = vadd.f32 %v1500_v40, %v1263_v41  ;;  %v1164_v45 = vadd.f32 %v1154_v42, %v1064_v28  ;;  %v1623_v46 = vpop.f32.mrb[25].mxu1  ;;  %v1637_v47 = vpop.f32.mrb[25].mxu0 }
 0x156   : > { %vm1276_vm3 = vcmp.ge.f32.partialorder %v1273_v44, 0.0  ;;  %v1279_v48 = vmul.f32 0.2, %v1273_v44  ;;  %v1264_v49 = vadd.f32 %v1254_v36, %v1164_v45 }
 0x157   : > { %v1159_v50 = vpop.f32.mrb[26].mxu1 }
 0x158   : > { %v1282_v51 = vsel %vm1276_vm3, %v1273_v44, %v1279_v48  ;;  %v1274_v52 = vadd.f32 %v1500_v40, %v1264_v49  ;;  %v1165_v53 = vadd.f32 %v1159_v50, %v1065_v34  ;;  %v1626_v54 = vpop.f32.mrb[27].mxu1 }
 0x159   : > { %1285 = vst [vmem:[%s370_s18] sm:$0xff] %v1282_v51 }
 0x15a   : > { %vm1277_vm4 = vcmp.ge.f32.partialorder %v1274_v52, 0.0  ;;  %v1280_v55 = vmul.f32 0.2, %v1274_v52  ;;  %v1265_v56 = vadd.f32 %v1259_v43, %v1165_v53 }
 0x15c   : > { %v1283_v57 = vsel %vm1277_vm4, %v1274_v52, %v1280_v55  ;;  %v1275_v58 = vadd.f32 %v1500_v40, %v1265_v56 }
 0x15d   : > { %1286 = vst [vmem:[%s370_s18 + $0x8] sm:$0xff] %v1283_v57 }
 0x15e   : > { %vm1278_vm5 = vcmp.ge.f32.partialorder %v1275_v58, 0.0  ;;  %v1281_v59 = vmul.f32 0.2, %v1275_v58 }
 0x160   : > { %v1284_v60 = vsel %vm1278_vm5, %v1275_v58, %v1281_v59 }
 0x161   : > { %1287 = vst [vmem:[%s370_s18 + $0x10] sm:$0xff] %v1284_v60 }
 0x162 PF: > { %s17_s22 = sadd.s32 1, %s1810_s22   ;;  %s2150_s18 = smov %s1802_s20 }
 0x163   : > { %p14_p12 = scmp.ge.s32.totalorder %s17_s22, 50   ;;  %s2151_s19 = smov %s1806_s21 }
 0x164   : > { %s2152_s20 = smov %s2155_s24  ;;  %s2153_s21 = smov %s2159_s25 }
 0x165   :  { %16 = sbr.rel (!%p14_p12) target bundleno = 4 (0x4), region = 93 }
 0x16c   :  { %1317 = vsyncpa [#allocation3], 1 }
 0x16d   :  { %1319 = vsyncpa [#allocation3 + $0x1], 1 }
 0x16e   :  { %1320 = vsyncpa [#allocation5], 1 }

// kernel: discriminator_forward.9
= control target key start
LH: loop header
LB: loop body
LE: loop exit
PB: predicated region body
PF: predicated region fallthrough
CT: control target
= control target key end

     0   :  { %s2808_s0 = inlined_call_operand.vmem [shape: f32[8,13,13,128], index: 0, kind: input, shape index: {}, may-alias: {0,1}]   ;;  %s2809_s1 = inlined_call_operand.vmem [shape: f32[8,13,13,128], index: 1, kind: input, shape index: {}, may-alias: {0,1}]   ;;  %s2810_s2 = inlined_call_operand.hbm [shape: f32[9,128,128], index: 2, kind: input, shape index: {}]   ;;  %s2811_s3 = inlined_call_operand.vmem [shape: f32[2,12,12,128], index: 3, kind: output, shape index: {0}]   ;;  %s2812_s4 = inlined_call_operand.vmem [shape: f32[2,12,1,128], index: 4, kind: output, shape index: {1}]   ;;  %s2813_s5 = inlined_call_operand.vmem [shape: f32[2,12,1,128], index: 5, kind: output, shape index: {2}]  }
   0x1   :  { %2819 = sst [smem:[#allocation11_spill]] %s2813_s5 }
   0x2   :  { %11 = vsyncpa [#allocation5], 0  ;;  %s2604_s18 = smov 0   ;;  %s2606_s19 = smov 0  }
   0x3   :  { %s2608_s20 = smov 0   ;;  %s2610_s21 = smov 0  }
   0x4   :  { %s2612_s22 = smov 0   ;;  %s2614_s23 = smov 0  }
   0x5   :  { %s2616_s24 = smov 0   ;;  %s2618_s25 = smov 0  }
   0x6   :  { %s2620_s26 = smov 0  }
   0x7 LB: > { %s1559_s27 = sadd.s32 4294967295, %s2569_s26   ;;  %s26_s28 = sadd.s32 1, %s2561_s24  ;;  %s2569_s26 = sphi %s2620_s26, %s17_s26   ;;  %s2565_s25 = sphi %s2618_s25, %s2845_s25   ;;  %s2561_s24 = sphi %s2616_s24, %s2844_s24   ;;  %s2557_s23 = sphi %s2614_s23, %s2843_s23   ;;  %s2553_s22 = sphi %s2612_s22, %s2842_s22   ;;  %s2549_s21 = sphi %s2610_s21, %s2841_s21   ;;  %s2545_s20 = sphi %s2608_s20, %s2840_s20   ;;  %s2541_s19 = sphi %s2606_s19, %s2839_s19   ;;  %s2537_s18 = sphi %s2604_s18, %s2838_s18  }
   0x8   : > { %p27_p0 = scmp.ge.s32.totalorder %s26_s28, 12  ;;  %s29_s29 = sadd.s32 1, %s2565_s25 }
   0x9   : > { %s38_s30 = sadd.s32 1, %s2549_s21  ;;  %p45_p1 = scmp.ne.s32.totalorder %s2549_s21, %s2545_s20 }
   0xa   : > { %s2655_s6 = scalar_select %p27_p0, 0, %s26_s28  }
   0xb   : > { %s2847_s29 = smov (!%p27_p0, %s29_s29), %s2565_s25  ;;  %p46_p2 = scmp.eq.s32.totalorder %s2569_s26, 0 }
   0xc   : > { %2820 = sst [smem:[#allocation7_spill]] %s2655_s6  ;;  %s34_s7 = ssub.s32 %s2561_s24, %s2655_s6 }
   0xd   : > { %p31_p3 = scmp.ge.s32.totalorder %s2847_s29, 2  ;;  %s62_s8 = sadd.s32 1, %s2655_s6 }
   0xe   : > { %p2664_p4 = por %p46_p2, %p45_p1  ;;  %s64_s10 = ssub.s32 %s26_s28, %s62_s8 }
   0xf   : > { %s2849_s29 = smov (%p31_p3, %s2847_s29), 0  ;;  %s68_s11 = sadd.s32 1, %s2541_s19 }
  0x10   : > { %s2821_s9 = scalar_select %p2664_p4, 1, 0 }
  0x11   : > { %2822 = sst [smem:[#allocation8_spill]] %s2849_s29  ;;  %p75_p5 = scmp.ne.s32.totalorder %s2541_s19, %s2537_s18 }
  0x12   : > { %s33_s12 = ssub.s32 %s2565_s25, %s2849_s29  ;;  %p1561_p6 = scmp.ge.s32.totalorder %s2569_s26, 1 }
  0x13   : > { %s35_s13 = sor.u32 %s34_s7, %s33_s12  ;;  %s65_s14 = sor.u32 %s64_s10, %s33_s12 }
  0x14   : > { %p36_p7 = scmp.eq.s32.totalorder %s35_s13, 0  ;;  %p66_p8 = scmp.eq.s32.totalorder %s65_s14, 0 }
  0x15   : > { %p2678_p9 = por %p75_p5, %p46_p2  ;;  %p197_p10 = scmp.lt.s32.totalorder %s2569_s26, 25 }
  0x16   : > { %s2684_s16 = scalar_select %p36_p7, %s2549_s21, %s38_s30  }
  0x17   : > { %s2823_s15 = scalar_select %p2678_p9, 1, 0 }
  0x18   : > { %2824 = sst [smem:[#allocation9_spill]] %s2684_s16  ;;  %p2689_p11 = pnand %p1561_p6, %p197_p10 }
  0x19   : > { %s2687_s17 = scalar_select %p66_p8, %s2541_s19, %s68_s11  }
  0x1a   : > { %s2826_s28 = scalar_select %p2689_p11, 1, 0 }
  0x1b   : > { %2825 = sst [smem:[#allocation10_spill]] %s2687_s17  ;;  %p2693_p12 = scmp.eq.s32.totalorder %s1559_s27, 0 }
  0x1c   : > { %p2386_p13 = pneg %p2689_p11  ;;  %s2571_s8 = smov [#allocation4]  }
  0x1d   : > { %s2827_s7 = scalar_select %p2693_p12, 1, 0 }
  0x1e   : > { %s209_s10 = sshll.u32 %s2571_s8, 4  ;;  %p2701_p0 = pnand %p2693_p12, %p2386_p13  ;;  %s210_s10 = int_to_ptr.vmem [resolvable:$true] %s209_s10 }
  0x1f   : > { %s2467_s13 = scalar_lea.hbm %s2810_s2, 18432 }
  0x20   : > { %p2468_p1 = scmp.ne.s32.totalorder %s2810_s2, %s2467_s13  ;;  %p2469_p2 = pneg %p2701_p0 }
  0x21   : > { %p2474_p6 = scmp.lt.u32.totalorder %s2467_s13, %s2810_s2 }
  0x22   : > { %p2470_p3 = pnand %p2469_p2, %p2468_p1 }
  0x24   : > { %p2471_p5 = pneg %p2470_p3 }
  0x26   : > { %p2476_p7 = pnand %p2474_p6, %p2471_p5 }
  0x28   : > { %2479 = shalt.err (!%p2476_p7)
}
  0x29   : > { %s2480_s6 = scalar_lea.vmem %s210_s10, 18432  ;;  %p2488_p12 = scmp.lt.s32.totalorder %s210_s10, %s210_s10 }
  0x2a   : > { %p2481_p8 = scmp.ne.s32.totalorder %s210_s10, %s2480_s6  ;;  %p2489_p11 = scmp.lt.s32.totalorder %s2480_s6, %s2480_s6 }
  0x2c   : > { %p2483_p10 = pnand %p2481_p8, %p2469_p2  ;;  %p2490_p9 = por %p2489_p11, %p2488_p12 }
  0x2e   : > { %p2484_p13 = pneg %p2483_p10 }
  0x30   : > { %p2491_p4 = pnand %p2490_p9, %p2484_p13 }
  0x32   : > { %2494 = shalt.err (!%p2491_p4)
}
  0x33   : > { %s2572_s11 = smov 128   ;;  %s2573_s12 = smov 8  }
  0x34   : > { %2389 = dma.hbm_to_vmem [thread:$0]  (!%p2701_p0), %s2810_s2, 18432, %s210_s10, [#allocation5], %s2572_s11, %s2572_s11, %s2573_s12  }
  0x35   : > { %p1563_p1 = scmp.ge.s32.totalorder %s2569_s26, 24 }
  0x36   : > { %p2829_p3 = scmp.ne.s32.totalorder (!%p1563_p1), %s2821_s9, 0 }
  0x37   : > { %219 = sbr.rel (%p1563_p1) target bundleno = 87 (0x57), region = 20 }
  0x3e   : > { %222 = sbr.rel (!%p2829_p3) target bundleno = 74 (0x4a), region = 24  ;;  %s224_s29 = sand.u32 (%p2829_p3), 1, %s2549_s21  }
  0x3f   : > { %s1566_s6 = sshll.u32 (%p2829_p3), %s2561_s24, 1  ;;  %s1564_s13 = sshll.u32 (%p2829_p3), %s224_s29, 6 }
  0x40   : > { %s2379_s8 = smul.u32 (%p2829_p3), 104, %s2565_s25  ;;  %s226_s10 = scalar_lea.vmem (%p2829_p3), [#allocation2], %s1564_s13 }
  0x42   : > { %s230_s16 = sadd.s32 (%p2829_p3), %s2379_s8, %s1566_s6 }
  0x43   : > { %s1568_s17 = sshll.u32 (%p2829_p3), %s230_s16, 3 }
  0x44   : > { %s232_s27 = scalar_lea.vmem (%p2829_p3), %s2808_s0, %s1568_s17 }
  0x45   : > { %v274_v0 = vld [vmem:[%s232_s27] sm:$0xff]  ;;  %v276_v1 = vld [vmem:[%s232_s27 + $0x8] sm:$0xff]  ;;  %v278_v2 = vld [vmem:[%s232_s27 + $0xd0] sm:$0xff] }
  0x46   : > { %275 = vst [vmem:[%s226_s10] sm:$0xff] %v274_v0  ;;  %277 = vst [vmem:[%s226_s10 + $0x8] sm:$0xff] %v276_v1  ;;  %v280_v3 = vld [vmem:[%s232_s27 + $0xd8] sm:$0xff]  ;;  %v282_v4 = vld [vmem:[%s232_s27 + $0x1a0] sm:$0xff] }
  0x47   : > { %279 = vst [vmem:[%s226_s10 + $0x10] sm:$0xff] %v278_v2  ;;  %v284_v5 = vld [vmem:[%s232_s27 + $0x1a8] sm:$0xff]  ;;  %281 = vst [vmem:[%s226_s10 + $0x18] sm:$0xff] %v280_v3  ;;  %v286_v6 = vld [vmem:[%s232_s27 + $0x270] sm:$0xff] }
  0x48   : > { %283 = vst [vmem:[%s226_s10 + $0x20] sm:$0xff] %v282_v4  ;;  %285 = vst [vmem:[%s226_s10 + $0x28] sm:$0xff] %v284_v5  ;;  %v288_v7 = vld [vmem:[%s232_s27 + $0x278] sm:$0xff] }
  0x49   : > { %287 = vst [vmem:[%s226_s10 + $0x30] sm:$0xff] %v286_v6  ;;  %289 = vst [vmem:[%s226_s10 + $0x38] sm:$0xff] %v288_v7 }
  0x4a PF: > { %p2830_p4 = scmp.ne.s32.totalorder %s2823_s15, 0 }
  0x4b   : > { %s297_s5 = sand.u32 (%p2830_p4), 1, %s2541_s19   ;;  %s1570_s9 = sshll.u32 (%p2830_p4), %s2561_s24, 1 }
  0x4c   : > { %295 = sbr.rel (!%p2830_p4) target bundleno = 87 (0x57), region = 62  ;;  %s1569_s16 = sshll.u32 (%p2830_p4), %s297_s5, 6 }
  0x4d   : > { %s1429_s17 = smul.u32 (%p2830_p4), 104, %s2565_s25  ;;  %s299_s13 = scalar_lea.vmem (%p2830_p4), [#allocation3], %s1569_s16 }
  0x4f   : > { %s1430_s11 = sadd.s32 (%p2830_p4), %s1570_s9, %s1429_s17 }
  0x50   : > { %s1571_s12 = sshll.u32 (%p2830_p4), %s1430_s11, 3 }
  0x51   : > { %s1432_s6 = scalar_lea.vmem (%p2830_p4), %s2809_s1, %s1571_s12 }
  0x52   : > { %v1572_v8 = vld [vmem:[%s1432_s6 + $0x10] sm:$0xff] (%p2830_p4)  ;;  %v1573_v9 = vld [vmem:[%s1432_s6 + $0x18] sm:$0xff] (%p2830_p4)  ;;  %v1574_v10 = vld [vmem:[%s1432_s6 + $0xe0] sm:$0xff] (%p2830_p4) }
  0x53   : > { %349 = vst [vmem:[%s299_s13] sm:$0xff] %v1572_v8  ;;  %351 = vst [vmem:[%s299_s13 + $0x8] sm:$0xff] %v1573_v9  ;;  %v1575_v11 = vld [vmem:[%s1432_s6 + $0xe8] sm:$0xff]  ;;  %v1576_v12 = vld [vmem:[%s1432_s6 + $0x1b0] sm:$0xff] }
  0x54   : > { %353 = vst [vmem:[%s299_s13 + $0x10] sm:$0xff] %v1574_v10  ;;  %v1577_v13 = vld [vmem:[%s1432_s6 + $0x1b8] sm:$0xff]  ;;  %355 = vst [vmem:[%s299_s13 + $0x18] sm:$0xff] %v1575_v11  ;;  %v1578_v14 = vld [vmem:[%s1432_s6 + $0x280] sm:$0xff] }
  0x55   : > { %357 = vst [vmem:[%s299_s13 + $0x20] sm:$0xff] %v1576_v12  ;;  %359 = vst [vmem:[%s299_s13 + $0x28] sm:$0xff] %v1577_v13  ;;  %v1579_v15 = vld [vmem:[%s1432_s6 + $0x288] sm:$0xff] }
  0x56   : > { %361 = vst [vmem:[%s299_s13 + $0x30] sm:$0xff] %v1578_v14  ;;  %363 = vst [vmem:[%s299_s13 + $0x38] sm:$0xff] %v1579_v15 }
  0x57 PF: > { %p2831_p9 = scmp.ne.s32.totalorder %s2826_s28, 0 }
  0x58   : > { %s375_s15 = sand.u32 (!%p2831_p9), 1, %s2545_s20   ;;  %s382_s8 = sand.u32 (!%p2831_p9), 1, %s2537_s18  }
  0x59   : > { %372 = sbr.rel (%p2831_p9) target bundleno = 493 (0x1ed), region = 100  ;;  %s1581_s30 = sshll.u32 (!%p2831_p9), %s375_s15, 6 }
  0x5a   : > { %s1582_s27 = sshll.u32 (!%p2831_p9), %s382_s8, 6  ;;  %s2742_s10 = scalar_lea.vmem (!%p2831_p9), [#allocation2], %s1581_s30 }
  0x5b   : > { %s2744_s5 = scalar_lea.vmem (!%p2831_p9), [#allocation3], %s1582_s27  ;;  %p2832_p11 = scmp.ne.s32.totalorder (!%p2831_p9), %s2827_s7, 0 }
  0x60   : > { %2532 = dma.done.wait (%p2832_p11), [#allocation5], 18432  }
  0x61   : > { %2534 = vsyncadd (%p2832_p11), [#allocation5], 4294948864  ;;  %v483_v16 = vld [vmem:[#allocation4 + $0x80] sm:$0xff]  ;;  %v484_v17 = vld [vmem:[#allocation4 + $0x88] sm:$0xff]  ;;  %p438_p12 = scmp.lt.s32.totalorder %s2557_s23, 1  ;;  %p440_p0 = scmp.lt.s32.totalorder %s2553_s22, 11 }
  0x62   : > { %v846_v18 = vld [vmem:[#allocation4 + $0x200] sm:$0xff]  ;;  %v2075_v19 = vpack.c.bf16 %v484_v17, %v483_v16  ;;  %v847_v20 = vld [vmem:[#allocation4 + $0x208] sm:$0xff]  ;;  %v485_v21 = vld [vmem:[#allocation4 + $0x90] sm:$0xff]  ;;  %vm1324_vm0 = vcmask 1043456   ;;  %s2833_s8 = sld [smem:[#allocation11_spill]] }
  0x63   : > { %v486_v22 = vld [vmem:[#allocation4 + $0x98] sm:$0xff]  ;;  %v2203_v23 = vpack.c.bf16 %v847_v20, %v846_v18  ;;  %v848_v25 = vld [vmem:[#allocation4 + $0x210] sm:$0xff]  ;;  %v487_v27 = vld [vmem:[#allocation4 + $0xa0] sm:$0xff]  ;;  %s2851_s23 = smov (!%p438_p12, %s2557_s23), 1  ;;  %s2853_s22 = smov (!%p440_p0, %s2553_s22), 11 }
  0x64   : > { %v2079_v24 = vpack.c.bf16 %v486_v22, %v485_v21  ;;  %v849_v26 = vld [vmem:[#allocation4 + $0x218] sm:$0xff]  ;;  %2076 = vmatprep.subr.bf16.mxu1 %v2075_v19  ;;  %v488_v29 = vld [vmem:[#allocation4 + $0xa8] sm:$0xff]  ;;  %v850_v30 = vld [vmem:[#allocation4 + $0x220] sm:$0xff]  ;;  %s2380_s18 = smul.u32 24, %s2851_s23  ;;  %s1584_s20 = sshll.u32 %s2853_s22, 1 }
  0x65   : > { %v2207_v28 = vpack.c.bf16 %v849_v26, %v848_v25  ;;  %v851_v31 = vld [vmem:[#allocation4 + $0x228] sm:$0xff]  ;;  %2204 = vmatprep.subr.bf16.mxu0 %v2203_v23  ;;  %2078 = vmatpush3.bf16.msra.mxu1 %v2075_v19  ;;  %v2083_v32 = vpack.c.bf16 %v488_v29, %v487_v27  ;;  %v489_v34 = vld [vmem:[#allocation4 + $0xb0] sm:$0xff]  ;;  %v490_v35 = vld [vmem:[#allocation4 + $0xb8] sm:$0xff]  ;;  %s2381_s11 = smul.u32 12, %s2851_s23 }
  0x66   : > { %2206 = vmatpush3.bf16.msra.mxu0 %v2203_v23  ;;  %2080 = vmatprep.subr.bf16.mxu1 %v2079_v24  ;;  %v2211_v33 = vpack.c.bf16 %v851_v31, %v850_v30  ;;  %v852_v36 = vld [vmem:[#allocation4 + $0x230] sm:$0xff]  ;;  %v853_v37 = vld [vmem:[#allocation4 + $0x238] sm:$0xff]  ;;  %v2087_v38 = vpack.c.bf16 %v490_v35, %v489_v34  ;;  %v491_v40 = vld [vmem:[#allocation4 + $0xc0] sm:$0xff]  ;;  %s444_s28 = sadd.s32 %s2380_s18, %s1584_s20 }
  0x67   : > { %2208 = vmatprep.subr.bf16.mxu0 %v2207_v28  ;;  %v2215_v39 = vpack.c.bf16 %v853_v37, %v852_v36  ;;  %v492_v41 = vld [vmem:[#allocation4 + $0xc8] sm:$0xff]  ;;  %v1586_v42 = vld [vmem:[%s2742_s10 + $0x10] sm:$0xff]  ;;  %v854_v43 = vld [vmem:[#allocation4 + $0x240] sm:$0xff]  ;;  %s1585_s7 = sshll.u32 %s444_s28, 3  ;;  %s452_s12 = sadd.s32 %s2381_s11, %s2853_s22 }
  0x68   : > { %v855_v44 = vld [vmem:[#allocation4 + $0x248] sm:$0xff]  ;;  %1792 = vmatprep.mubr.f32.mxu1 %v1586_v42  ;;  %v1590_v45 = vld [vmem:[%s2742_s10 + $0x30] sm:$0xff]  ;;  %v2091_v46 = vpack.c.bf16 %v492_v41, %v491_v40  ;;  %v494_v49 = vld [vmem:[#allocation4 + $0xd8] sm:$0xff]  ;;  %s446_s17 = scalar_lea.vmem %s2811_s3, %s1585_s7  ;;  %s453_s6 = scalar_lea.vmem %s2812_s4, %s452_s12 }
  0x69   : > { %2082 = vmatpush3.bf16.msra.mxu1 %v2079_v24  ;;  %1932 = vmatprep.mubr.f32.mxu0 %v1590_v45  ;;  %v2219_v47 = vpack.c.bf16 %v855_v44, %v854_v43  ;;  %v493_v48 = vld [vmem:[#allocation4 + $0xd0] sm:$0xff]  ;;  %v857_v51 = vld [vmem:[#allocation4 + $0x258] sm:$0xff]  ;;  %v495_v54 = vld [vmem:[#allocation4 + $0xe0] sm:$0xff]  ;;  %s460_s30 = scalar_lea.vmem %s2833_s8, %s452_s12 }
  0x6a   : > { %2210 = vmatpush3.bf16.msra.mxu0 %v2207_v28  ;;  %2084 = vmatprep.subr.bf16.mxu1 %v2083_v32  ;;  %v856_v50 = vld [vmem:[#allocation4 + $0x250] sm:$0xff]  ;;  %v2095_v52 = vpack.c.bf16 %v494_v49, %v493_v48  ;;  %v496_v55 = vld [vmem:[#allocation4 + $0xe8] sm:$0xff]  ;;  %v858_v56 = vld [vmem:[#allocation4 + $0x260] sm:$0xff] }
  0x6b   : > { %2212 = vmatprep.subr.bf16.mxu0 %v2211_v33  ;;  %v2223_v53 = vpack.c.bf16 %v857_v51, %v856_v50  ;;  %v859_v57 = vld [vmem:[#allocation4 + $0x268] sm:$0xff]  ;;  %v2099_v58 = vpack.c.bf16 %v496_v55, %v495_v54  ;;  %v497_v60 = vld [vmem:[#allocation4 + $0xf0] sm:$0xff]  ;;  %v498_v61 = vld [vmem:[#allocation4 + $0xf8] sm:$0xff] }
  0x6c   : > { %v2227_v59 = vpack.c.bf16 %v859_v57, %v858_v56  ;;  %v860_v62 = vld [vmem:[#allocation4 + $0x270] sm:$0xff]  ;;  %v861_v63 = vld [vmem:[#allocation4 + $0x278] sm:$0xff]  ;;  %v2103_v0 = vpack.c.bf16 %v498_v61, %v497_v60  ;;  %v463_v2 = vld [vmem:[#allocation4] sm:$0xff] }
  0x6d   : > { %2086 = vmatpush3.bf16.msra.mxu1 %v2083_v32  ;;  %v2231_v1 = vpack.c.bf16 %v861_v63, %v860_v62  ;;  %v464_v3 = vld [vmem:[#allocation4 + $0x8] sm:$0xff]  ;;  %v942_v4 = vld [vmem:[#allocation4 + $0x280] sm:$0xff]  ;;  %v465_v8 = vld [vmem:[#allocation4 + $0x10] sm:$0xff] }
  0x6e   : > { %2214 = vmatpush3.bf16.msra.mxu0 %v2211_v33  ;;  %2088 = vmatprep.subr.bf16.mxu1 %v2087_v38  ;;  %v943_v5 = vld [vmem:[#allocation4 + $0x288] sm:$0xff]  ;;  %v2107_v6 = vpack.c.bf16 %v464_v3, %v463_v2  ;;  %v466_v9 = vld [vmem:[#allocation4 + $0x18] sm:$0xff]  ;;  %v944_v10 = vld [vmem:[#allocation4 + $0x290] sm:$0xff] }
  0x6f   : > { %2216 = vmatprep.subr.bf16.mxu0 %v2215_v39  ;;  %v2235_v7 = vpack.c.bf16 %v943_v5, %v942_v4  ;;  %v945_v11 = vld [vmem:[#allocation4 + $0x298] sm:$0xff]  ;;  %v2111_v14 = vpack.c.bf16 %v466_v9, %v465_v8  ;;  %v467_v16 = vld [vmem:[#allocation4 + $0x20] sm:$0xff]  ;;  %v468_v17 = vld [vmem:[#allocation4 + $0x28] sm:$0xff] }
  0x70   : > { %v1587_v12 = vld [vmem:[%s2742_s10 + $0x18] sm:$0xf]  ;;  %v2239_v15 = vpack.c.bf16 %v945_v11, %v944_v10  ;;  %v946_v18 = vld [vmem:[#allocation4 + $0x2a0] sm:$0xff]  ;;  %v947_v19 = vld [vmem:[#allocation4 + $0x2a8] sm:$0xff]  ;;  %v2115_v22 = vpack.c.bf16 %v468_v17, %v467_v16 }
  0x71   : > { %2090 = vmatpush3.bf16.msra.mxu1 %v2087_v38  ;;  %v1591_v13 = vld [vmem:[%s2742_s10 + $0x38] sm:$0xf]  ;;  %v461_v20 = vld [vmem:[%s2742_s10] sm:$0xff]  ;;  %v2243_v23 = vpack.c.bf16 %v947_v19, %v946_v18  ;;  %v469_v24 = vld [vmem:[#allocation4 + $0x30] sm:$0xff] }
  0x72   : > { %2218 = vmatpush3.bf16.msra.mxu0 %v2215_v39  ;;  %2092 = vmatprep.subr.bf16.mxu1 %v2091_v46  ;;  %v1592_v21 = vld [vmem:[%s2742_s10 + $0x21] sm:$0xff]  ;;  %v470_v25 = vld [vmem:[#allocation4 + $0x38] sm:$0xff]  ;;  %v948_v26 = vld [vmem:[#allocation4 + $0x2b0] sm:$0xff] }
  0x73   : > { %2220 = vmatprep.subr.bf16.mxu0 %v2219_v47  ;;  %v949_v27 = vld [vmem:[#allocation4 + $0x2b8] sm:$0xff]  ;;  %v2119_v28 = vpack.c.bf16 %v470_v25, %v469_v24  ;;  %v471_v30 = vld [vmem:[#allocation4 + $0x40] sm:$0xff]  ;;  %v472_v31 = vld [vmem:[#allocation4 + $0x48] sm:$0xff] }
  0x74   : > { %v2247_v29 = vpack.c.bf16 %v949_v27, %v948_v26  ;;  %v950_v32 = vld [vmem:[#allocation4 + $0x2c0] sm:$0xff]  ;;  %v951_v33 = vld [vmem:[#allocation4 + $0x2c8] sm:$0xff]  ;;  %v2123_v34 = vpack.c.bf16 %v472_v31, %v471_v30  ;;  %v473_v36 = vld [vmem:[#allocation4 + $0x50] sm:$0xff] }
  0x75   : > { %2094 = vmatpush3.bf16.msra.mxu1 %v2091_v46  ;;  %v2251_v35 = vpack.c.bf16 %v951_v33, %v950_v32  ;;  %v474_v37 = vld [vmem:[#allocation4 + $0x58] sm:$0xff]  ;;  %v952_v38 = vld [vmem:[#allocation4 + $0x2d0] sm:$0xff]  ;;  %v475_v42 = vld [vmem:[#allocation4 + $0x60] sm:$0xff] }
  0x76   : > { %2222 = vmatpush3.bf16.msra.mxu0 %v2219_v47  ;;  %2096 = vmatprep.subr.bf16.mxu1 %v2095_v52  ;;  %v953_v39 = vld [vmem:[#allocation4 + $0x2d8] sm:$0xff]  ;;  %v2127_v40 = vpack.c.bf16 %v474_v37, %v473_v36  ;;  %v476_v43 = vld [vmem:[#allocation4 + $0x68] sm:$0xff]  ;;  %v954_v44 = vld [vmem:[#allocation4 + $0x2e0] sm:$0xff] }
  0x77   : > { %2224 = vmatprep.subr.bf16.mxu0 %v2223_v53  ;;  %v2255_v41 = vpack.c.bf16 %v953_v39, %v952_v38  ;;  %v955_v45 = vld [vmem:[#allocation4 + $0x2e8] sm:$0xff]  ;;  %v2131_v46 = vpack.c.bf16 %v476_v43, %v475_v42  ;;  %v477_v48 = vld [vmem:[#allocation4 + $0x70] sm:$0xff]  ;;  %v478_v49 = vld [vmem:[#allocation4 + $0x78] sm:$0xff] }
  0x78   : > { %v2259_v47 = vpack.c.bf16 %v955_v45, %v954_v44  ;;  %v956_v50 = vld [vmem:[#allocation4 + $0x2f0] sm:$0xff]  ;;  %v957_v51 = vld [vmem:[#allocation4 + $0x2f8] sm:$0xff]  ;;  %v652_v54 = vld [vmem:[#allocation4 + $0x100] sm:$0xff] }
  0x79   : > { %2098 = vmatpush3.bf16.msra.mxu1 %v2095_v52  ;;  %v2135_v52 = vpack.c.bf16 %v478_v49, %v477_v48  ;;  %v653_v55 = vld [vmem:[#allocation4 + $0x108] sm:$0xff]  ;;  %v1038_v56 = vld [vmem:[#allocation4 + $0x300] sm:$0xff]  ;;  %v654_v60 = vld [vmem:[#allocation4 + $0x110] sm:$0xff] }
  0x7a   : > { %2226 = vmatpush3.bf16.msra.mxu0 %v2223_v53  ;;  %2100 = vmatprep.subr.bf16.mxu1 %v2099_v58  ;;  %v2263_v53 = vpack.c.bf16 %v957_v51, %v956_v50  ;;  %v1039_v57 = vld [vmem:[#allocation4 + $0x308] sm:$0xff]  ;;  %v655_v61 = vld [vmem:[#allocation4 + $0x118] sm:$0xff]  ;;  %v1040_v62 = vld [vmem:[#allocation4 + $0x310] sm:$0xff] }
  0x7b   : > { %2228 = vmatprep.subr.bf16.mxu0 %v2227_v59  ;;  %v1041_v63 = vld [vmem:[#allocation4 + $0x318] sm:$0xff]  ;;  %v2143_v2 = vpack.c.bf16 %v655_v61, %v654_v60  ;;  %v656_v4 = vld [vmem:[#allocation4 + $0x120] sm:$0xff]  ;;  %v657_v5 = vld [vmem:[#allocation4 + $0x128] sm:$0xff] }
  0x7c   : > { %v2271_v3 = vpack.c.bf16 %v1041_v63, %v1040_v62  ;;  %v649_v8 = vld [vmem:[%s2742_s10 + $0x1] sm:$0xff]  ;;  %v2147_v10 = vpack.c.bf16 %v657_v5, %v656_v4  ;;  %v662_v24 = vld [vmem:[#allocation4 + $0x150] sm:$0xff]  ;;  %v663_v25 = vld [vmem:[#allocation4 + $0x158] sm:$0xff] }
  0x7d   : > { %2102 = vmatpush3.bf16.msra.mxu1 %v2099_v58  ;;  %v2139_v58 = vpack.c.bf16 %v653_v55, %v652_v54  ;;  %v1035_v9 = vld [vmem:[%s2744_s5] sm:$0xff]  ;;  %v661_v19 = vld [vmem:[#allocation4 + $0x148] sm:$0xff]  ;;  %v1048_v26 = vld [vmem:[#allocation4 + $0x350] sm:$0xff] }
  0x7e   : > { %2230 = vmatpush3.bf16.msra.mxu0 %v2227_v59  ;;  %2104 = vmatprep.subr.bf16.mxu1 %v2103_v0  ;;  %v2267_v59 = vpack.c.bf16 %v1039_v57, %v1038_v56  ;;  %v660_v18 = vld [vmem:[#allocation4 + $0x140] sm:$0xff]  ;;  %v1049_v27 = vld [vmem:[#allocation4 + $0x358] sm:$0xff]  ;;  %v665_v31 = vld [vmem:[#allocation4 + $0x168] sm:$0xff] }
  0x7f   : > { %2232 = vmatprep.subr.bf16.mxu0 %v2231_v1  ;;  %v664_v30 = vld [vmem:[#allocation4 + $0x160] sm:$0xff]  ;;  %v1051_v33 = vld [vmem:[#allocation4 + $0x368] sm:$0xff]  ;;  %v666_v36 = vld [vmem:[#allocation4 + $0x170] sm:$0xff] }
  0x80   : > { %v1050_v32 = vld [vmem:[#allocation4 + $0x360] sm:$0xff]  ;;  %v667_v37 = vld [vmem:[#allocation4 + $0x178] sm:$0xff]  ;;  %v1052_v38 = vld [vmem:[#allocation4 + $0x370] sm:$0xff] }
  0x81   : > { %2106 = vmatpush3.bf16.msra.mxu1 %v2103_v0  ;;  %v462_v0 = vld [vmem:[%s2742_s10 + $0x8] sm:$0xf]  ;;  %v1053_v39 = vld [vmem:[#allocation4 + $0x378] sm:$0xff]  ;;  %v749_v42 = vld [vmem:[#allocation4 + $0x180] sm:$0xff] }
  0x82   : > { %2234 = vmatpush3.bf16.msra.mxu0 %v2231_v1  ;;  %2108 = vmatprep.subr.bf16.mxu1 %v2107_v6  ;;  %v1593_v1 = vld [vmem:[%s2742_s10 + $0x29] sm:$0xf]  ;;  %v1135_v44 = vld [vmem:[#allocation4 + $0x380] sm:$0xff]  ;;  %v751_v48 = vld [vmem:[#allocation4 + $0x190] sm:$0xff] }
  0x83   : > { %2236 = vmatprep.subr.bf16.mxu0 %v2235_v7  ;;  %v750_v43 = vld [vmem:[#allocation4 + $0x188] sm:$0xff]  ;;  %v752_v49 = vld [vmem:[#allocation4 + $0x198] sm:$0xff]  ;;  %v1137_v50 = vld [vmem:[#allocation4 + $0x390] sm:$0xff] }
  0x84   : > { %1793 = vmatmul.mubr.f32.vlgmr.msra.gmra.mrb[0].mxu1 %v1587_v12  ;;  %v658_v12 = vld [vmem:[#allocation4 + $0x130] sm:$0xff]  ;;  %v1136_v45 = vld [vmem:[#allocation4 + $0x388] sm:$0xff]  ;;  %v1138_v51 = vld [vmem:[#allocation4 + $0x398] sm:$0xff]  ;;  %v2175_v54 = vpack.c.bf16 %v752_v49, %v751_v48 }
  0x85   : > { %2110 = vmatpush3.bf16.msra.mxu1 %v2107_v6  ;;  %1933 = vmatmul.mubr.f32.vlgmr.msra.gmra.mrb[0].mxu0 %v1591_v13  ;;  %v1042_v6 = vld [vmem:[#allocation4 + $0x320] sm:$0xff]  ;;  %v659_v13 = vld [vmem:[#allocation4 + $0x138] sm:$0xff]  ;;  %v2303_v55 = vpack.c.bf16 %v1138_v51, %v1137_v50  ;;  %v754_v57 = vld [vmem:[#allocation4 + $0x1a8] sm:$0xff] }
  0x86   : > { %2238 = vmatpush3.bf16.msra.mxu0 %v2235_v7  ;;  %2112 = vmatprep.subr.bf16.mxu1 %v2111_v14  ;;  %v1043_v7 = vld [vmem:[#allocation4 + $0x328] sm:$0xff]  ;;  %v2151_v16 = vpack.c.bf16 %v659_v13, %v658_v12  ;;  %v753_v56 = vld [vmem:[#allocation4 + $0x1a0] sm:$0xff]  ;;  %v1594_v61 = vld [vmem:[%s2744_s5 + $0x10] sm:$0xff] }
  0x87   : > { %2240 = vmatprep.subr.bf16.mxu0 %v2239_v15  ;;  %1827 = vmatprep.mubr.f32.mxu1 %v461_v20  ;;  %v2275_v11 = vpack.c.bf16 %v1043_v7, %v1042_v6  ;;  %v1046_v20 = vld [vmem:[#allocation4 + $0x340] sm:$0xff]  ;;  %v2179_v62 = vpack.c.bf16 %v754_v57, %v753_v56  ;;  %v758_v7 = vld [vmem:[#allocation4 + $0x1c8] sm:$0xff]  ;;  %v759_v12 = vld [vmem:[#allocation4 + $0x1d0] sm:$0xff] }
  0x88   : > { %1967 = vmatprep.mubr.f32.mxu0 %v1592_v21  ;;  %v1047_v21 = vld [vmem:[#allocation4 + $0x348] sm:$0xff]  ;;  %v1588_v60 = vld [vmem:[%s2742_s10 + $0x20] sm:$0xff]  ;;  %v760_v13 = vld [vmem:[#allocation4 + $0x1d8] sm:$0xff] }
  0x89   : > { %2114 = vmatpush3.bf16.msra.mxu1 %v2111_v14  ;;  %v1044_v14 = vld [vmem:[#allocation4 + $0x330] sm:$0xff]  ;;  %v757_v6 = vld [vmem:[#allocation4 + $0x1c0] sm:$0xff]  ;;  %v1242_v49 = vld [vmem:[#allocation4 + $0x458] sm:$0xff] }
  0x8a   : > { %2242 = vmatpush3.bf16.msra.mxu0 %v2239_v15  ;;  %2116 = vmatprep.subr.bf16.mxu1 %v2115_v22  ;;  %v1045_v15 = vld [vmem:[#allocation4 + $0x338] sm:$0xff]  ;;  %v1241_v48 = vld [vmem:[#allocation4 + $0x450] sm:$0xff]  ;;  %v1243_v51 = vld [vmem:[#allocation4 + $0x460] sm:$0xff] }
  0x8b   : > { %2244 = vmatprep.subr.bf16.mxu0 %v2243_v23  ;;  %v2279_v17 = vpack.c.bf16 %v1045_v15, %v1044_v14  ;;  %v1145_v14 = vld [vmem:[#allocation4 + $0x3d0] sm:$0xff]  ;;  %v1146_v15 = vld [vmem:[#allocation4 + $0x3d8] sm:$0xff]  ;;  %v2351_v50 = vpack.c.bf16 %v1242_v49, %v1241_v48  ;;  %v1229_v57 = vld [vmem:[%s2744_s5 + $0x9] sm:$0xf] }
  0x8d   : > { %2118 = vmatpush3.bf16.msra.mxu1 %v2115_v22  ;;  %v2155_v22 = vpack.c.bf16 %v661_v19, %v660_v18  ;;  %v761_v18 = vld [vmem:[#allocation4 + $0x1e0] sm:$0xff]  ;;  %v762_v19 = vld [vmem:[#allocation4 + $0x1e8] sm:$0xff] }
  0x8e   : > { %2246 = vmatpush3.bf16.msra.mxu0 %v2243_v23  ;;  %2120 = vmatprep.subr.bf16.mxu1 %v2119_v28  ;;  %v2283_v23 = vpack.c.bf16 %v1047_v21, %v1046_v20  ;;  %v1147_v20 = vld [vmem:[#allocation4 + $0x3e0] sm:$0xff]  ;;  %v1148_v21 = vld [vmem:[#allocation4 + $0x3e8] sm:$0xff] }
  0x8f   : > { %2248 = vmatprep.subr.bf16.mxu0 %v2247_v29 }
  0x91   : > { %2122 = vmatpush3.bf16.msra.mxu1 %v2119_v28  ;;  %v2159_v28 = vpack.c.bf16 %v663_v25, %v662_v24  ;;  %v763_v24 = vld [vmem:[#allocation4 + $0x1f0] sm:$0xff]  ;;  %v764_v25 = vld [vmem:[#allocation4 + $0x1f8] sm:$0xff] }
  0x92   : > { %2250 = vmatpush3.bf16.msra.mxu0 %v2247_v29  ;;  %2124 = vmatprep.subr.bf16.mxu1 %v2123_v34  ;;  %v2287_v29 = vpack.c.bf16 %v1049_v27, %v1048_v26  ;;  %v1149_v26 = vld [vmem:[#allocation4 + $0x3f0] sm:$0xff]  ;;  %v1150_v27 = vld [vmem:[#allocation4 + $0x3f8] sm:$0xff] }
  0x93   : > { %2252 = vmatprep.subr.bf16.mxu0 %v2251_v35 }
  0x95   : > { %2126 = vmatpush3.bf16.msra.mxu1 %v2123_v34  ;;  %v2163_v34 = vpack.c.bf16 %v665_v31, %v664_v30  ;;  %v1231_v30 = vld [vmem:[#allocation4 + $0x400] sm:$0xff]  ;;  %v1232_v31 = vld [vmem:[#allocation4 + $0x408] sm:$0xff] }
  0x96   : > { %2254 = vmatpush3.bf16.msra.mxu0 %v2251_v35  ;;  %2128 = vmatprep.subr.bf16.mxu1 %v2127_v40  ;;  %v2291_v35 = vpack.c.bf16 %v1051_v33, %v1050_v32  ;;  %v2331_v32 = vpack.c.bf16 %v1232_v31, %v1231_v30  ;;  %v1233_v33 = vld [vmem:[#allocation4 + $0x410] sm:$0xff] }
  0x97   : > { %2256 = vmatprep.subr.bf16.mxu0 %v2255_v41 }
  0x99   : > { %2130 = vmatpush3.bf16.msra.mxu1 %v2127_v40  ;;  %v2167_v40 = vpack.c.bf16 %v667_v37, %v666_v36  ;;  %v1595_v36 = vld [vmem:[%s2744_s5 + $0x18] sm:$0xf] }
  0x9a   : > { %2258 = vmatpush3.bf16.msra.mxu0 %v2255_v41  ;;  %2132 = vmatprep.subr.bf16.mxu1 %v2131_v46  ;;  %v2295_v41 = vpack.c.bf16 %v1053_v39, %v1052_v38  ;;  %v1228_v38 = vld [vmem:[%s2744_s5 + $0x1] sm:$0xff] }
  0x9b   : > { %2260 = vmatprep.subr.bf16.mxu0 %v2259_v47  ;;  %v1235_v39 = vld [vmem:[#allocation4 + $0x420] sm:$0xff] }
  0x9d   : > { %2134 = vmatpush3.bf16.msra.mxu1 %v2131_v46  ;;  %v2171_v46 = vpack.c.bf16 %v750_v43, %v749_v42  ;;  %v1237_v42 = vld [vmem:[#allocation4 + $0x430] sm:$0xff]  ;;  %v1238_v43 = vld [vmem:[#allocation4 + $0x438] sm:$0xff] }
  0x9e   : > { %2262 = vmatpush3.bf16.msra.mxu0 %v2259_v47  ;;  %2136 = vmatprep.subr.bf16.mxu1 %v2135_v52  ;;  %v2299_v47 = vpack.c.bf16 %v1136_v45, %v1135_v44  ;;  %v2343_v44 = vpack.c.bf16 %v1238_v43, %v1237_v42  ;;  %v1239_v45 = vld [vmem:[#allocation4 + $0x440] sm:$0xff] }
  0x9f   : > { %2264 = vmatprep.subr.bf16.mxu0 %v2263_v53 }
  0xa1   : > { %2138 = vmatpush3.bf16.msra.mxu1 %v2135_v52  ;;  %v650_v52 = vld [vmem:[%s2742_s10 + $0x9] sm:$0xf] }
  0xa2   : > { %2266 = vmatpush3.bf16.msra.mxu0 %v2263_v53  ;;  %2140 = vmatprep.subr.bf16.mxu1 %v2139_v58  ;;  %v1036_v53 = vld [vmem:[%s2744_s5 + $0x8] sm:$0xf] }
  0xa3   : > { %2268 = vmatprep.subr.bf16.mxu0 %v2267_v59 }
  0xa4   : > { %1828 = vmatmul.mubr.f32.vlgmr.msra.gmra.mrb[0].mxu1 %v462_v0  ;;  %v755_v0 = vld [vmem:[#allocation4 + $0x1b0] sm:$0xff] }
  0xa5   : > { %2142 = vmatpush3.bf16.msra.mxu1 %v2139_v58  ;;  %1968 = vmatmul.mubr.f32.vlgmr.msra.gmra.mrb[0].mxu0 %v1593_v1  ;;  %v1139_v58 = vld [vmem:[#allocation4 + $0x3a0] sm:$0xff]  ;;  %v756_v1 = vld [vmem:[#allocation4 + $0x1b8] sm:$0xff] }
  0xa6   : > { %2270 = vmatpush3.bf16.msra.mxu0 %v2267_v59  ;;  %2144 = vmatprep.subr.bf16.mxu1 %v2143_v2  ;;  %v1140_v59 = vld [vmem:[#allocation4 + $0x3a8] sm:$0xff]  ;;  %v2183_v4 = vpack.c.bf16 %v756_v1, %v755_v0 }
  0xa7   : > { %2272 = vmatprep.subr.bf16.mxu0 %v2271_v3  ;;  %1862 = vmatprep.mubr.f32.mxu1 %v649_v8  ;;  %v2307_v63 = vpack.c.bf16 %v1140_v59, %v1139_v58  ;;  %v1143_v8 = vld [vmem:[#allocation4 + $0x3c0] sm:$0xff] }
  0xa8   : > { %2002 = vmatprep.mubr.f32.mxu0 %v1035_v9  ;;  %v1144_v9 = vld [vmem:[#allocation4 + $0x3c8] sm:$0xff] }
  0xa9   : > { %2146 = vmatpush3.bf16.msra.mxu1 %v2143_v2  ;;  %v1141_v2 = vld [vmem:[#allocation4 + $0x3b0] sm:$0xff] }
  0xaa   : > { %2274 = vmatpush3.bf16.msra.mxu0 %v2271_v3  ;;  %2148 = vmatprep.subr.bf16.mxu1 %v2147_v10  ;;  %v1142_v3 = vld [vmem:[#allocation4 + $0x3b8] sm:$0xff] }
  0xab   : > { %2276 = vmatprep.subr.bf16.mxu0 %v2275_v11  ;;  %v2311_v5 = vpack.c.bf16 %v1142_v3, %v1141_v2 }
  0xad   : > { %2150 = vmatpush3.bf16.msra.mxu1 %v2147_v10  ;;  %v2187_v10 = vpack.c.bf16 %v758_v7, %v757_v6 }
  0xae   : > { %2278 = vmatpush3.bf16.msra.mxu0 %v2275_v11  ;;  %2152 = vmatprep.subr.bf16.mxu1 %v2151_v16  ;;  %v2315_v11 = vpack.c.bf16 %v1144_v9, %v1143_v8 }
  0xaf   : > { %2280 = vmatprep.subr.bf16.mxu0 %v2279_v17 }
  0xb1   : > { %2154 = vmatpush3.bf16.msra.mxu1 %v2151_v16  ;;  %v2191_v16 = vpack.c.bf16 %v760_v13, %v759_v12 }
  0xb2   : > { %2282 = vmatpush3.bf16.msra.mxu0 %v2279_v17  ;;  %2156 = vmatprep.subr.bf16.mxu1 %v2155_v22  ;;  %v2319_v17 = vpack.c.bf16 %v1146_v15, %v1145_v14 }
  0xb3   : > { %2284 = vmatprep.subr.bf16.mxu0 %v2283_v23 }
  0xb5   : > { %2158 = vmatpush3.bf16.msra.mxu1 %v2155_v22  ;;  %v2195_v22 = vpack.c.bf16 %v762_v19, %v761_v18 }
  0xb6   : > { %2286 = vmatpush3.bf16.msra.mxu0 %v2283_v23  ;;  %2160 = vmatprep.subr.bf16.mxu1 %v2159_v28  ;;  %v2323_v23 = vpack.c.bf16 %v1148_v21, %v1147_v20 }
  0xb7   : > { %2288 = vmatprep.subr.bf16.mxu0 %v2287_v29 }
  0xb9   : > { %2162 = vmatpush3.bf16.msra.mxu1 %v2159_v28  ;;  %v2199_v28 = vpack.c.bf16 %v764_v25, %v763_v24 }
  0xba   : > { %2290 = vmatpush3.bf16.msra.mxu0 %v2287_v29  ;;  %2164 = vmatprep.subr.bf16.mxu1 %v2163_v34  ;;  %v2327_v29 = vpack.c.bf16 %v1150_v27, %v1149_v26 }
  0xbb   : > { %2292 = vmatprep.subr.bf16.mxu0 %v2291_v35 }
  0xbd   : > { %2166 = vmatpush3.bf16.msra.mxu1 %v2163_v34  ;;  %v1234_v34 = vld [vmem:[#allocation4 + $0x418] sm:$0xff] }
  0xbe   : > { %2294 = vmatpush3.bf16.msra.mxu0 %v2291_v35  ;;  %2168 = vmatprep.subr.bf16.mxu1 %v2167_v40  ;;  %v1589_v35 = vld [vmem:[%s2742_s10 + $0x28] sm:$0xf]  ;;  %v2335_v37 = vpack.c.bf16 %v1234_v34, %v1233_v33 }
  0xbf   : > { %2296 = vmatprep.subr.bf16.mxu0 %v2295_v41 }
  0xc1   : > { %2170 = vmatpush3.bf16.msra.mxu1 %v2167_v40  ;;  %v1236_v40 = vld [vmem:[#allocation4 + $0x428] sm:$0xff] }
  0xc2   : > { %2298 = vmatpush3.bf16.msra.mxu0 %v2295_v41  ;;  %2172 = vmatprep.subr.bf16.mxu1 %v2171_v46  ;;  %v2339_v41 = vpack.c.bf16 %v1236_v40, %v1235_v39 }
  0xc3   : > { %2300 = vmatprep.subr.bf16.mxu0 %v2299_v47 }
  0xc4   : > { %1863 = vmatmul.mubr.f32.vlgmr.msra.gmra.mrb[0].mxu1 %v650_v52  ;;  %v1244_v52 = vld [vmem:[#allocation4 + $0x468] sm:$0xff] }
  0xc5   : > { %2174 = vmatpush3.bf16.msra.mxu1 %v2171_v46  ;;  %2003 = vmatmul.mubr.f32.vlgmr.msra.gmra.mrb[0].mxu0 %v1036_v53  ;;  %v1240_v46 = vld [vmem:[#allocation4 + $0x448] sm:$0xff]  ;;  %v2355_v53 = vpack.c.bf16 %v1244_v52, %v1243_v51 }
  0xc6   : > { %2302 = vmatpush3.bf16.msra.mxu0 %v2299_v47  ;;  %2176 = vmatprep.subr.bf16.mxu1 %v2175_v54  ;;  %v2347_v47 = vpack.c.bf16 %v1240_v46, %v1239_v45 }
  0xc7   : > { %2304 = vmatprep.subr.bf16.mxu0 %v2303_v55  ;;  %1897 = vmatprep.mubr.f32.mxu1 %v1588_v60 }
  0xc8   : > { %2037 = vmatprep.mubr.f32.mxu0 %v1594_v61 }
  0xc9   : > { %2178 = vmatpush3.bf16.msra.mxu1 %v2175_v54  ;;  %v1245_v54 = vld [vmem:[#allocation4 + $0x470] sm:$0xff] }
  0xca   : > { %2306 = vmatpush3.bf16.msra.mxu0 %v2303_v55  ;;  %2180 = vmatprep.subr.bf16.mxu1 %v2179_v62  ;;  %v1246_v55 = vld [vmem:[#allocation4 + $0x478] sm:$0xff] }
  0xcb   : > { %2308 = vmatprep.subr.bf16.mxu0 %v2307_v63  ;;  %v2359_v56 = vpack.c.bf16 %v1246_v55, %v1245_v54 }
  0xcd   : > { %2182 = vmatpush3.bf16.msra.mxu1 %v2179_v62 }
  0xce   : > { %2310 = vmatpush3.bf16.msra.mxu0 %v2307_v63  ;;  %2184 = vmatprep.subr.bf16.mxu1 %v2183_v4 }
  0xcf   : > { %2312 = vmatprep.subr.bf16.mxu0 %v2311_v5 }
  0xd1   : > { %2186 = vmatpush3.bf16.msra.mxu1 %v2183_v4 }
  0xd2   : > { %2314 = vmatpush3.bf16.msra.mxu0 %v2311_v5  ;;  %2188 = vmatprep.subr.bf16.mxu1 %v2187_v10 }
  0xd3   : > { %2316 = vmatprep.subr.bf16.mxu0 %v2315_v11 }
  0xd5   : > { %2190 = vmatpush3.bf16.msra.mxu1 %v2187_v10 }
  0xd6   : > { %2318 = vmatpush3.bf16.msra.mxu0 %v2315_v11  ;;  %2192 = vmatprep.subr.bf16.mxu1 %v2191_v16 }
  0xd7   : > { %2320 = vmatprep.subr.bf16.mxu0 %v2319_v17 }
  0xd9   : > { %2194 = vmatpush3.bf16.msra.mxu1 %v2191_v16 }
  0xda   : > { %2322 = vmatpush3.bf16.msra.mxu0 %v2319_v17  ;;  %2196 = vmatprep.subr.bf16.mxu1 %v2195_v22 }
  0xdb   : > { %2324 = vmatprep.subr.bf16.mxu0 %v2323_v23 }
  0xdd   : > { %2198 = vmatpush3.bf16.msra.mxu1 %v2195_v22 }
  0xde   : > { %2326 = vmatpush3.bf16.msra.mxu0 %v2323_v23  ;;  %2200 = vmatprep.subr.bf16.mxu1 %v2199_v28 }
  0xdf   : > { %2328 = vmatprep.subr.bf16.mxu0 %v2327_v29 }
  0xe1   : > { %2202 = vmatpush3.bf16.msra.mxu1 %v2199_v28 }
  0xe2   : > { %2330 = vmatpush3.bf16.msra.mxu0 %v2327_v29 }
  0xe3   : > { %2332 = vmatprep.subr.bf16.mxu0 %v2331_v32 }
  0xe4   : > { %1898 = vmatmul.mubr.f32.vlgmr.msra.gmra.mrb[0].mxu1 %v1589_v35 }
  0xe5   : > { %2038 = vmatmul.mubr.f32.vlgmr.msra.gmra.mrb[0].mxu0 %v1595_v36 }
  0xe6   : > { %2334 = vmatpush3.bf16.msra.mxu0 %v2331_v32  ;;  %2072 = vmatprep.mubr.f32.mxu0 %v1228_v38 }
  0xe7   : > { %2336 = vmatprep.subr.bf16.mxu0 %v2335_v37 }
  0xea   : > { %2338 = vmatpush3.bf16.msra.mxu0 %v2335_v37 }
  0xeb   : > { %2340 = vmatprep.subr.bf16.mxu0 %v2339_v41 }
  0xee   : > { %2342 = vmatpush3.bf16.msra.mxu0 %v2339_v41 }
  0xef   : > { %2344 = vmatprep.subr.bf16.mxu0 %v2343_v44 }
  0xf2   : > { %2346 = vmatpush3.bf16.msra.mxu0 %v2343_v44 }
  0xf3   : > { %2348 = vmatprep.subr.bf16.mxu0 %v2347_v47 }
  0xf6   : > { %2350 = vmatpush3.bf16.msra.mxu0 %v2347_v47 }
  0xf7   : > { %2352 = vmatprep.subr.bf16.mxu0 %v2351_v50 }
  0xfa   : > { %2354 = vmatpush3.bf16.msra.mxu0 %v2351_v50 }
  0xfb   : > { %2356 = vmatprep.subr.bf16.mxu0 %v2355_v53 }
  0xfe   : > { %2358 = vmatpush3.bf16.msra.mxu0 %v2355_v53 }
  0xff   : > { %2360 = vmatprep.subr.bf16.mxu0 %v2359_v56 }
 0x102   : > { %2362 = vmatpush3.bf16.msra.mxu0 %v2359_v56 }
 0x105   : > { %2073 = vmatmul.mubr.f32.vlgmr.msra.gmra.mrb[0].mxu0 %v1229_v57 }
 0x1b7   : > { %v1899_v58 = vpop.f32.mrb[0].mxu1 }
 0x1b8   : > { %v831_v59 = vpop.f32.mrb[1].mxu1 }
 0x1d8   : > { %v2074_v60 = vpop.f32.mrb[0].mxu0 }
 0x1d9   : > { %v2363_v61 = vadd.f32 %v2074_v60, %v1899_v58  ;;  %v1313_v62 = vpop.f32.mrb[1].mxu0 }
 0x1da   : > { %v2364_v63 = vadd.f32 %v1313_v62, %v831_v59 }
 0x1db   : > { %v1325_v0 = vsel %vm1324_vm0, %v2363_v61, 0.0  ;;  %v1335_v1 = vmul.f32 %v2363_v61, %v2363_v61  ;;  %1346 = vst [vmem:[%s446_s17 + $0x8] sm:$0xf] %v2363_v61 }
 0x1dc   : > { %v1326_v2 = vadd.f32 %v2364_v63, %v1325_v0  ;;  %v1334_v3 = vmul.f32 %v2364_v63, %v2364_v63  ;;  %1345 = vst [vmem:[%s446_s17] sm:$0xff] %v2364_v63 }
 0x1dd   : > { %v1336_v4 = vsel %vm1324_vm0, %v1335_v1, 0.0 }
 0x1de   : > { %v1327_v5 = vrot.slane %v1326_v2, 4  ;;  %v1337_v6 = vadd.f32 %v1336_v4, %v1334_v3 }
 0x1e0   : > { %v1328_v7 = vadd.f32 %v1327_v5, %v1326_v2  ;;  %v1338_v8 = vrot.slane %v1337_v6, 4 }
 0x1e2   : > { %v1329_v9 = vrot.slane %v1328_v7, 2  ;;  %v1339_v10 = vadd.f32 %v1338_v8, %v1337_v6 }
 0x1e4   : > { %v1330_v11 = vadd.f32 %v1329_v9, %v1328_v7  ;;  %v1340_v12 = vrot.slane %v1339_v10, 2 }
 0x1e6   : > { %v1331_v13 = vrot.slane %v1330_v11, 1  ;;  %v1341_v14 = vadd.f32 %v1340_v12, %v1339_v10 }
 0x1e8   : > { %v1332_v15 = vadd.f32 %v1331_v13, %v1330_v11  ;;  %v1342_v16 = vrot.slane %v1341_v14, 1 }
 0x1ea   : > { %1333 = vst [vmem:[%s453_s6] sm:$0x1] %v1332_v15  ;;  %v1343_v17 = vadd.f32 %v1342_v16, %v1341_v14 }
 0x1ec   : > { %1344 = vst [vmem:[%s460_s30] sm:$0x1] %v1343_v17 }
 0x1ed PF: > { %s17_s26 = sadd.s32 1, %s2569_s26   ;;  %s2834_s22 = sld [smem:[#allocation10_spill]] }
 0x1ee   : > { %p14_p2 = scmp.ge.s32.totalorder %s17_s26, 26   ;;  %s2835_s23 = sld [smem:[#allocation9_spill]] }
 0x1ef   : > { %s2836_s27 = sld [smem:[#allocation7_spill]]  ;;  %s2837_s10 = sld [smem:[#allocation8_spill]] }
 0x1f0   : > { %s2838_s18 = smov %s2541_s19  ;;  %s2840_s20 = smov %s2549_s21 }
 0x1f1   :  { %16 = sbr.rel (!%p14_p2) target bundleno = 7 (0x7), region = 192 }
 0x1f3   : > { %s2839_s19 = smov %s2834_s22  ;;  %s2842_s22 = smov %s2561_s24 }
 0x1f4   : > { %s2841_s21 = smov %s2835_s23  ;;  %s2843_s23 = smov %s2565_s25 }
 0x1f5   : > { %s2844_s24 = smov %s2836_s27  ;;  %s2845_s25 = smov %s2837_s10 }
 0x1f8   :  { %1416 = vsyncpa [#allocation5], 1 }
 0x1f9   :  { %1418 = vsyncpa [#allocation5 + $0x1], 1 }

// kernel: discriminator_forward.10
= control target key start
LH: loop header
LB: loop body
LE: loop exit
PB: predicated region body
PF: predicated region fallthrough
CT: control target
= control target key end

     0   :  { %s607_s0 = inlined_call_operand.vmem [shape: f32[288,128], index: 0, kind: input, shape index: {}]   ;;  %s608_s1 = inlined_call_operand.vmem [shape: f32[1,128], index: 1, kind: input, shape index: {}]   ;;  %s609_s2 = inlined_call_operand.vmem [shape: f32[1,128], index: 2, kind: input, shape index: {}]   ;;  %s610_s3 = inlined_call_operand.vmem [shape: f32[288,128], index: 3, kind: output, shape index: {}]  }
   0x1   :  { %v14_v0 = vld [vmem:[%s607_s0] sm:$0xff]  ;;  %v15_v4 = vld [vmem:[%s607_s0 + $0x8] sm:$0xff]  ;;  %v16_v5 = vld [vmem:[%s607_s0 + $0x10] sm:$0xff] }
   0x2   :  { %v312_v1 = vld [vmem:[%s608_s1] ss:$0 sm:$0xff]  ;;  %v17_v6 = vld [vmem:[%s607_s0 + $0x18] sm:$0xff]  ;;  %v19_v11 = vld [vmem:[%s607_s0 + $0x28] sm:$0xff] }
   0x3   :  { %v317_v2 = vld [vmem:[%s609_s2] ss:$0 sm:$0xff]  ;;  %v57_v3 = vmul.f32 %v312_v1, %v14_v0  ;;  %v58_v7 = vmul.f32 %v312_v1, %v15_v4  ;;  %v59_v8 = vmul.f32 %v312_v1, %v16_v5  ;;  %v60_v9 = vmul.f32 %v312_v1, %v17_v6  ;;  %v20_v12 = vld [vmem:[%s607_s0 + $0x30] sm:$0xff]  ;;  %v21_v17 = vld [vmem:[%s607_s0 + $0x38] sm:$0xff] }
   0x4   :  { %v18_v10 = vld [vmem:[%s607_s0 + $0x20] sm:$0xff]  ;;  %v62_v15 = vmul.f32 %v312_v1, %v19_v11  ;;  %v63_v16 = vmul.f32 %v312_v1, %v20_v12  ;;  %v64_v21 = vmul.f32 %v312_v1, %v21_v17  ;;  %v23_v30 = vld [vmem:[%s607_s0 + $0x48] sm:$0xff]  ;;  %v24_v31 = vld [vmem:[%s607_s0 + $0x50] sm:$0xff] }
   0x5   :  { %v100_v13 = vadd.f32 %v317_v2, %v57_v3  ;;  %v61_v14 = vmul.f32 %v312_v1, %v18_v10  ;;  %v101_v18 = vadd.f32 %v317_v2, %v58_v7  ;;  %v102_v19 = vadd.f32 %v317_v2, %v59_v8  ;;  %v22_v25 = vld [vmem:[%s607_s0 + $0x40] sm:$0xff]  ;;  %v25_v43 = vld [vmem:[%s607_s0 + $0x58] sm:$0xff]  ;;  %v27_v45 = vld [vmem:[%s607_s0 + $0x68] sm:$0xff] }
   0x6   :  { %v103_v20 = vadd.f32 %v317_v2, %v60_v9  ;;  %v105_v24 = vadd.f32 %v317_v2, %v62_v15  ;;  %v106_v37 = vadd.f32 %v317_v2, %v63_v16  ;;  %v107_v38 = vadd.f32 %v317_v2, %v64_v21  ;;  %v26_v44 = vld [vmem:[%s607_s0 + $0x60] sm:$0xff]  ;;  %v28_v56 = vld [vmem:[%s607_s0 + $0x70] sm:$0xff]  ;;  %v29_v4 = vld [vmem:[%s607_s0 + $0x78] sm:$0xff] }
   0x7   :  { %vm136_vm0 = vcmp.ge.f32.partialorder %v100_v13, 0.0  ;;  %v172_v22 = vmul.f32 0.2, %v100_v13  ;;  %v104_v23 = vadd.f32 %v317_v2, %v61_v14  ;;  %vm137_vm1 = vcmp.ge.f32.partialorder %v101_v18, 0.0  ;;  %v30_v5 = vld [vmem:[%s607_s0 + $0x80] sm:$0xff]  ;;  %v31_v9 = vld [vmem:[%s607_s0 + $0x88] sm:$0xff] }
   0x8   :  { %v173_v26 = vmul.f32 0.2, %v101_v18  ;;  %vm138_vm2 = vcmp.ge.f32.partialorder %v102_v19, 0.0  ;;  %v174_v27 = vmul.f32 0.2, %v102_v19  ;;  %vm139_vm3 = vcmp.ge.f32.partialorder %v103_v20, 0.0 }
   0x9   :  { %v208_v28 = vsel %vm136_vm0, %v100_v13, %v172_v22  ;;  %v175_v29 = vmul.f32 0.2, %v103_v20  ;;  %vm140_vm4 = vcmp.ge.f32.partialorder %v104_v23, 0.0  ;;  %v176_v34 = vmul.f32 0.2, %v104_v23  ;;  %v32_v10 = vld [vmem:[%s607_s0 + $0x90] sm:$0xff] }
   0xa   :  { %244 = vst [vmem:[%s610_s3] sm:$0xff] %v208_v28  ;;  %v209_v32 = vsel %vm137_vm1, %v101_v18, %v173_v26  ;;  %v210_v33 = vsel %vm138_vm2, %v102_v19, %v174_v27  ;;  %vm141_vm5 = vcmp.ge.f32.partialorder %v105_v24, 0.0  ;;  %v177_v36 = vmul.f32 0.2, %v105_v24  ;;  %v33_v17 = vld [vmem:[%s607_s0 + $0x98] sm:$0xff]  ;;  %v34_v18 = vld [vmem:[%s607_s0 + $0xa0] sm:$0xff] }
   0xb   :  { %245 = vst [vmem:[%s610_s3 + $0x8] sm:$0xff] %v209_v32  ;;  %246 = vst [vmem:[%s610_s3 + $0x10] sm:$0xff] %v210_v33  ;;  %v211_v35 = vsel %vm139_vm3, %v103_v20, %v175_v29  ;;  %v212_v39 = vsel %vm140_vm4, %v104_v23, %v176_v34  ;;  %v65_v40 = vmul.f32 %v312_v1, %v22_v25  ;;  %vm142_vm6 = vcmp.ge.f32.partialorder %v106_v37, 0.0  ;;  %v35_v32 = vld [vmem:[%s607_s0 + $0xa8] sm:$0xff]  ;;  %v36_v33 = vld [vmem:[%s607_s0 + $0xb0] sm:$0xff] }
   0xc   :  { %247 = vst [vmem:[%s610_s3 + $0x18] sm:$0xff] %v211_v35  ;;  %v66_v41 = vmul.f32 %v312_v1, %v23_v30  ;;  %v67_v42 = vmul.f32 %v312_v1, %v24_v31  ;;  %248 = vst [vmem:[%s610_s3 + $0x20] sm:$0xff] %v212_v39  ;;  %v213_v46 = vsel %vm141_vm5, %v105_v24, %v177_v36  ;;  %v178_v47 = vmul.f32 0.2, %v106_v37 }
   0xd   :  { %vm143_vm7 = vcmp.ge.f32.partialorder %v107_v38, 0.0  ;;  %249 = vst [vmem:[%s610_s3 + $0x28] sm:$0xff] %v213_v46  ;;  %v179_v48 = vmul.f32 0.2, %v107_v38  ;;  %v108_v49 = vadd.f32 %v317_v2, %v65_v40  ;;  %v68_v53 = vmul.f32 %v312_v1, %v25_v43  ;;  %v37_v40 = vld [vmem:[%s607_s0 + $0xb8] sm:$0xff]  ;;  %v39_v46 = vld [vmem:[%s607_s0 + $0xc8] sm:$0xff] }
   0xe   :  { %v109_v50 = vadd.f32 %v317_v2, %v66_v41  ;;  %v110_v51 = vadd.f32 %v317_v2, %v67_v42  ;;  %v214_v52 = vsel %vm142_vm6, %v106_v37, %v178_v47  ;;  %v69_v54 = vmul.f32 %v312_v1, %v26_v44  ;;  %v40_v47 = vld [vmem:[%s607_s0 + $0xd0] sm:$0xff] }
   0xf   :  { %v70_v55 = vmul.f32 %v312_v1, %v27_v45  ;;  %250 = vst [vmem:[%s610_s3 + $0x30] sm:$0xff] %v214_v52  ;;  %v215_v57 = vsel %vm143_vm7, %v107_v38, %v179_v48  ;;  %vm144_vm8 = vcmp.ge.f32.partialorder %v108_v49, 0.0  ;;  %v180_v58 = vmul.f32 0.2, %v108_v49  ;;  %v38_v45 = vld [vmem:[%s607_s0 + $0xc0] sm:$0xff] }
  0x10   :  { %vm145_vm9 = vcmp.ge.f32.partialorder %v109_v50, 0.0  ;;  %251 = vst [vmem:[%s610_s3 + $0x38] sm:$0xff] %v215_v57  ;;  %v181_v59 = vmul.f32 0.2, %v109_v50  ;;  %vm146_vm10 = vcmp.ge.f32.partialorder %v110_v51, 0.0  ;;  %v111_v61 = vadd.f32 %v317_v2, %v68_v53 }
  0x11   :  { %v182_v60 = vmul.f32 0.2, %v110_v51  ;;  %v216_v62 = vsel %vm144_vm8, %v108_v49, %v180_v58  ;;  %v112_v63 = vadd.f32 %v317_v2, %v69_v54  ;;  %v113_v0 = vadd.f32 %v317_v2, %v70_v55  ;;  %v41_v58 = vld [vmem:[%s607_s0 + $0xd8] sm:$0xff] }
  0x12   :  { %v71_v3 = vmul.f32 %v312_v1, %v28_v56  ;;  %252 = vst [vmem:[%s610_s3 + $0x40] sm:$0xff] %v216_v62  ;;  %v217_v6 = vsel %vm145_vm9, %v109_v50, %v181_v59  ;;  %vm147_vm11 = vcmp.ge.f32.partialorder %v111_v61, 0.0  ;;  %v183_v8 = vmul.f32 0.2, %v111_v61  ;;  %v42_v59 = vld [vmem:[%s607_s0 + $0xe0] sm:$0xff] }
  0x13   :  { %v218_v7 = vsel %vm146_vm10, %v110_v51, %v182_v60  ;;  %253 = vst [vmem:[%s610_s3 + $0x48] sm:$0xff] %v217_v6  ;;  %vm148_vm12 = vcmp.ge.f32.partialorder %v112_v63, 0.0  ;;  %v184_v11 = vmul.f32 0.2, %v112_v63  ;;  %vm149_vm13 = vcmp.ge.f32.partialorder %v113_v0, 0.0 }
  0x14   :  { %254 = vst [vmem:[%s610_s3 + $0x50] sm:$0xff] %v218_v7  ;;  %v185_v12 = vmul.f32 0.2, %v113_v0  ;;  %v219_v13 = vsel %vm147_vm11, %v111_v61, %v183_v8  ;;  %v114_v14 = vadd.f32 %v317_v2, %v71_v3  ;;  %v72_v15 = vmul.f32 %v312_v1, %v29_v4 }
  0x15   :  { %v73_v16 = vmul.f32 %v312_v1, %v30_v5  ;;  %255 = vst [vmem:[%s610_s3 + $0x58] sm:$0xff] %v219_v13  ;;  %v220_v19 = vsel %vm148_vm12, %v112_v63, %v184_v11  ;;  %v74_v21 = vmul.f32 %v312_v1, %v31_v9  ;;  %v75_v22 = vmul.f32 %v312_v1, %v32_v10  ;;  %v43_v10 = vld [vmem:[%s607_s0 + $0xe8] sm:$0xff]  ;;  %v44_v11 = vld [vmem:[%s607_s0 + $0xf0] sm:$0xff] }
  0x16   :  { %v221_v20 = vsel %vm149_vm13, %v113_v0, %v185_v12  ;;  %256 = vst [vmem:[%s610_s3 + $0x60] sm:$0xff] %v220_v19  ;;  %vm150_vm14 = vcmp.ge.f32.partialorder %v114_v14, 0.0  ;;  %v186_v23 = vmul.f32 0.2, %v114_v14  ;;  %v115_v24 = vadd.f32 %v317_v2, %v72_v15 }
  0x17   :  { %257 = vst [vmem:[%s610_s3 + $0x68] sm:$0xff] %v221_v20  ;;  %v116_v25 = vadd.f32 %v317_v2, %v73_v16  ;;  %v117_v26 = vadd.f32 %v317_v2, %v74_v21  ;;  %v118_v27 = vadd.f32 %v317_v2, %v75_v22  ;;  %v76_v28 = vmul.f32 %v312_v1, %v33_v17 }
  0x18   :  { %v77_v29 = vmul.f32 %v312_v1, %v34_v18  ;;  %v222_v30 = vsel %vm150_vm14, %v114_v14, %v186_v23  ;;  %vm151_vm15 = vcmp.ge.f32.partialorder %v115_v24, 0.0  ;;  %v187_v31 = vmul.f32 0.2, %v115_v24  ;;  %v45_v18 = vld [vmem:[%s607_s0 + $0xf8] sm:$0xff]  ;;  %v46_v23 = vld [vmem:[%s607_s0 + $0x100] sm:$0xff] }
  0x19   :  { %vm152_vm0 = vcmp.ge.f32.partialorder %v116_v25, 0.0  ;;  %258 = vst [vmem:[%s610_s3 + $0x70] sm:$0xff] %v222_v30  ;;  %v188_v34 = vmul.f32 0.2, %v116_v25  ;;  %vm153_vm1 = vcmp.ge.f32.partialorder %v117_v26, 0.0  ;;  %vm154_vm2 = vcmp.ge.f32.partialorder %v118_v27, 0.0 }
  0x1a   :  { %v189_v35 = vmul.f32 0.2, %v117_v26  ;;  %v223_v36 = vsel %vm151_vm15, %v115_v24, %v187_v31  ;;  %v190_v37 = vmul.f32 0.2, %v118_v27  ;;  %v119_v38 = vadd.f32 %v317_v2, %v76_v28  ;;  %v47_v24 = vld [vmem:[%s607_s0 + $0x108] sm:$0xff] }
  0x1b   :  { %v120_v39 = vadd.f32 %v317_v2, %v77_v29  ;;  %259 = vst [vmem:[%s610_s3 + $0x78] sm:$0xff] %v223_v36  ;;  %v224_v41 = vsel %vm152_vm0, %v116_v25, %v188_v34  ;;  %v78_v43 = vmul.f32 %v312_v1, %v35_v32  ;;  %v79_v44 = vmul.f32 %v312_v1, %v36_v33  ;;  %v48_v25 = vld [vmem:[%s607_s0 + $0x110] sm:$0xff]  ;;  %v49_v36 = vld [vmem:[%s607_s0 + $0x118] sm:$0xff] }
  0x1c   :  { %v225_v42 = vsel %vm153_vm1, %v117_v26, %v189_v35  ;;  %260 = vst [vmem:[%s610_s3 + $0x80] sm:$0xff] %v224_v41  ;;  %v226_v48 = vsel %vm154_vm2, %v118_v27, %v190_v37  ;;  %vm155_vm3 = vcmp.ge.f32.partialorder %v119_v38, 0.0  ;;  %v191_v49 = vmul.f32 0.2, %v119_v38 }
  0x1d   :  { %261 = vst [vmem:[%s610_s3 + $0x88] sm:$0xff] %v225_v42  ;;  %vm156_vm4 = vcmp.ge.f32.partialorder %v120_v39, 0.0  ;;  %262 = vst [vmem:[%s610_s3 + $0x90] sm:$0xff] %v226_v48  ;;  %v192_v50 = vmul.f32 0.2, %v120_v39  ;;  %v121_v51 = vadd.f32 %v317_v2, %v78_v43  ;;  %v122_v52 = vadd.f32 %v317_v2, %v79_v44 }
  0x1e   :  { %v80_v53 = vmul.f32 %v312_v1, %v37_v40  ;;  %v227_v54 = vsel %vm155_vm3, %v119_v38, %v191_v49  ;;  %v81_v55 = vmul.f32 %v312_v1, %v38_v45  ;;  %v82_v56 = vmul.f32 %v312_v1, %v39_v46 }
  0x1f   :  { %v83_v57 = vmul.f32 %v312_v1, %v40_v47  ;;  %263 = vst [vmem:[%s610_s3 + $0x98] sm:$0xff] %v227_v54  ;;  %v228_v60 = vsel %vm156_vm4, %v120_v39, %v192_v50  ;;  %vm157_vm5 = vcmp.ge.f32.partialorder %v121_v51, 0.0  ;;  %v193_v61 = vmul.f32 0.2, %v121_v51 }
  0x20   :  { %vm158_vm6 = vcmp.ge.f32.partialorder %v122_v52, 0.0  ;;  %264 = vst [vmem:[%s610_s3 + $0xa0] sm:$0xff] %v228_v60  ;;  %v194_v62 = vmul.f32 0.2, %v122_v52  ;;  %v123_v63 = vadd.f32 %v317_v2, %v80_v53  ;;  %v124_v0 = vadd.f32 %v317_v2, %v81_v55 }
  0x21   :  { %v125_v3 = vadd.f32 %v317_v2, %v82_v56  ;;  %v229_v4 = vsel %vm157_vm5, %v121_v51, %v193_v61  ;;  %v126_v5 = vadd.f32 %v317_v2, %v83_v57  ;;  %v84_v6 = vmul.f32 %v312_v1, %v41_v58 }
  0x22   :  { %v85_v7 = vmul.f32 %v312_v1, %v42_v59  ;;  %265 = vst [vmem:[%s610_s3 + $0xa8] sm:$0xff] %v229_v4  ;;  %v230_v8 = vsel %vm158_vm6, %v122_v52, %v194_v62  ;;  %vm159_vm7 = vcmp.ge.f32.partialorder %v123_v63, 0.0  ;;  %v195_v9 = vmul.f32 0.2, %v123_v63 }
  0x23   :  { %vm160_vm8 = vcmp.ge.f32.partialorder %v124_v0, 0.0  ;;  %266 = vst [vmem:[%s610_s3 + $0xb0] sm:$0xff] %v230_v8  ;;  %v196_v12 = vmul.f32 0.2, %v124_v0  ;;  %vm161_vm9 = vcmp.ge.f32.partialorder %v125_v3, 0.0  ;;  %vm162_vm10 = vcmp.ge.f32.partialorder %v126_v5, 0.0 }
  0x24   :  { %v197_v13 = vmul.f32 0.2, %v125_v3  ;;  %v231_v14 = vsel %vm159_vm7, %v123_v63, %v195_v9  ;;  %v198_v15 = vmul.f32 0.2, %v126_v5  ;;  %v127_v16 = vadd.f32 %v317_v2, %v84_v6 }
  0x25   :  { %v128_v17 = vadd.f32 %v317_v2, %v85_v7  ;;  %267 = vst [vmem:[%s610_s3 + $0xb8] sm:$0xff] %v231_v14  ;;  %v232_v19 = vsel %vm160_vm8, %v124_v0, %v196_v12  ;;  %v86_v21 = vmul.f32 %v312_v1, %v43_v10  ;;  %v87_v22 = vmul.f32 %v312_v1, %v44_v11 }
  0x26   :  { %v233_v20 = vsel %vm161_vm9, %v125_v3, %v197_v13  ;;  %268 = vst [vmem:[%s610_s3 + $0xc0] sm:$0xff] %v232_v19  ;;  %v234_v26 = vsel %vm162_vm10, %v126_v5, %v198_v15  ;;  %vm163_vm11 = vcmp.ge.f32.partialorder %v127_v16, 0.0  ;;  %v199_v27 = vmul.f32 0.2, %v127_v16 }
  0x27   :  { %269 = vst [vmem:[%s610_s3 + $0xc8] sm:$0xff] %v233_v20  ;;  %vm164_vm12 = vcmp.ge.f32.partialorder %v128_v17, 0.0  ;;  %270 = vst [vmem:[%s610_s3 + $0xd0] sm:$0xff] %v234_v26  ;;  %v200_v28 = vmul.f32 0.2, %v128_v17  ;;  %v129_v29 = vadd.f32 %v317_v2, %v86_v21  ;;  %v130_v30 = vadd.f32 %v317_v2, %v87_v22 }
  0x28   :  { %v88_v31 = vmul.f32 %v312_v1, %v45_v18  ;;  %v235_v32 = vsel %vm163_vm11, %v127_v16, %v199_v27  ;;  %v89_v33 = vmul.f32 %v312_v1, %v46_v23  ;;  %v90_v34 = vmul.f32 %v312_v1, %v47_v24 }
  0x29   :  { %v91_v35 = vmul.f32 %v312_v1, %v48_v25  ;;  %271 = vst [vmem:[%s610_s3 + $0xd8] sm:$0xff] %v235_v32  ;;  %v236_v37 = vsel %vm164_vm12, %v128_v17, %v200_v28  ;;  %vm165_vm13 = vcmp.ge.f32.partialorder %v129_v29, 0.0  ;;  %v201_v38 = vmul.f32 0.2, %v129_v29 }
  0x2a   :  { %vm166_vm14 = vcmp.ge.f32.partialorder %v130_v30, 0.0  ;;  %272 = vst [vmem:[%s610_s3 + $0xe0] sm:$0xff] %v236_v37  ;;  %v202_v39 = vmul.f32 0.2, %v130_v30  ;;  %v131_v40 = vadd.f32 %v317_v2, %v88_v31  ;;  %v132_v41 = vadd.f32 %v317_v2, %v89_v33 }
  0x2b   :  { %v133_v42 = vadd.f32 %v317_v2, %v90_v34  ;;  %v237_v43 = vsel %vm165_vm13, %v129_v29, %v201_v38  ;;  %v134_v44 = vadd.f32 %v317_v2, %v91_v35  ;;  %v92_v45 = vmul.f32 %v312_v1, %v49_v36 }
  0x2c   :  { %273 = vst [vmem:[%s610_s3 + $0xe8] sm:$0xff] %v237_v43  ;;  %v238_v46 = vsel %vm166_vm14, %v130_v30, %v202_v39  ;;  %vm167_vm15 = vcmp.ge.f32.partialorder %v131_v40, 0.0  ;;  %v203_v47 = vmul.f32 0.2, %v131_v40  ;;  %vm168_vm0 = vcmp.ge.f32.partialorder %v132_v41, 0.0 }
  0x2d   :  { %274 = vst [vmem:[%s610_s3 + $0xf0] sm:$0xff] %v238_v46  ;;  %v204_v48 = vmul.f32 0.2, %v132_v41  ;;  %vm169_vm1 = vcmp.ge.f32.partialorder %v133_v42, 0.0  ;;  %v205_v49 = vmul.f32 0.2, %v133_v42  ;;  %v135_v1 = vadd.f32 %v317_v2, %v92_v45 }
  0x2e   :  { %vm170_vm2 = vcmp.ge.f32.partialorder %v134_v44, 0.0  ;;  %v239_v50 = vsel %vm167_vm15, %v131_v40, %v203_v47  ;;  %v206_v51 = vmul.f32 0.2, %v134_v44 }
  0x2f   :  { %275 = vst [vmem:[%s610_s3 + $0xf8] sm:$0xff] %v239_v50  ;;  %v240_v52 = vsel %vm168_vm0, %v132_v41, %v204_v48  ;;  %v241_v53 = vsel %vm169_vm1, %v133_v42, %v205_v49  ;;  %vm171_vm3 = vcmp.ge.f32.partialorder %v135_v1, 0.0  ;;  %v207_v55 = vmul.f32 0.2, %v135_v1 }
  0x30   :  { %276 = vst [vmem:[%s610_s3 + $0x100] sm:$0xff] %v240_v52  ;;  %277 = vst [vmem:[%s610_s3 + $0x108] sm:$0xff] %v241_v53  ;;  %v242_v54 = vsel %vm170_vm2, %v134_v44, %v206_v51 }
  0x31   :  { %278 = vst [vmem:[%s610_s3 + $0x110] sm:$0xff] %v242_v54  ;;  %v243_v2 = vsel %vm171_vm3, %v135_v1, %v207_v55 }
  0x32   :  { %279 = vst [vmem:[%s610_s3 + $0x118] sm:$0xff] %v243_v2 }

// kernel: discriminator_forward.11
= control target key start
LH: loop header
LB: loop body
LE: loop exit
PB: predicated region body
PF: predicated region fallthrough
CT: control target
= control target key end

     0   :  { %12 = vsyncpa [#allocation3], 0  ;;  %s2500_s21 = smov 0   ;;  %s2502_s22 = smov 0   ;;  %s2654_s0 = inlined_call_operand.vmem [shape: f32[2,14,14,128], index: 0, kind: input, shape index: {}, may-alias: {0,1,2}]   ;;  %s2655_s1 = inlined_call_operand.vmem [shape: f32[2,14,14,128], index: 1, kind: input, shape index: {}, may-alias: {0,1,2}]   ;;  %s2656_s2 = inlined_call_operand.vmem [shape: f32[2,14,14,128], index: 2, kind: input, shape index: {}, may-alias: {0,1,2}]   ;;  %s2657_s3 = inlined_call_operand.hbm [shape: f32[9,128,128], index: 3, kind: input, shape index: {}]   ;;  %s2658_s4 = inlined_call_operand.vmem [shape: f32[2,12,12,128], index: 4, kind: output, shape index: {0}]   ;;  %s2659_s5 = inlined_call_operand.vmem [shape: f32[2,12,1,128], index: 5, kind: output, shape index: {1}]   ;;  %s2660_s6 = inlined_call_operand.vmem [shape: f32[2,12,1,128], index: 6, kind: output, shape index: {2}]  }
   0x1   :  { %s2504_s23 = smov 0   ;;  %s2506_s24 = smov 0  }
   0x2   :  { %s2508_s25 = smov 0  }
   0x3 LB: > { %s1536_s26 = sadd.s32 4294967295, %s2460_s25   ;;  %s27_s27 = sadd.s32 1, %s2452_s23  ;;  %s2460_s25 = sphi %s2508_s25, %s18_s25   ;;  %s2456_s24 = sphi %s2506_s24, %s2673_s24   ;;  %s2452_s23 = sphi %s2504_s23, %s2672_s23   ;;  %s2448_s22 = sphi %s2502_s22, %s2671_s22   ;;  %s2444_s21 = sphi %s2500_s21, %s2670_s21  }
   0x4   : > { %p28_p0 = scmp.ge.s32.totalorder %s27_s27, 12  ;;  %s30_s28 = sadd.s32 1, %s2456_s24 }
   0x5   : > { %p1538_p1 = scmp.ge.s32.totalorder %s2460_s25, 1  ;;  %p228_p2 = scmp.lt.s32.totalorder %s2460_s25, 25 }
   0x6   : > { %s2675_s27 = smov (%p28_p0, %s27_s27), 0  ;;  %s2677_s28 = smov (!%p28_p0, %s30_s28), %s2456_s24 }
   0x7   : > { %p2533_p3 = pnand %p1538_p1, %p228_p2  ;;  %p32_p4 = scmp.ge.s32.totalorder %s2677_s28, 2 }
   0x8   : > { %p2537_p5 = scmp.eq.s32.totalorder %s1536_s26, 0  ;;  %s2462_s7 = smov [#allocation2]  }
   0x9   : > { %s2664_s29 = scalar_select %p2533_p3, 1, 0 }
   0xa   : > { %s2665_s30 = scalar_select %p2537_p5, 1, 0 }
   0xb   : > { %p2341_p6 = pneg %p2533_p3  ;;  %s2679_s28 = smov (%p32_p4, %s2677_s28), 0 }
   0xc   : > { %s240_s8 = sshll.u32 %s2462_s7, 4  ;;  %s2390_s12 = scalar_lea.hbm %s2657_s3, 18432  ;;  %s241_s8 = int_to_ptr.vmem [resolvable:$true] %s240_s8 }
   0xd   : > { %p2547_p7 = pnand %p2537_p5, %p2341_p6  ;;  %p2391_p8 = scmp.ne.s32.totalorder %s2657_s3, %s2390_s12 }
   0xe   : > { %p2397_p12 = scmp.lt.u32.totalorder %s2390_s12, %s2657_s3 }
   0xf   : > { %p2392_p9 = pneg %p2547_p7 }
  0x11   : > { %p2393_p10 = pnand %p2392_p9, %p2391_p8 }
  0x13   : > { %p2394_p11 = pneg %p2393_p10 }
  0x15   : > { %p2399_p13 = pnand %p2397_p12, %p2394_p11 }
  0x17   : > { %2402 = shalt.err (!%p2399_p13)
}
  0x18   : > { %s2403_s17 = scalar_lea.vmem %s241_s8, 18432  ;;  %p2411_p4 = scmp.lt.s32.totalorder %s241_s8, %s241_s8 }
  0x19   : > { %p2404_p0 = scmp.ne.s32.totalorder %s241_s8, %s2403_s17  ;;  %p2412_p6 = scmp.lt.s32.totalorder %s2403_s17, %s2403_s17 }
  0x1b   : > { %p2406_p1 = pnand %p2404_p0, %p2392_p9  ;;  %p2413_p5 = por %p2412_p6, %p2411_p4 }
  0x1d   : > { %p2407_p2 = pneg %p2406_p1 }
  0x1f   : > { %p2414_p3 = pnand %p2413_p5, %p2407_p2 }
  0x21   : > { %2417 = shalt.err (!%p2414_p3)
}
  0x22   : > { %s2463_s18 = smov 128   ;;  %s2464_s19 = smov 8  }
  0x23   : > { %2344 = dma.hbm_to_vmem [thread:$0]  (!%p2547_p7), %s2657_s3, 18432, %s241_s8, [#allocation3], %s2463_s18, %s2463_s18, %s2464_s19  }
  0x24   : > { %p2667_p8 = scmp.ne.s32.totalorder %s2664_s29, 0 }
  0x25   : > { %p2668_p10 = scmp.ne.s32.totalorder (!%p2667_p8), %s2665_s30, 0 }
  0x26   : > { %296 = sbr.rel (%p2667_p8) target bundleno = 442 (0x1ba), region = 36 }
  0x2d   : > { %2439 = dma.done.wait (%p2668_p10), [#allocation3], 18432  }
  0x2e   : > { %2441 = vsyncadd (%p2668_p10), [#allocation3], 4294948864  ;;  %p368_p3 = scmp.lt.s32.totalorder %s2448_s22, 1  ;;  %p370_p5 = scmp.lt.s32.totalorder %s2444_s21, 13  ;;  %v443_v0 = vld [vmem:[#allocation2 + $0x80] sm:$0xff]  ;;  %v444_v1 = vld [vmem:[#allocation2 + $0x88] sm:$0xff] }
  0x2f   : > { %s377_s7 = sadd.s32 1, %s2444_s21  ;;  %v804_v2 = vld [vmem:[#allocation2 + $0x200] sm:$0xff]  ;;  %v2030_v3 = vpack.c.bf16 %v444_v1, %v443_v0  ;;  %v805_v4 = vld [vmem:[#allocation2 + $0x208] sm:$0xff]  ;;  %v445_v5 = vld [vmem:[#allocation2 + $0x90] sm:$0xff]  ;;  %s388_s26 = sadd.s32 2, %s2444_s21  ;;  %vm1281_vm0 = vcmask 1043456  }
  0x30   : > { %s2681_s22 = smov (!%p368_p3, %s2448_s22), 1  ;;  %p2583_p7 = scmp.lt.s32.totalorder %s377_s7, 13  ;;  %v446_v6 = vld [vmem:[#allocation2 + $0x98] sm:$0xff]  ;;  %v2158_v7 = vpack.c.bf16 %v805_v4, %v804_v2  ;;  %v806_v9 = vld [vmem:[#allocation2 + $0x210] sm:$0xff]  ;;  %v447_v11 = vld [vmem:[#allocation2 + $0xa0] sm:$0xff] }
  0x31   : > { %s371_s8 = scalar_select %p370_p5, %s2444_s21, 13  ;;  %v2034_v8 = vpack.c.bf16 %v446_v6, %v445_v5  ;;  %v807_v10 = vld [vmem:[#allocation2 + $0x218] sm:$0xff]  ;;  %2031 = vmatprep.subr.bf16.mxu1 %v2030_v3  ;;  %v448_v13 = vld [vmem:[#allocation2 + $0xa8] sm:$0xff]  ;;  %v808_v14 = vld [vmem:[#allocation2 + $0x220] sm:$0xff] }
  0x32   : > { %s2581_s29 = smul.u32 28, %s2681_s22  ;;  %s2683_s7 = smov (!%p2583_p7, %s377_s7), 13  ;;  %v2162_v12 = vpack.c.bf16 %v807_v10, %v806_v9  ;;  %v809_v15 = vld [vmem:[#allocation2 + $0x228] sm:$0xff]  ;;  %2159 = vmatprep.subr.bf16.mxu0 %v2158_v7  ;;  %2033 = vmatpush3.bf16.msra.mxu1 %v2030_v3  ;;  %v2038_v16 = vpack.c.bf16 %v448_v13, %v447_v11  ;;  %v449_v18 = vld [vmem:[#allocation2 + $0xb0] sm:$0xff]  ;;  %v450_v19 = vld [vmem:[#allocation2 + $0xb8] sm:$0xff] }
  0x33   : > { %s1543_s9 = sshll.u32 %s371_s8, 1  ;;  %s1545_s12 = sshll.u32 %s2683_s7, 1  ;;  %2161 = vmatpush3.bf16.msra.mxu0 %v2158_v7  ;;  %2035 = vmatprep.subr.bf16.mxu1 %v2034_v8  ;;  %v2166_v17 = vpack.c.bf16 %v809_v15, %v808_v14  ;;  %v810_v20 = vld [vmem:[#allocation2 + $0x230] sm:$0xff]  ;;  %v811_v21 = vld [vmem:[#allocation2 + $0x238] sm:$0xff]  ;;  %v2042_v22 = vpack.c.bf16 %v450_v19, %v449_v18  ;;  %v451_v24 = vld [vmem:[#allocation2 + $0xc0] sm:$0xff] }
  0x34   : > { %s374_s30 = sadd.s32 %s2581_s29, %s1543_s9  ;;  %s384_s13 = sadd.s32 %s2581_s29, %s1545_s12  ;;  %2163 = vmatprep.subr.bf16.mxu0 %v2162_v12  ;;  %v2170_v23 = vpack.c.bf16 %v811_v21, %v810_v20  ;;  %v452_v25 = vld [vmem:[#allocation2 + $0xc8] sm:$0xff]  ;;  %v812_v27 = vld [vmem:[#allocation2 + $0x240] sm:$0xff]  ;;  %v453_v32 = vld [vmem:[#allocation2 + $0xd0] sm:$0xff] }
  0x35   : > { %s1544_s11 = sshll.u32 %s374_s30, 3  ;;  %s1546_s14 = sshll.u32 %s384_s13, 3  ;;  %v813_v28 = vld [vmem:[#allocation2 + $0x248] sm:$0xff]  ;;  %v2046_v30 = vpack.c.bf16 %v452_v25, %v451_v24  ;;  %v454_v33 = vld [vmem:[#allocation2 + $0xd8] sm:$0xff]  ;;  %v814_v34 = vld [vmem:[#allocation2 + $0x250] sm:$0xff] }
  0x36   : > { %s2594_s17 = scalar_lea.vmem %s2654_s0, %s1544_s11  ;;  %2037 = vmatpush3.bf16.msra.mxu1 %v2034_v8  ;;  %s2599_s20 = scalar_lea.vmem %s2655_s1, %s1546_s14  ;;  %v2174_v31 = vpack.c.bf16 %v813_v28, %v812_v27  ;;  %v815_v35 = vld [vmem:[#allocation2 + $0x258] sm:$0xff]  ;;  %v2050_v36 = vpack.c.bf16 %v454_v33, %v453_v32  ;;  %v455_v38 = vld [vmem:[#allocation2 + $0xe0] sm:$0xff]  ;;  %v456_v39 = vld [vmem:[#allocation2 + $0xe8] sm:$0xff] }
  0x37   : > { %2165 = vmatpush3.bf16.msra.mxu0 %v2162_v12  ;;  %2039 = vmatprep.subr.bf16.mxu1 %v2038_v16  ;;  %v440_v26 = vld [vmem:[%s2594_s17 + $0x1] sm:$0xff]  ;;  %v2178_v37 = vpack.c.bf16 %v815_v35, %v814_v34  ;;  %v2054_v42 = vpack.c.bf16 %v456_v39, %v455_v38  ;;  %v457_v44 = vld [vmem:[#allocation2 + $0xf0] sm:$0xff]  ;;  %v458_v45 = vld [vmem:[#allocation2 + $0xf8] sm:$0xff]  ;;  %p391_p9 = scmp.lt.s32.totalorder %s388_s26, 13  ;;  %p401_p11 = scmp.lt.s32.totalorder %s2444_s21, 11 }
  0x38   : > { %2167 = vmatprep.subr.bf16.mxu0 %v2166_v17  ;;  %1747 = vmatprep.mubr.f32.mxu1 %v440_v26  ;;  %v801_v29 = vld [vmem:[%s2599_s20 + $0x1] sm:$0xff]  ;;  %v818_v46 = vld [vmem:[#allocation2 + $0x270] sm:$0xff]  ;;  %v819_v47 = vld [vmem:[#allocation2 + $0x278] sm:$0xff]  ;;  %v2058_v48 = vpack.c.bf16 %v458_v45, %v457_v44  ;;  %s2335_s11 = smul.u32 24, %s2681_s22 }
  0x39   : > { %1887 = vmatprep.mubr.f32.mxu0 %v801_v29  ;;  %v816_v40 = vld [vmem:[#allocation2 + $0x260] sm:$0xff]  ;;  %v817_v41 = vld [vmem:[#allocation2 + $0x268] sm:$0xff]  ;;  %v2186_v49 = vpack.c.bf16 %v819_v47, %v818_v46  ;;  %v426_v56 = vld [vmem:[#allocation2 + $0x10] sm:$0xff]  ;;  %s2685_s26 = smov (!%p391_p9, %s388_s26), 13  ;;  %s2687_s21 = smov (!%p401_p11, %s2444_s21), 11 }
  0x3a   : > { %2041 = vmatpush3.bf16.msra.mxu1 %v2038_v16  ;;  %v2182_v43 = vpack.c.bf16 %v817_v41, %v816_v40  ;;  %v424_v50 = vld [vmem:[#allocation2] sm:$0xff]  ;;  %v425_v51 = vld [vmem:[#allocation2 + $0x8] sm:$0xff]  ;;  %v427_v57 = vld [vmem:[#allocation2 + $0x18] sm:$0xff]  ;;  %s1547_s7 = sshll.u32 %s2685_s26, 1  ;;  %s1549_s12 = sshll.u32 %s2687_s21, 1 }
  0x3b   : > { %2169 = vmatpush3.bf16.msra.mxu0 %v2166_v17  ;;  %2043 = vmatprep.subr.bf16.mxu1 %v2042_v22  ;;  %v900_v52 = vld [vmem:[#allocation2 + $0x280] sm:$0xff]  ;;  %v901_v53 = vld [vmem:[#allocation2 + $0x288] sm:$0xff]  ;;  %v2062_v54 = vpack.c.bf16 %v425_v51, %v424_v50  ;;  %v902_v58 = vld [vmem:[#allocation2 + $0x290] sm:$0xff]  ;;  %v2066_v62 = vpack.c.bf16 %v427_v57, %v426_v56  ;;  %s395_s8 = sadd.s32 %s2581_s29, %s1547_s7  ;;  %s405_s13 = sadd.s32 %s2335_s11, %s1549_s12 }
  0x3c   : > { %2171 = vmatprep.subr.bf16.mxu0 %v2170_v23  ;;  %v2190_v55 = vpack.c.bf16 %v901_v53, %v900_v52  ;;  %v903_v59 = vld [vmem:[#allocation2 + $0x298] sm:$0xff]  ;;  %v441_v60 = vld [vmem:[%s2594_s17 + $0x9] sm:$0xf]  ;;  %v428_v0 = vld [vmem:[#allocation2 + $0x20] sm:$0xff]  ;;  %s1548_s9 = sshll.u32 %s395_s8, 3  ;;  %s1550_s14 = sshll.u32 %s405_s13, 3 }
  0x3d   : > { %v802_v61 = vld [vmem:[%s2599_s20 + $0x9] sm:$0xf]  ;;  %v2194_v63 = vpack.c.bf16 %v903_v59, %v902_v58  ;;  %v904_v2 = vld [vmem:[#allocation2 + $0x2a0] sm:$0xff]  ;;  %v430_v8 = vld [vmem:[#allocation2 + $0x30] sm:$0xff]  ;;  %s2614_s30 = scalar_lea.vmem %s2656_s2, %s1548_s9  ;;  %s2336_s18 = smul.u32 12, %s2681_s22 }
  0x3e   : > { %2045 = vmatpush3.bf16.msra.mxu1 %v2042_v22  ;;  %v429_v1 = vld [vmem:[#allocation2 + $0x28] sm:$0xff]  ;;  %v422_v4 = vld [vmem:[%s2594_s17] sm:$0xff]  ;;  %v431_v9 = vld [vmem:[#allocation2 + $0x38] sm:$0xff] }
  0x3f   : > { %2173 = vmatpush3.bf16.msra.mxu0 %v2170_v23  ;;  %2047 = vmatprep.subr.bf16.mxu1 %v2046_v30  ;;  %v905_v3 = vld [vmem:[#allocation2 + $0x2a8] sm:$0xff]  ;;  %v2070_v6 = vpack.c.bf16 %v429_v1, %v428_v0  ;;  %v906_v10 = vld [vmem:[#allocation2 + $0x2b0] sm:$0xff]  ;;  %v907_v11 = vld [vmem:[#allocation2 + $0x2b8] sm:$0xff]  ;;  %v2074_v12 = vpack.c.bf16 %v431_v9, %v430_v8  ;;  %s413_s19 = sadd.s32 %s2336_s18, %s2687_s21 }
  0x40   : > { %2175 = vmatprep.subr.bf16.mxu0 %v2174_v31  ;;  %v897_v5 = vld [vmem:[%s2599_s20 + $0x2] sm:$0xff]  ;;  %v2198_v7 = vpack.c.bf16 %v905_v3, %v904_v2  ;;  %v2202_v13 = vpack.c.bf16 %v907_v11, %v906_v10  ;;  %v434_v20 = vld [vmem:[#allocation2 + $0x50] sm:$0xff]  ;;  %v435_v21 = vld [vmem:[#allocation2 + $0x58] sm:$0xff]  ;;  %s414_s7 = scalar_lea.vmem %s2659_s5, %s413_s19  ;;  %s421_s29 = scalar_lea.vmem %s2660_s6, %s413_s19 }
  0x41   : > { %v432_v14 = vld [vmem:[#allocation2 + $0x40] sm:$0xff]  ;;  %v433_v15 = vld [vmem:[#allocation2 + $0x48] sm:$0xff]  ;;  %v910_v22 = vld [vmem:[#allocation2 + $0x2d0] sm:$0xff]  ;;  %v2082_v24 = vpack.c.bf16 %v435_v21, %v434_v20 }
  0x42   : > { %2049 = vmatpush3.bf16.msra.mxu1 %v2046_v30  ;;  %v908_v16 = vld [vmem:[#allocation2 + $0x2c0] sm:$0xff]  ;;  %v909_v17 = vld [vmem:[#allocation2 + $0x2c8] sm:$0xff]  ;;  %v2078_v18 = vpack.c.bf16 %v433_v15, %v432_v14  ;;  %v911_v23 = vld [vmem:[#allocation2 + $0x2d8] sm:$0xff] }
  0x43   : > { %2177 = vmatpush3.bf16.msra.mxu0 %v2174_v31  ;;  %2051 = vmatprep.subr.bf16.mxu1 %v2050_v36  ;;  %v2206_v19 = vpack.c.bf16 %v909_v17, %v908_v16  ;;  %v2210_v25 = vpack.c.bf16 %v911_v23, %v910_v22  ;;  %v436_v26 = vld [vmem:[#allocation2 + $0x60] sm:$0xff]  ;;  %v437_v27 = vld [vmem:[#allocation2 + $0x68] sm:$0xff]  ;;  %v438_v32 = vld [vmem:[#allocation2 + $0x70] sm:$0xff] }
  0x44   : > { %2179 = vmatprep.subr.bf16.mxu0 %v2178_v37  ;;  %v912_v28 = vld [vmem:[#allocation2 + $0x2e0] sm:$0xff]  ;;  %v913_v29 = vld [vmem:[#allocation2 + $0x2e8] sm:$0xff]  ;;  %v2086_v30 = vpack.c.bf16 %v437_v27, %v436_v26  ;;  %v439_v33 = vld [vmem:[#allocation2 + $0x78] sm:$0xff] }
  0x45   : > { %v2214_v31 = vpack.c.bf16 %v913_v29, %v912_v28  ;;  %v914_v34 = vld [vmem:[#allocation2 + $0x2f0] sm:$0xff]  ;;  %v915_v35 = vld [vmem:[#allocation2 + $0x2f8] sm:$0xff]  ;;  %v612_v38 = vld [vmem:[#allocation2 + $0x100] sm:$0xff] }
  0x46   : > { %2053 = vmatpush3.bf16.msra.mxu1 %v2050_v36  ;;  %v2090_v36 = vpack.c.bf16 %v439_v33, %v438_v32  ;;  %v613_v39 = vld [vmem:[#allocation2 + $0x108] sm:$0xff]  ;;  %v996_v40 = vld [vmem:[#allocation2 + $0x300] sm:$0xff]  ;;  %v614_v44 = vld [vmem:[#allocation2 + $0x110] sm:$0xff] }
  0x47   : > { %2181 = vmatpush3.bf16.msra.mxu0 %v2178_v37  ;;  %2055 = vmatprep.subr.bf16.mxu1 %v2054_v42  ;;  %v2218_v37 = vpack.c.bf16 %v915_v35, %v914_v34  ;;  %v997_v41 = vld [vmem:[#allocation2 + $0x308] sm:$0xff]  ;;  %v615_v45 = vld [vmem:[#allocation2 + $0x118] sm:$0xff]  ;;  %v998_v46 = vld [vmem:[#allocation2 + $0x310] sm:$0xff] }
  0x48   : > { %2183 = vmatprep.subr.bf16.mxu0 %v2182_v43  ;;  %v999_v47 = vld [vmem:[#allocation2 + $0x318] sm:$0xff]  ;;  %v2098_v50 = vpack.c.bf16 %v615_v45, %v614_v44  ;;  %v616_v52 = vld [vmem:[#allocation2 + $0x120] sm:$0xff]  ;;  %v617_v53 = vld [vmem:[#allocation2 + $0x128] sm:$0xff] }
  0x49   : > { %v2226_v51 = vpack.c.bf16 %v999_v47, %v998_v46  ;;  %v609_v56 = vld [vmem:[%s2594_s17 + $0x2] sm:$0xff]  ;;  %v2102_v58 = vpack.c.bf16 %v617_v53, %v616_v52  ;;  %v622_v8 = vld [vmem:[#allocation2 + $0x150] sm:$0xff]  ;;  %v623_v9 = vld [vmem:[#allocation2 + $0x158] sm:$0xff] }
  0x4a   : > { %2057 = vmatpush3.bf16.msra.mxu1 %v2054_v42  ;;  %v2094_v42 = vpack.c.bf16 %v613_v39, %v612_v38  ;;  %v993_v57 = vld [vmem:[%s2614_s30] sm:$0xff]  ;;  %v621_v3 = vld [vmem:[#allocation2 + $0x148] sm:$0xff]  ;;  %v1006_v10 = vld [vmem:[#allocation2 + $0x350] sm:$0xff] }
  0x4b   : > { %2185 = vmatpush3.bf16.msra.mxu0 %v2182_v43  ;;  %2059 = vmatprep.subr.bf16.mxu1 %v2058_v48  ;;  %v2222_v43 = vpack.c.bf16 %v997_v41, %v996_v40  ;;  %v620_v2 = vld [vmem:[#allocation2 + $0x140] sm:$0xff]  ;;  %v1007_v11 = vld [vmem:[#allocation2 + $0x358] sm:$0xff]  ;;  %v625_v15 = vld [vmem:[#allocation2 + $0x168] sm:$0xff] }
  0x4c   : > { %2187 = vmatprep.subr.bf16.mxu0 %v2186_v49  ;;  %v624_v14 = vld [vmem:[#allocation2 + $0x160] sm:$0xff]  ;;  %v1009_v17 = vld [vmem:[#allocation2 + $0x368] sm:$0xff]  ;;  %v626_v20 = vld [vmem:[#allocation2 + $0x170] sm:$0xff] }
  0x4d   : > { %v1008_v16 = vld [vmem:[#allocation2 + $0x360] sm:$0xff]  ;;  %v627_v21 = vld [vmem:[#allocation2 + $0x178] sm:$0xff]  ;;  %v1010_v22 = vld [vmem:[#allocation2 + $0x370] sm:$0xff] }
  0x4e   : > { %2061 = vmatpush3.bf16.msra.mxu1 %v2058_v48  ;;  %v423_v48 = vld [vmem:[%s2594_s17 + $0x8] sm:$0xf]  ;;  %v1011_v23 = vld [vmem:[#allocation2 + $0x378] sm:$0xff]  ;;  %v708_v26 = vld [vmem:[#allocation2 + $0x180] sm:$0xff] }
  0x4f   : > { %2189 = vmatpush3.bf16.msra.mxu0 %v2186_v49  ;;  %2063 = vmatprep.subr.bf16.mxu1 %v2062_v54  ;;  %v898_v49 = vld [vmem:[%s2599_s20 + $0xa] sm:$0xf]  ;;  %v1092_v28 = vld [vmem:[#allocation2 + $0x380] sm:$0xff]  ;;  %v710_v32 = vld [vmem:[#allocation2 + $0x190] sm:$0xff] }
  0x50   : > { %2191 = vmatprep.subr.bf16.mxu0 %v2190_v55  ;;  %v709_v27 = vld [vmem:[#allocation2 + $0x188] sm:$0xff]  ;;  %v711_v33 = vld [vmem:[#allocation2 + $0x198] sm:$0xff]  ;;  %v1094_v34 = vld [vmem:[#allocation2 + $0x390] sm:$0xff] }
  0x51   : > { %1748 = vmatmul.mubr.f32.vlgmr.msra.gmra.mrb[0].mxu1 %v441_v60  ;;  %v618_v60 = vld [vmem:[#allocation2 + $0x130] sm:$0xff]  ;;  %v1093_v29 = vld [vmem:[#allocation2 + $0x388] sm:$0xff]  ;;  %v1095_v35 = vld [vmem:[#allocation2 + $0x398] sm:$0xff]  ;;  %v2130_v38 = vpack.c.bf16 %v711_v33, %v710_v32 }
  0x52   : > { %2065 = vmatpush3.bf16.msra.mxu1 %v2062_v54  ;;  %1888 = vmatmul.mubr.f32.vlgmr.msra.gmra.mrb[0].mxu0 %v802_v61  ;;  %v1000_v54 = vld [vmem:[#allocation2 + $0x320] sm:$0xff]  ;;  %v619_v61 = vld [vmem:[#allocation2 + $0x138] sm:$0xff]  ;;  %v2258_v39 = vpack.c.bf16 %v1095_v35, %v1094_v34  ;;  %v713_v41 = vld [vmem:[#allocation2 + $0x1a8] sm:$0xff] }
  0x53   : > { %2193 = vmatpush3.bf16.msra.mxu0 %v2190_v55  ;;  %2067 = vmatprep.subr.bf16.mxu1 %v2066_v62  ;;  %v1001_v55 = vld [vmem:[#allocation2 + $0x328] sm:$0xff]  ;;  %v2106_v0 = vpack.c.bf16 %v619_v61, %v618_v60  ;;  %v712_v40 = vld [vmem:[#allocation2 + $0x1a0] sm:$0xff]  ;;  %v718_v60 = vld [vmem:[#allocation2 + $0x1d0] sm:$0xff] }
  0x54   : > { %2195 = vmatprep.subr.bf16.mxu0 %v2194_v63  ;;  %1782 = vmatprep.mubr.f32.mxu1 %v422_v4  ;;  %v2230_v59 = vpack.c.bf16 %v1001_v55, %v1000_v54  ;;  %v1004_v4 = vld [vmem:[#allocation2 + $0x340] sm:$0xff]  ;;  %v2134_v46 = vpack.c.bf16 %v713_v41, %v712_v40  ;;  %v717_v55 = vld [vmem:[#allocation2 + $0x1c8] sm:$0xff]  ;;  %v719_v61 = vld [vmem:[#allocation2 + $0x1d8] sm:$0xff] }
  0x55   : > { %1922 = vmatprep.mubr.f32.mxu0 %v897_v5  ;;  %v1005_v5 = vld [vmem:[#allocation2 + $0x348] sm:$0xff]  ;;  %v705_v44 = vld [vmem:[%s2599_s20] sm:$0xff]  ;;  %v1198_v32 = vld [vmem:[#allocation2 + $0x450] sm:$0xff] }
  0x56   : > { %2069 = vmatpush3.bf16.msra.mxu1 %v2066_v62  ;;  %v1002_v62 = vld [vmem:[#allocation2 + $0x330] sm:$0xff]  ;;  %v1089_v45 = vld [vmem:[%s2614_s30 + $0x1] sm:$0xff]  ;;  %v1199_v33 = vld [vmem:[#allocation2 + $0x458] sm:$0xff] }
  0x57   : > { %2197 = vmatpush3.bf16.msra.mxu0 %v2194_v63  ;;  %2071 = vmatprep.subr.bf16.mxu1 %v2070_v6  ;;  %v1003_v63 = vld [vmem:[#allocation2 + $0x338] sm:$0xff]  ;;  %v716_v54 = vld [vmem:[#allocation2 + $0x1c0] sm:$0xff]  ;;  %v2306_v34 = vpack.c.bf16 %v1199_v33, %v1198_v32  ;;  %v1186_v41 = vld [vmem:[%s2614_s30 + $0xa] sm:$0xf] }
  0x58   : > { %2199 = vmatprep.subr.bf16.mxu0 %v2198_v7  ;;  %v2234_v1 = vpack.c.bf16 %v1003_v63, %v1002_v62  ;;  %v1102_v62 = vld [vmem:[#allocation2 + $0x3d0] sm:$0xff]  ;;  %v1103_v63 = vld [vmem:[#allocation2 + $0x3d8] sm:$0xff]  ;;  %v1200_v35 = vld [vmem:[#allocation2 + $0x460] sm:$0xff] }
  0x5a   : > { %2073 = vmatpush3.bf16.msra.mxu1 %v2070_v6  ;;  %v2110_v6 = vpack.c.bf16 %v621_v3, %v620_v2  ;;  %v720_v2 = vld [vmem:[#allocation2 + $0x1e0] sm:$0xff]  ;;  %v721_v3 = vld [vmem:[#allocation2 + $0x1e8] sm:$0xff] }
  0x5b   : > { %2201 = vmatpush3.bf16.msra.mxu0 %v2198_v7  ;;  %2075 = vmatprep.subr.bf16.mxu1 %v2074_v12  ;;  %v2238_v7 = vpack.c.bf16 %v1005_v5, %v1004_v4  ;;  %v1104_v4 = vld [vmem:[#allocation2 + $0x3e0] sm:$0xff]  ;;  %v1105_v5 = vld [vmem:[#allocation2 + $0x3e8] sm:$0xff] }
  0x5c   : > { %2203 = vmatprep.subr.bf16.mxu0 %v2202_v13 }
  0x5e   : > { %2077 = vmatpush3.bf16.msra.mxu1 %v2074_v12  ;;  %v2114_v12 = vpack.c.bf16 %v623_v9, %v622_v8  ;;  %v722_v8 = vld [vmem:[#allocation2 + $0x1f0] sm:$0xff]  ;;  %v723_v9 = vld [vmem:[#allocation2 + $0x1f8] sm:$0xff] }
  0x5f   : > { %2205 = vmatpush3.bf16.msra.mxu0 %v2202_v13  ;;  %2079 = vmatprep.subr.bf16.mxu1 %v2078_v18  ;;  %v2242_v13 = vpack.c.bf16 %v1007_v11, %v1006_v10  ;;  %v1106_v10 = vld [vmem:[#allocation2 + $0x3f0] sm:$0xff]  ;;  %v1107_v11 = vld [vmem:[#allocation2 + $0x3f8] sm:$0xff] }
  0x60   : > { %2207 = vmatprep.subr.bf16.mxu0 %v2206_v19 }
  0x62   : > { %2081 = vmatpush3.bf16.msra.mxu1 %v2078_v18  ;;  %v2118_v18 = vpack.c.bf16 %v625_v15, %v624_v14  ;;  %v1188_v14 = vld [vmem:[#allocation2 + $0x400] sm:$0xff]  ;;  %v1189_v15 = vld [vmem:[#allocation2 + $0x408] sm:$0xff] }
  0x63   : > { %2209 = vmatpush3.bf16.msra.mxu0 %v2206_v19  ;;  %2083 = vmatprep.subr.bf16.mxu1 %v2082_v24  ;;  %v2246_v19 = vpack.c.bf16 %v1009_v17, %v1008_v16  ;;  %v2286_v16 = vpack.c.bf16 %v1189_v15, %v1188_v14  ;;  %v1190_v17 = vld [vmem:[#allocation2 + $0x410] sm:$0xff] }
  0x64   : > { %2211 = vmatprep.subr.bf16.mxu0 %v2210_v25 }
  0x66   : > { %2085 = vmatpush3.bf16.msra.mxu1 %v2082_v24  ;;  %v2122_v24 = vpack.c.bf16 %v627_v21, %v626_v20  ;;  %v1090_v20 = vld [vmem:[%s2614_s30 + $0x9] sm:$0xf] }
  0x67   : > { %2213 = vmatpush3.bf16.msra.mxu0 %v2210_v25  ;;  %2087 = vmatprep.subr.bf16.mxu1 %v2086_v30  ;;  %v2250_v25 = vpack.c.bf16 %v1011_v23, %v1010_v22  ;;  %v1185_v22 = vld [vmem:[%s2614_s30 + $0x2] sm:$0xff] }
  0x68   : > { %2215 = vmatprep.subr.bf16.mxu0 %v2214_v31  ;;  %v1192_v23 = vld [vmem:[#allocation2 + $0x420] sm:$0xff] }
  0x6a   : > { %2089 = vmatpush3.bf16.msra.mxu1 %v2086_v30  ;;  %v2126_v30 = vpack.c.bf16 %v709_v27, %v708_v26  ;;  %v1194_v26 = vld [vmem:[#allocation2 + $0x430] sm:$0xff]  ;;  %v1195_v27 = vld [vmem:[#allocation2 + $0x438] sm:$0xff] }
  0x6b   : > { %2217 = vmatpush3.bf16.msra.mxu0 %v2214_v31  ;;  %2091 = vmatprep.subr.bf16.mxu1 %v2090_v36  ;;  %v2254_v31 = vpack.c.bf16 %v1093_v29, %v1092_v28  ;;  %v2298_v28 = vpack.c.bf16 %v1195_v27, %v1194_v26  ;;  %v1196_v29 = vld [vmem:[#allocation2 + $0x440] sm:$0xff] }
  0x6c   : > { %2219 = vmatprep.subr.bf16.mxu0 %v2218_v37 }
  0x6e   : > { %2093 = vmatpush3.bf16.msra.mxu1 %v2090_v36  ;;  %v610_v36 = vld [vmem:[%s2594_s17 + $0xa] sm:$0xf]  ;;  %s407_s17 = scalar_lea.vmem %s2658_s4, %s1550_s14 }
  0x6f   : > { %2221 = vmatpush3.bf16.msra.mxu0 %v2218_v37  ;;  %2095 = vmatprep.subr.bf16.mxu1 %v2094_v42  ;;  %v994_v37 = vld [vmem:[%s2614_s30 + $0x8] sm:$0xf] }
  0x70   : > { %2223 = vmatprep.subr.bf16.mxu0 %v2222_v43 }
  0x71   : > { %1783 = vmatmul.mubr.f32.vlgmr.msra.gmra.mrb[0].mxu1 %v423_v48  ;;  %v714_v48 = vld [vmem:[#allocation2 + $0x1b0] sm:$0xff] }
  0x72   : > { %2097 = vmatpush3.bf16.msra.mxu1 %v2094_v42  ;;  %1923 = vmatmul.mubr.f32.vlgmr.msra.gmra.mrb[0].mxu0 %v898_v49  ;;  %v1096_v42 = vld [vmem:[#allocation2 + $0x3a0] sm:$0xff]  ;;  %v715_v49 = vld [vmem:[#allocation2 + $0x1b8] sm:$0xff] }
  0x73   : > { %2225 = vmatpush3.bf16.msra.mxu0 %v2222_v43  ;;  %2099 = vmatprep.subr.bf16.mxu1 %v2098_v50  ;;  %v1097_v43 = vld [vmem:[#allocation2 + $0x3a8] sm:$0xff]  ;;  %v2138_v52 = vpack.c.bf16 %v715_v49, %v714_v48 }
  0x74   : > { %2227 = vmatprep.subr.bf16.mxu0 %v2226_v51  ;;  %1817 = vmatprep.mubr.f32.mxu1 %v609_v56  ;;  %v2262_v47 = vpack.c.bf16 %v1097_v43, %v1096_v42  ;;  %v1100_v56 = vld [vmem:[#allocation2 + $0x3c0] sm:$0xff] }
  0x75   : > { %1957 = vmatprep.mubr.f32.mxu0 %v993_v57  ;;  %v1101_v57 = vld [vmem:[#allocation2 + $0x3c8] sm:$0xff] }
  0x76   : > { %2101 = vmatpush3.bf16.msra.mxu1 %v2098_v50  ;;  %v1098_v50 = vld [vmem:[#allocation2 + $0x3b0] sm:$0xff] }
  0x77   : > { %2229 = vmatpush3.bf16.msra.mxu0 %v2226_v51  ;;  %2103 = vmatprep.subr.bf16.mxu1 %v2102_v58  ;;  %v1099_v51 = vld [vmem:[#allocation2 + $0x3b8] sm:$0xff] }
  0x78   : > { %2231 = vmatprep.subr.bf16.mxu0 %v2230_v59  ;;  %v2266_v53 = vpack.c.bf16 %v1099_v51, %v1098_v50 }
  0x7a   : > { %2105 = vmatpush3.bf16.msra.mxu1 %v2102_v58  ;;  %v2142_v58 = vpack.c.bf16 %v717_v55, %v716_v54 }
  0x7b   : > { %2233 = vmatpush3.bf16.msra.mxu0 %v2230_v59  ;;  %2107 = vmatprep.subr.bf16.mxu1 %v2106_v0  ;;  %v2270_v59 = vpack.c.bf16 %v1101_v57, %v1100_v56 }
  0x7c   : > { %2235 = vmatprep.subr.bf16.mxu0 %v2234_v1 }
  0x7e   : > { %2109 = vmatpush3.bf16.msra.mxu1 %v2106_v0  ;;  %v2146_v0 = vpack.c.bf16 %v719_v61, %v718_v60 }
  0x7f   : > { %2237 = vmatpush3.bf16.msra.mxu0 %v2234_v1  ;;  %2111 = vmatprep.subr.bf16.mxu1 %v2110_v6  ;;  %v2274_v1 = vpack.c.bf16 %v1103_v63, %v1102_v62 }
  0x80   : > { %2239 = vmatprep.subr.bf16.mxu0 %v2238_v7 }
  0x82   : > { %2113 = vmatpush3.bf16.msra.mxu1 %v2110_v6  ;;  %v2150_v6 = vpack.c.bf16 %v721_v3, %v720_v2 }
  0x83   : > { %2241 = vmatpush3.bf16.msra.mxu0 %v2238_v7  ;;  %2115 = vmatprep.subr.bf16.mxu1 %v2114_v12  ;;  %v2278_v7 = vpack.c.bf16 %v1105_v5, %v1104_v4 }
  0x84   : > { %2243 = vmatprep.subr.bf16.mxu0 %v2242_v13 }
  0x86   : > { %2117 = vmatpush3.bf16.msra.mxu1 %v2114_v12  ;;  %v2154_v12 = vpack.c.bf16 %v723_v9, %v722_v8 }
  0x87   : > { %2245 = vmatpush3.bf16.msra.mxu0 %v2242_v13  ;;  %2119 = vmatprep.subr.bf16.mxu1 %v2118_v18  ;;  %v2282_v13 = vpack.c.bf16 %v1107_v11, %v1106_v10 }
  0x88   : > { %2247 = vmatprep.subr.bf16.mxu0 %v2246_v19 }
  0x8a   : > { %2121 = vmatpush3.bf16.msra.mxu1 %v2118_v18  ;;  %v1191_v18 = vld [vmem:[#allocation2 + $0x418] sm:$0xff] }
  0x8b   : > { %2249 = vmatpush3.bf16.msra.mxu0 %v2246_v19  ;;  %2123 = vmatprep.subr.bf16.mxu1 %v2122_v24  ;;  %v706_v19 = vld [vmem:[%s2599_s20 + $0x8] sm:$0xf]  ;;  %v2290_v21 = vpack.c.bf16 %v1191_v18, %v1190_v17 }
  0x8c   : > { %2251 = vmatprep.subr.bf16.mxu0 %v2250_v25 }
  0x8e   : > { %2125 = vmatpush3.bf16.msra.mxu1 %v2122_v24  ;;  %v1193_v24 = vld [vmem:[#allocation2 + $0x428] sm:$0xff] }
  0x8f   : > { %2253 = vmatpush3.bf16.msra.mxu0 %v2250_v25  ;;  %2127 = vmatprep.subr.bf16.mxu1 %v2126_v30  ;;  %v2294_v25 = vpack.c.bf16 %v1193_v24, %v1192_v23 }
  0x90   : > { %2255 = vmatprep.subr.bf16.mxu0 %v2254_v31 }
  0x91   : > { %1818 = vmatmul.mubr.f32.vlgmr.msra.gmra.mrb[0].mxu1 %v610_v36  ;;  %v1201_v36 = vld [vmem:[#allocation2 + $0x468] sm:$0xff] }
  0x92   : > { %2129 = vmatpush3.bf16.msra.mxu1 %v2126_v30  ;;  %1958 = vmatmul.mubr.f32.vlgmr.msra.gmra.mrb[0].mxu0 %v994_v37  ;;  %v1197_v30 = vld [vmem:[#allocation2 + $0x448] sm:$0xff]  ;;  %v2310_v37 = vpack.c.bf16 %v1201_v36, %v1200_v35 }
  0x93   : > { %2257 = vmatpush3.bf16.msra.mxu0 %v2254_v31  ;;  %2131 = vmatprep.subr.bf16.mxu1 %v2130_v38  ;;  %v2302_v31 = vpack.c.bf16 %v1197_v30, %v1196_v29 }
  0x94   : > { %2259 = vmatprep.subr.bf16.mxu0 %v2258_v39  ;;  %1852 = vmatprep.mubr.f32.mxu1 %v705_v44 }
  0x95   : > { %1992 = vmatprep.mubr.f32.mxu0 %v1089_v45 }
  0x96   : > { %2133 = vmatpush3.bf16.msra.mxu1 %v2130_v38  ;;  %v1202_v38 = vld [vmem:[#allocation2 + $0x470] sm:$0xff] }
  0x97   : > { %2261 = vmatpush3.bf16.msra.mxu0 %v2258_v39  ;;  %2135 = vmatprep.subr.bf16.mxu1 %v2134_v46  ;;  %v1203_v39 = vld [vmem:[#allocation2 + $0x478] sm:$0xff] }
  0x98   : > { %2263 = vmatprep.subr.bf16.mxu0 %v2262_v47  ;;  %v2314_v40 = vpack.c.bf16 %v1203_v39, %v1202_v38 }
  0x9a   : > { %2137 = vmatpush3.bf16.msra.mxu1 %v2134_v46 }
  0x9b   : > { %2265 = vmatpush3.bf16.msra.mxu0 %v2262_v47  ;;  %2139 = vmatprep.subr.bf16.mxu1 %v2138_v52 }
  0x9c   : > { %2267 = vmatprep.subr.bf16.mxu0 %v2266_v53 }
  0x9e   : > { %2141 = vmatpush3.bf16.msra.mxu1 %v2138_v52 }
  0x9f   : > { %2269 = vmatpush3.bf16.msra.mxu0 %v2266_v53  ;;  %2143 = vmatprep.subr.bf16.mxu1 %v2142_v58 }
  0xa0   : > { %2271 = vmatprep.subr.bf16.mxu0 %v2270_v59 }
  0xa2   : > { %2145 = vmatpush3.bf16.msra.mxu1 %v2142_v58 }
  0xa3   : > { %2273 = vmatpush3.bf16.msra.mxu0 %v2270_v59  ;;  %2147 = vmatprep.subr.bf16.mxu1 %v2146_v0 }
  0xa4   : > { %2275 = vmatprep.subr.bf16.mxu0 %v2274_v1 }
  0xa6   : > { %2149 = vmatpush3.bf16.msra.mxu1 %v2146_v0 }
  0xa7   : > { %2277 = vmatpush3.bf16.msra.mxu0 %v2274_v1  ;;  %2151 = vmatprep.subr.bf16.mxu1 %v2150_v6 }
  0xa8   : > { %2279 = vmatprep.subr.bf16.mxu0 %v2278_v7 }
  0xaa   : > { %2153 = vmatpush3.bf16.msra.mxu1 %v2150_v6 }
  0xab   : > { %2281 = vmatpush3.bf16.msra.mxu0 %v2278_v7  ;;  %2155 = vmatprep.subr.bf16.mxu1 %v2154_v12 }
  0xac   : > { %2283 = vmatprep.subr.bf16.mxu0 %v2282_v13 }
  0xae   : > { %2157 = vmatpush3.bf16.msra.mxu1 %v2154_v12 }
  0xaf   : > { %2285 = vmatpush3.bf16.msra.mxu0 %v2282_v13 }
  0xb0   : > { %2287 = vmatprep.subr.bf16.mxu0 %v2286_v16 }
  0xb1   : > { %1853 = vmatmul.mubr.f32.vlgmr.msra.gmra.mrb[0].mxu1 %v706_v19 }
  0xb2   : > { %1993 = vmatmul.mubr.f32.vlgmr.msra.gmra.mrb[0].mxu0 %v1090_v20 }
  0xb3   : > { %2289 = vmatpush3.bf16.msra.mxu0 %v2286_v16  ;;  %2027 = vmatprep.mubr.f32.mxu0 %v1185_v22 }
  0xb4   : > { %2291 = vmatprep.subr.bf16.mxu0 %v2290_v21 }
  0xb7   : > { %2293 = vmatpush3.bf16.msra.mxu0 %v2290_v21 }
  0xb8   : > { %2295 = vmatprep.subr.bf16.mxu0 %v2294_v25 }
  0xbb   : > { %2297 = vmatpush3.bf16.msra.mxu0 %v2294_v25 }
  0xbc   : > { %2299 = vmatprep.subr.bf16.mxu0 %v2298_v28 }
  0xbf   : > { %2301 = vmatpush3.bf16.msra.mxu0 %v2298_v28 }
  0xc0   : > { %2303 = vmatprep.subr.bf16.mxu0 %v2302_v31 }
  0xc3   : > { %2305 = vmatpush3.bf16.msra.mxu0 %v2302_v31 }
  0xc4   : > { %2307 = vmatprep.subr.bf16.mxu0 %v2306_v34 }
  0xc7   : > { %2309 = vmatpush3.bf16.msra.mxu0 %v2306_v34 }
  0xc8   : > { %2311 = vmatprep.subr.bf16.mxu0 %v2310_v37 }
  0xcb   : > { %2313 = vmatpush3.bf16.msra.mxu0 %v2310_v37 }
  0xcc   : > { %2315 = vmatprep.subr.bf16.mxu0 %v2314_v40 }
  0xcf   : > { %2317 = vmatpush3.bf16.msra.mxu0 %v2314_v40 }
  0xd2   : > { %2028 = vmatmul.mubr.f32.vlgmr.msra.gmra.mrb[0].mxu0 %v1186_v41 }
 0x184   : > { %v1854_v42 = vpop.f32.mrb[0].mxu1 }
 0x185   : > { %v790_v43 = vpop.f32.mrb[1].mxu1 }
 0x1a5   : > { %v2029_v44 = vpop.f32.mrb[0].mxu0 }
 0x1a6   : > { %v2318_v45 = vadd.f32 %v2029_v44, %v1854_v42  ;;  %v1270_v46 = vpop.f32.mrb[1].mxu0 }
 0x1a7   : > { %v2319_v47 = vadd.f32 %v1270_v46, %v790_v43 }
 0x1a8   : > { %v1282_v48 = vsel %vm1281_vm0, %v2318_v45, 0.0  ;;  %v1292_v49 = vmul.f32 %v2318_v45, %v2318_v45  ;;  %1303 = vst [vmem:[%s407_s17 + $0x8] sm:$0xf] %v2318_v45 }
 0x1a9   : > { %v1283_v50 = vadd.f32 %v2319_v47, %v1282_v48  ;;  %v1291_v51 = vmul.f32 %v2319_v47, %v2319_v47  ;;  %1302 = vst [vmem:[%s407_s17] sm:$0xff] %v2319_v47 }
 0x1aa   : > { %v1293_v52 = vsel %vm1281_vm0, %v1292_v49, 0.0 }
 0x1ab   : > { %v1284_v53 = vrot.slane %v1283_v50, 4  ;;  %v1294_v54 = vadd.f32 %v1293_v52, %v1291_v51 }
 0x1ad   : > { %v1285_v55 = vadd.f32 %v1284_v53, %v1283_v50  ;;  %v1295_v56 = vrot.slane %v1294_v54, 4 }
 0x1af   : > { %v1286_v57 = vrot.slane %v1285_v55, 2  ;;  %v1296_v58 = vadd.f32 %v1295_v56, %v1294_v54 }
 0x1b1   : > { %v1287_v59 = vadd.f32 %v1286_v57, %v1285_v55  ;;  %v1297_v60 = vrot.slane %v1296_v58, 2 }
 0x1b3   : > { %v1288_v61 = vrot.slane %v1287_v59, 1  ;;  %v1298_v62 = vadd.f32 %v1297_v60, %v1296_v58 }
 0x1b5   : > { %v1289_v63 = vadd.f32 %v1288_v61, %v1287_v59  ;;  %v1299_v0 = vrot.slane %v1298_v62, 1 }
 0x1b7   : > { %1290 = vst [vmem:[%s414_s7] sm:$0x1] %v1289_v63  ;;  %v1300_v1 = vadd.f32 %v1299_v0, %v1298_v62 }
 0x1b9   : > { %1301 = vst [vmem:[%s421_s29] sm:$0x1] %v1300_v1 }
 0x1ba PF: > { %s18_s25 = sadd.s32 1, %s2460_s25   ;;  %s2670_s21 = smov %s2452_s23 }
 0x1bb   : > { %p15_p12 = scmp.ge.s32.totalorder %s18_s25, 26   ;;  %s2671_s22 = smov %s2456_s24 }
 0x1bc   : > { %s2672_s23 = smov %s2675_s27  ;;  %s2673_s24 = smov %s2679_s28 }
 0x1bd   :  { %17 = sbr.rel (!%p15_p12) target bundleno = 3 (0x3), region = 109 }
 0x1c4   :  { %1373 = vsyncpa [#allocation3], 1 }
 0x1c5   :  { %1375 = vsyncpa [#allocation3 + $0x1], 1 }

// kernel: discriminator_forward.14
= control target key start
LH: loop header
LB: loop body
LE: loop exit
PB: predicated region body
PF: predicated region fallthrough
CT: control target
= control target key end

     0   :  { %s177_s0 = inlined_call_operand.vmem [shape: f32[72,128], index: 0, kind: input, shape index: {}]   ;;  %s178_s1 = inlined_call_operand.vmem [shape: f32[1,128], index: 1, kind: input, shape index: {}]   ;;  %s179_s2 = inlined_call_operand.vmem [shape: f32[1,128], index: 2, kind: input, shape index: {}]   ;;  %s180_s3 = inlined_call_operand.vmem [shape: f32[72,128], index: 3, kind: output, shape index: {}]  }
   0x1   :  { %v14_v0 = vld [vmem:[%s177_s0] sm:$0xff]  ;;  %v15_v4 = vld [vmem:[%s177_s0 + $0x8] sm:$0xff]  ;;  %v16_v5 = vld [vmem:[%s177_s0 + $0x10] sm:$0xff] }
   0x2   :  { %v95_v1 = vld [vmem:[%s178_s1] ss:$0 sm:$0xff]  ;;  %v17_v6 = vld [vmem:[%s177_s0 + $0x18] sm:$0xff]  ;;  %v19_v11 = vld [vmem:[%s177_s0 + $0x28] sm:$0xff] }
   0x3   :  { %v96_v2 = vld [vmem:[%s179_s2] ss:$0 sm:$0xff]  ;;  %v30_v3 = vmul.f32 %v95_v1, %v14_v0  ;;  %v31_v7 = vmul.f32 %v95_v1, %v15_v4  ;;  %v32_v8 = vmul.f32 %v95_v1, %v16_v5  ;;  %v33_v9 = vmul.f32 %v95_v1, %v17_v6  ;;  %v20_v12 = vld [vmem:[%s177_s0 + $0x30] sm:$0xff]  ;;  %v21_v17 = vld [vmem:[%s177_s0 + $0x38] sm:$0xff] }
   0x4   :  { %v18_v10 = vld [vmem:[%s177_s0 + $0x20] sm:$0xff]  ;;  %v35_v15 = vmul.f32 %v95_v1, %v19_v11  ;;  %v36_v16 = vmul.f32 %v95_v1, %v20_v12  ;;  %v37_v21 = vmul.f32 %v95_v1, %v21_v17 }
   0x5   :  { %v46_v13 = vadd.f32 %v96_v2, %v30_v3  ;;  %v34_v14 = vmul.f32 %v95_v1, %v18_v10  ;;  %v47_v18 = vadd.f32 %v96_v2, %v31_v7  ;;  %v48_v19 = vadd.f32 %v96_v2, %v32_v8  ;;  %v22_v29 = vld [vmem:[%s177_s0 + $0x40] sm:$0xff] }
   0x6   :  { %v49_v20 = vadd.f32 %v96_v2, %v33_v9  ;;  %v51_v24 = vadd.f32 %v96_v2, %v35_v15  ;;  %v52_v35 = vadd.f32 %v96_v2, %v36_v16  ;;  %v53_v36 = vadd.f32 %v96_v2, %v37_v21 }
   0x7   :  { %vm55_vm0 = vcmp.ge.f32.partialorder %v46_v13, 0.0  ;;  %v64_v22 = vmul.f32 0.2, %v46_v13  ;;  %v50_v23 = vadd.f32 %v96_v2, %v34_v14  ;;  %vm56_vm1 = vcmp.ge.f32.partialorder %v47_v18, 0.0 }
   0x8   :  { %v65_v25 = vmul.f32 0.2, %v47_v18  ;;  %vm57_vm2 = vcmp.ge.f32.partialorder %v48_v19, 0.0  ;;  %v66_v26 = vmul.f32 0.2, %v48_v19  ;;  %vm58_vm3 = vcmp.ge.f32.partialorder %v49_v20, 0.0 }
   0x9   :  { %v73_v27 = vsel %vm55_vm0, %v46_v13, %v64_v22  ;;  %v67_v28 = vmul.f32 0.2, %v49_v20  ;;  %vm59_vm4 = vcmp.ge.f32.partialorder %v50_v23, 0.0  ;;  %v68_v32 = vmul.f32 0.2, %v50_v23 }
   0xa   :  { %82 = vst [vmem:[%s180_s3] sm:$0xff] %v73_v27  ;;  %v74_v30 = vsel %vm56_vm1, %v47_v18, %v65_v25  ;;  %v75_v31 = vsel %vm57_vm2, %v48_v19, %v66_v26  ;;  %vm60_vm5 = vcmp.ge.f32.partialorder %v51_v24, 0.0  ;;  %v69_v34 = vmul.f32 0.2, %v51_v24 }
   0xb   :  { %83 = vst [vmem:[%s180_s3 + $0x8] sm:$0xff] %v74_v30  ;;  %84 = vst [vmem:[%s180_s3 + $0x10] sm:$0xff] %v75_v31  ;;  %v76_v33 = vsel %vm58_vm3, %v49_v20, %v67_v28  ;;  %v77_v37 = vsel %vm59_vm4, %v50_v23, %v68_v32  ;;  %v38_v38 = vmul.f32 %v95_v1, %v22_v29  ;;  %vm61_vm6 = vcmp.ge.f32.partialorder %v52_v35, 0.0 }
   0xc   :  { %85 = vst [vmem:[%s180_s3 + $0x18] sm:$0xff] %v76_v33  ;;  %86 = vst [vmem:[%s180_s3 + $0x20] sm:$0xff] %v77_v37  ;;  %v78_v39 = vsel %vm60_vm5, %v51_v24, %v69_v34  ;;  %v70_v40 = vmul.f32 0.2, %v52_v35  ;;  %vm62_vm7 = vcmp.ge.f32.partialorder %v53_v36, 0.0 }
   0xd   :  { %87 = vst [vmem:[%s180_s3 + $0x28] sm:$0xff] %v78_v39  ;;  %v71_v41 = vmul.f32 0.2, %v53_v36  ;;  %v54_v42 = vadd.f32 %v96_v2, %v38_v38 }
   0xe   :  { %v79_v43 = vsel %vm61_vm6, %v52_v35, %v70_v40 }
   0xf   :  { %88 = vst [vmem:[%s180_s3 + $0x30] sm:$0xff] %v79_v43  ;;  %v80_v44 = vsel %vm62_vm7, %v53_v36, %v71_v41  ;;  %vm63_vm8 = vcmp.ge.f32.partialorder %v54_v42, 0.0  ;;  %v72_v45 = vmul.f32 0.2, %v54_v42 }
  0x10   :  { %89 = vst [vmem:[%s180_s3 + $0x38] sm:$0xff] %v80_v44 }
  0x11   :  { %v81_v46 = vsel %vm63_vm8, %v54_v42, %v72_v45 }
  0x12   :  { %90 = vst [vmem:[%s180_s3 + $0x40] sm:$0xff] %v81_v46 }

// kernel: discriminator_forward.13
= control target key start
LH: loop header
LB: loop body
LE: loop exit
PB: predicated region body
PF: predicated region fallthrough
CT: control target
= control target key end

     0   :  { %s2456_s18 = smov 0   ;;  %s2458_s19 = smov 0   ;;  %s3134_s0 = inlined_call_operand.vmem [shape: f32[8,7,7,128], index: 0, kind: input, shape index: {}, may-alias: {0,1}]   ;;  %s3135_s1 = inlined_call_operand.vmem [shape: f32[8,7,7,128], index: 1, kind: input, shape index: {}, may-alias: {0,1}]   ;;  %s3136_s2 = inlined_call_operand.vmem [shape: f32[9,128,128], index: 2, kind: input, shape index: {}]   ;;  %s3137_s3 = inlined_call_operand.vmem [shape: f32[2,6,6,128], index: 3, kind: output, shape index: {0}]   ;;  %s3138_s4 = inlined_call_operand.vmem [shape: f32[2,6,1,128], index: 4, kind: output, shape index: {1}]   ;;  %s3139_s5 = inlined_call_operand.vmem [shape: f32[2,6,1,128], index: 5, kind: output, shape index: {2}]  }
   0x1   :  { %s2460_s20 = smov 0   ;;  %s2462_s21 = smov 0  }
   0x2   :  { %s2464_s22 = smov 0   ;;  %s2466_s23 = smov 0  }
   0x3   :  { %s2468_s24 = smov 0   ;;  %s2470_s25 = smov 0  }
   0x4   :  { %s2472_s26 = smov 0  }
   0x5 LB: > { %s25_s27 = sadd.s32 1, %s2413_s24  ;;  %s28_s28 = sadd.s32 1, %s2417_s25  ;;  %s2421_s26 = sphi %s2472_s26, %s16_s26   ;;  %s2417_s25 = sphi %s2470_s25, %s3149_s25   ;;  %s2413_s24 = sphi %s2468_s24, %s3148_s24   ;;  %s2409_s23 = sphi %s2466_s23, %s3147_s23   ;;  %s2405_s22 = sphi %s2464_s22, %s3146_s22   ;;  %s2401_s21 = sphi %s2462_s21, %s3145_s21   ;;  %s2397_s20 = sphi %s2460_s20, %s3144_s20   ;;  %s2393_s19 = sphi %s2458_s19, %s3143_s19   ;;  %s2389_s18 = sphi %s2456_s18, %s3142_s18  }
   0x6   : > { %p26_p0 = scmp.ge.s32.totalorder %s25_s27, 6  ;;  %p44_p1 = scmp.ne.s32.totalorder %s2401_s21, %s2397_s20 }
   0x7   : > { %p45_p2 = scmp.eq.s32.totalorder %s2421_s26, 0  ;;  %s37_s9 = sadd.s32 1, %s2401_s21 }
   0x8   : > { %s2506_s29 = scalar_select %p26_p0, 0, %s25_s27  }
   0x9   : > { %s3151_s28 = smov (!%p26_p0, %s28_s28), %s2417_s25  ;;  %p2511_p3 = por %p45_p2, %p44_p1 }
   0xa   : > { %p30_p4 = scmp.ge.s32.totalorder %s3151_s28, 2  ;;  %s61_s6 = sadd.s32 1, %s2506_s29 }
   0xb   : > { %s33_s7 = ssub.s32 %s2413_s24, %s2506_s29  ;;  %s63_s8 = ssub.s32 %s25_s27, %s61_s6 }
   0xc   : > { %s3153_s28 = smov (%p30_p4, %s3151_s28), 0  ;;  %p74_p5 = scmp.ne.s32.totalorder %s2393_s19, %s2389_s18 }
   0xd   : > { %s32_s10 = ssub.s32 %s2417_s25, %s3153_s28  ;;  %s67_s11 = sadd.s32 1, %s2393_s19 }
   0xe   : > { %s34_s12 = sor.u32 %s33_s7, %s32_s10  ;;  %s64_s13 = sor.u32 %s63_s8, %s32_s10 }
   0xf   : > { %p35_p6 = scmp.eq.s32.totalorder %s34_s12, 0  ;;  %p65_p7 = scmp.eq.s32.totalorder %s64_s13, 0 }
  0x10   : > { %p2528_p8 = por %p74_p5, %p45_p2  ;;  %p1425_p9 = scmp.ge.s32.totalorder %s2421_s26, 12 }
  0x11   : > { %s2533_s15 = scalar_select %p35_p6, %s2401_s21, %s37_s9  }
  0x12   : > { %s2536_s16 = scalar_select %p65_p7, %s2393_s19, %s67_s11  }
  0x13   : > { %208 = sbr.rel (%p1425_p9) target bundleno = 44 (0x2c), region = 20 }
  0x1a   : > { %211 = sbr.rel (!%p2511_p3) target bundleno = 35 (0x23), region = 24  ;;  %s213_s17 = sand.u32 (%p2511_p3), 1, %s2401_s21  }
  0x1b   : > { %s2274_s27 = smul.u32 (%p2511_p3), 28, %s2417_s25  ;;  %s1426_s6 = sshll.u32 (%p2511_p3), %s213_s17, 5 }
  0x1c   : > { %s215_s11 = scalar_lea.vmem (%p2511_p3), [#allocation2], %s1426_s6 }
  0x1d   : > { %s218_s7 = sadd.s32 (%p2511_p3), %s2413_s24, %s2274_s27 }
  0x1e   : > { %s1429_s8 = sshll.u32 (%p2511_p3), %s218_s7, 3 }
  0x1f   : > { %s220_s9 = scalar_lea.vmem (%p2511_p3), %s3134_s0, %s1429_s8 }
  0x20   : > { %v254_v0 = vld [vmem:[%s220_s9] sm:$0xff] (%p2511_p3)  ;;  %v256_v1 = vld [vmem:[%s220_s9 + $0x38] sm:$0xff] (%p2511_p3)  ;;  %v258_v2 = vld [vmem:[%s220_s9 + $0x70] sm:$0xff] (%p2511_p3) }
  0x21   : > { %255 = vst [vmem:[%s215_s11] sm:$0xff] %v254_v0  ;;  %257 = vst [vmem:[%s215_s11 + $0x8] sm:$0xff] %v256_v1  ;;  %v260_v3 = vld [vmem:[%s220_s9 + $0xa8] sm:$0xff] }
  0x22   : > { %259 = vst [vmem:[%s215_s11 + $0x10] sm:$0xff] %v258_v2  ;;  %261 = vst [vmem:[%s215_s11 + $0x18] sm:$0xff] %v260_v3 }
  0x23 PF: > { %267 = sbr.rel (!%p2528_p8) target bundleno = 44 (0x2c), region = 62  ;;  %s269_s30 = sand.u32 (%p2528_p8), 1, %s2393_s19  }
  0x24   : > { %s1306_s13 = smul.u32 (%p2528_p8), 28, %s2417_s25  ;;  %s1430_s17 = sshll.u32 (%p2528_p8), %s269_s30, 5 }
  0x25   : > { %s271_s12 = scalar_lea.vmem (%p2528_p8), [#allocation3], %s1430_s17 }
  0x26   : > { %s1307_s27 = sadd.s32 (%p2528_p8), %s2413_s24, %s1306_s13 }
  0x27   : > { %s1431_s7 = sshll.u32 (%p2528_p8), %s1307_s27, 3 }
  0x28   : > { %s1309_s6 = scalar_lea.vmem (%p2528_p8), %s3135_s1, %s1431_s7 }
  0x29   : > { %v1432_v4 = vld [vmem:[%s1309_s6 + $0x8] sm:$0xff] (%p2528_p8)  ;;  %v1433_v5 = vld [vmem:[%s1309_s6 + $0x40] sm:$0xff] (%p2528_p8)  ;;  %v1434_v6 = vld [vmem:[%s1309_s6 + $0x78] sm:$0xff] (%p2528_p8) }
  0x2a   : > { %312 = vst [vmem:[%s271_s12] sm:$0xff] %v1432_v4  ;;  %314 = vst [vmem:[%s271_s12 + $0x8] sm:$0xff] %v1433_v5  ;;  %v1435_v7 = vld [vmem:[%s1309_s6 + $0xb0] sm:$0xff] }
  0x2b   : > { %316 = vst [vmem:[%s271_s12 + $0x10] sm:$0xff] %v1434_v6  ;;  %318 = vst [vmem:[%s271_s12 + $0x18] sm:$0xff] %v1435_v7 }
  0x2c PF: > { %p1436_p10 = scmp.ge.s32.totalorder %s2421_s26, 1  ;;  %p323_p11 = scmp.lt.s32.totalorder %s2421_s26, 13 }
  0x2e   : > { %p324_p12 = pnand %p1436_p10, %p323_p11 }
  0x2f   : > { %v1441_v8 = vld [vmem:[%s3136_s2 + $0x80] sm:$0xff] (!%p324_p12)  ;;  %v1442_v9 = vld [vmem:[%s3136_s2 + $0x88] sm:$0xff] (!%p324_p12)  ;;  %v2423_v11 = vmov (!%p324_p12), 0.0|0.0   ;;  %v1443_v14 = vld [vmem:[%s3136_s2 + $0x90] sm:$0xff] (!%p324_p12)  ;;  %vm2424_vm0 = vmmov (!%p324_p12), 0   ;;  %v2425_v19 = vmov (!%p324_p12), 0.0  }
  0x30   : > { %327 = sbr.rel (%p324_p12) target bundleno = 440 (0x1b8), region = 100  ;;  %v1491_v10 = vld [vmem:[%s3136_s2 + $0x200] sm:$0xff] (!%p324_p12)  ;;  %2043 = vmatprep.subr.bf16.mxu1 (!%p324_p12), %v2423_v11  ;;  %2139 = vmatprep.subr.bf16.mxu0 (!%p324_p12), %v2423_v11  ;;  %v2044_v12 = vpack.c.bf16 (!%p324_p12), %v1442_v9, %v1441_v8  ;;  %v1492_v13 = vld [vmem:[%s3136_s2 + $0x208] sm:$0xff] (!%p324_p12)  ;;  %v1444_v15 = vld [vmem:[%s3136_s2 + $0x98] sm:$0xff] (!%p324_p12)  ;;  %s330_s8 = sand.u32 (!%p324_p12), 1, %s2397_s20   ;;  %vm1212_vm1 = vcmask (!%p324_p12), 1045504  }
  0x31   : > { %v2140_v16 = vpack.c.bf16 (!%p324_p12), %v1492_v13, %v1491_v10  ;;  %v1493_v17 = vld [vmem:[%s3136_s2 + $0x210] sm:$0xff] (!%p324_p12)  ;;  %v1494_v18 = vld [vmem:[%s3136_s2 + $0x218] sm:$0xff] (!%p324_p12)  ;;  %1760 = vmatprep.mubr.msk.f32.mxu1 (!%p324_p12), %vm2424_vm0, %v2425_v19  ;;  %1900 = vmatprep.mubr.msk.f32.mxu0 (!%p324_p12), %vm2424_vm0, %v2425_v19  ;;  %v2047_v20 = vpack.c.bf16 (!%p324_p12), %v1444_v15, %v1443_v14  ;;  %v1445_v22 = vld [vmem:[%s3136_s2 + $0xa0] sm:$0xff] (!%p324_p12)  ;;  %s1437_s13 = sshll.u32 (!%p324_p12), %s330_s8, 5  ;;  %p388_p13 = scmp.lt.s32.totalorder (!%p324_p12), %s2409_s23, 1 }
  0x32   : > { %2045 = vmatpush3.bf16.msra.mxu1 (!%p324_p12), %v2044_v12  ;;  %v2143_v21 = vpack.c.bf16 (!%p324_p12), %v1494_v18, %v1493_v17  ;;  %v1446_v23 = vld [vmem:[%s3136_s2 + $0xa8] sm:$0xff] (!%p324_p12)  ;;  %v1495_v24 = vld [vmem:[%s3136_s2 + $0x220] sm:$0xff] (!%p324_p12)  ;;  %v1447_v28 = vld [vmem:[%s3136_s2 + $0xb0] sm:$0xff] (!%p324_p12)  ;;  %s2686_s9 = scalar_lea.vmem (!%p324_p12), [#allocation2], %s1437_s13  ;;  %s337_s13 = sand.u32 (!%p324_p12), 1, %s2389_s18  }
  0x33   : > { %2141 = vmatpush3.bf16.msra.mxu0 (!%p324_p12), %v2140_v16  ;;  %2046 = vmatprep.subr.bf16.mxu1 (!%p324_p12), %v2423_v11  ;;  %v1496_v25 = vld [vmem:[%s3136_s2 + $0x228] sm:$0xff] (!%p324_p12)  ;;  %v2050_v26 = vpack.c.bf16 (!%p324_p12), %v1446_v23, %v1445_v22  ;;  %v1448_v29 = vld [vmem:[%s3136_s2 + $0xb8] sm:$0xff] (!%p324_p12)  ;;  %v1497_v30 = vld [vmem:[%s3136_s2 + $0x230] sm:$0xff] (!%p324_p12)  ;;  %s1438_s11 = sshll.u32 (!%p324_p12), %s337_s13, 5  ;;  %p390_p0 = scmp.lt.s32.totalorder (!%p324_p12), %s2405_s22, 5 }
  0x34   : > { %2142 = vmatprep.subr.bf16.mxu0 (!%p324_p12), %v2423_v11  ;;  %v2146_v27 = vpack.c.bf16 (!%p324_p12), %v1496_v25, %v1495_v24  ;;  %v1498_v31 = vld [vmem:[%s3136_s2 + $0x238] sm:$0xff] (!%p324_p12)  ;;  %v2053_v32 = vpack.c.bf16 (!%p324_p12), %v1448_v29, %v1447_v28  ;;  %v1449_v34 = vld [vmem:[%s3136_s2 + $0xc0] sm:$0xff] (!%p324_p12)  ;;  %v1450_v35 = vld [vmem:[%s3136_s2 + $0xc8] sm:$0xff] (!%p324_p12)  ;;  %s2927_s12 = scalar_lea.vmem (!%p324_p12), [#allocation3], %s1438_s11 }
  0x35   : > { %v2149_v33 = vpack.c.bf16 (!%p324_p12), %v1498_v31, %v1497_v30  ;;  %v1499_v36 = vld [vmem:[%s3136_s2 + $0x240] sm:$0xff] (!%p324_p12)  ;;  %v1500_v37 = vld [vmem:[%s3136_s2 + $0x248] sm:$0xff] (!%p324_p12)  ;;  %v2056_v38 = vpack.c.bf16 (!%p324_p12), %v1450_v35, %v1449_v34  ;;  %v1451_v40 = vld [vmem:[%s3136_s2 + $0xd0] sm:$0xff] (!%p324_p12) }
  0x36   : > { %2048 = vmatpush3.bf16.msra.mxu1 (!%p324_p12), %v2047_v20  ;;  %v2152_v39 = vpack.c.bf16 (!%p324_p12), %v1500_v37, %v1499_v36  ;;  %v1452_v41 = vld [vmem:[%s3136_s2 + $0xd8] sm:$0xff] (!%p324_p12)  ;;  %v1501_v42 = vld [vmem:[%s3136_s2 + $0x250] sm:$0xff] (!%p324_p12)  ;;  %v1453_v46 = vld [vmem:[%s3136_s2 + $0xe0] sm:$0xff] (!%p324_p12) }
  0x37   : > { %2144 = vmatpush3.bf16.msra.mxu0 %v2143_v21  ;;  %2049 = vmatprep.subr.bf16.mxu1 %v2423_v11  ;;  %v1502_v43 = vld [vmem:[%s3136_s2 + $0x258] sm:$0xff]  ;;  %v2059_v44 = vpack.c.bf16 %v1452_v41, %v1451_v40  ;;  %v1454_v47 = vld [vmem:[%s3136_s2 + $0xe8] sm:$0xff]  ;;  %v1503_v48 = vld [vmem:[%s3136_s2 + $0x260] sm:$0xff]  ;;  %s3155_s23 = smov (!%p388_p13, %s2409_s23), 1  ;;  %s3157_s22 = smov (!%p390_p0, %s2405_s22), 5 }
  0x38   : > { %2145 = vmatprep.subr.bf16.mxu0 %v2423_v11  ;;  %v2155_v45 = vpack.c.bf16 %v1502_v43, %v1501_v42  ;;  %v1504_v49 = vld [vmem:[%s3136_s2 + $0x268] sm:$0xff]  ;;  %v2062_v50 = vpack.c.bf16 %v1454_v47, %v1453_v46  ;;  %v1455_v52 = vld [vmem:[%s3136_s2 + $0xf0] sm:$0xff]  ;;  %v1456_v53 = vld [vmem:[%s3136_s2 + $0xf8] sm:$0xff]  ;;  %s2275_s14 = smul.u32 6, %s3155_s23 }
  0x39   : > { %v2158_v51 = vpack.c.bf16 %v1504_v49, %v1503_v48  ;;  %v1505_v54 = vld [vmem:[%s3136_s2 + $0x270] sm:$0xff]  ;;  %v1506_v55 = vld [vmem:[%s3136_s2 + $0x278] sm:$0xff]  ;;  %v2065_v56 = vpack.c.bf16 %v1456_v53, %v1455_v52  ;;  %v411_v58 = vld [vmem:[%s3136_s2] sm:$0xff] }
  0x3a   : > { %2051 = vmatpush3.bf16.msra.mxu1 %v2050_v26  ;;  %v2161_v57 = vpack.c.bf16 %v1506_v55, %v1505_v54  ;;  %v412_v59 = vld [vmem:[%s3136_s2 + $0x8] sm:$0xff]  ;;  %v1508_v60 = vld [vmem:[%s3136_s2 + $0x280] sm:$0xff]  ;;  %v1490_v0 = vld [vmem:[%s2686_s9 + $0x18] sm:$0x3f]  ;;  %s393_s20 = sadd.s32 %s2275_s14, %s3157_s22 }
  0x3b   : > { %2147 = vmatpush3.bf16.msra.mxu0 %v2146_v27  ;;  %2052 = vmatprep.subr.bf16.mxu1 %v2423_v11  ;;  %v1509_v61 = vld [vmem:[%s3136_s2 + $0x288] sm:$0xff]  ;;  %v2068_v63 = vpack.c.bf16 %v412_v59, %v411_v58  ;;  %v413_v2 = vld [vmem:[%s3136_s2 + $0x10] sm:$0xff]  ;;  %v414_v3 = vld [vmem:[%s3136_s2 + $0x18] sm:$0xff]  ;;  %s409_s10 = scalar_lea.vmem %s3139_s5, %s393_s20 }
  0x3c   : > { %2148 = vmatprep.subr.bf16.mxu0 %v2423_v11  ;;  %v1440_v62 = vld [vmem:[%s2686_s9 + $0x8] sm:$0x3f]  ;;  %v2164_v1 = vpack.c.bf16 %v1509_v61, %v1508_v60  ;;  %v1510_v4 = vld [vmem:[%s3136_s2 + $0x290] sm:$0xff]  ;;  %v1511_v5 = vld [vmem:[%s3136_s2 + $0x298] sm:$0xff]  ;;  %v2071_v6 = vpack.c.bf16 %v414_v3, %v413_v2 }
  0x3d   : > { %v2167_v7 = vpack.c.bf16 %v1511_v5, %v1510_v4  ;;  %v415_v8 = vld [vmem:[%s3136_s2 + $0x20] sm:$0xff]  ;;  %v416_v9 = vld [vmem:[%s3136_s2 + $0x28] sm:$0xff]  ;;  %v417_v15 = vld [vmem:[%s3136_s2 + $0x30] sm:$0xff] }
  0x3e   : > { %2054 = vmatpush3.bf16.msra.mxu1 %v2053_v32  ;;  %v1512_v10 = vld [vmem:[%s3136_s2 + $0x2a0] sm:$0xff]  ;;  %v1513_v12 = vld [vmem:[%s3136_s2 + $0x2a8] sm:$0xff]  ;;  %v2074_v13 = vpack.c.bf16 %v416_v9, %v415_v8  ;;  %v418_v16 = vld [vmem:[%s3136_s2 + $0x38] sm:$0xff] }
  0x3f   : > { %2150 = vmatpush3.bf16.msra.mxu0 %v2149_v33  ;;  %2055 = vmatprep.subr.bf16.mxu1 %v2423_v11  ;;  %v2170_v14 = vpack.c.bf16 %v1513_v12, %v1512_v10  ;;  %v1514_v17 = vld [vmem:[%s3136_s2 + $0x2b0] sm:$0xff]  ;;  %v1515_v18 = vld [vmem:[%s3136_s2 + $0x2b8] sm:$0xff]  ;;  %v2077_v20 = vpack.c.bf16 %v418_v16, %v417_v15  ;;  %v419_v22 = vld [vmem:[%s3136_s2 + $0x40] sm:$0xff] }
  0x40   : > { %2151 = vmatprep.subr.bf16.mxu0 %v2423_v11  ;;  %v2173_v21 = vpack.c.bf16 %v1515_v18, %v1514_v17  ;;  %v420_v23 = vld [vmem:[%s3136_s2 + $0x48] sm:$0xff]  ;;  %v1516_v24 = vld [vmem:[%s3136_s2 + $0x2c0] sm:$0xff]  ;;  %v421_v28 = vld [vmem:[%s3136_s2 + $0x50] sm:$0xff] }
  0x41   : > { %v1517_v25 = vld [vmem:[%s3136_s2 + $0x2c8] sm:$0xff]  ;;  %v2080_v26 = vpack.c.bf16 %v420_v23, %v419_v22  ;;  %v422_v29 = vld [vmem:[%s3136_s2 + $0x58] sm:$0xff]  ;;  %v1518_v30 = vld [vmem:[%s3136_s2 + $0x2d0] sm:$0xff] }
  0x42   : > { %2057 = vmatpush3.bf16.msra.mxu1 %v2056_v38  ;;  %v2176_v27 = vpack.c.bf16 %v1517_v25, %v1516_v24  ;;  %v1519_v31 = vld [vmem:[%s3136_s2 + $0x2d8] sm:$0xff]  ;;  %v2083_v32 = vpack.c.bf16 %v422_v29, %v421_v28  ;;  %v423_v34 = vld [vmem:[%s3136_s2 + $0x60] sm:$0xff]  ;;  %v424_v35 = vld [vmem:[%s3136_s2 + $0x68] sm:$0xff] }
  0x43   : > { %2153 = vmatpush3.bf16.msra.mxu0 %v2152_v39  ;;  %2058 = vmatprep.subr.bf16.mxu1 %v2423_v11  ;;  %v2179_v33 = vpack.c.bf16 %v1519_v31, %v1518_v30  ;;  %v1520_v36 = vld [vmem:[%s3136_s2 + $0x2e0] sm:$0xff]  ;;  %v1521_v37 = vld [vmem:[%s3136_s2 + $0x2e8] sm:$0xff]  ;;  %v2086_v38 = vpack.c.bf16 %v424_v35, %v423_v34  ;;  %v425_v40 = vld [vmem:[%s3136_s2 + $0x70] sm:$0xff] }
  0x44   : > { %2154 = vmatprep.subr.bf16.mxu0 %v2423_v11  ;;  %v2182_v39 = vpack.c.bf16 %v1521_v37, %v1520_v36  ;;  %v426_v41 = vld [vmem:[%s3136_s2 + $0x78] sm:$0xff]  ;;  %v1522_v42 = vld [vmem:[%s3136_s2 + $0x2f0] sm:$0xff]  ;;  %v1457_v46 = vld [vmem:[%s3136_s2 + $0x100] sm:$0xff] }
  0x45   : > { %v1523_v43 = vld [vmem:[%s3136_s2 + $0x2f8] sm:$0xff]  ;;  %v1458_v47 = vld [vmem:[%s3136_s2 + $0x108] sm:$0xff]  ;;  %v1524_v48 = vld [vmem:[%s3136_s2 + $0x300] sm:$0xff] }
  0x46   : > { %2060 = vmatpush3.bf16.msra.mxu1 %v2059_v44  ;;  %v2089_v44 = vpack.c.bf16 %v426_v41, %v425_v40  ;;  %v1525_v49 = vld [vmem:[%s3136_s2 + $0x308] sm:$0xff]  ;;  %v1507_v52 = vld [vmem:[%s2686_s9 + $0x11] sm:$0x3f]  ;;  %v1460_v55 = vld [vmem:[%s3136_s2 + $0x118] sm:$0xff] }
  0x47   : > { %2156 = vmatpush3.bf16.msra.mxu0 %v2155_v45  ;;  %2061 = vmatprep.subr.bf16.mxu1 %v2423_v11  ;;  %v2185_v45 = vpack.c.bf16 %v1523_v43, %v1522_v42  ;;  %v2188_v53 = vpack.c.bf16 %v1525_v49, %v1524_v48  ;;  %v1459_v54 = vld [vmem:[%s3136_s2 + $0x110] sm:$0xff]  ;;  %v1461_v60 = vld [vmem:[%s3136_s2 + $0x120] sm:$0xff]  ;;  %v1462_v61 = vld [vmem:[%s3136_s2 + $0x128] sm:$0xff] }
  0x48   : > { %2157 = vmatprep.subr.bf16.mxu0 %v2423_v11  ;;  %v2095_v58 = vpack.c.bf16 %v1460_v55, %v1459_v54  ;;  %v1463_v2 = vld [vmem:[%s3136_s2 + $0x130] sm:$0xff]  ;;  %v1464_v3 = vld [vmem:[%s3136_s2 + $0x138] sm:$0xff]  ;;  %v1465_v8 = vld [vmem:[%s3136_s2 + $0x140] sm:$0xff] }
  0x49   : > { %v1530_v4 = vld [vmem:[%s3136_s2 + $0x330] sm:$0xff]  ;;  %v1531_v5 = vld [vmem:[%s3136_s2 + $0x338] sm:$0xff]  ;;  %v1466_v9 = vld [vmem:[%s3136_s2 + $0x148] sm:$0xff] }
  0x4a   : > { %2063 = vmatpush3.bf16.msra.mxu1 %v2062_v50  ;;  %v410_v50 = vld [vmem:[%s2686_s9] sm:$0x3f]  ;;  %v1533_v12 = vld [vmem:[%s3136_s2 + $0x348] sm:$0xff]  ;;  %v1467_v15 = vld [vmem:[%s3136_s2 + $0x150] sm:$0xff] }
  0x4b   : > { %2159 = vmatpush3.bf16.msra.mxu0 %v2158_v51  ;;  %2064 = vmatprep.subr.bf16.mxu1 %v2423_v11  ;;  %v2092_v51 = vpack.c.bf16 %v1458_v47, %v1457_v46  ;;  %v1532_v10 = vld [vmem:[%s3136_s2 + $0x340] sm:$0xff]  ;;  %v1468_v16 = vld [vmem:[%s3136_s2 + $0x158] sm:$0xff]  ;;  %v1534_v17 = vld [vmem:[%s3136_s2 + $0x350] sm:$0xff] }
  0x4c   : > { %2160 = vmatprep.subr.bf16.mxu0 %v2423_v11  ;;  %v1535_v18 = vld [vmem:[%s3136_s2 + $0x358] sm:$0xff]  ;;  %v1469_v22 = vld [vmem:[%s3136_s2 + $0x160] sm:$0xff]  ;;  %v1470_v23 = vld [vmem:[%s3136_s2 + $0x168] sm:$0xff] }
  0x4d   : > { %v1536_v24 = vld [vmem:[%s3136_s2 + $0x360] sm:$0xff]  ;;  %v1537_v25 = vld [vmem:[%s3136_s2 + $0x368] sm:$0xff]  ;;  %v1471_v28 = vld [vmem:[%s3136_s2 + $0x170] sm:$0xff] }
  0x4e   : > { %2066 = vmatpush3.bf16.msra.mxu1 %v2065_v56  ;;  %v1526_v56 = vld [vmem:[%s3136_s2 + $0x310] sm:$0xff]  ;;  %v1472_v29 = vld [vmem:[%s3136_s2 + $0x178] sm:$0xff]  ;;  %v1474_v34 = vld [vmem:[%s3136_s2 + $0x180] sm:$0xff] }
  0x4f   : > { %2162 = vmatpush3.bf16.msra.mxu0 %v2161_v57  ;;  %2067 = vmatprep.subr.bf16.mxu1 %v2423_v11  ;;  %v1527_v57 = vld [vmem:[%s3136_s2 + $0x318] sm:$0xff]  ;;  %v1538_v30 = vld [vmem:[%s3136_s2 + $0x370] sm:$0xff]  ;;  %v1475_v35 = vld [vmem:[%s3136_s2 + $0x188] sm:$0xff] }
  0x50   : > { %2163 = vmatprep.subr.bf16.mxu0 %v2423_v11  ;;  %v2191_v59 = vpack.c.bf16 %v1527_v57, %v1526_v56  ;;  %v1539_v31 = vld [vmem:[%s3136_s2 + $0x378] sm:$0xff]  ;;  %v1541_v36 = vld [vmem:[%s3136_s2 + $0x380] sm:$0xff]  ;;  %v1542_v37 = vld [vmem:[%s3136_s2 + $0x388] sm:$0xff] }
  0x51   : > { %1761 = vmatmul.mubr.f32.vlgmr.msra.gmra.mrb[0].mxu1 %v1440_v62  ;;  %v1528_v62 = vld [vmem:[%s3136_s2 + $0x320] sm:$0xff]  ;;  %v2212_v41 = vpack.c.bf16 %v1542_v37, %v1541_v36  ;;  %v1476_v42 = vld [vmem:[%s3136_s2 + $0x190] sm:$0xff]  ;;  %v1477_v43 = vld [vmem:[%s3136_s2 + $0x198] sm:$0xff] }
  0x52   : > { %2069 = vmatpush3.bf16.msra.mxu1 %v2068_v63  ;;  %1901 = vmatmul.mubr.f32.vlgmr.msra.gmra.mrb[0].mxu0 %v1490_v0  ;;  %v1529_v63 = vld [vmem:[%s3136_s2 + $0x328] sm:$0xff]  ;;  %v2098_v0 = vpack.c.bf16 %v1462_v61, %v1461_v60  ;;  %v944_v40 = vld [vmem:[%s2927_s12] sm:$0x3f]  ;;  %v2119_v46 = vpack.c.bf16 %v1477_v43, %v1476_v42  ;;  %v1480_v54 = vld [vmem:[%s3136_s2 + $0x1b0] sm:$0xff] }
  0x53   : > { %2165 = vmatpush3.bf16.msra.mxu0 %v2164_v1  ;;  %2070 = vmatprep.subr.bf16.mxu1 %v2423_v11  ;;  %v2194_v1 = vpack.c.bf16 %v1529_v63, %v1528_v62  ;;  %v1478_v48 = vld [vmem:[%s3136_s2 + $0x1a0] sm:$0xff]  ;;  %v1479_v49 = vld [vmem:[%s3136_s2 + $0x1a8] sm:$0xff]  ;;  %v1481_v55 = vld [vmem:[%s3136_s2 + $0x1b8] sm:$0xff] }
  0x54   : > { %2166 = vmatprep.subr.bf16.mxu0 %v2423_v11  ;;  %1795 = vmatprep.mubr.msk.f32.mxu1 %vm2424_vm0, %v2425_v19  ;;  %v1547_v56 = vld [vmem:[%s3136_s2 + $0x3b0] sm:$0xff]  ;;  %v1548_v57 = vld [vmem:[%s3136_s2 + $0x3b8] sm:$0xff]  ;;  %v1482_v60 = vld [vmem:[%s3136_s2 + $0x1c0] sm:$0xff] }
  0x55   : > { %1935 = vmatprep.mubr.msk.f32.mxu0 %vm2424_vm0, %v2425_v19  ;;  %v1483_v61 = vld [vmem:[%s3136_s2 + $0x1c8] sm:$0xff]  ;;  %v1549_v62 = vld [vmem:[%s3136_s2 + $0x3c0] sm:$0xff] }
  0x56   : > { %2072 = vmatpush3.bf16.msra.mxu1 %v2071_v6  ;;  %v2101_v6 = vpack.c.bf16 %v1464_v3, %v1463_v2  ;;  %v1550_v63 = vld [vmem:[%s3136_s2 + $0x3c8] sm:$0xff]  ;;  %v1484_v2 = vld [vmem:[%s3136_s2 + $0x1d0] sm:$0xff]  ;;  %v1485_v3 = vld [vmem:[%s3136_s2 + $0x1d8] sm:$0xff] }
  0x57   : > { %2168 = vmatpush3.bf16.msra.mxu0 %v2167_v7  ;;  %2073 = vmatprep.subr.bf16.mxu1 %v2423_v11  ;;  %v2197_v7 = vpack.c.bf16 %v1531_v5, %v1530_v4  ;;  %v1551_v4 = vld [vmem:[%s3136_s2 + $0x3d0] sm:$0xff]  ;;  %v1552_v5 = vld [vmem:[%s3136_s2 + $0x3d8] sm:$0xff]  ;;  %v1566_v36 = vld [vmem:[%s3136_s2 + $0x448] sm:$0xff] }
  0x58   : > { %2169 = vmatprep.subr.bf16.mxu0 %v2423_v11  ;;  %v1570_v42 = vld [vmem:[%s3136_s2 + $0x468] sm:$0xff] }
  0x5a   : > { %2075 = vmatpush3.bf16.msra.mxu1 %v2074_v13  ;;  %v2104_v13 = vpack.c.bf16 %v1466_v9, %v1465_v8  ;;  %v1486_v8 = vld [vmem:[%s3136_s2 + $0x1e0] sm:$0xff]  ;;  %v1487_v9 = vld [vmem:[%s3136_s2 + $0x1e8] sm:$0xff] }
  0x5b   : > { %2171 = vmatpush3.bf16.msra.mxu0 %v2170_v14  ;;  %2076 = vmatprep.subr.bf16.mxu1 %v2423_v11  ;;  %v2200_v14 = vpack.c.bf16 %v1533_v12, %v1532_v10  ;;  %v1553_v10 = vld [vmem:[%s3136_s2 + $0x3e0] sm:$0xff]  ;;  %v1554_v12 = vld [vmem:[%s3136_s2 + $0x3e8] sm:$0xff] }
  0x5c   : > { %2172 = vmatprep.subr.bf16.mxu0 %v2423_v11 }
  0x5e   : > { %2078 = vmatpush3.bf16.msra.mxu1 %v2077_v20  ;;  %v2107_v20 = vpack.c.bf16 %v1468_v16, %v1467_v15  ;;  %v1488_v15 = vld [vmem:[%s3136_s2 + $0x1f0] sm:$0xff]  ;;  %v1489_v16 = vld [vmem:[%s3136_s2 + $0x1f8] sm:$0xff] }
  0x5f   : > { %2174 = vmatpush3.bf16.msra.mxu0 %v2173_v21  ;;  %2079 = vmatprep.subr.bf16.mxu1 %v2423_v11  ;;  %v2203_v21 = vpack.c.bf16 %v1535_v18, %v1534_v17  ;;  %v1555_v17 = vld [vmem:[%s3136_s2 + $0x3f0] sm:$0xff]  ;;  %v1556_v18 = vld [vmem:[%s3136_s2 + $0x3f8] sm:$0xff] }
  0x60   : > { %2175 = vmatprep.subr.bf16.mxu0 %v2423_v11 }
  0x62   : > { %2081 = vmatpush3.bf16.msra.mxu1 %v2080_v26  ;;  %v2110_v26 = vpack.c.bf16 %v1470_v23, %v1469_v22  ;;  %v1557_v22 = vld [vmem:[%s3136_s2 + $0x400] sm:$0xff]  ;;  %v1558_v23 = vld [vmem:[%s3136_s2 + $0x408] sm:$0xff] }
  0x63   : > { %2177 = vmatpush3.bf16.msra.mxu0 %v2176_v27  ;;  %2082 = vmatprep.subr.bf16.mxu1 %v2423_v11  ;;  %v2206_v27 = vpack.c.bf16 %v1537_v25, %v1536_v24  ;;  %v1473_v24 = vld [vmem:[%s2686_s9 + $0x10] sm:$0x3f]  ;;  %v1540_v25 = vld [vmem:[%s2927_s12 + $0x8] sm:$0x3f] }
  0x64   : > { %2178 = vmatprep.subr.bf16.mxu0 %v2423_v11 }
  0x66   : > { %2084 = vmatpush3.bf16.msra.mxu1 %v2083_v32  ;;  %v2113_v32 = vpack.c.bf16 %v1472_v29, %v1471_v28  ;;  %v1560_v28 = vld [vmem:[%s3136_s2 + $0x418] sm:$0xff] }
  0x67   : > { %2180 = vmatpush3.bf16.msra.mxu0 %v2179_v33  ;;  %2085 = vmatprep.subr.bf16.mxu1 %v2423_v11  ;;  %v2209_v33 = vpack.c.bf16 %v1539_v31, %v1538_v30  ;;  %v1561_v30 = vld [vmem:[%s3136_s2 + $0x420] sm:$0xff]  ;;  %v1562_v31 = vld [vmem:[%s3136_s2 + $0x428] sm:$0xff] }
  0x68   : > { %2181 = vmatprep.subr.bf16.mxu0 %v2423_v11 }
  0x6a   : > { %2087 = vmatpush3.bf16.msra.mxu1 %v2086_v38  ;;  %v586_v38 = vld [vmem:[%s2686_s9 + $0x1] sm:$0x3f]  ;;  %s1439_s9 = sshll.u32 %s393_s20, 3 }
  0x6b   : > { %2183 = vmatpush3.bf16.msra.mxu0 %v2182_v39  ;;  %2088 = vmatprep.subr.bf16.mxu1 %v2423_v11  ;;  %v2116_v39 = vpack.c.bf16 %v1475_v35, %v1474_v34  ;;  %v1565_v35 = vld [vmem:[%s3136_s2 + $0x440] sm:$0xff]  ;;  %s395_s27 = scalar_lea.vmem %s3137_s3, %s1439_s9 }
  0x6c   : > { %2184 = vmatprep.subr.bf16.mxu0 %v2423_v11  ;;  %v2248_v37 = vpack.c.bf16 %v1566_v36, %v1565_v35 }
  0x6e   : > { %2090 = vmatpush3.bf16.msra.mxu1 %v2089_v44  ;;  %v1543_v44 = vld [vmem:[%s3136_s2 + $0x390] sm:$0xff] }
  0x6f   : > { %2186 = vmatpush3.bf16.msra.mxu0 %v2185_v45  ;;  %2091 = vmatprep.subr.bf16.mxu1 %v2423_v11  ;;  %v1544_v45 = vld [vmem:[%s3136_s2 + $0x398] sm:$0xff] }
  0x70   : > { %2187 = vmatprep.subr.bf16.mxu0 %v2423_v11  ;;  %v2215_v47 = vpack.c.bf16 %v1544_v45, %v1543_v44  ;;  %v1571_v44 = vld [vmem:[%s3136_s2 + $0x470] sm:$0xff]  ;;  %v1572_v45 = vld [vmem:[%s3136_s2 + $0x478] sm:$0xff] }
  0x71   : > { %1796 = vmatmul.mubr.f32.vlgmr.msra.gmra.mrb[0].mxu1 %v410_v50  ;;  %v1545_v50 = vld [vmem:[%s3136_s2 + $0x3a0] sm:$0xff] }
  0x72   : > { %2093 = vmatpush3.bf16.msra.mxu1 %v2092_v51  ;;  %1936 = vmatmul.mubr.f32.vlgmr.msra.gmra.mrb[0].mxu0 %v1507_v52  ;;  %v1546_v51 = vld [vmem:[%s3136_s2 + $0x3a8] sm:$0xff]  ;;  %v2122_v52 = vpack.c.bf16 %v1479_v49, %v1478_v48 }
  0x73   : > { %2189 = vmatpush3.bf16.msra.mxu0 %v2188_v53  ;;  %2094 = vmatprep.subr.bf16.mxu1 %v2423_v11  ;;  %v2218_v53 = vpack.c.bf16 %v1546_v51, %v1545_v50 }
  0x74   : > { %2190 = vmatprep.subr.bf16.mxu0 %v2423_v11  ;;  %1830 = vmatprep.mubr.msk.f32.mxu1 %vm2424_vm0, %v2425_v19 }
  0x75   : > { %1970 = vmatprep.mubr.msk.f32.mxu0 %vm2424_vm0, %v2425_v19 }
  0x76   : > { %2096 = vmatpush3.bf16.msra.mxu1 %v2095_v58  ;;  %v2125_v58 = vpack.c.bf16 %v1481_v55, %v1480_v54 }
  0x77   : > { %2192 = vmatpush3.bf16.msra.mxu0 %v2191_v59  ;;  %2097 = vmatprep.subr.bf16.mxu1 %v2423_v11  ;;  %v2221_v59 = vpack.c.bf16 %v1548_v57, %v1547_v56 }
  0x78   : > { %2193 = vmatprep.subr.bf16.mxu0 %v2423_v11 }
  0x7a   : > { %2099 = vmatpush3.bf16.msra.mxu1 %v2098_v0  ;;  %v2128_v0 = vpack.c.bf16 %v1483_v61, %v1482_v60 }
  0x7b   : > { %2195 = vmatpush3.bf16.msra.mxu0 %v2194_v1  ;;  %2100 = vmatprep.subr.bf16.mxu1 %v2423_v11  ;;  %v2224_v1 = vpack.c.bf16 %v1550_v63, %v1549_v62 }
  0x7c   : > { %2196 = vmatprep.subr.bf16.mxu0 %v2423_v11 }
  0x7e   : > { %2102 = vmatpush3.bf16.msra.mxu1 %v2101_v6  ;;  %v2131_v6 = vpack.c.bf16 %v1485_v3, %v1484_v2 }
  0x7f   : > { %2198 = vmatpush3.bf16.msra.mxu0 %v2197_v7  ;;  %2103 = vmatprep.subr.bf16.mxu1 %v2423_v11  ;;  %v2227_v7 = vpack.c.bf16 %v1552_v5, %v1551_v4 }
  0x80   : > { %2199 = vmatprep.subr.bf16.mxu0 %v2423_v11 }
  0x82   : > { %2105 = vmatpush3.bf16.msra.mxu1 %v2104_v13  ;;  %v2134_v13 = vpack.c.bf16 %v1487_v9, %v1486_v8 }
  0x83   : > { %2201 = vmatpush3.bf16.msra.mxu0 %v2200_v14  ;;  %2106 = vmatprep.subr.bf16.mxu1 %v2423_v11  ;;  %v2230_v14 = vpack.c.bf16 %v1554_v12, %v1553_v10 }
  0x84   : > { %2202 = vmatprep.subr.bf16.mxu0 %v2423_v11 }
  0x86   : > { %2108 = vmatpush3.bf16.msra.mxu1 %v2107_v20  ;;  %v2137_v20 = vpack.c.bf16 %v1489_v16, %v1488_v15 }
  0x87   : > { %2204 = vmatpush3.bf16.msra.mxu0 %v2203_v21  ;;  %2109 = vmatprep.subr.bf16.mxu1 %v2423_v11  ;;  %v2233_v21 = vpack.c.bf16 %v1556_v18, %v1555_v17 }
  0x88   : > { %2205 = vmatprep.subr.bf16.mxu0 %v2423_v11 }
  0x8a   : > { %2111 = vmatpush3.bf16.msra.mxu1 %v2110_v26  ;;  %v2236_v26 = vpack.c.bf16 %v1558_v23, %v1557_v22 }
  0x8b   : > { %2207 = vmatpush3.bf16.msra.mxu0 %v2206_v27  ;;  %2112 = vmatprep.subr.bf16.mxu1 %v2423_v11  ;;  %v1559_v27 = vld [vmem:[%s3136_s2 + $0x410] sm:$0xff] }
  0x8c   : > { %2208 = vmatprep.subr.bf16.mxu0 %v2423_v11  ;;  %v2239_v29 = vpack.c.bf16 %v1560_v28, %v1559_v27 }
  0x8e   : > { %2114 = vmatpush3.bf16.msra.mxu1 %v2113_v32  ;;  %v2242_v32 = vpack.c.bf16 %v1562_v31, %v1561_v30 }
  0x8f   : > { %2210 = vmatpush3.bf16.msra.mxu0 %v2209_v33  ;;  %2115 = vmatprep.subr.bf16.mxu1 %v2423_v11  ;;  %v1563_v33 = vld [vmem:[%s3136_s2 + $0x430] sm:$0xff] }
  0x90   : > { %2211 = vmatprep.subr.bf16.mxu0 %v2423_v11 }
  0x91   : > { %1831 = vmatmul.mubr.f32.vlgmr.msra.gmra.mrb[0].mxu1 %v586_v38  ;;  %v1567_v38 = vld [vmem:[%s3136_s2 + $0x450] sm:$0xff] }
  0x92   : > { %2117 = vmatpush3.bf16.msra.mxu1 %v2116_v39  ;;  %1971 = vmatmul.mubr.f32.vlgmr.msra.gmra.mrb[0].mxu0 %v944_v40  ;;  %v1568_v39 = vld [vmem:[%s3136_s2 + $0x458] sm:$0xff] }
  0x93   : > { %2213 = vmatpush3.bf16.msra.mxu0 %v2212_v41  ;;  %2118 = vmatprep.subr.bf16.mxu1 %v2423_v11  ;;  %v2251_v40 = vpack.c.bf16 %v1568_v39, %v1567_v38  ;;  %v1569_v41 = vld [vmem:[%s3136_s2 + $0x460] sm:$0xff] }
  0x94   : > { %2214 = vmatprep.subr.bf16.mxu0 %v2423_v11  ;;  %1865 = vmatprep.mubr.msk.f32.mxu1 %vm2424_vm0, %v2425_v19  ;;  %v2254_v43 = vpack.c.bf16 %v1570_v42, %v1569_v41 }
  0x95   : > { %2005 = vmatprep.mubr.msk.f32.mxu0 %vm2424_vm0, %v2425_v19 }
  0x96   : > { %2120 = vmatpush3.bf16.msra.mxu1 %v2119_v46  ;;  %v2257_v46 = vpack.c.bf16 %v1572_v45, %v1571_v44 }
  0x97   : > { %2216 = vmatpush3.bf16.msra.mxu0 %v2215_v47  ;;  %2121 = vmatprep.subr.bf16.mxu1 %v2423_v11  ;;  %v1123_v47 = vld [vmem:[%s2927_s12 + $0x1] sm:$0x3f]  ;;  %s402_s12 = scalar_lea.vmem %s3138_s4, %s393_s20 }
  0x98   : > { %2217 = vmatprep.subr.bf16.mxu0 %v2423_v11 }
  0x9a   : > { %2123 = vmatpush3.bf16.msra.mxu1 %v2122_v52 }
  0x9b   : > { %2219 = vmatpush3.bf16.msra.mxu0 %v2218_v53  ;;  %2124 = vmatprep.subr.bf16.mxu1 %v2423_v11 }
  0x9c   : > { %2220 = vmatprep.subr.bf16.mxu0 %v2423_v11 }
  0x9e   : > { %2126 = vmatpush3.bf16.msra.mxu1 %v2125_v58 }
  0x9f   : > { %2222 = vmatpush3.bf16.msra.mxu0 %v2221_v59  ;;  %2127 = vmatprep.subr.bf16.mxu1 %v2423_v11 }
  0xa0   : > { %2223 = vmatprep.subr.bf16.mxu0 %v2423_v11 }
  0xa2   : > { %2129 = vmatpush3.bf16.msra.mxu1 %v2128_v0 }
  0xa3   : > { %2225 = vmatpush3.bf16.msra.mxu0 %v2224_v1  ;;  %2130 = vmatprep.subr.bf16.mxu1 %v2423_v11 }
  0xa4   : > { %2226 = vmatprep.subr.bf16.mxu0 %v2423_v11 }
  0xa6   : > { %2132 = vmatpush3.bf16.msra.mxu1 %v2131_v6 }
  0xa7   : > { %2228 = vmatpush3.bf16.msra.mxu0 %v2227_v7  ;;  %2133 = vmatprep.subr.bf16.mxu1 %v2423_v11 }
  0xa8   : > { %2229 = vmatprep.subr.bf16.mxu0 %v2423_v11 }
  0xaa   : > { %2135 = vmatpush3.bf16.msra.mxu1 %v2134_v13 }
  0xab   : > { %2231 = vmatpush3.bf16.msra.mxu0 %v2230_v14  ;;  %2136 = vmatprep.subr.bf16.mxu1 %v2423_v11 }
  0xac   : > { %2232 = vmatprep.subr.bf16.mxu0 %v2423_v11 }
  0xae   : > { %2138 = vmatpush3.bf16.msra.mxu1 %v2137_v20 }
  0xaf   : > { %2234 = vmatpush3.bf16.msra.mxu0 %v2233_v21 }
  0xb0   : > { %2235 = vmatprep.subr.bf16.mxu0 %v2423_v11 }
  0xb1   : > { %1866 = vmatmul.mubr.f32.vlgmr.msra.gmra.mrb[0].mxu1 %v1473_v24 }
  0xb2   : > { %2006 = vmatmul.mubr.f32.vlgmr.msra.gmra.mrb[0].mxu0 %v1540_v25 }
  0xb3   : > { %2237 = vmatpush3.bf16.msra.mxu0 %v2236_v26  ;;  %2040 = vmatprep.mubr.msk.f32.mxu0 %vm2424_vm0, %v2425_v19  ;;  %v1564_v19 = vld [vmem:[%s3136_s2 + $0x438] sm:$0xff] }
  0xb4   : > { %2238 = vmatprep.subr.bf16.mxu0 %v2423_v11  ;;  %v2245_v34 = vpack.c.bf16 %v1564_v19, %v1563_v33 }
  0xb7   : > { %2240 = vmatpush3.bf16.msra.mxu0 %v2239_v29 }
  0xb8   : > { %2241 = vmatprep.subr.bf16.mxu0 %v2423_v11 }
  0xbb   : > { %2243 = vmatpush3.bf16.msra.mxu0 %v2242_v32 }
  0xbc   : > { %2244 = vmatprep.subr.bf16.mxu0 %v2423_v11 }
  0xbf   : > { %2246 = vmatpush3.bf16.msra.mxu0 %v2245_v34 }
  0xc0   : > { %2247 = vmatprep.subr.bf16.mxu0 %v2423_v11 }
  0xc3   : > { %2249 = vmatpush3.bf16.msra.mxu0 %v2248_v37 }
  0xc4   : > { %2250 = vmatprep.subr.bf16.mxu0 %v2423_v11 }
  0xc7   : > { %2252 = vmatpush3.bf16.msra.mxu0 %v2251_v40 }
  0xc8   : > { %2253 = vmatprep.subr.bf16.mxu0 %v2423_v11 }
  0xcb   : > { %2255 = vmatpush3.bf16.msra.mxu0 %v2254_v43 }
  0xcc   : > { %2256 = vmatprep.subr.bf16.mxu0 %v2423_v11 }
  0xcf   : > { %2258 = vmatpush3.bf16.msra.mxu0 %v2257_v46 }
  0xd2   : > { %2041 = vmatmul.mubr.f32.vlgmr.msra.gmra.mrb[0].mxu0 %v1123_v47 }
 0x184   : > { %v760_v48 = vpop.f32.mrb[0].mxu1 }
 0x185   : > { %v1867_v49 = vpop.f32.mrb[1].mxu1 }
 0x1a5   : > { %v1207_v50 = vpop.f32.mrb[0].mxu0 }
 0x1a6   : > { %v2259_v51 = vadd.f32 %v1207_v50, %v760_v48  ;;  %v2042_v11 = vpop.f32.mrb[1].mxu0 }
 0x1a8   : > { %v1213_v52 = vsel %vm1212_vm1, %v2259_v51, 0.0  ;;  %v1221_v53 = vmul.f32 %v2259_v51, %v2259_v51  ;;  %1230 = vst [vmem:[%s395_s27] sm:$0x3f] %v2259_v51 }
 0x1a9   : > { %v1214_v54 = vrot.slane %v1213_v52, 4 }
 0x1aa   : > { %v1222_v55 = vsel %vm1212_vm1, %v1221_v53, 0.0 }
 0x1ab   : > { %v1215_v56 = vadd.f32 %v1214_v54, %v1213_v52  ;;  %v1223_v57 = vrot.slane %v1222_v55, 4 }
 0x1ad   : > { %v1216_v58 = vrot.slane %v1215_v56, 2  ;;  %v1224_v59 = vadd.f32 %v1223_v57, %v1222_v55 }
 0x1af   : > { %v1217_v60 = vadd.f32 %v1216_v58, %v1215_v56  ;;  %v1225_v61 = vrot.slane %v1224_v59, 2 }
 0x1b1   : > { %v1218_v62 = vrot.slane %v1217_v60, 1  ;;  %v1226_v63 = vadd.f32 %v1225_v61, %v1224_v59 }
 0x1b3   : > { %v1219_v0 = vadd.f32 %v1218_v62, %v1217_v60  ;;  %v1227_v1 = vrot.slane %v1226_v63, 1 }
 0x1b5   : > { %1220 = vst [vmem:[%s402_s12] sm:$0x1] %v1219_v0  ;;  %v1228_v2 = vadd.f32 %v1227_v1, %v1226_v63 }
 0x1b7   : > { %1229 = vst [vmem:[%s409_s10] sm:$0x1] %v1228_v2 }
 0x1b8 PF: > { %s16_s26 = sadd.s32 1, %s2421_s26   ;;  %s3142_s18 = smov %s2393_s19 }
 0x1b9   : > { %p13_p1 = scmp.ge.s32.totalorder %s16_s26, 14   ;;  %s3143_s19 = smov %s2536_s16 }
 0x1ba   : > { %s3144_s20 = smov %s2401_s21  ;;  %s3145_s21 = smov %s2533_s15 }
 0x1bb   : > { %s3146_s22 = smov %s2413_s24  ;;  %s3147_s23 = smov %s2417_s25 }
 0x1bc   : > { %s3148_s24 = smov %s2506_s29  ;;  %s3149_s25 = smov %s3153_s28 }
 0x1bd   :  { %15 = sbr.rel (!%p13_p1) target bundleno = 5 (0x5), region = 187 }

// kernel: discriminator_forward.15
= control target key start
LH: loop header
LB: loop body
LE: loop exit
PB: predicated region body
PF: predicated region fallthrough
CT: control target
= control target key end

     0   :  { %10 = vsyncpa [#allocation4], 0  ;;  %s4048_s0 = inlined_call_operand.vmem [shape: f32[2,4608], index: 0, kind: input, shape index: {}]   ;;  %s4049_s1 = inlined_call_operand.hbm [shape: f32[4608,1024], index: 1, kind: input, shape index: {}]   ;;  %s4050_s2 = inlined_call_operand.vmem [shape: f32[1,1024], index: 2, kind: input, shape index: {}]   ;;  %s4051_s3 = inlined_call_operand.vmem [shape: f32[1024,128], index: 3, kind: input, shape index: {}]   ;;  %s4052_s4 = inlined_call_operand.vmem [shape: f32[1,128], index: 4, kind: input, shape index: {}]   ;;  %s4053_s5 = inlined_call_operand.vmem [shape: f32[2,128], index: 5, kind: output, shape index: {}]  }
   0x1   :  { %12 = vsyncpa [#allocation4 + $0x1], 0  ;;  %s2959_s18 = smov 0   ;;  %s2961_s19 = smov 0  }
   0x2   :  { %s2963_s20 = smov 0   ;;  %s2965_s21 = smov 0  }
   0x3 LB: > { %s2978_s22 = sadd.s32 4294967295, %s2922_s21   ;;  %s2981_s23 = sadd.s32 1, %s2922_s21   ;;  %s2922_s21 = sphi %s2965_s21, %s4060_s21   ;;  %s2918_s20 = sphi %s2963_s20, %s4059_s20   ;;  %s2914_s19 = sphi %s2961_s19, %s4058_s19   ;;  %s2910_s18 = sphi %s2959_s18, %s4057_s18  }
   0x4   : > { %s48_s24 = ssub.s32 %s2922_s21, %s2981_s23  ;;  %s51_s25 = sadd.s32 1, %s2918_s20 }
   0x5   : > { %p49_p0 = scmp.eq.s32.totalorder %s48_s24, 0  ;;  %p58_p1 = scmp.ne.s32.totalorder %s2918_s20, %s2914_s19 }
   0x6   : > { %p59_p2 = scmp.eq.s32.totalorder %s2922_s21, 0  ;;  %p64_p3 = scmp.ne.s32.totalorder %s2914_s19, %s2910_s18 }
   0x7   : > { %s2991_s26 = scalar_select %p49_p0, %s2918_s20, %s51_s25  }
   0x8   : > { %p60_p4 = por %p59_p2, %p58_p1  ;;  %p65_p5 = scmp.eq.s32.totalorder %s2978_s22, 0 }
   0x9   : > { %p2820_p6 = scmp.lt.s32.totalorder %s2922_s21, 9  ;;  %s190_s28 = sand.u32 1, %s2918_s20  }
   0xa   : > { %p2995_p7 = por %p65_p5, %p64_p3  ;;  %s2011_s29 = sshll.u32 %s190_s28, 12 }
   0xb   : > { %s2025_s30 = sshll.u32 %s2922_s21, 16  ;;  %s194_s9 = scalar_lea.vmem [#allocation3], %s2011_s29 }
   0xc   : > { %s3004_s8 = scalar_lea.hbm %s4049_s1, %s2025_s30  ;;  %s202_s10 = sshll.u32 %s194_s9, 4  ;;  %s3006_s10 = int_to_ptr.vmem [resolvable:$true] %s202_s10 }
   0xd   : > { %p3008_p8 = pnand %p2820_p6, %p60_p4  ;;  %s3013_s12 = scalar_lea.sflag [#allocation4], %s190_s28 }
   0xe   : > { %s2858_s13 = scalar_lea.hbm %s3004_s8, 65536  ;;  %s2863_s16 = scalar_lea.hbm %s4049_s1, 589824 }
   0xf   : > { %p2859_p10 = scmp.ne.s32.totalorder %s3004_s8, %s2858_s13  ;;  %p2860_p11 = pneg %p3008_p8 }
  0x10   : > { %p2864_p0 = scmp.lt.u32.totalorder %s3004_s8, %s4049_s1  ;;  %p2865_p1 = scmp.lt.u32.totalorder %s2863_s16, %s2858_s13 }
  0x11   : > { %p2861_p12 = pnand %p2860_p11, %p2859_p10  ;;  %p2867_p3 = scmp.lt.u32.totalorder %s2858_s13, %s3004_s8 }
  0x12   : > { %p2866_p2 = por %p2865_p1, %p2864_p0 }
  0x13   : > { %p2862_p13 = pneg %p2861_p12 }
  0x14   : > { %p2868_p4 = por %p2867_p3, %p2866_p2 }
  0x16   : > { %p2869_p5 = pnand %p2868_p4, %p2862_p13 }
  0x18   : > { %2872 = shalt.err (!%p2869_p5)
}
  0x19   : > { %s2873_s24 = scalar_lea.vmem %s3006_s10, 65536  ;;  %s2924_s25 = smov [#allocation3]  }
  0x1a   : > { %p2874_p6 = scmp.ne.s32.totalorder %s3006_s10, %s2873_s24  ;;  %s2878_s28 = sshll.u32 %s2924_s25, 4  ;;  %s2879_s28 = int_to_ptr.vmem [resolvable:$false] %s2878_s28 }
  0x1b   : > { %s2880_s29 = scalar_lea.vmem %s2879_s28, 131072  ;;  %p2881_p9 = scmp.lt.s32.totalorder %s3006_s10, %s2879_s28 }
  0x1c   : > { %p2876_p10 = pnand %p2874_p6, %p2860_p11  ;;  %p2882_p0 = scmp.lt.s32.totalorder %s2880_s29, %s2873_s24 }
  0x1e   : > { %p2877_p12 = pneg %p2876_p10  ;;  %p2883_p1 = por %p2882_p0, %p2881_p9 }
  0x20   : > { %p2884_p2 = pnand %p2883_p1, %p2877_p12 }
  0x22   : > { %2887 = shalt.err (!%p2884_p2)
}
  0x23   : > { %s2925_s30 = smov 1024   ;;  %s2926_s6 = smov 64  }
  0x24   : > { %2819 = dma.hbm_to_vmem [thread:$0]  (!%p3008_p8), %s3004_s8, 65536, %s3006_s10, %s3013_s12, %s2925_s30, %s2925_s30, %s2926_s6  }
  0x25   : > { %p210_p11 = scmp.lt.s32.totalorder %s2922_s21, 10  ;;  %p4056_p13 = scmp.ge.s32.totalorder %s2922_s21, 1 }
  0x27   : > { %p211_p3 = pnand %p4056_p13, %p210_p11 }
  0x28   : > { %s216_s7 = sand.u32 (!%p211_p3), 1, %s2914_s19  }
  0x29   : > { %214 = sbr.rel (%p211_p3) target bundleno = 805 (0x325), region = 40  ;;  %s2016_s9 = sshll.u32 (!%p211_p3), %s216_s7, 12 }
  0x2a   : > { %s217_s13 = scalar_lea.sflag (!%p211_p3), [#allocation4], %s216_s7  ;;  %s3045_s14 = scalar_lea.vmem (!%p211_p3), [#allocation3], %s2016_s9 }
  0x30   : > { %2905 = dma.done.wait (%p2995_p7), %s217_s13, 65536  }
  0x31   : > { %2907 = vsyncadd (%p2995_p7), %s217_s13, 4294901760  ;;  %s2017_s15 = sshll.u32 %s2978_s22, 2  ;;  %p2019_p8 = scmp.ne.s32.totalorder %s2978_s22, 0 }
  0x32   : > { %p248_p9 = scmp.lt.s32.totalorder %s2017_s15, 35  ;;  %v2927_v0 = vmov (!%p2019_p8), 0.0  }
  0x33   : > { %257 = sbr.rel (%p2019_p8) target bundleno = 58 (0x3a), region = 48  ;;  %258 = vst [vmem:[#allocation2] sm:$0xff] (!%p2019_p8), %v2927_v0  ;;  %259 = vst [vmem:[#allocation2 + $0x8] sm:$0xff] (!%p2019_p8), %v2927_v0 }
  0x34   : > { %s4062_s15 = smov (!%p248_p9, %s2017_s15), 35 }
  0x35   : > { %s2018_s8 = sshll.u32 %s4062_s15, 1 }
  0x36   : > { %s3055_s11 = scalar_lea.vmem %s4048_s0, %s2018_s8 }
  0x3a PF: > { %v264_v1 = vld [vmem:[%s3045_s14 + $0x8] sm:$0xff]  ;;  %v266_v3 = vld [vmem:[%s3045_s14 + $0x18] sm:$0xff]  ;;  %v263_v6 = vld [vmem:[%s3045_s14] sm:$0xff]  ;;  %p2020_p7 = scmp.ne.s32.totalorder %s2978_s22, 8 }
  0x3b   : > { %v272_v2 = vld [vmem:[%s3045_s14 + $0x48] sm:$0xff]  ;;  %v274_v5 = vld [vmem:[%s3045_s14 + $0x58] sm:$0xff]  ;;  %v271_v7 = vld [vmem:[%s3045_s14 + $0x40] sm:$0xff] }
  0x3c   : > { %v2166_v4 = vpack.c.bf16 %v272_v2, %v264_v1  ;;  %v2294_v8 = vpack.c.bf16 %v274_v5, %v266_v3  ;;  %v2168_v9 = vpack.c.bf16 %v271_v7, %v263_v6  ;;  %v265_v10 = vld [vmem:[%s3045_s14 + $0x10] sm:$0xff]  ;;  %v280_v12 = vld [vmem:[%s3045_s14 + $0x88] sm:$0xff]  ;;  %v282_v15 = vld [vmem:[%s3045_s14 + $0x98] sm:$0xff] }
  0x3d   : > { %v273_v11 = vld [vmem:[%s3045_s14 + $0x50] sm:$0xff]  ;;  %v288_v14 = vld [vmem:[%s3045_s14 + $0xc8] sm:$0xff]  ;;  %v290_v16 = vld [vmem:[%s3045_s14 + $0xd8] sm:$0xff] }
  0x3e   : > { %2167 = vmatprep.subr.bf16.mxu0 %v2166_v4  ;;  %v2296_v13 = vpack.c.bf16 %v273_v11, %v265_v10  ;;  %2295 = vmatprep.subr.bf16.mxu1 %v2294_v8  ;;  %v2170_v17 = vpack.c.bf16 %v288_v14, %v280_v12  ;;  %v2298_v18 = vpack.c.bf16 %v290_v16, %v282_v15  ;;  %v279_v19 = vld [vmem:[%s3045_s14 + $0x80] sm:$0xff]  ;;  %v281_v21 = vld [vmem:[%s3045_s14 + $0x90] sm:$0xff]  ;;  %v296_v24 = vld [vmem:[%s3045_s14 + $0x108] sm:$0xff] }
  0x3f   : > { %2169 = vmatpush1.bf16.msra.mxu0 %v2168_v9  ;;  %v287_v20 = vld [vmem:[%s3045_s14 + $0xc0] sm:$0xff]  ;;  %v289_v23 = vld [vmem:[%s3045_s14 + $0xd0] sm:$0xff]  ;;  %v304_v25 = vld [vmem:[%s3045_s14 + $0x148] sm:$0xff] }
  0x40   : > { %2297 = vmatpush1.bf16.msra.mxu1 %v2296_v13  ;;  %v2172_v22 = vpack.c.bf16 %v287_v20, %v279_v19  ;;  %2171 = vmatprep.subr.bf16.mxu0 %v2170_v17  ;;  %v2300_v26 = vpack.c.bf16 %v289_v23, %v281_v21  ;;  %v2174_v27 = vpack.c.bf16 %v304_v25, %v296_v24  ;;  %v298_v28 = vld [vmem:[%s3045_s14 + $0x118] sm:$0xff]  ;;  %v295_v30 = vld [vmem:[%s3045_s14 + $0x100] sm:$0xff]  ;;  %v297_v33 = vld [vmem:[%s3045_s14 + $0x110] sm:$0xff] }
  0x41   : > { %2299 = vmatprep.subr.bf16.mxu1 %v2298_v18  ;;  %v306_v29 = vld [vmem:[%s3045_s14 + $0x158] sm:$0xff]  ;;  %v303_v32 = vld [vmem:[%s3045_s14 + $0x140] sm:$0xff]  ;;  %v305_v34 = vld [vmem:[%s3045_s14 + $0x150] sm:$0xff] }
  0x42   : > { %v2302_v31 = vpack.c.bf16 %v306_v29, %v298_v28  ;;  %v2176_v35 = vpack.c.bf16 %v303_v32, %v295_v30  ;;  %v312_v36 = vld [vmem:[%s3045_s14 + $0x188] sm:$0xff]  ;;  %v314_v38 = vld [vmem:[%s3045_s14 + $0x198] sm:$0xff]  ;;  %v2304_v39 = vpack.c.bf16 %v305_v34, %v297_v33  ;;  %v311_v42 = vld [vmem:[%s3045_s14 + $0x180] sm:$0xff] }
  0x43   : > { %2173 = vmatpush1.bf16.msra.mxu0 %v2172_v22  ;;  %v320_v37 = vld [vmem:[%s3045_s14 + $0x1c8] sm:$0xff]  ;;  %v322_v41 = vld [vmem:[%s3045_s14 + $0x1d8] sm:$0xff]  ;;  %v319_v43 = vld [vmem:[%s3045_s14 + $0x1c0] sm:$0xff] }
  0x44   : > { %2301 = vmatpush1.bf16.msra.mxu1 %v2300_v26  ;;  %2175 = vmatprep.subr.bf16.mxu0 %v2174_v27  ;;  %v2178_v40 = vpack.c.bf16 %v320_v37, %v312_v36  ;;  %v2306_v44 = vpack.c.bf16 %v322_v41, %v314_v38  ;;  %v313_v45 = vld [vmem:[%s3045_s14 + $0x190] sm:$0xff]  ;;  %v328_v47 = vld [vmem:[%s3045_s14 + $0x208] sm:$0xff]  ;;  %v330_v49 = vld [vmem:[%s3045_s14 + $0x218] sm:$0xff]  ;;  %v2180_v51 = vpack.c.bf16 %v319_v43, %v311_v42 }
  0x45   : > { %2303 = vmatprep.subr.bf16.mxu1 %v2302_v31  ;;  %v321_v46 = vld [vmem:[%s3045_s14 + $0x1d0] sm:$0xff]  ;;  %v336_v48 = vld [vmem:[%s3045_s14 + $0x248] sm:$0xff]  ;;  %v338_v50 = vld [vmem:[%s3045_s14 + $0x258] sm:$0xff] }
  0x46   : > { %v2308_v52 = vpack.c.bf16 %v321_v46, %v313_v45  ;;  %v2182_v53 = vpack.c.bf16 %v336_v48, %v328_v47  ;;  %v327_v54 = vld [vmem:[%s3045_s14 + $0x200] sm:$0xff]  ;;  %v329_v56 = vld [vmem:[%s3045_s14 + $0x210] sm:$0xff]  ;;  %v2310_v57 = vpack.c.bf16 %v338_v50, %v330_v49  ;;  %v344_v59 = vld [vmem:[%s3045_s14 + $0x288] sm:$0xff]  ;;  %v2928_v47 = vmov 1983009808  }
  0x47   : > { %2177 = vmatpush1.bf16.msra.mxu0 %v2176_v35  ;;  %v335_v55 = vld [vmem:[%s3045_s14 + $0x240] sm:$0xff]  ;;  %v337_v58 = vld [vmem:[%s3045_s14 + $0x250] sm:$0xff]  ;;  %v352_v60 = vld [vmem:[%s3045_s14 + $0x2c8] sm:$0xff]  ;;  %v778_v48 = vunpack.c.l.s4 %v2928_v47  ;;  %v780_v49 = vlaneseq }
  0x48   : > { %2305 = vmatpush1.bf16.msra.mxu1 %v2304_v39  ;;  %2179 = vmatprep.subr.bf16.mxu0 %v2178_v40  ;;  %v346_v61 = vld [vmem:[%s3045_s14 + $0x298] sm:$0xff]  ;;  %v2184_v63 = vpack.c.bf16 %v335_v55, %v327_v54  ;;  %v2312_v0 = vpack.c.bf16 %v337_v58, %v329_v56  ;;  %v2186_v1 = vpack.c.bf16 %v352_v60, %v344_v59  ;;  %v343_v2 = vld [vmem:[%s3045_s14 + $0x280] sm:$0xff]  ;;  %v345_v4 = vld [vmem:[%s3045_s14 + $0x290] sm:$0xff] }
  0x49   : > { %2307 = vmatprep.subr.bf16.mxu1 %v2306_v44  ;;  %v354_v62 = vld [vmem:[%s3045_s14 + $0x2d8] sm:$0xff]  ;;  %v351_v3 = vld [vmem:[%s3045_s14 + $0x2c0] sm:$0xff]  ;;  %v353_v6 = vld [vmem:[%s3045_s14 + $0x2d0] sm:$0xff] }
  0x4a   : > { %v2314_v5 = vpack.c.bf16 %v354_v62, %v346_v61  ;;  %v360_v7 = vld [vmem:[%s3045_s14 + $0x308] sm:$0xff]  ;;  %v362_v9 = vld [vmem:[%s3045_s14 + $0x318] sm:$0xff]  ;;  %v2188_v11 = vpack.c.bf16 %v351_v3, %v343_v2  ;;  %v2316_v12 = vpack.c.bf16 %v353_v6, %v345_v4  ;;  %v359_v14 = vld [vmem:[%s3045_s14 + $0x300] sm:$0xff]  ;;  %v779_v62 = vunpack.c.0.s8 %v778_v48 }
  0x4b   : > { %2181 = vmatpush1.bf16.msra.mxu0 %v2180_v51  ;;  %v368_v8 = vld [vmem:[%s3045_s14 + $0x348] sm:$0xff]  ;;  %v370_v10 = vld [vmem:[%s3045_s14 + $0x358] sm:$0xff]  ;;  %v367_v15 = vld [vmem:[%s3045_s14 + $0x340] sm:$0xff] }
  0x4c   : > { %2309 = vmatpush1.bf16.msra.mxu1 %v2308_v52  ;;  %2183 = vmatprep.subr.bf16.mxu0 %v2182_v53  ;;  %v2190_v13 = vpack.c.bf16 %v368_v8, %v360_v7  ;;  %v361_v16 = vld [vmem:[%s3045_s14 + $0x310] sm:$0xff]  ;;  %v2318_v17 = vpack.c.bf16 %v370_v10, %v362_v9  ;;  %v376_v19 = vld [vmem:[%s3045_s14 + $0x388] sm:$0xff]  ;;  %v378_v21 = vld [vmem:[%s3045_s14 + $0x398] sm:$0xff]  ;;  %v2192_v23 = vpack.c.bf16 %v367_v15, %v359_v14 }
  0x4d   : > { %2311 = vmatprep.subr.bf16.mxu1 %v2310_v57  ;;  %v369_v18 = vld [vmem:[%s3045_s14 + $0x350] sm:$0xff]  ;;  %v384_v20 = vld [vmem:[%s3045_s14 + $0x3c8] sm:$0xff]  ;;  %v386_v22 = vld [vmem:[%s3045_s14 + $0x3d8] sm:$0xff] }
  0x4e   : > { %v2320_v24 = vpack.c.bf16 %v369_v18, %v361_v16  ;;  %v2194_v25 = vpack.c.bf16 %v384_v20, %v376_v19  ;;  %v375_v26 = vld [vmem:[%s3045_s14 + $0x380] sm:$0xff]  ;;  %v377_v28 = vld [vmem:[%s3045_s14 + $0x390] sm:$0xff]  ;;  %v2322_v29 = vpack.c.bf16 %v386_v22, %v378_v21  ;;  %v392_v31 = vld [vmem:[%s3045_s14 + $0x408] sm:$0xff] }
  0x4f   : > { %2185 = vmatpush1.bf16.msra.mxu0 %v2184_v63  ;;  %v383_v27 = vld [vmem:[%s3045_s14 + $0x3c0] sm:$0xff]  ;;  %v385_v30 = vld [vmem:[%s3045_s14 + $0x3d0] sm:$0xff]  ;;  %v400_v32 = vld [vmem:[%s3045_s14 + $0x448] sm:$0xff]  ;;  %v3142_v63 = vshrl.u32 %v780_v49, 7 }
  0x50   : > { %2313 = vmatpush1.bf16.msra.mxu1 %v2312_v0  ;;  %2187 = vmatprep.subr.bf16.mxu0 %v2186_v1  ;;  %v394_v33 = vld [vmem:[%s3045_s14 + $0x418] sm:$0xff]  ;;  %v2196_v35 = vpack.c.bf16 %v383_v27, %v375_v26  ;;  %v2324_v36 = vpack.c.bf16 %v385_v30, %v377_v28  ;;  %v2198_v37 = vpack.c.bf16 %v400_v32, %v392_v31  ;;  %v391_v38 = vld [vmem:[%s3045_s14 + $0x400] sm:$0xff]  ;;  %v393_v40 = vld [vmem:[%s3045_s14 + $0x410] sm:$0xff] }
  0x51   : > { %2315 = vmatprep.subr.bf16.mxu1 %v2314_v5  ;;  %v402_v34 = vld [vmem:[%s3045_s14 + $0x458] sm:$0xff]  ;;  %v399_v39 = vld [vmem:[%s3045_s14 + $0x440] sm:$0xff]  ;;  %v401_v42 = vld [vmem:[%s3045_s14 + $0x450] sm:$0xff] }
  0x52   : > { %v2326_v41 = vpack.c.bf16 %v402_v34, %v394_v33  ;;  %v408_v43 = vld [vmem:[%s3045_s14 + $0x488] sm:$0xff]  ;;  %v410_v45 = vld [vmem:[%s3045_s14 + $0x498] sm:$0xff]  ;;  %v2200_v50 = vpack.c.bf16 %v399_v39, %v391_v38  ;;  %v2328_v51 = vpack.c.bf16 %v401_v42, %v393_v40  ;;  %v407_v53 = vld [vmem:[%s3045_s14 + $0x480] sm:$0xff] }
  0x53   : > { %2189 = vmatpush1.bf16.msra.mxu0 %v2188_v11  ;;  %v416_v44 = vld [vmem:[%s3045_s14 + $0x4c8] sm:$0xff]  ;;  %v418_v46 = vld [vmem:[%s3045_s14 + $0x4d8] sm:$0xff]  ;;  %v415_v54 = vld [vmem:[%s3045_s14 + $0x4c0] sm:$0xff] }
  0x54   : > { %2317 = vmatpush1.bf16.msra.mxu1 %v2316_v12  ;;  %2191 = vmatprep.subr.bf16.mxu0 %v2190_v13  ;;  %v2202_v52 = vpack.c.bf16 %v416_v44, %v408_v43  ;;  %v409_v55 = vld [vmem:[%s3045_s14 + $0x490] sm:$0xff]  ;;  %v2330_v56 = vpack.c.bf16 %v418_v46, %v410_v45  ;;  %v424_v58 = vld [vmem:[%s3045_s14 + $0x508] sm:$0xff]  ;;  %v426_v60 = vld [vmem:[%s3045_s14 + $0x518] sm:$0xff]  ;;  %v2204_v0 = vpack.c.bf16 %v415_v54, %v407_v53 }
  0x55   : > { %2319 = vmatprep.subr.bf16.mxu1 %v2318_v17  ;;  %v417_v57 = vld [vmem:[%s3045_s14 + $0x4d0] sm:$0xff]  ;;  %v432_v59 = vld [vmem:[%s3045_s14 + $0x548] sm:$0xff]  ;;  %v434_v61 = vld [vmem:[%s3045_s14 + $0x558] sm:$0xff]  ;;  %v3153_v12 = vsub.s32 %v779_v62, %v3142_v63 }
  0x56   : > { %v2332_v1 = vpack.c.bf16 %v417_v57, %v409_v55  ;;  %v2206_v2 = vpack.c.bf16 %v432_v59, %v424_v58  ;;  %v423_v3 = vld [vmem:[%s3045_s14 + $0x500] sm:$0xff]  ;;  %v425_v5 = vld [vmem:[%s3045_s14 + $0x510] sm:$0xff]  ;;  %v2334_v6 = vpack.c.bf16 %v434_v61, %v426_v60  ;;  %v440_v8 = vld [vmem:[%s3045_s14 + $0x588] sm:$0xff] }
  0x57   : > { %2193 = vmatpush1.bf16.msra.mxu0 %v2192_v23  ;;  %v431_v4 = vld [vmem:[%s3045_s14 + $0x540] sm:$0xff]  ;;  %v433_v7 = vld [vmem:[%s3045_s14 + $0x550] sm:$0xff]  ;;  %v448_v9 = vld [vmem:[%s3045_s14 + $0x5c8] sm:$0xff] }
  0x58   : > { %2321 = vmatpush1.bf16.msra.mxu1 %v2320_v24  ;;  %2195 = vmatprep.subr.bf16.mxu0 %v2194_v25  ;;  %v442_v10 = vld [vmem:[%s3045_s14 + $0x598] sm:$0xff]  ;;  %v2208_v13 = vpack.c.bf16 %v431_v4, %v423_v3  ;;  %v439_v14 = vld [vmem:[%s3045_s14 + $0x580] sm:$0xff]  ;;  %v2336_v15 = vpack.c.bf16 %v433_v7, %v425_v5  ;;  %v2210_v16 = vpack.c.bf16 %v448_v9, %v440_v8  ;;  %v441_v18 = vld [vmem:[%s3045_s14 + $0x590] sm:$0xff] }
  0x59   : > { %2323 = vmatprep.subr.bf16.mxu1 %v2322_v29  ;;  %v450_v11 = vld [vmem:[%s3045_s14 + $0x5d8] sm:$0xff]  ;;  %v447_v17 = vld [vmem:[%s3045_s14 + $0x5c0] sm:$0xff]  ;;  %v449_v19 = vld [vmem:[%s3045_s14 + $0x5d0] sm:$0xff] }
  0x5a   : > { %v2338_v20 = vpack.c.bf16 %v450_v11, %v442_v10  ;;  %v456_v21 = vld [vmem:[%s3045_s14 + $0x608] sm:$0xff]  ;;  %v3162_v23 = vld [vmem:[%s3055_s11] sm:$0xff]  ;;  %v458_v24 = vld [vmem:[%s3045_s14 + $0x618] sm:$0xff]  ;;  %v2212_v27 = vpack.c.bf16 %v447_v17, %v439_v14  ;;  %v2340_v28 = vpack.c.bf16 %v449_v19, %v441_v18 }
  0x5b   : > { %2197 = vmatpush1.bf16.msra.mxu0 %v2196_v35  ;;  %v464_v22 = vld [vmem:[%s3045_s14 + $0x648] sm:$0xff]  ;;  %v466_v25 = vld [vmem:[%s3045_s14 + $0x658] sm:$0xff]  ;;  %v3168_v26 = vrot.slane %v3162_v23, %v3153_v12  ;;  %v455_v30 = vld [vmem:[%s3045_s14 + $0x600] sm:$0xff]  ;;  %v776_v11 = vcombine.high %v3162_v23, %v3162_v23 }
  0x5c   : > { %2325 = vmatpush1.bf16.msra.mxu1 %v2324_v36  ;;  %2199 = vmatprep.subr.bf16.mxu0 %v2198_v37  ;;  %v2214_v29 = vpack.c.bf16 %v464_v22, %v456_v21  ;;  %v463_v31 = vld [vmem:[%s3045_s14 + $0x640] sm:$0xff]  ;;  %v457_v32 = vld [vmem:[%s3045_s14 + $0x610] sm:$0xff]  ;;  %v2342_v34 = vpack.c.bf16 %v466_v25, %v458_v24  ;;  %v472_v36 = vld [vmem:[%s3045_s14 + $0x688] sm:$0xff] }
  0x5d   : > { %2327 = vmatprep.subr.bf16.mxu1 %v2326_v41  ;;  %v3175_v33 = vcombine.high %v3168_v26, %v3168_v26  ;;  %v465_v35 = vld [vmem:[%s3045_s14 + $0x650] sm:$0xff]  ;;  %v480_v37 = vld [vmem:[%s3045_s14 + $0x6c8] sm:$0xff]  ;;  %v474_v38 = vld [vmem:[%s3045_s14 + $0x698] sm:$0xff]  ;;  %v2216_v40 = vpack.c.bf16 %v463_v31, %v455_v30  ;;  %v3217_v25 = vrot.slane %v776_v11, %v3153_v12 }
  0x5e   : > { %v482_v39 = vld [vmem:[%s3045_s14 + $0x6d8] sm:$0xff]  ;;  %v2344_v41 = vpack.c.bf16 %v465_v35, %v457_v32  ;;  %v2218_v42 = vpack.c.bf16 %v480_v37, %v472_v36  ;;  %v471_v43 = vld [vmem:[%s3045_s14 + $0x680] sm:$0xff]  ;;  %v473_v45 = vld [vmem:[%s3045_s14 + $0x690] sm:$0xff] }
  0x5f   : > { %2201 = vmatpush1.bf16.msra.mxu0 %v2200_v50  ;;  %861 = vmatprep.mubr.f32.mxu0 %v3175_v33  ;;  %v479_v44 = vld [vmem:[%s3045_s14 + $0x6c0] sm:$0xff]  ;;  %v2346_v46 = vpack.c.bf16 %v482_v39, %v474_v38  ;;  %v481_v47 = vld [vmem:[%s3045_s14 + $0x6d0] sm:$0xff]  ;;  %v488_v48 = vld [vmem:[%s3045_s14 + $0x708] sm:$0xff] }
  0x60   : > { %2329 = vmatpush1.bf16.msra.mxu1 %v2328_v51  ;;  %2203 = vmatprep.subr.bf16.mxu0 %v2202_v52  ;;  %v496_v49 = vld [vmem:[%s3045_s14 + $0x748] sm:$0xff]  ;;  %v490_v50 = vld [vmem:[%s3045_s14 + $0x718] sm:$0xff]  ;;  %v2220_v52 = vpack.c.bf16 %v479_v44, %v471_v43  ;;  %v2348_v53 = vpack.c.bf16 %v481_v47, %v473_v45  ;;  %v487_v55 = vld [vmem:[%s3045_s14 + $0x700] sm:$0xff] }
  0x61   : > { %2331 = vmatprep.subr.bf16.mxu1 %v2330_v56  ;;  %1003 = vmatprep.mubr.f32.mxu1 %v3175_v33  ;;  %v498_v51 = vld [vmem:[%s3045_s14 + $0x758] sm:$0xff]  ;;  %v2222_v54 = vpack.c.bf16 %v496_v49, %v488_v48  ;;  %v495_v56 = vld [vmem:[%s3045_s14 + $0x740] sm:$0xff]  ;;  %v489_v57 = vld [vmem:[%s3045_s14 + $0x710] sm:$0xff] }
  0x62   : > { %v2350_v58 = vpack.c.bf16 %v498_v51, %v490_v50  ;;  %v497_v59 = vld [vmem:[%s3045_s14 + $0x750] sm:$0xff]  ;;  %v504_v60 = vld [vmem:[%s3045_s14 + $0x788] sm:$0xff]  ;;  %v506_v62 = vld [vmem:[%s3045_s14 + $0x798] sm:$0xff] }
  0x63   : > { %2205 = vmatpush1.bf16.msra.mxu0 %v2204_v0  ;;  %v512_v61 = vld [vmem:[%s3045_s14 + $0x7c8] sm:$0xff]  ;;  %v514_v0 = vld [vmem:[%s3045_s14 + $0x7d8] sm:$0xff]  ;;  %v503_v4 = vld [vmem:[%s3045_s14 + $0x780] sm:$0xff] }
  0x64   : > { %2333 = vmatpush1.bf16.msra.mxu1 %v2332_v1  ;;  %2207 = vmatprep.subr.bf16.mxu0 %v2206_v2  ;;  %v2224_v1 = vpack.c.bf16 %v495_v56, %v487_v55  ;;  %v2352_v2 = vpack.c.bf16 %v497_v59, %v489_v57  ;;  %v2226_v3 = vpack.c.bf16 %v512_v61, %v504_v60  ;;  %v511_v5 = vld [vmem:[%s3045_s14 + $0x7c0] sm:$0xff]  ;;  %v513_v8 = vld [vmem:[%s3045_s14 + $0x7d0] sm:$0xff]  ;;  %v520_v9 = vld [vmem:[%s3045_s14 + $0x808] sm:$0xff] }
  0x65   : > { %2335 = vmatprep.subr.bf16.mxu1 %v2334_v6  ;;  %v505_v6 = vld [vmem:[%s3045_s14 + $0x790] sm:$0xff]  ;;  %v2354_v7 = vpack.c.bf16 %v514_v0, %v506_v62  ;;  %v528_v10 = vld [vmem:[%s3045_s14 + $0x848] sm:$0xff]  ;;  %v530_v14 = vld [vmem:[%s3045_s14 + $0x858] sm:$0xff] }
  0x66   : > { %v2230_v17 = vpack.c.bf16 %v528_v10, %v520_v9  ;;  %v519_v18 = vld [vmem:[%s3045_s14 + $0x800] sm:$0xff]  ;;  %v529_v22 = vld [vmem:[%s3045_s14 + $0x850] sm:$0xff]  ;;  %v536_v23 = vld [vmem:[%s3045_s14 + $0x888] sm:$0xff] }
  0x67   : > { %2209 = vmatpush1.bf16.msra.mxu0 %v2208_v13  ;;  %v522_v13 = vld [vmem:[%s3045_s14 + $0x818] sm:$0xff]  ;;  %v527_v19 = vld [vmem:[%s3045_s14 + $0x840] sm:$0xff]  ;;  %v544_v24 = vld [vmem:[%s3045_s14 + $0x8c8] sm:$0xff] }
  0x68   : > { %2337 = vmatpush1.bf16.msra.mxu1 %v2336_v15  ;;  %2211 = vmatprep.subr.bf16.mxu0 %v2210_v16  ;;  %v2228_v15 = vpack.c.bf16 %v511_v5, %v503_v4  ;;  %v2356_v16 = vpack.c.bf16 %v513_v8, %v505_v6  ;;  %v2358_v21 = vpack.c.bf16 %v530_v14, %v522_v13  ;;  %v535_v32 = vld [vmem:[%s3045_s14 + $0x880] sm:$0xff]  ;;  %v537_v35 = vld [vmem:[%s3045_s14 + $0x890] sm:$0xff]  ;;  %v552_v38 = vld [vmem:[%s3045_s14 + $0x908] sm:$0xff] }
  0x69   : > { %2339 = vmatprep.subr.bf16.mxu1 %v2338_v20  ;;  %v521_v20 = vld [vmem:[%s3045_s14 + $0x810] sm:$0xff]  ;;  %v2234_v31 = vpack.c.bf16 %v544_v24, %v536_v23  ;;  %v560_v39 = vld [vmem:[%s3045_s14 + $0x948] sm:$0xff]  ;;  %v559_v47 = vld [vmem:[%s3045_s14 + $0x940] sm:$0xff] }
  0x6a   : > { %v2360_v30 = vpack.c.bf16 %v529_v22, %v521_v20  ;;  %v545_v37 = vld [vmem:[%s3045_s14 + $0x8d0] sm:$0xff]  ;;  %v2238_v45 = vpack.c.bf16 %v560_v39, %v552_v38  ;;  %v568_v51 = vld [vmem:[%s3045_s14 + $0x988] sm:$0xff]  ;;  %v575_v59 = vld [vmem:[%s3045_s14 + $0x9c0] sm:$0xff] }
  0x6b   : > { %2213 = vmatpush1.bf16.msra.mxu0 %v2212_v27  ;;  %v538_v27 = vld [vmem:[%s3045_s14 + $0x898] sm:$0xff]  ;;  %v2364_v44 = vpack.c.bf16 %v545_v37, %v537_v35  ;;  %v553_v48 = vld [vmem:[%s3045_s14 + $0x910] sm:$0xff]  ;;  %v584_v0 = vld [vmem:[%s3045_s14 + $0xa08] sm:$0xff] }
  0x6c   : > { %2341 = vmatpush1.bf16.msra.mxu1 %v2340_v28  ;;  %2215 = vmatprep.subr.bf16.mxu0 %v2214_v29  ;;  %v546_v28 = vld [vmem:[%s3045_s14 + $0x8d8] sm:$0xff]  ;;  %v2232_v29 = vpack.c.bf16 %v527_v19, %v519_v18  ;;  %v561_v50 = vld [vmem:[%s3045_s14 + $0x950] sm:$0xff]  ;;  %v591_v8 = vld [vmem:[%s3045_s14 + $0xa40] sm:$0xff] }
  0x6d   : > { %2343 = vmatprep.subr.bf16.mxu1 %v2342_v34  ;;  %v543_v34 = vld [vmem:[%s3045_s14 + $0x8c0] sm:$0xff]  ;;  %v2362_v36 = vpack.c.bf16 %v546_v28, %v538_v27  ;;  %v2368_v56 = vpack.c.bf16 %v561_v50, %v553_v48  ;;  %v569_v60 = vld [vmem:[%s3045_s14 + $0x990] sm:$0xff]  ;;  %v600_v13 = vld [vmem:[%s3045_s14 + $0xa88] sm:$0xff] }
  0x6e   : > { %v2236_v43 = vpack.c.bf16 %v543_v34, %v535_v32  ;;  %v577_v62 = vld [vmem:[%s3045_s14 + $0x9d0] sm:$0xff]  ;;  %v608_v14 = vld [vmem:[%s3045_s14 + $0xac8] sm:$0xff]  ;;  %v599_v20 = vld [vmem:[%s3045_s14 + $0xa80] sm:$0xff] }
  0x6f   : > { %2217 = vmatpush1.bf16.msra.mxu0 %v2216_v40  ;;  %v3229_v40 = vcombine.high %v3217_v25, %v3217_v25  ;;  %v2372_v5 = vpack.c.bf16 %v577_v62, %v569_v60  ;;  %v585_v9 = vld [vmem:[%s3045_s14 + $0xa10] sm:$0xff]  ;;  %v2250_v19 = vpack.c.bf16 %v608_v14, %v600_v13  ;;  %v616_v27 = vld [vmem:[%s3045_s14 + $0xb08] sm:$0xff]  ;;  %v615_v35 = vld [vmem:[%s3045_s14 + $0xb00] sm:$0xff] }
  0x70   : > { %2345 = vmatpush1.bf16.msra.mxu1 %v2344_v41  ;;  %2219 = vmatprep.subr.bf16.mxu0 %v2218_v42  ;;  %v554_v41 = vld [vmem:[%s3045_s14 + $0x918] sm:$0xff]  ;;  %v593_v11 = vld [vmem:[%s3045_s14 + $0xa50] sm:$0xff]  ;;  %v624_v28 = vld [vmem:[%s3045_s14 + $0xb48] sm:$0xff] }
  0x71   : > { %2347 = vmatprep.subr.bf16.mxu1 %v2346_v46  ;;  %v562_v42 = vld [vmem:[%s3045_s14 + $0x958] sm:$0xff]  ;;  %v551_v46 = vld [vmem:[%s3045_s14 + $0x900] sm:$0xff]  ;;  %v2376_v18 = vpack.c.bf16 %v593_v11, %v585_v9  ;;  %v601_v22 = vld [vmem:[%s3045_s14 + $0xa90] sm:$0xff]  ;;  %v2254_v34 = vpack.c.bf16 %v624_v28, %v616_v27 }
  0x72   : > { %v2366_v49 = vpack.c.bf16 %v562_v42, %v554_v41  ;;  %v2240_v55 = vpack.c.bf16 %v559_v47, %v551_v46  ;;  %v609_v24 = vld [vmem:[%s3045_s14 + $0xad0] sm:$0xff]  ;;  %v632_v41 = vld [vmem:[%s3045_s14 + $0xb88] sm:$0xff]  ;;  %v631_v48 = vld [vmem:[%s3045_s14 + $0xb80] sm:$0xff] }
  0x73   : > { %2221 = vmatpush1.bf16.msra.mxu0 %v2220_v52  ;;  %v576_v52 = vld [vmem:[%s3045_s14 + $0x9c8] sm:$0xff]  ;;  %v2380_v32 = vpack.c.bf16 %v609_v24, %v601_v22  ;;  %v617_v37 = vld [vmem:[%s3045_s14 + $0xb10] sm:$0xff]  ;;  %v647_v60 = vld [vmem:[%s3045_s14 + $0xc00] sm:$0xff] }
  0x74   : > { %2349 = vmatpush1.bf16.msra.mxu1 %v2348_v53  ;;  %2223 = vmatprep.subr.bf16.mxu0 %v2222_v54  ;;  %v570_v53 = vld [vmem:[%s3045_s14 + $0x998] sm:$0xff]  ;;  %v2242_v57 = vpack.c.bf16 %v576_v52, %v568_v51  ;;  %v625_v39 = vld [vmem:[%s3045_s14 + $0xb50] sm:$0xff]  ;;  %v640_v42 = vld [vmem:[%s3045_s14 + $0xbc8] sm:$0xff] }
  0x75   : > { %2351 = vmatprep.subr.bf16.mxu1 %v2350_v58  ;;  %v578_v54 = vld [vmem:[%s3045_s14 + $0x9d8] sm:$0xff]  ;;  %v567_v58 = vld [vmem:[%s3045_s14 + $0x980] sm:$0xff]  ;;  %v2384_v46 = vpack.c.bf16 %v625_v39, %v617_v37  ;;  %v2258_v47 = vpack.c.bf16 %v640_v42, %v632_v41  ;;  %v633_v50 = vld [vmem:[%s3045_s14 + $0xb90] sm:$0xff] }
  0x76   : > { %v2370_v61 = vpack.c.bf16 %v578_v54, %v570_v53  ;;  %v2244_v4 = vpack.c.bf16 %v575_v59, %v567_v58  ;;  %v641_v52 = vld [vmem:[%s3045_s14 + $0xbd0] sm:$0xff]  ;;  %v648_v53 = vld [vmem:[%s3045_s14 + $0xc08] sm:$0xff]  ;;  %v663_v9 = vld [vmem:[%s3045_s14 + $0xc80] sm:$0xff] }
  0x77   : > { %2225 = vmatpush1.bf16.msra.mxu0 %v2224_v1  ;;  %v592_v1 = vld [vmem:[%s3045_s14 + $0xa48] sm:$0xff]  ;;  %v2388_v58 = vpack.c.bf16 %v641_v52, %v633_v50  ;;  %v649_v62 = vld [vmem:[%s3045_s14 + $0xc10] sm:$0xff]  ;;  %v679_v22 = vld [vmem:[%s3045_s14 + $0xd00] sm:$0xff] }
  0x78   : > { %2353 = vmatpush1.bf16.msra.mxu1 %v2352_v2  ;;  %2227 = vmatprep.subr.bf16.mxu0 %v2226_v3  ;;  %v586_v2 = vld [vmem:[%s3045_s14 + $0xa18] sm:$0xff]  ;;  %v2246_v6 = vpack.c.bf16 %v592_v1, %v584_v0  ;;  %v656_v54 = vld [vmem:[%s3045_s14 + $0xc48] sm:$0xff]  ;;  %v657_v1 = vld [vmem:[%s3045_s14 + $0xc50] sm:$0xff] }
  0x79   : > { %2355 = vmatprep.subr.bf16.mxu1 %v2354_v7  ;;  %v594_v3 = vld [vmem:[%s3045_s14 + $0xa58] sm:$0xff]  ;;  %v583_v7 = vld [vmem:[%s3045_s14 + $0xa00] sm:$0xff]  ;;  %v2262_v59 = vpack.c.bf16 %v656_v54, %v648_v53  ;;  %v665_v11 = vld [vmem:[%s3045_s14 + $0xc90] sm:$0xff] }
  0x7a   : > { %v2374_v10 = vpack.c.bf16 %v594_v3, %v586_v2  ;;  %v664_v2 = vld [vmem:[%s3045_s14 + $0xc88] sm:$0xff]  ;;  %v673_v14 = vld [vmem:[%s3045_s14 + $0xcd0] sm:$0xff]  ;;  %v695_v37 = vld [vmem:[%s3045_s14 + $0xd80] sm:$0xff] }
  0x7b   : > { %2229 = vmatpush1.bf16.msra.mxu0 %v2228_v15  ;;  %v602_v15 = vld [vmem:[%s3045_s14 + $0xa98] sm:$0xff]  ;;  %v672_v3 = vld [vmem:[%s3045_s14 + $0xcc8] sm:$0xff]  ;;  %v681_v24 = vld [vmem:[%s3045_s14 + $0xd10] sm:$0xff] }
  0x7c   : > { %2357 = vmatpush1.bf16.msra.mxu1 %v2356_v16  ;;  %2231 = vmatprep.subr.bf16.mxu0 %v2230_v17  ;;  %v610_v16 = vld [vmem:[%s3045_s14 + $0xad8] sm:$0xff]  ;;  %v2248_v17 = vpack.c.bf16 %v591_v8, %v583_v7  ;;  %v2392_v7 = vpack.c.bf16 %v657_v1, %v649_v62  ;;  %v2266_v8 = vpack.c.bf16 %v672_v3, %v664_v2  ;;  %v689_v28 = vld [vmem:[%s3045_s14 + $0xd50] sm:$0xff]  ;;  %v711_v50 = vld [vmem:[%s3045_s14 + $0xe00] sm:$0xff] }
  0x7d   : > { %2359 = vmatprep.subr.bf16.mxu1 %v2358_v21  ;;  %v607_v21 = vld [vmem:[%s3045_s14 + $0xac0] sm:$0xff]  ;;  %v2378_v23 = vpack.c.bf16 %v610_v16, %v602_v15  ;;  %v680_v15 = vld [vmem:[%s3045_s14 + $0xd08] sm:$0xff]  ;;  %v697_v39 = vld [vmem:[%s3045_s14 + $0xd90] sm:$0xff] }
  0x7e   : > { %862 = vmatmul.mubr.f32.vlgmr.msra.gmra.mrb[0].mxu0 %v3168_v26  ;;  %v688_v16 = vld [vmem:[%s3045_s14 + $0xd48] sm:$0xff]  ;;  %v705_v42 = vld [vmem:[%s3045_s14 + $0xdd0] sm:$0xff]  ;;  %v727_v62 = vld [vmem:[%s3045_s14 + $0xe80] sm:$0xff] }
  0x7f   : > { %2233 = vmatpush1.bf16.msra.mxu0 %v2232_v29  ;;  %1004 = vmatmul.mubr.f32.vlgmr.msra.gmra.mrb[0].mxu1 %v3168_v26  ;;  %v618_v29 = vld [vmem:[%s3045_s14 + $0xb18] sm:$0xff]  ;;  %v713_v52 = vld [vmem:[%s3045_s14 + $0xe10] sm:$0xff] }
  0x80   : > { %2361 = vmatpush1.bf16.msra.mxu1 %v2360_v30  ;;  %2235 = vmatprep.subr.bf16.mxu0 %v2234_v31  ;;  %v626_v30 = vld [vmem:[%s3045_s14 + $0xb58] sm:$0xff]  ;;  %v2252_v31 = vpack.c.bf16 %v607_v21, %v599_v20  ;;  %v2396_v20 = vpack.c.bf16 %v673_v14, %v665_v11  ;;  %v2270_v21 = vpack.c.bf16 %v688_v16, %v680_v15  ;;  %v721_v54 = vld [vmem:[%s3045_s14 + $0xe50] sm:$0xff]  ;;  %v743_v11 = vld [vmem:[%s3045_s14 + $0xf00] sm:$0xff] }
  0x81   : > { %2363 = vmatprep.subr.bf16.mxu1 %v2362_v36  ;;  %932 = vmatprep.mubr.f32.mxu0 %v3229_v40  ;;  %v623_v36 = vld [vmem:[%s3045_s14 + $0xb40] sm:$0xff]  ;;  %v2382_v38 = vpack.c.bf16 %v626_v30, %v618_v29  ;;  %v696_v29 = vld [vmem:[%s3045_s14 + $0xd88] sm:$0xff]  ;;  %v729_v1 = vld [vmem:[%s3045_s14 + $0xe90] sm:$0xff] }
  0x82   : > { %1074 = vmatprep.mubr.f32.mxu1 %v3229_v40  ;;  %v704_v30 = vld [vmem:[%s3045_s14 + $0xdc8] sm:$0xff]  ;;  %v737_v3 = vld [vmem:[%s3045_s14 + $0xed0] sm:$0xff] }
  0x83   : > { %2237 = vmatpush1.bf16.msra.mxu0 %v2236_v43  ;;  %v634_v43 = vld [vmem:[%s3045_s14 + $0xb98] sm:$0xff]  ;;  %v745_v14 = vld [vmem:[%s3045_s14 + $0xf10] sm:$0xff] }
  0x84   : > { %2365 = vmatpush1.bf16.msra.mxu1 %v2364_v44  ;;  %2239 = vmatprep.subr.bf16.mxu0 %v2238_v45  ;;  %v642_v44 = vld [vmem:[%s3045_s14 + $0xbd8] sm:$0xff]  ;;  %v2256_v45 = vpack.c.bf16 %v623_v36, %v615_v35  ;;  %v2400_v35 = vpack.c.bf16 %v689_v28, %v681_v24  ;;  %v2274_v36 = vpack.c.bf16 %v704_v30, %v696_v29  ;;  %v753_v16 = vld [vmem:[%s3045_s14 + $0xf50] sm:$0xff]  ;;  %v759_v24 = vld [vmem:[%s3045_s14 + $0xf80] sm:$0xff] }
  0x85   : > { %2367 = vmatprep.subr.bf16.mxu1 %v2366_v49  ;;  %v639_v49 = vld [vmem:[%s3045_s14 + $0xbc0] sm:$0xff]  ;;  %v2386_v51 = vpack.c.bf16 %v642_v44, %v634_v43  ;;  %v712_v43 = vld [vmem:[%s3045_s14 + $0xe08] sm:$0xff]  ;;  %v761_v28 = vld [vmem:[%s3045_s14 + $0xf90] sm:$0xff] }
  0x86   : > { %v720_v44 = vld [vmem:[%s3045_s14 + $0xe48] sm:$0xff]  ;;  %v769_v30 = vld [vmem:[%s3045_s14 + $0xfd0] sm:$0xff] }
  0x87   : > { %2241 = vmatpush1.bf16.msra.mxu0 %v2240_v55  ;;  %v650_v55 = vld [vmem:[%s3045_s14 + $0xc18] sm:$0xff] }
  0x88   : > { %2369 = vmatpush1.bf16.msra.mxu1 %v2368_v56  ;;  %2243 = vmatprep.subr.bf16.mxu0 %v2242_v57  ;;  %v658_v56 = vld [vmem:[%s3045_s14 + $0xc58] sm:$0xff]  ;;  %v2260_v57 = vpack.c.bf16 %v639_v49, %v631_v48  ;;  %v2404_v48 = vpack.c.bf16 %v705_v42, %v697_v39  ;;  %v2278_v49 = vpack.c.bf16 %v720_v44, %v712_v43  ;;  %v267_v39 = vld [vmem:[%s3045_s14 + $0x20] sm:$0xff]  ;;  %v269_v42 = vld [vmem:[%s3045_s14 + $0x30] sm:$0xff] }
  0x89   : > { %2371 = vmatprep.subr.bf16.mxu1 %v2370_v61  ;;  %v655_v61 = vld [vmem:[%s3045_s14 + $0xc40] sm:$0xff]  ;;  %v2390_v0 = vpack.c.bf16 %v658_v56, %v650_v55  ;;  %v728_v55 = vld [vmem:[%s3045_s14 + $0xe88] sm:$0xff]  ;;  %v277_v44 = vld [vmem:[%s3045_s14 + $0x70] sm:$0xff] }
  0x8a   : > { %v736_v56 = vld [vmem:[%s3045_s14 + $0xec8] sm:$0xff] }
  0x8b   : > { %2245 = vmatpush1.bf16.msra.mxu0 %v2244_v4  ;;  %v666_v4 = vld [vmem:[%s3045_s14 + $0xc98] sm:$0xff] }
  0x8c   : > { %2373 = vmatpush1.bf16.msra.mxu1 %v2372_v5  ;;  %2247 = vmatprep.subr.bf16.mxu0 %v2246_v6  ;;  %v674_v5 = vld [vmem:[%s3045_s14 + $0xcd8] sm:$0xff]  ;;  %v2264_v6 = vpack.c.bf16 %v655_v61, %v647_v60  ;;  %v2408_v60 = vpack.c.bf16 %v721_v54, %v713_v52  ;;  %v2282_v61 = vpack.c.bf16 %v736_v56, %v728_v55  ;;  %v283_v52 = vld [vmem:[%s3045_s14 + $0xa0] sm:$0xff]  ;;  %v285_v54 = vld [vmem:[%s3045_s14 + $0xb0] sm:$0xff] }
  0x8d   : > { %2375 = vmatprep.subr.bf16.mxu1 %v2374_v10  ;;  %v671_v10 = vld [vmem:[%s3045_s14 + $0xcc0] sm:$0xff]  ;;  %v2394_v13 = vpack.c.bf16 %v674_v5, %v666_v4  ;;  %v744_v4 = vld [vmem:[%s3045_s14 + $0xf08] sm:$0xff]  ;;  %v293_v56 = vld [vmem:[%s3045_s14 + $0xf0] sm:$0xff] }
  0x8e   : > { %v752_v5 = vld [vmem:[%s3045_s14 + $0xf48] sm:$0xff] }
  0x8f   : > { %2249 = vmatpush1.bf16.msra.mxu0 %v2248_v17  ;;  %v682_v17 = vld [vmem:[%s3045_s14 + $0xd18] sm:$0xff] }
  0x90   : > { %2377 = vmatpush1.bf16.msra.mxu1 %v2376_v18  ;;  %2251 = vmatprep.subr.bf16.mxu0 %v2250_v19  ;;  %v690_v18 = vld [vmem:[%s3045_s14 + $0xd58] sm:$0xff]  ;;  %v2268_v19 = vpack.c.bf16 %v671_v10, %v663_v9  ;;  %v2412_v9 = vpack.c.bf16 %v737_v3, %v729_v1  ;;  %v2286_v10 = vpack.c.bf16 %v752_v5, %v744_v4  ;;  %v299_v1 = vld [vmem:[%s3045_s14 + $0x120] sm:$0xff]  ;;  %v301_v3 = vld [vmem:[%s3045_s14 + $0x130] sm:$0xff] }
  0x91   : > { %2379 = vmatprep.subr.bf16.mxu1 %v2378_v23  ;;  %v687_v23 = vld [vmem:[%s3045_s14 + $0xd40] sm:$0xff]  ;;  %v2398_v27 = vpack.c.bf16 %v690_v18, %v682_v17  ;;  %v760_v17 = vld [vmem:[%s3045_s14 + $0xf88] sm:$0xff]  ;;  %v309_v5 = vld [vmem:[%s3045_s14 + $0x170] sm:$0xff] }
  0x92   : > { %v768_v18 = vld [vmem:[%s3045_s14 + $0xfc8] sm:$0xff] }
  0x93   : > { %2253 = vmatpush1.bf16.msra.mxu0 %v2252_v31  ;;  %v698_v31 = vld [vmem:[%s3045_s14 + $0xd98] sm:$0xff] }
  0x94   : > { %2381 = vmatpush1.bf16.msra.mxu1 %v2380_v32  ;;  %2255 = vmatprep.subr.bf16.mxu0 %v2254_v34  ;;  %v706_v32 = vld [vmem:[%s3045_s14 + $0xdd8] sm:$0xff]  ;;  %v2272_v34 = vpack.c.bf16 %v687_v23, %v679_v22  ;;  %v2416_v22 = vpack.c.bf16 %v753_v16, %v745_v14  ;;  %v2290_v23 = vpack.c.bf16 %v768_v18, %v760_v17  ;;  %v315_v14 = vld [vmem:[%s3045_s14 + $0x1a0] sm:$0xff]  ;;  %v317_v16 = vld [vmem:[%s3045_s14 + $0x1b0] sm:$0xff] }
  0x95   : > { %2383 = vmatprep.subr.bf16.mxu1 %v2382_v38  ;;  %v703_v38 = vld [vmem:[%s3045_s14 + $0xdc0] sm:$0xff]  ;;  %v2402_v41 = vpack.c.bf16 %v706_v32, %v698_v31  ;;  %v268_v31 = vld [vmem:[%s3045_s14 + $0x28] sm:$0xff]  ;;  %v325_v18 = vld [vmem:[%s3045_s14 + $0x1f0] sm:$0xff] }
  0x96   : > { %v276_v32 = vld [vmem:[%s3045_s14 + $0x68] sm:$0xff] }
  0x97   : > { %2257 = vmatpush1.bf16.msra.mxu0 %v2256_v45  ;;  %v714_v45 = vld [vmem:[%s3045_s14 + $0xe18] sm:$0xff] }
  0x98   : > { %2385 = vmatpush1.bf16.msra.mxu1 %v2384_v46  ;;  %2259 = vmatprep.subr.bf16.mxu0 %v2258_v47  ;;  %v722_v46 = vld [vmem:[%s3045_s14 + $0xe58] sm:$0xff]  ;;  %v2276_v47 = vpack.c.bf16 %v703_v38, %v695_v37  ;;  %v2420_v37 = vpack.c.bf16 %v769_v30, %v761_v28  ;;  %v2422_v38 = vpack.c.bf16 %v276_v32, %v268_v31  ;;  %v339_v28 = vld [vmem:[%s3045_s14 + $0x260] sm:$0xff]  ;;  %v341_v31 = vld [vmem:[%s3045_s14 + $0x270] sm:$0xff] }
  0x99   : > { %2387 = vmatprep.subr.bf16.mxu1 %v2386_v51  ;;  %v719_v51 = vld [vmem:[%s3045_s14 + $0xe40] sm:$0xff]  ;;  %v2406_v53 = vpack.c.bf16 %v722_v46, %v714_v45  ;;  %v284_v45 = vld [vmem:[%s3045_s14 + $0xa8] sm:$0xff] }
  0x9a   : > { %v292_v46 = vld [vmem:[%s3045_s14 + $0xe8] sm:$0xff] }
  0x9b   : > { %2261 = vmatpush1.bf16.msra.mxu0 %v2260_v57  ;;  %v730_v57 = vld [vmem:[%s3045_s14 + $0xe98] sm:$0xff]  ;;  %v348_v32 = vld [vmem:[%s3045_s14 + $0x2a8] sm:$0xff] }
  0x9c   : > { %2389 = vmatpush1.bf16.msra.mxu1 %v2388_v58  ;;  %2263 = vmatprep.subr.bf16.mxu0 %v2262_v59  ;;  %v738_v58 = vld [vmem:[%s3045_s14 + $0xed8] sm:$0xff]  ;;  %v2280_v59 = vpack.c.bf16 %v719_v51, %v711_v50  ;;  %v2552_v50 = vpack.c.bf16 %v277_v44, %v269_v42  ;;  %v2426_v51 = vpack.c.bf16 %v292_v46, %v284_v45  ;;  %v355_v42 = vld [vmem:[%s3045_s14 + $0x2e0] sm:$0xff]  ;;  %v357_v45 = vld [vmem:[%s3045_s14 + $0x2f0] sm:$0xff] }
  0x9d   : > { %2391 = vmatprep.subr.bf16.mxu1 %v2390_v0  ;;  %v735_v0 = vld [vmem:[%s3045_s14 + $0xec0] sm:$0xff]  ;;  %v2410_v2 = vpack.c.bf16 %v738_v58, %v730_v57  ;;  %v300_v57 = vld [vmem:[%s3045_s14 + $0x128] sm:$0xff] }
  0x9e   : > { %v308_v58 = vld [vmem:[%s3045_s14 + $0x168] sm:$0xff] }
  0x9f   : > { %2265 = vmatpush1.bf16.msra.mxu0 %v2264_v6  ;;  %v746_v6 = vld [vmem:[%s3045_s14 + $0xf18] sm:$0xff]  ;;  %v364_v46 = vld [vmem:[%s3045_s14 + $0x328] sm:$0xff] }
  0xa0   : > { %2393 = vmatpush1.bf16.msra.mxu1 %v2392_v7  ;;  %2267 = vmatprep.subr.bf16.mxu0 %v2266_v8  ;;  %v754_v7 = vld [vmem:[%s3045_s14 + $0xf58] sm:$0xff]  ;;  %v2284_v8 = vpack.c.bf16 %v735_v0, %v727_v62  ;;  %v2556_v62 = vpack.c.bf16 %v293_v56, %v285_v54  ;;  %v2430_v0 = vpack.c.bf16 %v308_v58, %v300_v57  ;;  %v371_v54 = vld [vmem:[%s3045_s14 + $0x360] sm:$0xff]  ;;  %v373_v57 = vld [vmem:[%s3045_s14 + $0x370] sm:$0xff] }
  0xa1   : > { %2395 = vmatprep.subr.bf16.mxu1 %v2394_v13  ;;  %v751_v13 = vld [vmem:[%s3045_s14 + $0xf40] sm:$0xff]  ;;  %v2414_v15 = vpack.c.bf16 %v754_v7, %v746_v6  ;;  %v316_v6 = vld [vmem:[%s3045_s14 + $0x1a8] sm:$0xff] }
  0xa2   : > { %v324_v7 = vld [vmem:[%s3045_s14 + $0x1e8] sm:$0xff] }
  0xa3   : > { %2269 = vmatpush1.bf16.msra.mxu0 %v2268_v19  ;;  %v762_v19 = vld [vmem:[%s3045_s14 + $0xf98] sm:$0xff]  ;;  %v380_v58 = vld [vmem:[%s3045_s14 + $0x3a8] sm:$0xff] }
  0xa4   : > { %2397 = vmatpush1.bf16.msra.mxu1 %v2396_v20  ;;  %2271 = vmatprep.subr.bf16.mxu0 %v2270_v21  ;;  %v770_v20 = vld [vmem:[%s3045_s14 + $0xfd8] sm:$0xff]  ;;  %v2288_v21 = vpack.c.bf16 %v751_v13, %v743_v11  ;;  %v2560_v11 = vpack.c.bf16 %v309_v5, %v301_v3  ;;  %v2434_v13 = vpack.c.bf16 %v324_v7, %v316_v6  ;;  %v387_v3 = vld [vmem:[%s3045_s14 + $0x3e0] sm:$0xff]  ;;  %v389_v6 = vld [vmem:[%s3045_s14 + $0x3f0] sm:$0xff] }
  0xa5   : > { %2399 = vmatprep.subr.bf16.mxu1 %v2398_v27  ;;  %v767_v27 = vld [vmem:[%s3045_s14 + $0xfc0] sm:$0xff]  ;;  %v2418_v29 = vpack.c.bf16 %v770_v20, %v762_v19  ;;  %v332_v19 = vld [vmem:[%s3045_s14 + $0x228] sm:$0xff]  ;;  %v334_v20 = vld [vmem:[%s3045_s14 + $0x238] sm:$0xff] }
  0xa6   : > { %v396_v7 = vld [vmem:[%s3045_s14 + $0x428] sm:$0xff] }
  0xa7   : > { %2273 = vmatpush1.bf16.msra.mxu0 %v2272_v34  ;;  %v270_v34 = vld [vmem:[%s3045_s14 + $0x38] sm:$0xff] }
  0xa8   : > { %2401 = vmatpush1.bf16.msra.mxu1 %v2400_v35  ;;  %2275 = vmatprep.subr.bf16.mxu0 %v2274_v36  ;;  %v278_v35 = vld [vmem:[%s3045_s14 + $0x78] sm:$0xff]  ;;  %v2292_v36 = vpack.c.bf16 %v767_v27, %v759_v24  ;;  %v331_v27 = vld [vmem:[%s3045_s14 + $0x220] sm:$0xff] }
  0xa9   : > { %2403 = vmatprep.subr.bf16.mxu1 %v2402_v41  ;;  %v275_v41 = vld [vmem:[%s3045_s14 + $0x60] sm:$0xff]  ;;  %v2550_v43 = vpack.c.bf16 %v278_v35, %v270_v34  ;;  %v356_v34 = vld [vmem:[%s3045_s14 + $0x2e8] sm:$0xff]  ;;  %v350_v35 = vld [vmem:[%s3045_s14 + $0x2b8] sm:$0xff] }
  0xab   : > { %2277 = vmatpush1.bf16.msra.mxu0 %v2276_v47  ;;  %v286_v47 = vld [vmem:[%s3045_s14 + $0xb8] sm:$0xff] }
  0xac   : > { %2405 = vmatpush1.bf16.msra.mxu1 %v2404_v48  ;;  %2279 = vmatprep.subr.bf16.mxu0 %v2278_v49  ;;  %v294_v48 = vld [vmem:[%s3045_s14 + $0xf8] sm:$0xff]  ;;  %v2424_v49 = vpack.c.bf16 %v275_v41, %v267_v39  ;;  %v2442_v39 = vpack.c.bf16 %v356_v34, %v348_v32  ;;  %v347_v41 = vld [vmem:[%s3045_s14 + $0x2a0] sm:$0xff]  ;;  %v421_v32 = vld [vmem:[%s3045_s14 + $0x4f0] sm:$0xff] }
  0xad   : > { %2407 = vmatprep.subr.bf16.mxu1 %v2406_v53  ;;  %v291_v53 = vld [vmem:[%s3045_s14 + $0xe0] sm:$0xff]  ;;  %v2554_v55 = vpack.c.bf16 %v294_v48, %v286_v47  ;;  %v372_v47 = vld [vmem:[%s3045_s14 + $0x368] sm:$0xff]  ;;  %v366_v48 = vld [vmem:[%s3045_s14 + $0x338] sm:$0xff] }
  0xae   : > { %v428_v34 = vld [vmem:[%s3045_s14 + $0x528] sm:$0xff] }
  0xaf   : > { %2281 = vmatpush1.bf16.msra.mxu0 %v2280_v59  ;;  %v302_v59 = vld [vmem:[%s3045_s14 + $0x138] sm:$0xff] }
  0xb0   : > { %2409 = vmatpush1.bf16.msra.mxu1 %v2408_v60  ;;  %2283 = vmatprep.subr.bf16.mxu0 %v2282_v61  ;;  %v310_v60 = vld [vmem:[%s3045_s14 + $0x178] sm:$0xff]  ;;  %v2428_v61 = vpack.c.bf16 %v291_v53, %v283_v52  ;;  %v2446_v52 = vpack.c.bf16 %v372_v47, %v364_v46  ;;  %v363_v53 = vld [vmem:[%s3045_s14 + $0x320] sm:$0xff]  ;;  %v437_v46 = vld [vmem:[%s3045_s14 + $0x570] sm:$0xff] }
  0xb1   : > { %2411 = vmatprep.subr.bf16.mxu1 %v2410_v2  ;;  %v307_v2 = vld [vmem:[%s3045_s14 + $0x160] sm:$0xff]  ;;  %v2558_v4 = vpack.c.bf16 %v310_v60, %v302_v59  ;;  %v388_v59 = vld [vmem:[%s3045_s14 + $0x3e8] sm:$0xff]  ;;  %v382_v60 = vld [vmem:[%s3045_s14 + $0x3b8] sm:$0xff] }
  0xb2   : > { %v444_v47 = vld [vmem:[%s3045_s14 + $0x5a8] sm:$0xff] }
  0xb3   : > { %2285 = vmatpush1.bf16.msra.mxu0 %v2284_v8  ;;  %v318_v8 = vld [vmem:[%s3045_s14 + $0x1b8] sm:$0xff] }
  0xb4   : > { %2413 = vmatpush1.bf16.msra.mxu1 %v2412_v9  ;;  %2287 = vmatprep.subr.bf16.mxu0 %v2286_v10  ;;  %v326_v9 = vld [vmem:[%s3045_s14 + $0x1f8] sm:$0xff]  ;;  %v2432_v10 = vpack.c.bf16 %v307_v2, %v299_v1  ;;  %v2450_v1 = vpack.c.bf16 %v388_v59, %v380_v58  ;;  %v379_v2 = vld [vmem:[%s3045_s14 + $0x3a0] sm:$0xff]  ;;  %v453_v58 = vld [vmem:[%s3045_s14 + $0x5f0] sm:$0xff] }
  0xb5   : > { %2415 = vmatprep.subr.bf16.mxu1 %v2414_v15  ;;  %v323_v15 = vld [vmem:[%s3045_s14 + $0x1e0] sm:$0xff]  ;;  %v2562_v17 = vpack.c.bf16 %v326_v9, %v318_v8  ;;  %v404_v8 = vld [vmem:[%s3045_s14 + $0x468] sm:$0xff]  ;;  %v398_v9 = vld [vmem:[%s3045_s14 + $0x438] sm:$0xff] }
  0xb6   : > { %v460_v59 = vld [vmem:[%s3045_s14 + $0x628] sm:$0xff] }
  0xb7   : > { %2289 = vmatpush1.bf16.msra.mxu0 %v2288_v21  ;;  %v342_v21 = vld [vmem:[%s3045_s14 + $0x278] sm:$0xff] }
  0xb8   : > { %2417 = vmatpush1.bf16.msra.mxu1 %v2416_v22  ;;  %2291 = vmatprep.subr.bf16.mxu0 %v2290_v23  ;;  %v2436_v22 = vpack.c.bf16 %v323_v15, %v315_v14  ;;  %v2564_v23 = vpack.c.bf16 %v325_v18, %v317_v16  ;;  %v2566_v30 = vpack.c.bf16 %v342_v21, %v334_v20  ;;  %v395_v15 = vld [vmem:[%s3045_s14 + $0x420] sm:$0xff]  ;;  %v420_v20 = vld [vmem:[%s3045_s14 + $0x4e8] sm:$0xff]  ;;  %v414_v21 = vld [vmem:[%s3045_s14 + $0x4b8] sm:$0xff] }
  0xb9   : > { %2419 = vmatprep.subr.bf16.mxu1 %v2418_v29  ;;  %v333_v29 = vld [vmem:[%s3045_s14 + $0x230] sm:$0xff]  ;;  %v2454_v14 = vpack.c.bf16 %v404_v8, %v396_v7  ;;  %v403_v16 = vld [vmem:[%s3045_s14 + $0x460] sm:$0xff]  ;;  %v476_v8 = vld [vmem:[%s3045_s14 + $0x6a8] sm:$0xff] }
  0xba   : > { %v469_v7 = vld [vmem:[%s3045_s14 + $0x670] sm:$0xff] }
  0xbb   : > { %2293 = vmatpush1.bf16.msra.mxu0 %v2292_v36  ;;  %v358_v36 = vld [vmem:[%s3045_s14 + $0x2f8] sm:$0xff] }
  0xbc   : > { %2421 = vmatpush1.bf16.msra.mxu1 %v2420_v37  ;;  %2423 = vmatprep.subr.bf16.mxu0 %v2422_v38  ;;  %v2440_v37 = vpack.c.bf16 %v339_v28, %v331_v27  ;;  %v2568_v38 = vpack.c.bf16 %v341_v31, %v333_v29  ;;  %v2570_v44 = vpack.c.bf16 %v358_v36, %v350_v35  ;;  %v411_v28 = vld [vmem:[%s3045_s14 + $0x4a0] sm:$0xff]  ;;  %v436_v35 = vld [vmem:[%s3045_s14 + $0x568] sm:$0xff]  ;;  %v430_v36 = vld [vmem:[%s3045_s14 + $0x538] sm:$0xff] }
  0xbd   : > { %2551 = vmatprep.subr.bf16.mxu1 %v2550_v43  ;;  %v349_v43 = vld [vmem:[%s3045_s14 + $0x2b0] sm:$0xff]  ;;  %v419_v29 = vld [vmem:[%s3045_s14 + $0x4e0] sm:$0xff] }
  0xbe   : > { %933 = vmatmul.mubr.f32.vlgmr.msra.gmra.mrb[0].mxu0 %v3217_v25 }
  0xbf   : > { %1075 = vmatmul.mubr.f32.vlgmr.msra.gmra.mrb[0].mxu1 %v3217_v25  ;;  %2425 = vmatpush1.bf16.msra.mxu0 %v2424_v49  ;;  %v374_v49 = vld [vmem:[%s3045_s14 + $0x378] sm:$0xff] }
  0xc0   : > { %2553 = vmatpush1.bf16.msra.mxu1 %v2552_v50  ;;  %2427 = vmatprep.subr.bf16.mxu0 %v2426_v51  ;;  %v2444_v50 = vpack.c.bf16 %v355_v42, %v347_v41  ;;  %v2572_v51 = vpack.c.bf16 %v357_v45, %v349_v43  ;;  %v2574_v56 = vpack.c.bf16 %v374_v49, %v366_v48  ;;  %v427_v42 = vld [vmem:[%s3045_s14 + $0x520] sm:$0xff]  ;;  %v452_v48 = vld [vmem:[%s3045_s14 + $0x5e8] sm:$0xff]  ;;  %v446_v49 = vld [vmem:[%s3045_s14 + $0x5b8] sm:$0xff] }
  0xc1   : > { %2555 = vmatprep.subr.bf16.mxu1 %v2554_v55  ;;  %1145 = vmatprep.mubr.f32.mxu0 %v3175_v33  ;;  %v365_v55 = vld [vmem:[%s3045_s14 + $0x330] sm:$0xff]  ;;  %v2462_v41 = vpack.c.bf16 %v436_v35, %v428_v34  ;;  %v435_v43 = vld [vmem:[%s3045_s14 + $0x560] sm:$0xff]  ;;  %v508_v35 = vld [vmem:[%s3045_s14 + $0x7a8] sm:$0xff] }
  0xc2   : > { %1287 = vmatprep.mubr.f32.mxu1 %v3175_v33  ;;  %v340_v33 = vld [vmem:[%s3045_s14 + $0x268] sm:$0xff]  ;;  %v501_v34 = vld [vmem:[%s3045_s14 + $0x770] sm:$0xff] }
  0xc3   : > { %2429 = vmatpush1.bf16.msra.mxu0 %v2428_v61  ;;  %v2438_v24 = vpack.c.bf16 %v340_v33, %v332_v19  ;;  %v390_v61 = vld [vmem:[%s3045_s14 + $0x3f8] sm:$0xff]  ;;  %v405_v19 = vld [vmem:[%s3045_s14 + $0x470] sm:$0xff]  ;;  %v412_v33 = vld [vmem:[%s3045_s14 + $0x4a8] sm:$0xff] }
  0xc4   : > { %2557 = vmatpush1.bf16.msra.mxu1 %v2556_v62  ;;  %2431 = vmatprep.subr.bf16.mxu0 %v2430_v0  ;;  %v2448_v62 = vpack.c.bf16 %v371_v54, %v363_v53  ;;  %v2576_v0 = vpack.c.bf16 %v373_v57, %v365_v55  ;;  %v2578_v5 = vpack.c.bf16 %v390_v61, %v382_v60  ;;  %v443_v54 = vld [vmem:[%s3045_s14 + $0x5a0] sm:$0xff]  ;;  %v468_v60 = vld [vmem:[%s3045_s14 + $0x668] sm:$0xff]  ;;  %v462_v61 = vld [vmem:[%s3045_s14 + $0x638] sm:$0xff] }
  0xc5   : > { %2559 = vmatprep.subr.bf16.mxu1 %v2558_v4  ;;  %v381_v4 = vld [vmem:[%s3045_s14 + $0x3b0] sm:$0xff]  ;;  %v2458_v27 = vpack.c.bf16 %v420_v20, %v412_v33  ;;  %v2466_v53 = vpack.c.bf16 %v452_v48, %v444_v47  ;;  %v451_v55 = vld [vmem:[%s3045_s14 + $0x5e0] sm:$0xff]  ;;  %v492_v20 = vld [vmem:[%s3045_s14 + $0x728] sm:$0xff] }
  0xc6   : > { %v485_v33 = vld [vmem:[%s3045_s14 + $0x6f0] sm:$0xff]  ;;  %v524_v48 = vld [vmem:[%s3045_s14 + $0x828] sm:$0xff] }
  0xc7   : > { %2433 = vmatpush1.bf16.msra.mxu0 %v2432_v10  ;;  %v406_v10 = vld [vmem:[%s3045_s14 + $0x478] sm:$0xff]  ;;  %v517_v47 = vld [vmem:[%s3045_s14 + $0x7f0] sm:$0xff] }
  0xc8   : > { %2561 = vmatpush1.bf16.msra.mxu1 %v2560_v11  ;;  %2435 = vmatprep.subr.bf16.mxu0 %v2434_v13  ;;  %v2452_v11 = vpack.c.bf16 %v387_v3, %v379_v2  ;;  %v2580_v13 = vpack.c.bf16 %v389_v6, %v381_v4  ;;  %v2582_v18 = vpack.c.bf16 %v406_v10, %v398_v9  ;;  %v459_v3 = vld [vmem:[%s3045_s14 + $0x620] sm:$0xff]  ;;  %v484_v9 = vld [vmem:[%s3045_s14 + $0x6e8] sm:$0xff]  ;;  %v478_v10 = vld [vmem:[%s3045_s14 + $0x6b8] sm:$0xff] }
  0xc9   : > { %2563 = vmatprep.subr.bf16.mxu1 %v2562_v17  ;;  %v397_v17 = vld [vmem:[%s3045_s14 + $0x430] sm:$0xff]  ;;  %v2470_v2 = vpack.c.bf16 %v468_v60, %v460_v59  ;;  %v467_v4 = vld [vmem:[%s3045_s14 + $0x660] sm:$0xff]  ;;  %v540_v60 = vld [vmem:[%s3045_s14 + $0x8a8] sm:$0xff] }
  0xca   : > { %v533_v59 = vld [vmem:[%s3045_s14 + $0x870] sm:$0xff] }
  0xcb   : > { %2437 = vmatpush1.bf16.msra.mxu0 %v2436_v22  ;;  %v422_v22 = vld [vmem:[%s3045_s14 + $0x4f8] sm:$0xff] }
  0xcc   : > { %2565 = vmatpush1.bf16.msra.mxu1 %v2564_v23  ;;  %2439 = vmatprep.subr.bf16.mxu0 %v2438_v24  ;;  %v2456_v23 = vpack.c.bf16 %v403_v16, %v395_v15  ;;  %v2584_v24 = vpack.c.bf16 %v405_v19, %v397_v17  ;;  %v2586_v31 = vpack.c.bf16 %v422_v22, %v414_v21  ;;  %v475_v16 = vld [vmem:[%s3045_s14 + $0x6a0] sm:$0xff]  ;;  %v500_v21 = vld [vmem:[%s3045_s14 + $0x768] sm:$0xff]  ;;  %v494_v22 = vld [vmem:[%s3045_s14 + $0x738] sm:$0xff] }
  0xcd   : > { %2567 = vmatprep.subr.bf16.mxu1 %v2566_v30  ;;  %v413_v30 = vld [vmem:[%s3045_s14 + $0x4b0] sm:$0xff]  ;;  %v2474_v15 = vpack.c.bf16 %v484_v9, %v476_v8  ;;  %v483_v17 = vld [vmem:[%s3045_s14 + $0x6e0] sm:$0xff]  ;;  %v556_v9 = vld [vmem:[%s3045_s14 + $0x928] sm:$0xff] }
  0xce   : > { %v549_v8 = vld [vmem:[%s3045_s14 + $0x8f0] sm:$0xff] }
  0xcf   : > { %2441 = vmatpush1.bf16.msra.mxu0 %v2440_v37  ;;  %v438_v37 = vld [vmem:[%s3045_s14 + $0x578] sm:$0xff] }
  0xd0   : > { %2569 = vmatpush1.bf16.msra.mxu1 %v2568_v38  ;;  %2443 = vmatprep.subr.bf16.mxu0 %v2442_v39  ;;  %v2460_v38 = vpack.c.bf16 %v419_v29, %v411_v28  ;;  %v2588_v39 = vpack.c.bf16 %v421_v32, %v413_v30  ;;  %v2590_v45 = vpack.c.bf16 %v438_v37, %v430_v36  ;;  %v491_v29 = vld [vmem:[%s3045_s14 + $0x720] sm:$0xff]  ;;  %v516_v36 = vld [vmem:[%s3045_s14 + $0x7e8] sm:$0xff]  ;;  %v510_v37 = vld [vmem:[%s3045_s14 + $0x7b8] sm:$0xff] }
  0xd1   : > { %2571 = vmatprep.subr.bf16.mxu1 %v2570_v44  ;;  %v429_v44 = vld [vmem:[%s3045_s14 + $0x530] sm:$0xff]  ;;  %v2478_v28 = vpack.c.bf16 %v500_v21, %v492_v20  ;;  %v499_v30 = vld [vmem:[%s3045_s14 + $0x760] sm:$0xff]  ;;  %v572_v21 = vld [vmem:[%s3045_s14 + $0x9a8] sm:$0xff] }
  0xd2   : > { %v565_v20 = vld [vmem:[%s3045_s14 + $0x970] sm:$0xff] }
  0xd3   : > { %2445 = vmatpush1.bf16.msra.mxu0 %v2444_v50  ;;  %v454_v50 = vld [vmem:[%s3045_s14 + $0x5f8] sm:$0xff] }
  0xd4   : > { %2573 = vmatpush1.bf16.msra.mxu1 %v2572_v51  ;;  %2447 = vmatprep.subr.bf16.mxu0 %v2446_v52  ;;  %v2464_v51 = vpack.c.bf16 %v435_v43, %v427_v42  ;;  %v2592_v52 = vpack.c.bf16 %v437_v46, %v429_v44  ;;  %v2594_v57 = vpack.c.bf16 %v454_v50, %v446_v49  ;;  %v507_v43 = vld [vmem:[%s3045_s14 + $0x7a0] sm:$0xff]  ;;  %v532_v49 = vld [vmem:[%s3045_s14 + $0x868] sm:$0xff]  ;;  %v526_v50 = vld [vmem:[%s3045_s14 + $0x838] sm:$0xff] }
  0xd5   : > { %2575 = vmatprep.subr.bf16.mxu1 %v2574_v56  ;;  %v445_v56 = vld [vmem:[%s3045_s14 + $0x5b0] sm:$0xff]  ;;  %v2482_v42 = vpack.c.bf16 %v516_v36, %v508_v35  ;;  %v515_v44 = vld [vmem:[%s3045_s14 + $0x7e0] sm:$0xff]  ;;  %v588_v35 = vld [vmem:[%s3045_s14 + $0xa28] sm:$0xff] }
  0xd6   : > { %v590_v36 = vld [vmem:[%s3045_s14 + $0xa38] sm:$0xff] }
  0xd7   : > { %2449 = vmatpush1.bf16.msra.mxu0 %v2448_v62  ;;  %v470_v62 = vld [vmem:[%s3045_s14 + $0x678] sm:$0xff] }
  0xd8   : > { %2577 = vmatpush1.bf16.msra.mxu1 %v2576_v0  ;;  %2451 = vmatprep.subr.bf16.mxu0 %v2450_v1  ;;  %v2468_v0 = vpack.c.bf16 %v451_v55, %v443_v54  ;;  %v2596_v1 = vpack.c.bf16 %v453_v58, %v445_v56  ;;  %v2598_v6 = vpack.c.bf16 %v470_v62, %v462_v61  ;;  %v523_v55 = vld [vmem:[%s3045_s14 + $0x820] sm:$0xff]  ;;  %v548_v61 = vld [vmem:[%s3045_s14 + $0x8e8] sm:$0xff]  ;;  %v542_v62 = vld [vmem:[%s3045_s14 + $0x8b8] sm:$0xff] }
  0xd9   : > { %2579 = vmatprep.subr.bf16.mxu1 %v2578_v5  ;;  %v461_v5 = vld [vmem:[%s3045_s14 + $0x630] sm:$0xff]  ;;  %v2486_v54 = vpack.c.bf16 %v532_v49, %v524_v48  ;;  %v531_v56 = vld [vmem:[%s3045_s14 + $0x860] sm:$0xff]  ;;  %v612_v48 = vld [vmem:[%s3045_s14 + $0xae8] sm:$0xff] }
  0xda   : > { %v606_v49 = vld [vmem:[%s3045_s14 + $0xab8] sm:$0xff] }
  0xdb   : > { %2453 = vmatpush1.bf16.msra.mxu0 %v2452_v11  ;;  %v486_v11 = vld [vmem:[%s3045_s14 + $0x6f8] sm:$0xff] }
  0xdc   : > { %2581 = vmatpush1.bf16.msra.mxu1 %v2580_v13  ;;  %2455 = vmatprep.subr.bf16.mxu0 %v2454_v14  ;;  %v2472_v13 = vpack.c.bf16 %v467_v4, %v459_v3  ;;  %v2600_v14 = vpack.c.bf16 %v469_v7, %v461_v5  ;;  %v2602_v19 = vpack.c.bf16 %v486_v11, %v478_v10  ;;  %v539_v4 = vld [vmem:[%s3045_s14 + $0x8a0] sm:$0xff]  ;;  %v564_v10 = vld [vmem:[%s3045_s14 + $0x968] sm:$0xff]  ;;  %v558_v11 = vld [vmem:[%s3045_s14 + $0x938] sm:$0xff] }
  0xdd   : > { %2583 = vmatprep.subr.bf16.mxu1 %v2582_v18  ;;  %v477_v18 = vld [vmem:[%s3045_s14 + $0x6b0] sm:$0xff]  ;;  %v2490_v3 = vpack.c.bf16 %v548_v61, %v540_v60  ;;  %v547_v5 = vld [vmem:[%s3045_s14 + $0x8e0] sm:$0xff]  ;;  %v628_v60 = vld [vmem:[%s3045_s14 + $0xb68] sm:$0xff] }
  0xde   : > { %v622_v61 = vld [vmem:[%s3045_s14 + $0xb38] sm:$0xff] }
  0xdf   : > { %2457 = vmatpush1.bf16.msra.mxu0 %v2456_v23  ;;  %v502_v23 = vld [vmem:[%s3045_s14 + $0x778] sm:$0xff] }
  0xe0   : > { %2585 = vmatpush1.bf16.msra.mxu1 %v2584_v24  ;;  %2459 = vmatprep.subr.bf16.mxu0 %v2458_v27  ;;  %v2476_v24 = vpack.c.bf16 %v483_v17, %v475_v16  ;;  %v2604_v27 = vpack.c.bf16 %v485_v33, %v477_v18  ;;  %v2606_v32 = vpack.c.bf16 %v502_v23, %v494_v22  ;;  %v555_v17 = vld [vmem:[%s3045_s14 + $0x920] sm:$0xff]  ;;  %v580_v22 = vld [vmem:[%s3045_s14 + $0x9e8] sm:$0xff]  ;;  %v582_v23 = vld [vmem:[%s3045_s14 + $0x9f8] sm:$0xff] }
  0xe1   : > { %2587 = vmatprep.subr.bf16.mxu1 %v2586_v31  ;;  %v493_v31 = vld [vmem:[%s3045_s14 + $0x730] sm:$0xff]  ;;  %v2494_v16 = vpack.c.bf16 %v564_v10, %v556_v9  ;;  %v563_v18 = vld [vmem:[%s3045_s14 + $0x960] sm:$0xff]  ;;  %v644_v9 = vld [vmem:[%s3045_s14 + $0xbe8] sm:$0xff] }
  0xe2   : > { %v638_v10 = vld [vmem:[%s3045_s14 + $0xbb8] sm:$0xff] }
  0xe3   : > { %2461 = vmatpush1.bf16.msra.mxu0 %v2460_v38  ;;  %v518_v38 = vld [vmem:[%s3045_s14 + $0x7f8] sm:$0xff] }
  0xe4   : > { %2589 = vmatpush1.bf16.msra.mxu1 %v2588_v39  ;;  %2463 = vmatprep.subr.bf16.mxu0 %v2462_v41  ;;  %v2480_v39 = vpack.c.bf16 %v499_v30, %v491_v29  ;;  %v2608_v41 = vpack.c.bf16 %v501_v34, %v493_v31  ;;  %v2610_v46 = vpack.c.bf16 %v518_v38, %v510_v37  ;;  %v571_v29 = vld [vmem:[%s3045_s14 + $0x9a0] sm:$0xff]  ;;  %v573_v31 = vld [vmem:[%s3045_s14 + $0x9b0] sm:$0xff]  ;;  %v598_v37 = vld [vmem:[%s3045_s14 + $0xa78] sm:$0xff] }
  0xe5   : > { %2591 = vmatprep.subr.bf16.mxu1 %v2590_v45  ;;  %v509_v45 = vld [vmem:[%s3045_s14 + $0x7b0] sm:$0xff]  ;;  %v579_v30 = vld [vmem:[%s3045_s14 + $0x9e0] sm:$0xff] }
  0xe6   : > { %v581_v34 = vld [vmem:[%s3045_s14 + $0x9f0] sm:$0xff]  ;;  %v2500_v38 = vpack.c.bf16 %v579_v30, %v571_v29  ;;  %v659_v29 = vld [vmem:[%s3045_s14 + $0xc60] sm:$0xff] }
  0xe7   : > { %2465 = vmatpush1.bf16.msra.mxu0 %v2464_v51  ;;  %v534_v51 = vld [vmem:[%s3045_s14 + $0x878] sm:$0xff]  ;;  %v653_v30 = vld [vmem:[%s3045_s14 + $0xc30] sm:$0xff] }
  0xe8   : > { %2593 = vmatpush1.bf16.msra.mxu1 %v2592_v52  ;;  %2467 = vmatprep.subr.bf16.mxu0 %v2466_v53  ;;  %v2484_v52 = vpack.c.bf16 %v515_v44, %v507_v43  ;;  %v2612_v53 = vpack.c.bf16 %v517_v47, %v509_v45  ;;  %v2614_v58 = vpack.c.bf16 %v534_v51, %v526_v50  ;;  %v595_v43 = vld [vmem:[%s3045_s14 + $0xa60] sm:$0xff]  ;;  %v589_v44 = vld [vmem:[%s3045_s14 + $0xa30] sm:$0xff]  ;;  %v604_v47 = vld [vmem:[%s3045_s14 + $0xaa8] sm:$0xff] }
  0xe9   : > { %2595 = vmatprep.subr.bf16.mxu1 %v2594_v57  ;;  %v525_v57 = vld [vmem:[%s3045_s14 + $0x830] sm:$0xff]  ;;  %v2630_v45 = vpack.c.bf16 %v598_v37, %v590_v36  ;;  %v614_v50 = vld [vmem:[%s3045_s14 + $0xaf8] sm:$0xff] }
  0xea   : > { %v678_v36 = vld [vmem:[%s3045_s14 + $0xcf8] sm:$0xff] }
  0xeb   : > { %2469 = vmatpush1.bf16.msra.mxu0 %v2468_v0  ;;  %v550_v0 = vld [vmem:[%s3045_s14 + $0x8f8] sm:$0xff] }
  0xec   : > { %2597 = vmatpush1.bf16.msra.mxu1 %v2596_v1  ;;  %2471 = vmatprep.subr.bf16.mxu0 %v2470_v2  ;;  %v2488_v1 = vpack.c.bf16 %v531_v56, %v523_v55  ;;  %v2616_v2 = vpack.c.bf16 %v533_v59, %v525_v57  ;;  %v2618_v7 = vpack.c.bf16 %v550_v0, %v542_v62  ;;  %v611_v55 = vld [vmem:[%s3045_s14 + $0xae0] sm:$0xff]  ;;  %v605_v56 = vld [vmem:[%s3045_s14 + $0xab0] sm:$0xff]  ;;  %v620_v59 = vld [vmem:[%s3045_s14 + $0xb28] sm:$0xff] }
  0xed   : > { %2599 = vmatprep.subr.bf16.mxu1 %v2598_v6  ;;  %v541_v6 = vld [vmem:[%s3045_s14 + $0x8b0] sm:$0xff]  ;;  %v2634_v57 = vpack.c.bf16 %v614_v50, %v606_v49  ;;  %v630_v62 = vld [vmem:[%s3045_s14 + $0xb78] sm:$0xff] }
  0xee   : > { %v694_v49 = vld [vmem:[%s3045_s14 + $0xd78] sm:$0xff] }
  0xef   : > { %2473 = vmatpush1.bf16.msra.mxu0 %v2472_v13  ;;  %v566_v13 = vld [vmem:[%s3045_s14 + $0x978] sm:$0xff] }
  0xf0   : > { %2601 = vmatpush1.bf16.msra.mxu1 %v2600_v14  ;;  %2475 = vmatprep.subr.bf16.mxu0 %v2474_v15  ;;  %v2492_v14 = vpack.c.bf16 %v547_v5, %v539_v4  ;;  %v2620_v15 = vpack.c.bf16 %v549_v8, %v541_v6  ;;  %v2622_v33 = vpack.c.bf16 %v566_v13, %v558_v11  ;;  %v627_v4 = vld [vmem:[%s3045_s14 + $0xb60] sm:$0xff]  ;;  %v621_v5 = vld [vmem:[%s3045_s14 + $0xb30] sm:$0xff]  ;;  %v636_v8 = vld [vmem:[%s3045_s14 + $0xba8] sm:$0xff] }
  0xf1   : > { %2603 = vmatprep.subr.bf16.mxu1 %v2602_v19  ;;  %v557_v19 = vld [vmem:[%s3045_s14 + $0x930] sm:$0xff]  ;;  %v2638_v6 = vpack.c.bf16 %v630_v62, %v622_v61  ;;  %v646_v11 = vld [vmem:[%s3045_s14 + $0xbf8] sm:$0xff] }
  0xf2   : > { %v710_v61 = vld [vmem:[%s3045_s14 + $0xdf8] sm:$0xff] }
  0xf3   : > { %2477 = vmatpush1.bf16.msra.mxu0 %v2476_v24  ;;  %v2496_v24 = vpack.c.bf16 %v563_v18, %v555_v17  ;;  %v643_v17 = vld [vmem:[%s3045_s14 + $0xbe0] sm:$0xff]  ;;  %v637_v18 = vld [vmem:[%s3045_s14 + $0xbb0] sm:$0xff] }
  0xf4   : > { %2605 = vmatpush1.bf16.msra.mxu1 %v2604_v27  ;;  %2479 = vmatprep.subr.bf16.mxu0 %v2478_v28  ;;  %v2624_v27 = vpack.c.bf16 %v565_v20, %v557_v19  ;;  %v2498_v28 = vpack.c.bf16 %v580_v22, %v572_v21  ;;  %v2642_v19 = vpack.c.bf16 %v646_v11, %v638_v10  ;;  %v652_v20 = vld [vmem:[%s3045_s14 + $0xc28] sm:$0xff]  ;;  %v654_v22 = vld [vmem:[%s3045_s14 + $0xc38] sm:$0xff] }
  0xf5   : > { %2607 = vmatprep.subr.bf16.mxu1 %v2606_v32  ;;  %v660_v21 = vld [vmem:[%s3045_s14 + $0xc68] sm:$0xff]  ;;  %v726_v10 = vld [vmem:[%s3045_s14 + $0xe78] sm:$0xff] }
  0xf7   : > { %2481 = vmatpush1.bf16.msra.mxu0 %v2480_v39  ;;  %v2628_v39 = vpack.c.bf16 %v581_v34, %v573_v31  ;;  %v668_v34 = vld [vmem:[%s3045_s14 + $0xca8] sm:$0xff] }
  0xf8   : > { %2609 = vmatpush1.bf16.msra.mxu1 %v2608_v41  ;;  %2483 = vmatprep.subr.bf16.mxu0 %v2482_v42  ;;  %v587_v42 = vld [vmem:[%s3045_s14 + $0xa20] sm:$0xff] }
  0xf9   : > { %2611 = vmatprep.subr.bf16.mxu1 %v2610_v46  ;;  %v597_v46 = vld [vmem:[%s3045_s14 + $0xa70] sm:$0xff]  ;;  %v2504_v51 = vpack.c.bf16 %v595_v43, %v587_v42  ;;  %v675_v42 = vld [vmem:[%s3045_s14 + $0xce0] sm:$0xff] }
  0xfa   : > { %v669_v43 = vld [vmem:[%s3045_s14 + $0xcb0] sm:$0xff] }
  0xfb   : > { %2485 = vmatpush1.bf16.msra.mxu0 %v2484_v52  ;;  %v2632_v52 = vpack.c.bf16 %v597_v46, %v589_v44  ;;  %v684_v46 = vld [vmem:[%s3045_s14 + $0xd28] sm:$0xff] }
  0xfc   : > { %2613 = vmatpush1.bf16.msra.mxu1 %v2612_v53  ;;  %2487 = vmatprep.subr.bf16.mxu0 %v2486_v54  ;;  %v2506_v53 = vpack.c.bf16 %v612_v48, %v604_v47  ;;  %v603_v54 = vld [vmem:[%s3045_s14 + $0xaa0] sm:$0xff]  ;;  %v692_v47 = vld [vmem:[%s3045_s14 + $0xd68] sm:$0xff]  ;;  %v686_v48 = vld [vmem:[%s3045_s14 + $0xd38] sm:$0xff] }
  0xfd   : > { %2615 = vmatprep.subr.bf16.mxu1 %v2614_v58  ;;  %v613_v58 = vld [vmem:[%s3045_s14 + $0xaf0] sm:$0xff]  ;;  %v2508_v0 = vpack.c.bf16 %v611_v55, %v603_v54  ;;  %v691_v54 = vld [vmem:[%s3045_s14 + $0xd60] sm:$0xff] }
  0xfe   : > { %1146 = vmatmul.mubr.f32.vlgmr.msra.gmra.mrb[2].mxu0 %v3168_v26  ;;  %v685_v55 = vld [vmem:[%s3045_s14 + $0xd30] sm:$0xff] }
  0xff   : > { %2489 = vmatpush1.bf16.msra.mxu0 %v2488_v1  ;;  %1288 = vmatmul.mubr.f32.vlgmr.msra.gmra.mrb[2].mxu1 %v3168_v26  ;;  %v574_v26 = vld [vmem:[%s3045_s14 + $0x9b8] sm:$0xff]  ;;  %v2636_v1 = vpack.c.bf16 %v613_v58, %v605_v56  ;;  %v2654_v56 = vpack.c.bf16 %v694_v49, %v686_v48  ;;  %v700_v58 = vld [vmem:[%s3045_s14 + $0xda8] sm:$0xff] }
 0x100   : > { %2617 = vmatpush1.bf16.msra.mxu1 %v2616_v2  ;;  %2491 = vmatprep.subr.bf16.mxu0 %v2490_v3  ;;  %v2626_v32 = vpack.c.bf16 %v582_v23, %v574_v26  ;;  %v2510_v2 = vpack.c.bf16 %v628_v60, %v620_v59  ;;  %v619_v3 = vld [vmem:[%s3045_s14 + $0xb20] sm:$0xff]  ;;  %v662_v26 = vld [vmem:[%s3045_s14 + $0xc78] sm:$0xff]  ;;  %v708_v59 = vld [vmem:[%s3045_s14 + $0xde8] sm:$0xff] }
 0x101   : > { %2619 = vmatprep.subr.bf16.mxu1 %v2618_v7  ;;  %1216 = vmatprep.mubr.f32.mxu0 %v3229_v40  ;;  %v629_v7 = vld [vmem:[%s3045_s14 + $0xb70] sm:$0xff]  ;;  %v2512_v13 = vpack.c.bf16 %v627_v4, %v619_v3  ;;  %v2646_v31 = vpack.c.bf16 %v662_v26, %v654_v22  ;;  %v702_v60 = vld [vmem:[%s3045_s14 + $0xdb8] sm:$0xff]  ;;  %v707_v3 = vld [vmem:[%s3045_s14 + $0xde0] sm:$0xff] }
 0x102   : > { %1358 = vmatprep.mubr.f32.mxu1 %v3229_v40  ;;  %v596_v40 = vld [vmem:[%s3045_s14 + $0xa68] sm:$0xff]  ;;  %v701_v4 = vld [vmem:[%s3045_s14 + $0xdb0] sm:$0xff]  ;;  %v742_v22 = vld [vmem:[%s3045_s14 + $0xef8] sm:$0xff] }
 0x103   : > { %2493 = vmatpush1.bf16.msra.mxu0 %v2492_v14  ;;  %v2502_v41 = vpack.c.bf16 %v596_v40, %v588_v35  ;;  %v2640_v14 = vpack.c.bf16 %v629_v7, %v621_v5  ;;  %v676_v35 = vld [vmem:[%s3045_s14 + $0xce8] sm:$0xff]  ;;  %v670_v40 = vld [vmem:[%s3045_s14 + $0xcb8] sm:$0xff]  ;;  %v2658_v5 = vpack.c.bf16 %v710_v61, %v702_v60 }
 0x104   : > { %2621 = vmatpush1.bf16.msra.mxu1 %v2620_v15  ;;  %2495 = vmatprep.subr.bf16.mxu0 %v2494_v16  ;;  %v2514_v15 = vpack.c.bf16 %v644_v9, %v636_v8  ;;  %v635_v16 = vld [vmem:[%s3045_s14 + $0xba0] sm:$0xff]  ;;  %v2650_v44 = vpack.c.bf16 %v678_v36, %v670_v40  ;;  %v716_v7 = vld [vmem:[%s3045_s14 + $0xe28] sm:$0xff]  ;;  %v718_v9 = vld [vmem:[%s3045_s14 + $0xe38] sm:$0xff] }
 0x105   : > { %2623 = vmatprep.subr.bf16.mxu1 %v2622_v33  ;;  %v645_v33 = vld [vmem:[%s3045_s14 + $0xbf0] sm:$0xff]  ;;  %v2516_v23 = vpack.c.bf16 %v643_v17, %v635_v16  ;;  %v724_v8 = vld [vmem:[%s3045_s14 + $0xe68] sm:$0xff]  ;;  %v723_v16 = vld [vmem:[%s3045_s14 + $0xe60] sm:$0xff] }
 0x106   : > { %v717_v17 = vld [vmem:[%s3045_s14 + $0xe30] sm:$0xff]  ;;  %v758_v40 = vld [vmem:[%s3045_s14 + $0xf78] sm:$0xff] }
 0x107   : > { %2497 = vmatpush1.bf16.msra.mxu0 %v2496_v24  ;;  %v2644_v24 = vpack.c.bf16 %v645_v33, %v637_v18  ;;  %v2662_v18 = vpack.c.bf16 %v726_v10, %v718_v9  ;;  %v732_v33 = vld [vmem:[%s3045_s14 + $0xea8] sm:$0xff]  ;;  %v774_v48 = vld [vmem:[%s3045_s14 + $0xff8] sm:$0xff] }
 0x108   : > { %2625 = vmatpush1.bf16.msra.mxu1 %v2624_v27  ;;  %2499 = vmatprep.subr.bf16.mxu0 %v2498_v28  ;;  %v2518_v27 = vpack.c.bf16 %v660_v21, %v652_v20  ;;  %v651_v28 = vld [vmem:[%s3045_s14 + $0xc20] sm:$0xff]  ;;  %v740_v20 = vld [vmem:[%s3045_s14 + $0xee8] sm:$0xff]  ;;  %v734_v21 = vld [vmem:[%s3045_s14 + $0xeb8] sm:$0xff] }
 0x109   : > { %2627 = vmatprep.subr.bf16.mxu1 %v2626_v32  ;;  %v661_v32 = vld [vmem:[%s3045_s14 + $0xc70] sm:$0xff]  ;;  %v2520_v37 = vpack.c.bf16 %v659_v29, %v651_v28  ;;  %v739_v28 = vld [vmem:[%s3045_s14 + $0xee0] sm:$0xff] }
 0x10a   : > { %v733_v29 = vld [vmem:[%s3045_s14 + $0xeb0] sm:$0xff] }
 0x10b   : > { %2501 = vmatpush1.bf16.msra.mxu0 %v2500_v38  ;;  %v2648_v38 = vpack.c.bf16 %v661_v32, %v653_v30  ;;  %v2666_v30 = vpack.c.bf16 %v742_v22, %v734_v21  ;;  %v748_v32 = vld [vmem:[%s3045_s14 + $0xf28] sm:$0xff]  ;;  %v1498_v21 = vld [vmem:[%s4051_s3 + $0x8] sm:$0xff] (!%p2020_p7)  ;;  %v1545_v22 = vld [vmem:[%s4051_s3 + $0x180] sm:$0xff] (!%p2020_p7) }
 0x10c   : > { %2629 = vmatpush1.bf16.msra.mxu1 %v2628_v39  ;;  %2503 = vmatprep.subr.bf16.mxu0 %v2502_v41  ;;  %v2522_v39 = vpack.c.bf16 %v676_v35, %v668_v34  ;;  %v667_v41 = vld [vmem:[%s3045_s14 + $0xca0] sm:$0xff]  ;;  %v756_v34 = vld [vmem:[%s3045_s14 + $0xf68] sm:$0xff]  ;;  %v750_v35 = vld [vmem:[%s3045_s14 + $0xf38] sm:$0xff] }
 0x10d   : > { %2631 = vmatprep.subr.bf16.mxu1 %v2630_v45  ;;  %v677_v45 = vld [vmem:[%s3045_s14 + $0xcf0] sm:$0xff]  ;;  %v2524_v50 = vpack.c.bf16 %v675_v42, %v667_v41  ;;  %v755_v41 = vld [vmem:[%s3045_s14 + $0xf60] sm:$0xff] }
 0x10e   : > { %v749_v42 = vld [vmem:[%s3045_s14 + $0xf30] sm:$0xff] }
 0x10f   : > { %2505 = vmatpush1.bf16.msra.mxu0 %v2504_v51  ;;  %v2652_v51 = vpack.c.bf16 %v677_v45, %v669_v43  ;;  %v2670_v43 = vpack.c.bf16 %v758_v40, %v750_v35  ;;  %v764_v45 = vld [vmem:[%s3045_s14 + $0xfa8] sm:$0xff] }
 0x110   : > { %2633 = vmatpush1.bf16.msra.mxu1 %v2632_v52  ;;  %2507 = vmatprep.subr.bf16.mxu0 %v2506_v53  ;;  %v2526_v52 = vpack.c.bf16 %v692_v47, %v684_v46  ;;  %v683_v53 = vld [vmem:[%s3045_s14 + $0xd20] sm:$0xff]  ;;  %v772_v46 = vld [vmem:[%s3045_s14 + $0xfe8] sm:$0xff]  ;;  %v766_v47 = vld [vmem:[%s3045_s14 + $0xfb8] sm:$0xff] }
 0x111   : > { %2635 = vmatprep.subr.bf16.mxu1 %v2634_v57  ;;  %v693_v57 = vld [vmem:[%s3045_s14 + $0xd70] sm:$0xff]  ;;  %v2528_v62 = vpack.c.bf16 %v691_v54, %v683_v53  ;;  %v771_v53 = vld [vmem:[%s3045_s14 + $0xfe0] sm:$0xff]  ;;  %v2674_v54 = vpack.c.bf16 %v774_v48, %v766_v47  ;;  %v1502_v47 = vld [vmem:[%s4051_s3 + $0x28] sm:$0xff] (!%p2020_p7) }
 0x112   : > { %v1549_v48 = vld [vmem:[%s4051_s3 + $0x1a0] sm:$0xff] (!%p2020_p7) }
 0x113   : > { %2509 = vmatpush1.bf16.msra.mxu0 %v2508_v0  ;;  %v2656_v0 = vpack.c.bf16 %v693_v57, %v685_v55  ;;  %v765_v55 = vld [vmem:[%s3045_s14 + $0xfb0] sm:$0xff] }
 0x114   : > { %2637 = vmatpush1.bf16.msra.mxu1 %v2636_v1  ;;  %2511 = vmatprep.subr.bf16.mxu0 %v2510_v2  ;;  %v2530_v1 = vpack.c.bf16 %v708_v59, %v700_v58  ;;  %v699_v2 = vld [vmem:[%s3045_s14 + $0xda0] sm:$0xff] }
 0x115   : > { %2639 = vmatprep.subr.bf16.mxu1 %v2638_v6  ;;  %v709_v6 = vld [vmem:[%s3045_s14 + $0xdf0] sm:$0xff]  ;;  %v2532_v11 = vpack.c.bf16 %v707_v3, %v699_v2 }
 0x117   : > { %2513 = vmatpush1.bf16.msra.mxu0 %v2512_v13  ;;  %v2660_v13 = vpack.c.bf16 %v709_v6, %v701_v4  ;;  %v260_v4 = vld [vmem:[#allocation2] sm:$0xff] }
 0x118   : > { %2641 = vmatpush1.bf16.msra.mxu1 %v2640_v14  ;;  %2515 = vmatprep.subr.bf16.mxu0 %v2514_v15  ;;  %v2534_v14 = vpack.c.bf16 %v724_v8, %v716_v7  ;;  %v715_v15 = vld [vmem:[%s3045_s14 + $0xe20] sm:$0xff] }
 0x119   : > { %2643 = vmatprep.subr.bf16.mxu1 %v2642_v19  ;;  %v725_v19 = vld [vmem:[%s3045_s14 + $0xe70] sm:$0xff]  ;;  %v2536_v26 = vpack.c.bf16 %v723_v16, %v715_v15  ;;  %v261_v15 = vld [vmem:[#allocation2 + $0x8] sm:$0xff] }
 0x11b   : > { %2517 = vmatpush1.bf16.msra.mxu0 %v2516_v23  ;;  %v2664_v23 = vpack.c.bf16 %v725_v19, %v717_v17  ;;  %v1514_v19 = vld [vmem:[%s4051_s3 + $0x88] sm:$0xff] (!%p2020_p7) }
 0x11c   : > { %2645 = vmatpush1.bf16.msra.mxu1 %v2644_v24  ;;  %2519 = vmatprep.subr.bf16.mxu0 %v2518_v27  ;;  %v2538_v24 = vpack.c.bf16 %v740_v20, %v732_v33  ;;  %v731_v27 = vld [vmem:[%s3045_s14 + $0xea0] sm:$0xff]  ;;  %v1497_v33 = vld [vmem:[%s4051_s3] sm:$0xff] (!%p2020_p7) }
 0x11d   : > { %2647 = vmatprep.subr.bf16.mxu1 %v2646_v31  ;;  %v741_v31 = vld [vmem:[%s3045_s14 + $0xef0] sm:$0xff]  ;;  %v2540_v36 = vpack.c.bf16 %v739_v28, %v731_v27  ;;  %v1530_v28 = vld [vmem:[%s4051_s3 + $0x108] sm:$0xff] (!%p2020_p7) }
 0x11e   : > { %v1529_v27 = vld [vmem:[%s4051_s3 + $0x100] sm:$0xff] (!%p2020_p7) }
 0x11f   : > { %2521 = vmatpush1.bf16.msra.mxu0 %v2520_v37  ;;  %v2668_v37 = vpack.c.bf16 %v741_v31, %v733_v29  ;;  %v1515_v29 = vld [vmem:[%s4051_s3 + $0x90] sm:$0xff] (!%p2020_p7)  ;;  %v1516_v31 = vld [vmem:[%s4051_s3 + $0x98] sm:$0xff] (!%p2020_p7) }
 0x120   : > { %2649 = vmatpush1.bf16.msra.mxu1 %v2648_v38  ;;  %2523 = vmatprep.subr.bf16.mxu0 %v2522_v39  ;;  %v2542_v38 = vpack.c.bf16 %v756_v34, %v748_v32  ;;  %v747_v39 = vld [vmem:[%s3045_s14 + $0xf20] sm:$0xff]  ;;  %v1500_v34 = vld [vmem:[%s4051_s3 + $0x18] sm:$0xff] (!%p2020_p7)  ;;  %v2682_v35 = vpack.c.bf16 (!%p2020_p7), %v1516_v31, %v1515_v29  ;;  %v1427_v29 = vsub.s32 (!%p2020_p7), 1, %v3142_v63  ;;  %v1557_v31 = vld [vmem:[%s4051_s3 + $0x1e0] sm:$0xff] (!%p2020_p7) }
 0x121   : > { %2651 = vmatprep.subr.bf16.mxu1 %v2650_v44  ;;  %v757_v44 = vld [vmem:[%s3045_s14 + $0xf70] sm:$0xff]  ;;  %v2544_v49 = vpack.c.bf16 %v755_v41, %v747_v39  ;;  %v1499_v32 = vld [vmem:[%s4051_s3 + $0x10] sm:$0xff] (!%p2020_p7)  ;;  %v1532_v41 = vld [vmem:[%s4051_s3 + $0x118] sm:$0xff] (!%p2020_p7) }
 0x122   : > { %v2684_v40 = vpack.c.bf16 (!%p2020_p7), %v1500_v34, %v1499_v32  ;;  %v1558_v32 = vld [vmem:[%s4051_s3 + $0x1e8] sm:$0xff] (!%p2020_p7)  ;;  %v1435_v34 = vsub.s32 (!%p2020_p7), 3, %v3142_v63 }
 0x123   : > { %2525 = vmatpush1.bf16.msra.mxu0 %v2524_v50  ;;  %v2672_v50 = vpack.c.bf16 %v757_v44, %v749_v42  ;;  %v1517_v42 = vld [vmem:[%s4051_s3 + $0xa0] sm:$0xff] (!%p2020_p7) }
 0x124   : > { %2653 = vmatpush1.bf16.msra.mxu1 %v2652_v51  ;;  %2527 = vmatprep.subr.bf16.mxu0 %v2526_v52  ;;  %v2546_v51 = vpack.c.bf16 %v772_v46, %v764_v45  ;;  %v763_v52 = vld [vmem:[%s3045_s14 + $0xfa0] sm:$0xff]  ;;  %v1501_v46 = vld [vmem:[%s4051_s3 + $0x20] sm:$0xff] (!%p2020_p7) }
 0x125   : > { %2655 = vmatprep.subr.bf16.mxu1 %v2654_v56  ;;  %v773_v56 = vld [vmem:[%s3045_s14 + $0xff0] sm:$0xff]  ;;  %v2548_v57 = vpack.c.bf16 %v771_v53, %v763_v52  ;;  %v2688_v52 = vpack.c.bf16 (!%p2020_p7), %v1502_v47, %v1501_v46 }
 0x126   : > { %v2676_v58 = vpack.c.bf16 %v773_v56, %v765_v55  ;;  %v1520_v55 = vld [vmem:[%s4051_s3 + $0xb8] sm:$0xff] (!%p2020_p7)  ;;  %v1503_v56 = vld [vmem:[%s4051_s3 + $0x30] sm:$0xff] (!%p2020_p7) }
 0x127   : > { %2529 = vmatpush1.bf16.msra.mxu0 %v2528_v62 }
 0x128   : > { %2657 = vmatpush1.bf16.msra.mxu1 %v2656_v0  ;;  %2531 = vmatprep.subr.bf16.mxu0 %v2530_v1 }
 0x129   : > { %2659 = vmatprep.subr.bf16.mxu1 %v2658_v5 }
 0x12b   : > { %2533 = vmatpush1.bf16.msra.mxu0 %v2532_v11 }
 0x12c   : > { %2661 = vmatpush1.bf16.msra.mxu1 %v2660_v13  ;;  %2535 = vmatprep.subr.bf16.mxu0 %v2534_v14 }
 0x12d   : > { %2663 = vmatprep.subr.bf16.mxu1 %v2662_v18  ;;  %v1513_v18 = vld [vmem:[%s4051_s3 + $0x80] sm:$0xff] (!%p2020_p7) }
 0x12e   : > { %v2678_v20 = vpack.c.bf16 (!%p2020_p7), %v1514_v19, %v1513_v18 }
 0x12f   : > { %2537 = vmatpush1.bf16.msra.mxu0 %v2536_v26  ;;  %v1546_v26 = vld [vmem:[%s4051_s3 + $0x188] sm:$0xff] (!%p2020_p7) }
 0x130   : > { %2665 = vmatpush1.bf16.msra.mxu1 %v2664_v23  ;;  %2539 = vmatprep.subr.bf16.mxu0 %v2538_v24  ;;  %v2680_v23 = vpack.c.bf16 (!%p2020_p7), %v1498_v21, %v1497_v33  ;;  %v2710_v24 = vpack.c.bf16 (!%p2020_p7), %v1546_v26, %v1545_v22  ;;  %v1508_v21 = vld [vmem:[%s4051_s3 + $0x58] sm:$0xff] (!%p2020_p7)  ;;  %v1539_v22 = vld [vmem:[%s4051_s3 + $0x150] sm:$0xff] (!%p2020_p7) }
 0x131   : > { %2667 = vmatprep.subr.bf16.mxu1 %v2666_v30  ;;  %v2712_v30 = vpack.c.bf16 (!%p2020_p7), %v1530_v28, %v1529_v27  ;;  %v1526_v27 = vld [vmem:[%s4051_s3 + $0xe8] sm:$0xff] (!%p2020_p7)  ;;  %v1423_v28 = vsub.s32 (!%p2020_p7), 0, %v3142_v63 }
 0x133   : > { %2541 = vmatpush1.bf16.msra.mxu0 %v2540_v36  ;;  %v1547_v36 = vld [vmem:[%s4051_s3 + $0x190] sm:$0xff] (!%p2020_p7) }
 0x134   : > { %2669 = vmatpush1.bf16.msra.mxu1 %v2668_v37  ;;  %2543 = vmatprep.subr.bf16.mxu0 %v2542_v38  ;;  %v1548_v37 = vld [vmem:[%s4051_s3 + $0x198] sm:$0xff] (!%p2020_p7)  ;;  %v1531_v38 = vld [vmem:[%s4051_s3 + $0x110] sm:$0xff] (!%p2020_p7) }
 0x135   : > { %2671 = vmatprep.subr.bf16.mxu1 %v2670_v43  ;;  %v2714_v39 = vpack.c.bf16 (!%p2020_p7), %v1548_v37, %v1547_v36  ;;  %v1518_v43 = vld [vmem:[%s4051_s3 + $0xa8] sm:$0xff] (!%p2020_p7)  ;;  %v2716_v44 = vpack.c.bf16 (!%p2020_p7), %v1532_v41, %v1531_v38  ;;  %v1419_v41 = vld [vmem:[%s4050_s2] sm:$0xff] (!%p2020_p7) }
 0x136   : > { %v2686_v45 = vpack.c.bf16 (!%p2020_p7), %v1518_v43, %v1517_v42  ;;  %v1510_v38 = vld [vmem:[%s4051_s3 + $0x68] sm:$0xff] (!%p2020_p7)  ;;  %v2734_v42 = vpack.c.bf16 (!%p2020_p7), %v1558_v32, %v1557_v31  ;;  %v1424_v46 = vrot.slane (!%p2020_p7), %v1419_v41, %v1423_v28  ;;  %v1428_v47 = vrot.slane (!%p2020_p7), %v1419_v41, %v1427_v29  ;;  %v1580_v28 = vld [vmem:[%s4051_s3 + $0x298] sm:$0xff] (!%p2020_p7)  ;;  %v1593_v31 = vld [vmem:[%s4051_s3 + $0x300] sm:$0xff] (!%p2020_p7) }
 0x137   : > { %2545 = vmatpush1.bf16.msra.mxu0 %v2544_v49  ;;  %v1550_v49 = vld [vmem:[%s4051_s3 + $0x1a8] sm:$0xff] (!%p2020_p7) }
 0x138   : > { %2673 = vmatpush1.bf16.msra.mxu1 %v2672_v50  ;;  %2547 = vmatprep.subr.bf16.mxu0 %v2546_v51  ;;  %v1533_v50 = vld [vmem:[%s4051_s3 + $0x120] sm:$0xff] (!%p2020_p7)  ;;  %v1534_v51 = vld [vmem:[%s4051_s3 + $0x128] sm:$0xff] (!%p2020_p7)  ;;  %v2718_v53 = vpack.c.bf16 (!%p2020_p7), %v1550_v49, %v1549_v48  ;;  %v1559_v49 = vld [vmem:[%s4051_s3 + $0x1f0] sm:$0xff] (!%p2020_p7) }
 0x139   : > { %2675 = vmatprep.subr.bf16.mxu1 %v2674_v54  ;;  %v1519_v54 = vld [vmem:[%s4051_s3 + $0xb0] sm:$0xff] (!%p2020_p7)  ;;  %v1542_v43 = vld [vmem:[%s4051_s3 + $0x168] sm:$0xff] (!%p2020_p7) }
 0x13a   : > { %v1594_v32 = vld [vmem:[%s4051_s3 + $0x308] sm:$0xff] (!%p2020_p7) }
 0x13b   : > { %2549 = vmatpush1.bf16.msra.mxu0 %v2548_v57  ;;  %v2720_v57 = vpack.c.bf16 (!%p2020_p7), %v1534_v51, %v1533_v50  ;;  %v1560_v50 = vld [vmem:[%s4051_s3 + $0x1f8] sm:$0xff] (!%p2020_p7)  ;;  %v1436_v51 = vrot.slane (!%p2020_p7), %v1419_v41, %v1435_v34 }
 0x13c   : > { %2677 = vmatpush1.bf16.msra.mxu1 %v2676_v58  ;;  %2679 = vmatprep.subr.bf16.mxu0 (!%p2020_p7), %v2678_v20  ;;  %v2690_v58 = vpack.c.bf16 (!%p2020_p7), %v1520_v55, %v1519_v54  ;;  %v1507_v20 = vld [vmem:[%s4051_s3 + $0x50] sm:$0xff] (!%p2020_p7) }
 0x13d   : > { %2711 = vmatprep.subr.bf16.mxu1 (!%p2020_p7), %v2710_v24  ;;  %v1525_v24 = vld [vmem:[%s4051_s3 + $0xe0] sm:$0xff] (!%p2020_p7)  ;;  %v1511_v55 = vld [vmem:[%s4051_s3 + $0x70] sm:$0xff] (!%p2020_p7) }
 0x13e   : > { %1217 = vmatmul.mubr.f32.vlgmr.msra.gmra.mrb[2].mxu0 %v3217_v25  ;;  %v2702_v37 = vpack.c.bf16 (!%p2020_p7), %v1526_v27, %v1525_v24  ;;  %v1579_v27 = vld [vmem:[%s4051_s3 + $0x290] sm:$0xff] (!%p2020_p7) }
 0x13f   : > { %1359 = vmatmul.mubr.f32.vlgmr.msra.gmra.mrb[2].mxu1 %v3217_v25  ;;  %2681 = vmatpush3.bf16.msra.mxu0 (!%p2020_p7), %v2680_v23  ;;  %v1540_v23 = vld [vmem:[%s4051_s3 + $0x158] sm:$0xff] (!%p2020_p7) }
 0x140   : > { %2713 = vmatpush3.bf16.msra.mxu1 (!%p2020_p7), %v2712_v30  ;;  %2683 = vmatprep.subr.bf16.mxu0 (!%p2020_p7), %v2682_v35  ;;  %v1431_v30 = vsub.s32 (!%p2020_p7), 2, %v3142_v63  ;;  %v2700_v35 = vpack.c.bf16 (!%p2020_p7), %v1508_v21, %v1507_v20  ;;  %v2732_v36 = vpack.c.bf16 (!%p2020_p7), %v1540_v23, %v1539_v22  ;;  %v1561_v22 = vld [vmem:[%s4051_s3 + $0x200] sm:$0xff] (!%p2020_p7) }
 0x141   : > { %2715 = vmatprep.subr.bf16.mxu1 (!%p2020_p7), %v2714_v39  ;;  %v1541_v39 = vld [vmem:[%s4051_s3 + $0x160] sm:$0xff] (!%p2020_p7) }
 0x142   : > { %v1432_v48 = vrot.slane (!%p2020_p7), %v1419_v41, %v1431_v30 }
 0x143   : > { %2685 = vmatpush3.bf16.msra.mxu0 (!%p2020_p7), %v2684_v40  ;;  %v1509_v40 = vld [vmem:[%s4051_s3 + $0x60] sm:$0xff] (!%p2020_p7) }
 0x144   : > { %2717 = vmatpush3.bf16.msra.mxu1 (!%p2020_p7), %v2716_v44  ;;  %2687 = vmatprep.subr.bf16.mxu0 (!%p2020_p7), %v2686_v45  ;;  %v1527_v44 = vld [vmem:[%s4051_s3 + $0xf0] sm:$0xff] (!%p2020_p7)  ;;  %v1528_v45 = vld [vmem:[%s4051_s3 + $0xf8] sm:$0xff] (!%p2020_p7)  ;;  %v2704_v54 = vpack.c.bf16 (!%p2020_p7), %v1510_v38, %v1509_v40  ;;  %v2746_v38 = vpack.c.bf16 (!%p2020_p7), %v1580_v28, %v1579_v27  ;;  %v1601_v28 = vld [vmem:[%s4051_s3 + $0x340] sm:$0xff] (!%p2020_p7) }
 0x145   : > { %2719 = vmatprep.subr.bf16.mxu1 (!%p2020_p7), %v2718_v53  ;;  %v1443_v53 = vsub.s32 (!%p2020_p7), 5, %v3142_v63 }
 0x147   : > { %2689 = vmatpush3.bf16.msra.mxu0 (!%p2020_p7), %v2688_v52  ;;  %v1439_v52 = vsub.s32 (!%p2020_p7), 4, %v3142_v63 }
 0x148   : > { %2721 = vmatpush3.bf16.msra.mxu1 (!%p2020_p7), %v2720_v57  ;;  %2691 = vmatprep.subr.bf16.mxu0 (!%p2020_p7), %v2690_v58  ;;  %v1453_v57 = vcombine.low (!%p2020_p7), %v1424_v46, %v1428_v47  ;;  %v1447_v58 = vsub.s32 (!%p2020_p7), 6, %v3142_v63 }
 0x191   : > { %v934_v59 = vpop.f32.mrb[0].mxu0 }
 0x192   : > { %v1076_v60 = vpop.f32.mrb[0].mxu1  ;;  %v936_v61 = vpop.f32.mrb[1].mxu0 }
 0x193   : > { %v1373_v62 = vcombine.low %v934_v59, %v936_v61  ;;  %v1078_v0 = vpop.f32.mrb[1].mxu1  ;;  %v1504_v59 = vld [vmem:[%s4051_s3 + $0x38] sm:$0xff] (!%p2020_p7) }
 0x194   : > { %v1374_v1 = vcombine.low %v1076_v60, %v1078_v0  ;;  %v1551_v60 = vld [vmem:[%s4051_s3 + $0x1b0] sm:$0xff] (!%p2020_p7)  ;;  %v1552_v61 = vld [vmem:[%s4051_s3 + $0x1b8] sm:$0xff] (!%p2020_p7) }
 0x195   : > { %v1381_v2 = vrot.slane %v1373_v62, %v3153_v12  ;;  %v2722_v62 = vpack.c.bf16 (!%p2020_p7), %v1552_v61, %v1551_v60  ;;  %v1535_v0 = vld [vmem:[%s4051_s3 + $0x130] sm:$0xff] (!%p2020_p7)  ;;  %v2736_v60 = vpack.c.bf16 (!%p2020_p7), %v1542_v43, %v1541_v39  ;;  %v2706_v61 = vpack.c.bf16 (!%p2020_p7), %v1528_v45, %v1527_v44  ;;  %v1581_v44 = vld [vmem:[%s4051_s3 + $0x2a0] sm:$0xff] (!%p2020_p7)  ;;  %v1582_v45 = vld [vmem:[%s4051_s3 + $0x2a8] sm:$0xff] (!%p2020_p7) }
 0x196   : > { %v1388_v3 = vrot.slane %v1374_v1, %v3153_v12  ;;  %v1536_v1 = vld [vmem:[%s4051_s3 + $0x138] sm:$0xff] (!%p2020_p7)  ;;  %v1563_v39 = vld [vmem:[%s4051_s3 + $0x210] sm:$0xff] (!%p2020_p7)  ;;  %v2776_v43 = vpack.c.bf16 (!%p2020_p7), %v1594_v32, %v1593_v31 }
 0x197   : > { %2723 = vmatprep.subr.bf16.mxu1 (!%p2020_p7), %v2722_v62  ;;  %v1543_v62 = vld [vmem:[%s4051_s3 + $0x170] sm:$0xff] (!%p2020_p7)  ;;  %v1620_v32 = vld [vmem:[%s4051_s3 + $0x3d8] sm:$0xff] (!%p2020_p7) }
 0x198   : > { %v1389_v5 = vcombine.low %v1381_v2, %v1388_v3  ;;  %v1521_v2 = vld [vmem:[%s4051_s3 + $0xc0] sm:$0xff] (!%p2020_p7)  ;;  %v1522_v3 = vld [vmem:[%s4051_s3 + $0xc8] sm:$0xff] (!%p2020_p7)  ;;  %v1619_v31 = vld [vmem:[%s4051_s3 + $0x3d0] sm:$0xff] (!%p2020_p7) }
 0x19a   : > { %v1409_v6 = vadd.f32 %v1389_v5, %v260_v4  ;;  %v2692_v4 = vpack.c.bf16 (!%p2020_p7), %v1504_v59, %v1503_v56  ;;  %v1553_v5 = vld [vmem:[%s4051_s3 + $0x1c0] sm:$0xff] (!%p2020_p7)  ;;  %v1512_v56 = vld [vmem:[%s4051_s3 + $0x78] sm:$0xff] (!%p2020_p7)  ;;  %v1451_v59 = vsub.s32 (!%p2020_p7), 7, %v3142_v63 }
 0x19b   : > { %v1577_v63 = vld [vmem:[%s4051_s3 + $0x280] sm:$0xff] (!%p2020_p7) }
 0x19c   : > { %1411 = vst [vmem:[#allocation2] sm:$0xff] %v1409_v6  ;;  %v1554_v6 = vld [vmem:[%s4051_s3 + $0x1c8] sm:$0xff] (!%p2020_p7)  ;;  %2693 = vmatpush3.bf16.msra.mxu0 (!%p2020_p7), %v2692_v4 }
 0x19d   : > { %v1578_v4 = vld [vmem:[%s4051_s3 + $0x288] sm:$0xff] (!%p2020_p7) }
 0x211   : > { %v1218_v7 = vpop.f32.mrb[2].mxu0 }
 0x212   : > { %v1360_v8 = vpop.f32.mrb[2].mxu1  ;;  %v1220_v9 = vpop.f32.mrb[3].mxu0 }
 0x213   : > { %v1390_v10 = vcombine.low %v1218_v7, %v1220_v9  ;;  %v1362_v11 = vpop.f32.mrb[3].mxu1  ;;  %v2724_v7 = vpack.c.bf16 (!%p2020_p7), %v1536_v1, %v1535_v0  ;;  %v1505_v9 = vld [vmem:[%s4051_s3 + $0x40] sm:$0xff] (!%p2020_p7)  ;;  %v1454_v0 = vcombine.low (!%p2020_p7), %v1432_v48, %v1436_v51  ;;  %v2738_v1 = vpack.c.bf16 (!%p2020_p7), %v1560_v50, %v1559_v49  ;;  %v1595_v48 = vld [vmem:[%s4051_s3 + $0x310] sm:$0xff] (!%p2020_p7)  ;;  %v1596_v49 = vld [vmem:[%s4051_s3 + $0x318] sm:$0xff] (!%p2020_p7) }
 0x214   : > { %v1391_v25 = vcombine.low %v1360_v8, %v1362_v11  ;;  %v2694_v8 = vpack.c.bf16 (!%p2020_p7), %v1522_v3, %v1521_v2  ;;  %v1537_v11 = vld [vmem:[%s4051_s3 + $0x140] sm:$0xff] (!%p2020_p7)  ;;  %v1544_v2 = vld [vmem:[%s4051_s3 + $0x178] sm:$0xff] (!%p2020_p7)  ;;  %v1461_v3 = vrot.slane (!%p2020_p7), %v1453_v57, %v3153_v12  ;;  %v2780_v57 = vpack.c.bf16 (!%p2020_p7), %v1596_v49, %v1595_v48  ;;  %v1574_v48 = vld [vmem:[%s4051_s3 + $0x268] sm:$0xff] (!%p2020_p7) }
 0x215   : > { %v1398_v13 = vrot.slane %v1390_v10, %v3153_v12  ;;  %v1506_v10 = vld [vmem:[%s4051_s3 + $0x48] sm:$0xff] (!%p2020_p7)  ;;  %2725 = vmatpush3.bf16.msra.mxu1 (!%p2020_p7), %v2724_v7  ;;  %v1609_v7 = vld [vmem:[%s4051_s3 + $0x380] sm:$0xff] (!%p2020_p7) }
 0x216   : > { %v1405_v14 = vrot.slane %v1391_v25, %v3153_v12  ;;  %1416 = sbr.rel (%p2020_p7) target bundleno = 805 (0x325), region = 52  ;;  %v2726_v25 = vpack.c.bf16 (!%p2020_p7), %v1554_v6, %v1553_v5  ;;  %v2696_v18 = vpack.c.bf16 (!%p2020_p7), %v1506_v10, %v1505_v9  ;;  %2695 = vmatprep.subr.bf16.mxu0 (!%p2020_p7), %v2694_v8  ;;  %v2708_v5 = vpack.c.bf16 (!%p2020_p7), %v1512_v56, %v1511_v55  ;;  %v1610_v8 = vld [vmem:[%s4051_s3 + $0x388] sm:$0xff] (!%p2020_p7)  ;;  %v1417_v9 = vld [vmem:[#allocation2] sm:$0xff] (!%p2020_p7) }
 0x217   : > { %v1468_v6 = vrot.slane (!%p2020_p7), %v1454_v0, %v3153_v12  ;;  %v1440_v10 = vrot.slane (!%p2020_p7), %v1419_v41, %v1439_v52  ;;  %v1613_v51 = vld [vmem:[%s4051_s3 + $0x3a0] sm:$0xff] (!%p2020_p7)  ;;  %v1614_v52 = vld [vmem:[%s4051_s3 + $0x3a8] sm:$0xff] (!%p2020_p7) }
 0x218   : > { %v1406_v16 = vcombine.low %v1398_v13, %v1405_v14  ;;  %v1538_v13 = vld [vmem:[%s4051_s3 + $0x148] sm:$0xff] (!%p2020_p7)  ;;  %v1523_v14 = vld [vmem:[%s4051_s3 + $0xd0] sm:$0xff] (!%p2020_p7)  ;;  %2727 = vmatprep.subr.bf16.mxu1 (!%p2020_p7), %v2726_v25  ;;  %2697 = vmatpush3.bf16.msra.mxu0 (!%p2020_p7), %v2696_v18  ;;  %v1448_v25 = vrot.slane (!%p2020_p7), %v1419_v41, %v1447_v58 }
 0x219   : > { %v2728_v19 = vpack.c.bf16 (!%p2020_p7), %v1538_v13, %v1537_v11  ;;  %v1444_v11 = vrot.slane (!%p2020_p7), %v1419_v41, %v1443_v53  ;;  %v1452_v13 = vrot.slane (!%p2020_p7), %v1419_v41, %v1451_v59  ;;  %v1564_v41 = vld [vmem:[%s4051_s3 + $0x218] sm:$0xff] (!%p2020_p7)  ;;  %v2750_v53 = vpack.c.bf16 (!%p2020_p7), %v1582_v45, %v1581_v44  ;;  %v1566_v55 = vld [vmem:[%s4051_s3 + $0x228] sm:$0xff] (!%p2020_p7)  ;;  %v1583_v58 = vld [vmem:[%s4051_s3 + $0x2b0] sm:$0xff] (!%p2020_p7) }
 0x21a   : > { %v1410_v17 = vadd.f32 %v1406_v16, %v261_v15  ;;  %v1524_v15 = vld [vmem:[%s4051_s3 + $0xd8] sm:$0xff] (!%p2020_p7)  ;;  %v1555_v16 = vld [vmem:[%s4051_s3 + $0x1d0] sm:$0xff] (!%p2020_p7)  ;;  %v2748_v50 = vpack.c.bf16 (!%p2020_p7), %v1564_v41, %v1563_v39  ;;  %v1598_v0 = vld [vmem:[%s4051_s3 + $0x328] sm:$0xff] (!%p2020_p7)  ;;  %v2794_v39 = vpack.c.bf16 (!%p2020_p7), %v1620_v32, %v1619_v31 }
 0x21b   : > { %v2698_v33 = vpack.c.bf16 (!%p2020_p7), %v1524_v15, %v1523_v14  ;;  %2729 = vmatpush3.bf16.msra.mxu1 (!%p2020_p7), %v2728_v19  ;;  %v2740_v14 = vpack.c.bf16 (!%p2020_p7), %v1544_v2, %v1543_v62  ;;  %v1469_v15 = vcombine.low (!%p2020_p7), %v1461_v3, %v1468_v6  ;;  %v1470_v19 = vcombine.low (!%p2020_p7), %v1440_v10, %v1444_v11  ;;  %v1584_v59 = vld [vmem:[%s4051_s3 + $0x2b8] sm:$0xff] (!%p2020_p7)  ;;  %v1597_v62 = vld [vmem:[%s4051_s3 + $0x320] sm:$0xff] (!%p2020_p7)  ;;  %v1615_v2 = vld [vmem:[%s4051_s3 + $0x3b0] sm:$0xff] (!%p2020_p7) }
 0x21c   : > { %1412 = vst [vmem:[#allocation2 + $0x8] sm:$0xff] %v1410_v17  ;;  %v1556_v17 = vld [vmem:[%s4051_s3 + $0x1d8] sm:$0xff] (!%p2020_p7)  ;;  %v1603_v41 = vld [vmem:[%s4051_s3 + $0x350] sm:$0xff] (!%p2020_p7)  ;;  %v1621_v44 = vld [vmem:[%s4051_s3 + $0x3e0] sm:$0xff] (!%p2020_p7) }
 0x21d   : > { %v2730_v26 = vpack.c.bf16 %v1556_v17, %v1555_v16  ;;  %2699 = vmatprep.subr.bf16.mxu0 %v2698_v33  ;;  %v2742_v16 = vpack.c.bf16 %v1578_v4, %v1577_v63  ;;  %v2774_v17 = vpack.c.bf16 %v1610_v8, %v1609_v7  ;;  %v1489_v18 = vadd.f32 %v1469_v15, %v1417_v9  ;;  %v1616_v3 = vld [vmem:[%s4051_s3 + $0x3b8] sm:$0xff]  ;;  %v1585_v8 = vld [vmem:[%s4051_s3 + $0x2c0] sm:$0xff]  ;;  %v1586_v9 = vld [vmem:[%s4051_s3 + $0x2c8] sm:$0xff] }
 0x21e   : > { %2701 = vmatpush3.bf16.msra.mxu0 %v2700_v35  ;;  %v1471_v33 = vcombine.low %v1448_v25, %v1452_v13  ;;  %v1478_v29 = vrot.slane %v1470_v19, %v3153_v12  ;;  %v2754_v4 = vpack.c.bf16 %v1584_v59, %v1583_v58  ;;  %v1568_v6 = vld [vmem:[%s4051_s3 + $0x238] sm:$0xff]  ;;  %v2784_v7 = vpack.c.bf16 %v1598_v0, %v1597_v62  ;;  %v1599_v25 = vld [vmem:[%s4051_s3 + $0x330] sm:$0xff]  ;;  %v1622_v45 = vld [vmem:[%s4051_s3 + $0x3e8] sm:$0xff] }
 0x21f   : > { %2731 = vmatprep.subr.bf16.mxu1 %v2730_v26  ;;  %2703 = vmatprep.subr.bf16.mxu0 %v2702_v37  ;;  %vm1491_vm0 = vcmp.ge.f32.partialorder %v1489_v18, 0.0  ;;  %v1493_v20 = vmul.f32 0.2, %v1489_v18  ;;  %v1562_v26 = vld [vmem:[%s4051_s3 + $0x208] sm:$0xff]  ;;  %v1612_v37 = vld [vmem:[%s4051_s3 + $0x398] sm:$0xff]  ;;  %v2786_v11 = vpack.c.bf16 %v1616_v3, %v1615_v2  ;;  %v2758_v19 = vpack.c.bf16 %v1586_v9, %v1585_v8  ;;  %v1575_v59 = vld [vmem:[%s4051_s3 + $0x270] sm:$0xff] }
 0x220   : > { %2733 = vmatpush3.bf16.msra.mxu1 %v2732_v36  ;;  %v1485_v30 = vrot.slane %v1471_v33, %v3153_v12  ;;  %v2744_v40 = vpack.c.bf16 %v1562_v26, %v1561_v22  ;;  %v1611_v36 = vld [vmem:[%s4051_s3 + $0x390] sm:$0xff]  ;;  %v1600_v13 = vld [vmem:[%s4051_s3 + $0x338] sm:$0xff]  ;;  %v1569_v33 = vld [vmem:[%s4051_s3 + $0x240] sm:$0xff] }
 0x221   : > { %2735 = vmatprep.subr.bf16.mxu1 %v2734_v42  ;;  %v1495_v21 = vsel %vm1491_vm0, %v1489_v18, %v1493_v20  ;;  %v2778_v47 = vpack.c.bf16 %v1612_v37, %v1611_v36  ;;  %v1618_v18 = vld [vmem:[%s4051_s3 + $0x3c8] sm:$0xff]  ;;  %v2788_v26 = vpack.c.bf16 %v1600_v13, %v1599_v25  ;;  %v1589_v37 = vld [vmem:[%s4051_s3 + $0x2e0] sm:$0xff]  ;;  %v1607_v0 = vld [vmem:[%s4051_s3 + $0x370] sm:$0xff] }
 0x222   : > { %2705 = vmatpush3.bf16.msra.mxu0 %v2704_v54  ;;  %v1641_v23 = vrot.slane %v1495_v21, %v3153_v12  ;;  %v1634_v24 = vcombine.high %v1495_v21, %v1495_v21  ;;  %v1486_v46 = vcombine.low %v1478_v29, %v1485_v30  ;;  %v1565_v54 = vld [vmem:[%s4051_s3 + $0x220] sm:$0xff]  ;;  %v1570_v20 = vld [vmem:[%s4051_s3 + $0x248] sm:$0xff] }
 0x223   : > { %2707 = vmatprep.subr.bf16.mxu0 %v2706_v61  ;;  %v1418_v56 = vld [vmem:[#allocation2 + $0x8] sm:$0xff]  ;;  %v2782_v61 = vpack.c.bf16 %v1614_v52, %v1613_v51  ;;  %v2760_v30 = vpack.c.bf16 %v1570_v20, %v1569_v33  ;;  %v1592_v51 = vld [vmem:[%s4051_s3 + $0x2f8] sm:$0xff]  ;;  %v2798_v52 = vpack.c.bf16 %v1622_v45, %v1621_v44 }
 0x224   : > { %2737 = vmatpush3.bf16.msra.mxu1 %v2736_v60  ;;  %v1649_v34 = vcombine.high %v1641_v23, %v1641_v23  ;;  %v1648_v35 = vrot.slane %v1634_v24, %v3153_v12  ;;  %v1490_v60 = vadd.f32 %v1486_v46, %v1418_v56  ;;  %v1588_v24 = vld [vmem:[%s4051_s3 + $0x2d8] sm:$0xff]  ;;  %v1623_v56 = vld [vmem:[%s4051_s3 + $0x3f0] sm:$0xff] }
 0x225   : > { %2739 = vmatprep.subr.bf16.mxu1 %v2738_v1  ;;  %v2752_v1 = vpack.c.bf16 %v1566_v55, %v1565_v54  ;;  %v1606_v54 = vld [vmem:[%s4051_s3 + $0x368] sm:$0xff] }
 0x226   : > { %2709 = vmatpush3.bf16.msra.mxu0 %v2708_v5  ;;  %1740 = vmatprep.mubr.f32.mxu0 %v1649_v34  ;;  %v1650_v42 = vcombine.high %v1648_v35, %v1648_v35  ;;  %vm1492_vm1 = vcmp.ge.f32.partialorder %v1490_v60, 0.0  ;;  %v1494_v63 = vmul.f32 0.2, %v1490_v60  ;;  %v1567_v5 = vld [vmem:[%s4051_s3 + $0x230] sm:$0xff] }
 0x227   : > { %2743 = vmatprep.subr.bf16.mxu0 %v2742_v16  ;;  %v2756_v16 = vpack.c.bf16 %v1568_v6, %v1567_v5 }
 0x228   : > { %2741 = vmatpush3.bf16.msra.mxu1 %v2740_v14  ;;  %1810 = vmatprep.mubr.f32.mxu1 %v1650_v42  ;;  %v1496_v10 = vsel %vm1492_vm1, %v1490_v60, %v1494_v63  ;;  %v1604_v42 = vld [vmem:[%s4051_s3 + $0x358] sm:$0xff] }
 0x229   : > { %2775 = vmatprep.subr.bf16.mxu1 %v2774_v17  ;;  %1741 = vmatmul.mubr.f32.vlgmr.msra.gmra.mrb[0].mxu0 %v1641_v23  ;;  %v3928_v14 = vrot.slane %v1496_v10, %v3153_v12  ;;  %v1651_v15 = vcombine.high %v1496_v10, %v1496_v10  ;;  %v1617_v17 = vld [vmem:[%s4051_s3 + $0x3c0] sm:$0xff]  ;;  %v1587_v23 = vld [vmem:[%s4051_s3 + $0x2d0] sm:$0xff]  ;;  %v2796_v49 = vpack.c.bf16 %v1604_v42, %v1603_v41  ;;  %v1576_v60 = vld [vmem:[%s4051_s3 + $0x278] sm:$0xff] }
 0x22a   : > { %2745 = vmatpush3.bf16.msra.mxu0 %v2744_v40  ;;  %v2790_v27 = vpack.c.bf16 %v1618_v18, %v1617_v17  ;;  %v2762_v34 = vpack.c.bf16 %v1588_v24, %v1587_v23  ;;  %v1572_v40 = vld [vmem:[%s4051_s3 + $0x258] sm:$0xff]  ;;  %v2772_v2 = vpack.c.bf16 %v1576_v60, %v1575_v59 }
 0x22b   : > { %1811 = vmatmul.mubr.f32.vlgmr.msra.gmra.mrb[0].mxu1 %v1648_v35  ;;  %2747 = vmatprep.subr.bf16.mxu0 %v2746_v38  ;;  %v1666_v21 = vcombine.high %v3928_v14, %v3928_v14  ;;  %v3945_v22 = vrot.slane %v1651_v15, %v3153_v12  ;;  %v1602_v12 = vld [vmem:[%s4051_s3 + $0x348] sm:$0xff]  ;;  %v1571_v35 = vld [vmem:[%s4051_s3 + $0x250] sm:$0xff] }
 0x22c   : > { %2777 = vmatpush3.bf16.msra.mxu1 %v2776_v43  ;;  %v2792_v36 = vpack.c.bf16 %v1602_v12, %v1601_v28  ;;  %v1590_v38 = vld [vmem:[%s4051_s3 + $0x2e8] sm:$0xff]  ;;  %v2764_v43 = vpack.c.bf16 %v1572_v40, %v1571_v35 }
 0x22d   : > { %2779 = vmatprep.subr.bf16.mxu1 %v2778_v47  ;;  %1880 = vmatprep.mubr.f32.mxu0 %v1666_v21  ;;  %v1667_v29 = vcombine.high %v3945_v22, %v3945_v22  ;;  %v2766_v46 = vpack.c.bf16 %v1590_v38, %v1589_v37  ;;  %v1573_v47 = vld [vmem:[%s4051_s3 + $0x260] sm:$0xff] }
 0x22e   : > { %2749 = vmatpush3.bf16.msra.mxu0 %v2748_v50  ;;  %v1591_v50 = vld [vmem:[%s4051_s3 + $0x2f0] sm:$0xff]  ;;  %v2768_v55 = vpack.c.bf16 %v1574_v48, %v1573_v47 }
 0x22f   : > { %2751 = vmatprep.subr.bf16.mxu0 %v2750_v53  ;;  %1950 = vmatprep.mubr.f32.mxu1 %v1667_v29  ;;  %v1605_v53 = vld [vmem:[%s4051_s3 + $0x360] sm:$0xff]  ;;  %v2770_v58 = vpack.c.bf16 %v1592_v51, %v1591_v50 }
 0x230   : > { %2781 = vmatpush3.bf16.msra.mxu1 %v2780_v57  ;;  %v1624_v57 = vld [vmem:[%s4051_s3 + $0x3f8] sm:$0xff] }
 0x231   : > { %2783 = vmatprep.subr.bf16.mxu1 %v2782_v61  ;;  %v2800_v61 = vpack.c.bf16 %v1606_v54, %v1605_v53  ;;  %v2802_v62 = vpack.c.bf16 %v1624_v57, %v1623_v56 }
 0x232   : > { %2753 = vmatpush3.bf16.msra.mxu0 %v2752_v1  ;;  %v1608_v1 = vld [vmem:[%s4051_s3 + $0x378] sm:$0xff] }
 0x233   : > { %2755 = vmatprep.subr.bf16.mxu0 %v2754_v4  ;;  %v2804_v3 = vpack.c.bf16 %v1608_v1, %v1607_v0  ;;  %v2021_v4 = vld [vmem:[%s4052_s4] ss:$0 sm:$0xff] }
 0x234   : > { %2785 = vmatpush3.bf16.msra.mxu1 %v2784_v7 }
 0x235   : > { %2787 = vmatprep.subr.bf16.mxu1 %v2786_v11 }
 0x236   : > { %2757 = vmatpush3.bf16.msra.mxu0 %v2756_v16 }
 0x237   : > { %2759 = vmatprep.subr.bf16.mxu0 %v2758_v19 }
 0x238   : > { %2789 = vmatpush3.bf16.msra.mxu1 %v2788_v26 }
 0x239   : > { %2791 = vmatprep.subr.bf16.mxu1 %v2790_v27 }
 0x23a   : > { %2761 = vmatpush3.bf16.msra.mxu0 %v2760_v30 }
 0x23b   : > { %2763 = vmatprep.subr.bf16.mxu0 %v2762_v34 }
 0x23c   : > { %2793 = vmatpush3.bf16.msra.mxu1 %v2792_v36 }
 0x23d   : > { %2795 = vmatprep.subr.bf16.mxu1 %v2794_v39 }
 0x23e   : > { %2765 = vmatpush3.bf16.msra.mxu0 %v2764_v43 }
 0x23f   : > { %2767 = vmatprep.subr.bf16.mxu0 %v2766_v46 }
 0x240   : > { %2797 = vmatpush3.bf16.msra.mxu1 %v2796_v49 }
 0x241   : > { %2799 = vmatprep.subr.bf16.mxu1 %v2798_v52 }
 0x242   : > { %2769 = vmatpush3.bf16.msra.mxu0 %v2768_v55 }
 0x243   : > { %2771 = vmatprep.subr.bf16.mxu0 %v2770_v58 }
 0x244   : > { %2801 = vmatpush3.bf16.msra.mxu1 %v2800_v61 }
 0x245   : > { %2803 = vmatprep.subr.bf16.mxu1 %v2802_v62 }
 0x246   : > { %2773 = vmatpush3.bf16.msra.mxu0 %v2772_v2 }
 0x248   : > { %2805 = vmatpush3.bf16.msra.mxu1 %v2804_v3 }
 0x249   : > { %1881 = vmatmul.mubr.f32.vlgmr.msra.gmra.mrb[2].mxu0 %v3928_v14 }
 0x24b   : > { %1951 = vmatmul.mubr.f32.vlgmr.msra.gmra.mrb[2].mxu1 %v3945_v22 }
 0x2fc   : > { %v2058_v63 = vpop.f32.mrb[0].mxu0 }
 0x2fd   : > { %v2059_v5 = vpop.f32.mrb[1].mxu0 }
 0x2fe   : > { %v2060_v6 = vadd.f32 %v2059_v5, %v2058_v63  ;;  %v2093_v7 = vpop.f32.mrb[0].mxu1 }
 0x2ff   : > { %v2094_v8 = vpop.f32.mrb[1].mxu1 }
 0x300   : > { %v1743_v9 = vadd.f32 %v2060_v6, %v2021_v4  ;;  %v2095_v10 = vadd.f32 %v2094_v8, %v2093_v7 }
 0x302   : > { %v1813_v11 = vadd.f32 %v2095_v10, %v1743_v9 }
 0x31c   : > { %v2128_v25 = vpop.f32.mrb[2].mxu0 }
 0x31d   : > { %v2129_v13 = vpop.f32.mrb[3].mxu0 }
 0x31e   : > { %v2130_v15 = vadd.f32 %v2129_v13, %v2128_v25  ;;  %v2163_v16 = vpop.f32.mrb[2].mxu1 }
 0x31f   : > { %v2164_v17 = vpop.f32.mrb[3].mxu1 }
 0x320   : > { %v1883_v14 = vadd.f32 %v2130_v15, %v1813_v11  ;;  %v2165_v18 = vadd.f32 %v2164_v17, %v2163_v16 }
 0x322   : > { %v1953_v19 = vadd.f32 %v2165_v18, %v1883_v14 }
 0x324   : > { %1956 = vst [vmem:[%s4053_s5] sm:$0x3] %v1953_v19 }
 0x325 PF: > { %p15_p4 = scmp.ge.s32.totalorder %s2981_s23, 11   ;;  %s4057_s18 = smov %s2914_s19 }
 0x326   : > { %s4058_s19 = smov %s2918_s20  ;;  %s4059_s20 = smov %s2991_s26 }
 0x327   : > { %s4060_s21 = smov %s2981_s23  ;;  %17 = sbr.rel (!%p15_p4) target bundleno = 3 (0x3), region = 87 }
 0x32e   :  { %1968 = vsyncpa [#allocation4], 1 }
 0x32f   :  { %1970 = vsyncpa [#allocation4 + $0x1], 1 }

</bundles_post_ra>
